<compile_context>
chip_gen: v7x
topology: tpu7x:2x2x1
jax: 0.10.0
libtpu: 0.0.40
codegen_flags: <defaults>
</compile_context>

<pallas_src>
import functools

import jax
import jax.numpy as jnp
from jax.experimental import pallas as pl
from jax.experimental.pallas import tpu as pltpu


# ----------------------------------------------------------------------------
# Fused SFE6 Pallas kernel: whole conv stack, channels-major (C, lanes) layout
# ----------------------------------------------------------------------------
def _sfe6_fused_kernel(x_ref, m_ref, hw_ref, hb_ref, rbw_ref, rbb_ref,
                       tw_ref, tb_ref, o_ref, stage_ref, *,
                       W, res_num, res_scale):
    """Whole conv stack on one lane-flattened image group.

    x_ref    : (1, cin_pad, L) f32   input activations (L = imgs_per_step*H*W)
    m_ref    : (9, 1, L)       f32   per-tap 0/1 border masks (tiled per image)
    hw_ref   : (nF, 9*cin_pad) bf16  conv_head weight, tap-major packed
    rbw_ref  : (2*res_num, nF, 9*nF) bf16  ResBlock conv weights
    tw_ref   : (nF, 9*nF)      bf16  conv_tail weight
    *b refs  : (..., nF, 1)    f32   biases
    stage_ref: (9*max(cin_pad,nF), L) bf16  shared 9-tap staging buffer
    """
    L = x_ref.shape[-1]

    def conv3x3(x, w_packed, bias, relu):
        # 3x3 same-pad conv as ONE (Cout, 9*Cin) @ (9*Cin, L) MXU GEMM.
        cin = x.shape[0]
        for t in range(9):
            dy, dx = t // 3 - 1, t % 3 - 1
            s = dy * W + dx
            if s == 0:
                xs = x
            else:
                # out[:, p] wants x[:, p + s]; pltpu.roll wraps, and the mask
                # zeroes every lane whose tap crosses an image border — which
                # is exactly where the roll wraps or crosses an image seam.
                xs = pltpu.roll(x, (-s) % L, axis=1) * m_ref[t]
            stage_ref[t * cin:(t + 1) * cin, :] = xs.astype(jnp.bfloat16)
        acc = jnp.dot(w_packed, stage_ref[0:9 * cin, :],
                      preferred_element_type=jnp.float32)
        acc = acc + bias                                # (Cout, 1) broadcast
        if relu:
            acc = jnp.maximum(acc, 0.0)
        return acc

    # conv_head + ReLU; head skip stays in registers (no VMEM round trip).
    x = conv3x3(x_ref[0], hw_ref[...], hb_ref[...], relu=True)
    x1 = x

    # ResBlocks: x = conv2(relu(conv1(x))) * res_scale + x
    for i in range(res_num):
        y = conv3x3(x, rbw_ref[2 * i], rbb_ref[2 * i], relu=True)
        z = conv3x3(y, rbw_ref[2 * i + 1], rbb_ref[2 * i + 1], relu=False)
        if res_scale != 1.0:
            z = z * res_scale
        x = z + x

    # conv_tail + global skip
    x = conv3x3(x, tw_ref[...], tb_ref[...], relu=False) + x1
    o_ref[0] = x.astype(o_ref.dtype)


# ----------------------------------------------------------------------------
# Wrapper: weight / mask packing + pallas_call
# ----------------------------------------------------------------------------
def _round_up(x, m):
    return (x + m - 1) // m * m


def _pack_conv_w(w, cin_pad=None):
    """(3,3,Cin,Cout) f32 -> (Cout, 9*Cin[_pad]) bf16, tap-major / chan-minor.

    Column (t*Cin + c) holds w[ky, kx, c, :] with t = ky*3 + kx, matching the
    in-kernel staging layout.  Padded input channels get zero weights (the
    activations are zero-padded too, so either guarantee suffices).
    """
    kh, kw, cin, cout = w.shape
    if cin_pad is not None and cin_pad > cin:
        w = jnp.pad(w, ((0, 0), (0, 0), (0, cin_pad - cin), (0, 0)))
    return (jnp.transpose(w, (3, 0, 1, 2))
            .reshape(cout, kh * kw * w.shape[2]).astype(jnp.bfloat16))


def _bias_cm(b):
    return b.reshape(-1, 1).astype(jnp.float32)         # (Cout, 1)


def _border_masks(H, W, imgs):
    """(9, 1, imgs*H*W) f32 0/1 masks, per-image modular lane indexing."""
    lane = jnp.arange(H * W, dtype=jnp.int32)
    hh = lane // W
    ww = lane - hh * W
    rows = []
    for t in range(9):
        dy, dx = t // 3 - 1, t % 3 - 1
        ok = ((hh + dy >= 0) & (hh + dy < H) & (ww + dx >= 0) & (ww + dx < W))
        rows.append(ok)
    m = jnp.stack(rows, 0).astype(jnp.float32)           # (9, H*W)
    m = jnp.tile(m, (1, imgs))                           # repeat per image
    return m[:, None, :]                                 # (9, 1, L)


def sfe6_fused_pallas(xin_nchw, params, *, res_scale=1.0):
    """Whole SFE6 stack (head -> ResBlocks -> tail + skips) in ONE pallas_call.

    xin_nchw: (N, Cin, H, W) f32  ->  (N, n_feats, H, W) f32
    """
    N, Cin, H, W = xin_nchw.shape
    P = H * W
    n_feats = params["head"][0].shape[-1]
    res_num = len(params["rbs"])

    # Flatten the batch into the lane dimension: 2 grid steps when possible
    # (keeps both v7x TensorCores busy), otherwise 1; either way fewer, wider
    # grid iterations (L = imgs*H*W lanes) than one image per step.
    grid_n = 2 if (N % 2 == 0 and N >= 2) else 1
    imgs = N // grid_n
    L = imgs * P

    # Pad input channels (33 -> 48) so every tap block of the staging operand
    # is a multiple of the bf16 sublane tile; padded rows are zero in both the
    # activations and the packed weights.
    cin_pad = _round_up(Cin, 16)
    x_flat = xin_nchw.reshape(N, Cin, P)
    if cin_pad > Cin:
        x_flat = jnp.pad(x_flat, ((0, 0), (0, cin_pad - Cin), (0, 0)))
    # (N, C, P) -> (grid_n, C, imgs*P): images concatenated along lanes.
    x_g = (x_flat.reshape(grid_n, imgs, cin_pad, P)
           .transpose(0, 2, 1, 3).reshape(grid_n, cin_pad, L))

    masks = _border_masks(H, W, imgs)                    # (9, 1, L) f32

    hw, hb = params["head"]
    head_w = _pack_conv_w(hw, cin_pad)                   # (nF, 9*cin_pad) bf16
    head_b = _bias_cm(hb)
    rb_w = jnp.stack([_pack_conv_w(w) for blk in params["rbs"]
                      for w in (blk[0], blk[2])], axis=0)  # (2R, nF, 9*nF)
    rb_b = jnp.stack([_bias_cm(b) for blk in params["rbs"]
                      for b in (blk[1], blk[3])], axis=0)  # (2R, nF, 1)
    tw, tb = params["tail"]
    tail_w = _pack_conv_w(tw)
    tail_b = _bias_cm(tb)

    k_stage = 9 * max(cin_pad, n_feats)

    kernel = functools.partial(_sfe6_fused_kernel, W=W, res_num=res_num,
                               res_scale=float(res_scale))

    out = pl.pallas_call(
        kernel,
        out_shape=jax.ShapeDtypeStruct((grid_n, n_feats, L), jnp.float32),
        grid_spec=pltpu.PrefetchScalarGridSpec(
            num_scalar_prefetch=0,
            grid=(grid_n,),
            in_specs=[
                pl.BlockSpec((1, cin_pad, L), lambda n: (n, 0, 0)),
                pl.BlockSpec(masks.shape, lambda n: (0, 0, 0)),
                pl.BlockSpec(head_w.shape, lambda n: (0, 0)),
                pl.BlockSpec(head_b.shape, lambda n: (0, 0)),
                pl.BlockSpec(rb_w.shape, lambda n: (0, 0, 0)),
                pl.BlockSpec(rb_b.shape, lambda n: (0, 0, 0)),
                pl.BlockSpec(tail_w.shape, lambda n: (0, 0)),
                pl.BlockSpec(tail_b.shape, lambda n: (0, 0)),
            ],
            out_specs=pl.BlockSpec((1, n_feats, L), lambda n: (n, 0, 0)),
            scratch_shapes=[pltpu.VMEM((k_stage, L), jnp.bfloat16)],
        ),
        compiler_params=pltpu.CompilerParams(
            dimension_semantics=("parallel",)),
    )(x_g, masks, head_w, head_b, rb_w, rb_b, tail_w, tail_b)

    out = (out.reshape(grid_n, n_feats, imgs, P)
           .transpose(0, 2, 1, 3).reshape(N, n_feats, H, W))
    return out


# ----------------------------------------------------------------------------
# Plain-JAX reference conv stack (used for an in-script correctness check)
# ----------------------------------------------------------------------------
def _conv3x3_ref(x_nchw, w, b, relu=False):
    wt = jnp.transpose(w, (3, 2, 0, 1))                  # (Cout, Cin, 3, 3)
    y = jax.lax.conv_general_dilated(
        x_nchw, wt, window_strides=(1, 1), padding=((1, 1), (1, 1)),
        dimension_numbers=("NCHW", "OIHW", "NCHW"))
    y = y + b.reshape(1, -1, 1, 1)
    if relu:
        y = jnp.maximum(y, 0.0)
    return y


def sfe6_forward_ref(xin_nchw, params, res_scale=1.0):
    hw, hb = params["head"]
    x = _conv3x3_ref(xin_nchw, hw, hb, relu=True)
    x1 = x
    for (w1, b1, w2, b2) in params["rbs"]:
        y = _conv3x3_ref(x, w1, b1, relu=True)
        x = _conv3x3_ref(y, w2, b2) * res_scale + x
    tw, tb = params["tail"]
    x = _conv3x3_ref(x, tw, tb) + x1
    return x


# ----------------------------------------------------------------------------
# Plain-JAX glue ops (data-dependent gather / layout only)
# ----------------------------------------------------------------------------
def unfold3x3(x_nchw):
    """F.unfold(x, kernel_size=3, padding=1).view(B, C*9, H, W) semantics."""
    B, C, H, W = x_nchw.shape
    xp = jnp.pad(x_nchw, ((0, 0), (0, 0), (1, 1), (1, 1)))
    pats = jnp.stack(
        [xp[:, :, ky:ky + H, kx:kx + W] for ky in range(3) for kx in range(3)],
        axis=2,
    )                                   # (B, C, 9, H, W)
    return pats.reshape(B, C * 9, H, W)


def grid_sample_bilinear_zeros(feats, grid):
    """torch.nn.functional.grid_sample(mode='bilinear', padding_mode='zeros',
    align_corners=False) for NCHW feats and (B, Ho, Wo, 2) grid in [-1, 1]."""
    # TODO(synk): data-dependent bilinear gather kept in plain JAX (not
    #             lane-friendly inside a TPU kernel at this size).
    B, C, H, W = feats.shape
    gx = grid[..., 0]
    gy = grid[..., 1]
    ix = ((gx + 1.0) * W - 1.0) / 2.0
    iy = ((gy + 1.0) * H - 1.0) / 2.0
    ix0 = jnp.floor(ix)
    iy0 = jnp.floor(iy)
    ix1 = ix0 + 1.0
    iy1 = iy0 + 1.0
    wx1 = ix - ix0
    wx0 = 1.0 - wx1
    wy1 = iy - iy0
    wy0 = 1.0 - wy1

    flat = feats.reshape(B, C, H * W)

    def gather(iy_, ix_):
        valid = ((ix_ >= 0) & (ix_ <= W - 1) & (iy_ >= 0) & (iy_ <= H - 1))
        ixc = jnp.clip(ix_, 0, W - 1).astype(jnp.int32)
        iyc = jnp.clip(iy_, 0, H - 1).astype(jnp.int32)
        idx = (iyc * W + ixc).reshape(B, 1, -1)
        g = jnp.take_along_axis(flat, idx, axis=2)
        g = g.reshape(B, C, *ix_.shape[1:])
        return g * valid[:, None, :, :].astype(feats.dtype)

    out = (gather(iy0, ix0) * (wy0 * wx0)[:, None]
           + gather(iy0, ix1) * (wy0 * wx1)[:, None]
           + gather(iy1, ix0) * (wy1 * wx0)[:, None]
           + gather(iy1, ix1) * (wy1 * wx1)[:, None])
    return out


# ----------------------------------------------------------------------------
# Parameters (deterministic, in-script) and the module forward
# ----------------------------------------------------------------------------
def init_conv(key, cin, cout):
    k1, k2 = jax.random.split(key)
    w = jax.random.normal(k1, (3, 3, cin, cout), jnp.float32) * 0.05
    b = jax.random.normal(k2, (1, cout), jnp.float32) * 0.01
    return w, b


def init_fe_params(key, nf, res_num):
    in_ch = 4 + 27 + 1 + 1   # 33
    n_feats = nf * 2
    keys = jax.random.split(key, 2 + 2 * res_num)
    params = {}
    params["head"] = init_conv(keys[0], in_ch, n_feats)
    params["rbs"] = []
    for i in range(res_num):
        w1, b1 = init_conv(keys[1 + 2 * i], n_feats, n_feats)
        w2, b2 = init_conv(keys[2 + 2 * i], n_feats, n_feats)
        params["rbs"].append((w1, b1, w2, b2))
    params["tail"] = init_conv(keys[-1], n_feats, n_feats)
    return params


def fe_forward(x, src_dms, sr_sampling_maps, sr_valid_depth_masks,
               sr_valid_map_masks, params, dim, nf, *, use_pallas=True):
    bs, nv, c, h, w = dim

    src_dms_e = src_dms[:, :, None]                       # (bs, nv, 1, h, w)

    x_0 = grid_sample_bilinear_zeros(unfold3x3(x[:, 1]),  # sample view-1 feats
                                     sr_sampling_maps[:, 0, 0])
    x_2 = grid_sample_bilinear_zeros(unfold3x3(x[:, 0]),  # sample view-0 feats
                                     sr_sampling_maps[:, 1, 0])

    xd = jnp.concatenate([x, src_dms_e], axis=2)          # (bs, nv, c+1, h, w)

    x_0 = jnp.concatenate([xd[:, 0], x_0,
                           sr_valid_depth_masks[:, 0, 0],
                           sr_valid_map_masks[:, 0, 0]], axis=1)  # (bs, 33, h, w)
    x_2 = jnp.concatenate([xd[:, 1], x_2,
                           sr_valid_depth_masks[:, 1, 0],
                           sr_valid_map_masks[:, 1, 0]], axis=1)  # (bs, 33, h, w)

    xcat = jnp.stack([x_0, x_2], axis=1)                  # (bs, 2, 33, h, w)
    xin = xcat.reshape(bs * nv, 4 + 27 + 1 + 1, h, w)     # NCHW, fed directly

    if use_pallas:
        out = sfe6_fused_pallas(xin, params, res_scale=1.0)
    else:
        out = sfe6_forward_ref(xin, params, res_scale=1.0)
    return out.reshape(bs, nv, nf * 2, h, w)


# ----------------------------------------------------------------------------
if __name__ == "__main__":
    nf = 16
    res_num = 2
    bs, nv, c, h, w = 2, 2, 3, 16, 16
    dim = (bs, nv, c, h, w)

    root = jax.random.PRNGKey(0)
    k_par, k_x, k_dm, k_map, k_vd, k_vm = jax.random.split(root, 6)

    params = init_fe_params(k_par, nf, res_num)

    x = jax.random.normal(k_x, (bs, nv, c, h, w), jnp.float32)
    src_dms = jax.random.normal(k_dm, (bs, nv, h, w), jnp.float32)
    sr_sampling_maps = jax.random.uniform(
        k_map, (bs, nv, 1, h, w, 2), jnp.float32, minval=-1.0, maxval=1.0)
    sr_valid_depth_masks = (jax.random.uniform(
        k_vd, (bs, nv, 1, 1, h, w)) > 0.5).astype(jnp.float32)
    sr_valid_map_masks = (jax.random.uniform(
        k_vm, (bs, nv, 1, 1, h, w)) > 0.5).astype(jnp.float32)

    fwd = jax.jit(functools.partial(fe_forward, dim=dim, nf=nf, use_pallas=True))
    out = fwd(x, src_dms, sr_sampling_maps, sr_valid_depth_masks,
              sr_valid_map_masks, params=params)
    out = jax.block_until_ready(out)

    # Correctness check of the fused Pallas conv stack vs a plain-JAX (f32)
    # reference; bf16 MXU operands with f32 accumulation stay well inside a
    # 1e-2 max-relative-to-global-max tolerance (tightened from 5e-2 per
    # review so tap-ordering / mask regressions are actually caught).
    ref = fe_forward(x, src_dms, sr_sampling_maps, sr_valid_depth_masks,
                     sr_valid_map_masks, params, dim, nf, use_pallas=False)
    ref = jax.block_until_ready(ref)
    rel_err = float(jnp.max(jnp.abs(out - ref)) / (jnp.max(jnp.abs(ref)) + 1e-6))

    assert out.shape == (bs, nv, nf * 2, h, w), out.shape
    assert out.dtype == jnp.float32
    assert bool(jnp.isfinite(out).all())
    assert rel_err < 1e-2, f"Pallas vs reference mismatch: rel_err={rel_err}"
    print("KERNEL_OK")
</pallas_src>

<mosaic_0001>
module attributes {stable_mosaic.version = 11 : i64} {
  func.func @_sfe6_fused_kernel(%arg0: i32, %arg1: memref<1x48x512xf32, #tpu.memory_space<vmem>>, %arg2: memref<9x1x512xf32, #tpu.memory_space<vmem>>, %arg3: memref<32x432xbf16, #tpu.memory_space<vmem>>, %arg4: memref<32x1xf32, #tpu.memory_space<vmem>>, %arg5: memref<4x32x288xbf16, #tpu.memory_space<vmem>>, %arg6: memref<4x32x1xf32, #tpu.memory_space<vmem>>, %arg7: memref<32x288xbf16, #tpu.memory_space<vmem>>, %arg8: memref<32x1xf32, #tpu.memory_space<vmem>>, %arg9: memref<1x32x512xf32, #tpu.memory_space<vmem>>, %arg10: memref<432x512xbf16, #tpu.memory_space<vmem>>) attributes {dimension_semantics = [#tpu.dimension_semantics<parallel>], iteration_bounds = array<i64: 2>, scalar_prefetch = 0 : i64, scratch_operands = 1 : i64, tpu.core_type = #tpu.core_type<tc>, window_params = [{transform_indices = @transform_0, window_bounds = array<i64: 1, 48, 512>}, {pipeline_mode = #tpu.pipeline_mode<synchronous>, transform_indices = @transform_1, window_bounds = array<i64: 9, 1, 512>}, {pipeline_mode = #tpu.pipeline_mode<synchronous>, transform_indices = @transform_2, window_bounds = array<i64: 32, 432>}, {pipeline_mode = #tpu.pipeline_mode<synchronous>, transform_indices = @transform_3, window_bounds = array<i64: 32, 1>}, {pipeline_mode = #tpu.pipeline_mode<synchronous>, transform_indices = @transform_4, window_bounds = array<i64: 4, 32, 288>}, {pipeline_mode = #tpu.pipeline_mode<synchronous>, transform_indices = @transform_5, window_bounds = array<i64: 4, 32, 1>}, {pipeline_mode = #tpu.pipeline_mode<synchronous>, transform_indices = @transform_6, window_bounds = array<i64: 32, 288>}, {pipeline_mode = #tpu.pipeline_mode<synchronous>, transform_indices = @transform_7, window_bounds = array<i64: 32, 1>}, {transform_indices = @transform_8, window_bounds = array<i64: 1, 32, 512>}]} {
    %c0 = arith.constant 0 : index
    %c0_0 = arith.constant 0 : index
    %c0_1 = arith.constant 0 : index
    %0 = vector.load %arg1[%c0, %c0_0, %c0_1] : memref<1x48x512xf32, #tpu.memory_space<vmem>>, vector<1x48x512xf32>
    %1 = vector.shape_cast %0 : vector<1x48x512xf32> to vector<48x512xf32>
    %c0_2 = arith.constant 0 : index
    %c0_3 = arith.constant 0 : index
    %2 = vector.load %arg3[%c0_2, %c0_3] : memref<32x432xbf16, #tpu.memory_space<vmem>>, vector<32x432xbf16>
    %c0_4 = arith.constant 0 : index
    %c0_5 = arith.constant 0 : index
    %3 = vector.load %arg4[%c0_4, %c0_5] : memref<32x1xf32, #tpu.memory_space<vmem>>, vector<32x1xf32>
    %c17_i32 = arith.constant 17 : i32
    %4 = tpu.dynamic_rotate %1 by %c17_i32 dim 1 : vector<48x512xf32>, i32 -> vector<48x512xf32>
    %c0_6 = arith.constant 0 : index
    %c0_7 = arith.constant 0 : index
    %c0_8 = arith.constant 0 : index
    %5 = vector.load %arg2[%c0_6, %c0_7, %c0_8] : memref<9x1x512xf32, #tpu.memory_space<vmem>>, vector<1x1x512xf32>
    %6 = vector.shape_cast %5 : vector<1x1x512xf32> to vector<1x512xf32>
    %7 = vector.broadcast %6 : vector<1x512xf32> to vector<48x512xf32>
    %8 = arith.mulf %4, %7 : vector<48x512xf32>
    %9 = arith.truncf %8 : vector<48x512xf32> to vector<48x512xbf16>
    %c0_9 = arith.constant 0 : index
    %c0_10 = arith.constant 0 : index
    %10 = vector.load %arg10[%c0_9, %c0_10] : memref<432x512xbf16, #tpu.memory_space<vmem>>, vector<48x512xbf16>
    tpu.vector_store %arg10[%c0_9, %c0_10], %9 {strides = array<i32>} : memref<432x512xbf16, #tpu.memory_space<vmem>>, vector<48x512xbf16>,
    %c16_i32 = arith.constant 16 : i32
    %11 = tpu.dynamic_rotate %1 by %c16_i32 dim 1 : vector<48x512xf32>, i32 -> vector<48x512xf32>
    %c1 = arith.constant 1 : index
    %c0_11 = arith.constant 0 : index
    %c0_12 = arith.constant 0 : index
    %12 = vector.load %arg2[%c1, %c0_11, %c0_12] : memref<9x1x512xf32, #tpu.memory_space<vmem>>, vector<1x1x512xf32>
    %13 = vector.shape_cast %12 : vector<1x1x512xf32> to vector<1x512xf32>
    %14 = vector.broadcast %13 : vector<1x512xf32> to vector<48x512xf32>
    %15 = arith.mulf %11, %14 : vector<48x512xf32>
    %16 = arith.truncf %15 : vector<48x512xf32> to vector<48x512xbf16>
    %c48 = arith.constant 48 : index
    %c0_13 = arith.constant 0 : index
    %17 = vector.load %arg10[%c48, %c0_13] : memref<432x512xbf16, #tpu.memory_space<vmem>>, vector<48x512xbf16>
    tpu.vector_store %arg10[%c48, %c0_13], %16 {strides = array<i32>} : memref<432x512xbf16, #tpu.memory_space<vmem>>, vector<48x512xbf16>,
    %c15_i32 = arith.constant 15 : i32
    %18 = tpu.dynamic_rotate %1 by %c15_i32 dim 1 : vector<48x512xf32>, i32 -> vector<48x512xf32>
    %c2 = arith.constant 2 : index
    %c0_14 = arith.constant 0 : index
    %c0_15 = arith.constant 0 : index
    %19 = vector.load %arg2[%c2, %c0_14, %c0_15] : memref<9x1x512xf32, #tpu.memory_space<vmem>>, vector<1x1x512xf32>
    %20 = vector.shape_cast %19 : vector<1x1x512xf32> to vector<1x512xf32>
    %21 = vector.broadcast %20 : vector<1x512xf32> to vector<48x512xf32>
    %22 = arith.mulf %18, %21 : vector<48x512xf32>
    %23 = arith.truncf %22 : vector<48x512xf32> to vector<48x512xbf16>
    %c96 = arith.constant 96 : index
    %c0_16 = arith.constant 0 : index
    %24 = vector.load %arg10[%c96, %c0_16] : memref<432x512xbf16, #tpu.memory_space<vmem>>, vector<48x512xbf16>
    tpu.vector_store %arg10[%c96, %c0_16], %23 {strides = array<i32>} : memref<432x512xbf16, #tpu.memory_space<vmem>>, vector<48x512xbf16>,
    %c1_i32 = arith.constant 1 : i32
    %25 = tpu.dynamic_rotate %1 by %c1_i32 dim 1 : vector<48x512xf32>, i32 -> vector<48x512xf32>
    %c3 = arith.constant 3 : index
    %c0_17 = arith.constant 0 : index
    %c0_18 = arith.constant 0 : index
    %26 = vector.load %arg2[%c3, %c0_17, %c0_18] : memref<9x1x512xf32, #tpu.memory_space<vmem>>, vector<1x1x512xf32>
    %27 = vector.shape_cast %26 : vector<1x1x512xf32> to vector<1x512xf32>
    %28 = vector.broadcast %27 : vector<1x512xf32> to vector<48x512xf32>
    %29 = arith.mulf %25, %28 : vector<48x512xf32>
    %30 = arith.truncf %29 : vector<48x512xf32> to vector<48x512xbf16>
    %c144 = arith.constant 144 : index
    %c0_19 = arith.constant 0 : index
    %31 = vector.load %arg10[%c144, %c0_19] : memref<432x512xbf16, #tpu.memory_space<vmem>>, vector<48x512xbf16>
    tpu.vector_store %arg10[%c144, %c0_19], %30 {strides = array<i32>} : memref<432x512xbf16, #tpu.memory_space<vmem>>, vector<48x512xbf16>,
    %32 = arith.truncf %1 : vector<48x512xf32> to vector<48x512xbf16>
    %c192 = arith.constant 192 : index
    %c0_20 = arith.constant 0 : index
    %33 = vector.load %arg10[%c192, %c0_20] : memref<432x512xbf16, #tpu.memory_space<vmem>>, vector<48x512xbf16>
    tpu.vector_store %arg10[%c192, %c0_20], %32 {strides = array<i32>} : memref<432x512xbf16, #tpu.memory_space<vmem>>, vector<48x512xbf16>,
    %c511_i32 = arith.constant 511 : i32
    %34 = tpu.dynamic_rotate %1 by %c511_i32 dim 1 : vector<48x512xf32>, i32 -> vector<48x512xf32>
    %c5 = arith.constant 5 : index
    %c0_21 = arith.constant 0 : index
    %c0_22 = arith.constant 0 : index
    %35 = vector.load %arg2[%c5, %c0_21, %c0_22] : memref<9x1x512xf32, #tpu.memory_space<vmem>>, vector<1x1x512xf32>
    %36 = vector.shape_cast %35 : vector<1x1x512xf32> to vector<1x512xf32>
    %37 = vector.broadcast %36 : vector<1x512xf32> to vector<48x512xf32>
    %38 = arith.mulf %34, %37 : vector<48x512xf32>
    %39 = arith.truncf %38 : vector<48x512xf32> to vector<48x512xbf16>
    %c240 = arith.constant 240 : index
    %c0_23 = arith.constant 0 : index
    %40 = vector.load %arg10[%c240, %c0_23] : memref<432x512xbf16, #tpu.memory_space<vmem>>, vector<48x512xbf16>
    tpu.vector_store %arg10[%c240, %c0_23], %39 {strides = array<i32>} : memref<432x512xbf16, #tpu.memory_space<vmem>>, vector<48x512xbf16>,
    %c497_i32 = arith.constant 497 : i32
    %41 = tpu.dynamic_rotate %1 by %c497_i32 dim 1 : vector<48x512xf32>, i32 -> vector<48x512xf32>
    %c6 = arith.constant 6 : index
    %c0_24 = arith.constant 0 : index
    %c0_25 = arith.constant 0 : index
    %42 = vector.load %arg2[%c6, %c0_24, %c0_25] : memref<9x1x512xf32, #tpu.memory_space<vmem>>, vector<1x1x512xf32>
    %43 = vector.shape_cast %42 : vector<1x1x512xf32> to vector<1x512xf32>
    %44 = vector.broadcast %43 : vector<1x512xf32> to vector<48x512xf32>
    %45 = arith.mulf %41, %44 : vector<48x512xf32>
    %46 = arith.truncf %45 : vector<48x512xf32> to vector<48x512xbf16>
    %c288 = arith.constant 288 : index
    %c0_26 = arith.constant 0 : index
    %47 = vector.load %arg10[%c288, %c0_26] : memref<432x512xbf16, #tpu.memory_space<vmem>>, vector<48x512xbf16>
    tpu.vector_store %arg10[%c288, %c0_26], %46 {strides = array<i32>} : memref<432x512xbf16, #tpu.memory_space<vmem>>, vector<48x512xbf16>,
    %c496_i32 = arith.constant 496 : i32
    %48 = tpu.dynamic_rotate %1 by %c496_i32 dim 1 : vector<48x512xf32>, i32 -> vector<48x512xf32>
    %c7 = arith.constant 7 : index
    %c0_27 = arith.constant 0 : index
    %c0_28 = arith.constant 0 : index
    %49 = vector.load %arg2[%c7, %c0_27, %c0_28] : memref<9x1x512xf32, #tpu.memory_space<vmem>>, vector<1x1x512xf32>
    %50 = vector.shape_cast %49 : vector<1x1x512xf32> to vector<1x512xf32>
    %51 = vector.broadcast %50 : vector<1x512xf32> to vector<48x512xf32>
    %52 = arith.mulf %48, %51 : vector<48x512xf32>
    %53 = arith.truncf %52 : vector<48x512xf32> to vector<48x512xbf16>
    %c336 = arith.constant 336 : index
    %c0_29 = arith.constant 0 : index
    %54 = vector.load %arg10[%c336, %c0_29] : memref<432x512xbf16, #tpu.memory_space<vmem>>, vector<48x512xbf16>
    tpu.vector_store %arg10[%c336, %c0_29], %53 {strides = array<i32>} : memref<432x512xbf16, #tpu.memory_space<vmem>>, vector<48x512xbf16>,
    %c495_i32 = arith.constant 495 : i32
    %55 = tpu.dynamic_rotate %1 by %c495_i32 dim 1 : vector<48x512xf32>, i32 -> vector<48x512xf32>
    %c8 = arith.constant 8 : index
    %c0_30 = arith.constant 0 : index
    %c0_31 = arith.constant 0 : index
    %56 = vector.load %arg2[%c8, %c0_30, %c0_31] : memref<9x1x512xf32, #tpu.memory_space<vmem>>, vector<1x1x512xf32>
    %57 = vector.shape_cast %56 : vector<1x1x512xf32> to vector<1x512xf32>
    %58 = vector.broadcast %57 : vector<1x512xf32> to vector<48x512xf32>
    %59 = arith.mulf %55, %58 : vector<48x512xf32>
    %60 = arith.truncf %59 : vector<48x512xf32> to vector<48x512xbf16>
    %c384 = arith.constant 384 : index
    %c0_32 = arith.constant 0 : index
    %61 = vector.load %arg10[%c384, %c0_32] : memref<432x512xbf16, #tpu.memory_space<vmem>>, vector<48x512xbf16>
    tpu.vector_store %arg10[%c384, %c0_32], %60 {strides = array<i32>} : memref<432x512xbf16, #tpu.memory_space<vmem>>, vector<48x512xbf16>,
    %c0_33 = arith.constant 0 : index
    %c0_34 = arith.constant 0 : index
    %62 = vector.load %arg10[%c0_33, %c0_34] : memref<432x512xbf16, #tpu.memory_space<vmem>>, vector<432x512xbf16>
    %cst = arith.constant dense<0.000000e+00> : vector<32x512xf32>
    %63 = tpu.matmul %2, %62, %cst {dimension_numbers = #tpu.dot_dimension_numbers<[1], [0], [0], [1], [0, 0, 1, 1], [], []>} : vector<32x432xbf16>, vector<432x512xbf16>, vector<32x512xf32> -> vector<32x512xf32>
    %64 = vector.broadcast %3 : vector<32x1xf32> to vector<32x512xf32>
    %65 = arith.addf %63, %64 : vector<32x512xf32>
    %cst_35 = arith.constant 0.000000e+00 : f32
    %66 = vector.broadcast %cst_35 : f32 to vector<32x512xf32>
    %67 = arith.maximumf %65, %66 : vector<32x512xf32>
    %c0_36 = arith.constant 0 : index
    %c0_37 = arith.constant 0 : index
    %c0_38 = arith.constant 0 : index
    %68 = vector.load %arg5[%c0_36, %c0_37, %c0_38] : memref<4x32x288xbf16, #tpu.memory_space<vmem>>, vector<1x32x288xbf16>
    %69 = vector.shape_cast %68 : vector<1x32x288xbf16> to vector<32x288xbf16>
    %c0_39 = arith.constant 0 : index
    %c0_40 = arith.constant 0 : index
    %c0_41 = arith.constant 0 : index
    %70 = vector.load %arg6[%c0_39, %c0_40, %c0_41] : memref<4x32x1xf32, #tpu.memory_space<vmem>>, vector<1x32x1xf32>
    %71 = vector.shape_cast %70 : vector<1x32x1xf32> to vector<32x1xf32>
    %c17_i32_42 = arith.constant 17 : i32
    %72 = tpu.dynamic_rotate %67 by %c17_i32_42 dim 1 : vector<32x512xf32>, i32 -> vector<32x512xf32>
    %c0_43 = arith.constant 0 : index
    %c0_44 = arith.constant 0 : index
    %c0_45 = arith.constant 0 : index
    %73 = vector.load %arg2[%c0_43, %c0_44, %c0_45] : memref<9x1x512xf32, #tpu.memory_space<vmem>>, vector<1x1x512xf32>
    %74 = vector.shape_cast %73 : vector<1x1x512xf32> to vector<1x512xf32>
    %75 = vector.broadcast %74 : vector<1x512xf32> to vector<32x512xf32>
    %76 = arith.mulf %72, %75 : vector<32x512xf32>
    %77 = arith.truncf %76 : vector<32x512xf32> to vector<32x512xbf16>
    %c0_46 = arith.constant 0 : index
    %c0_47 = arith.constant 0 : index
    %78 = vector.load %arg10[%c0_46, %c0_47] : memref<432x512xbf16, #tpu.memory_space<vmem>>, vector<32x512xbf16>
    tpu.vector_store %arg10[%c0_46, %c0_47], %77 {strides = array<i32>} : memref<432x512xbf16, #tpu.memory_space<vmem>>, vector<32x512xbf16>,
    %c16_i32_48 = arith.constant 16 : i32
    %79 = tpu.dynamic_rotate %67 by %c16_i32_48 dim 1 : vector<32x512xf32>, i32 -> vector<32x512xf32>
    %c1_49 = arith.constant 1 : index
    %c0_50 = arith.constant 0 : index
    %c0_51 = arith.constant 0 : index
    %80 = vector.load %arg2[%c1_49, %c0_50, %c0_51] : memref<9x1x512xf32, #tpu.memory_space<vmem>>, vector<1x1x512xf32>
    %81 = vector.shape_cast %80 : vector<1x1x512xf32> to vector<1x512xf32>
    %82 = vector.broadcast %81 : vector<1x512xf32> to vector<32x512xf32>
    %83 = arith.mulf %79, %82 : vector<32x512xf32>
    %84 = arith.truncf %83 : vector<32x512xf32> to vector<32x512xbf16>
    %c32 = arith.constant 32 : index
    %c0_52 = arith.constant 0 : index
    %85 = vector.load %arg10[%c32, %c0_52] : memref<432x512xbf16, #tpu.memory_space<vmem>>, vector<32x512xbf16>
    tpu.vector_store %arg10[%c32, %c0_52], %84 {strides = array<i32>} : memref<432x512xbf16, #tpu.memory_space<vmem>>, vector<32x512xbf16>,
    %c15_i32_53 = arith.constant 15 : i32
    %86 = tpu.dynamic_rotate %67 by %c15_i32_53 dim 1 : vector<32x512xf32>, i32 -> vector<32x512xf32>
    %c2_54 = arith.constant 2 : index
    %c0_55 = arith.constant 0 : index
    %c0_56 = arith.constant 0 : index
    %87 = vector.load %arg2[%c2_54, %c0_55, %c0_56] : memref<9x1x512xf32, #tpu.memory_space<vmem>>, vector<1x1x512xf32>
    %88 = vector.shape_cast %87 : vector<1x1x512xf32> to vector<1x512xf32>
    %89 = vector.broadcast %88 : vector<1x512xf32> to vector<32x512xf32>
    %90 = arith.mulf %86, %89 : vector<32x512xf32>
    %91 = arith.truncf %90 : vector<32x512xf32> to vector<32x512xbf16>
    %c64 = arith.constant 64 : index
    %c0_57 = arith.constant 0 : index
    %92 = vector.load %arg10[%c64, %c0_57] : memref<432x512xbf16, #tpu.memory_space<vmem>>, vector<32x512xbf16>
    tpu.vector_store %arg10[%c64, %c0_57], %91 {strides = array<i32>} : memref<432x512xbf16, #tpu.memory_space<vmem>>, vector<32x512xbf16>,
    %c1_i32_58 = arith.constant 1 : i32
    %93 = tpu.dynamic_rotate %67 by %c1_i32_58 dim 1 : vector<32x512xf32>, i32 -> vector<32x512xf32>
    %c3_59 = arith.constant 3 : index
    %c0_60 = arith.constant 0 : index
    %c0_61 = arith.constant 0 : index
    %94 = vector.load %arg2[%c3_59, %c0_60, %c0_61] : memref<9x1x512xf32, #tpu.memory_space<vmem>>, vector<1x1x512xf32>
    %95 = vector.shape_cast %94 : vector<1x1x512xf32> to vector<1x512xf32>
    %96 = vector.broadcast %95 : vector<1x512xf32> to vector<32x512xf32>
    %97 = arith.mulf %93, %96 : vector<32x512xf32>
    %98 = arith.truncf %97 : vector<32x512xf32> to vector<32x512xbf16>
    %c96_62 = arith.constant 96 : index
    %c0_63 = arith.constant 0 : index
    %99 = vector.load %arg10[%c96_62, %c0_63] : memref<432x512xbf16, #tpu.memory_space<vmem>>, vector<32x512xbf16>
    tpu.vector_store %arg10[%c96_62, %c0_63], %98 {strides = array<i32>} : memref<432x512xbf16, #tpu.memory_space<vmem>>, vector<32x512xbf16>,
    %100 = arith.truncf %67 : vector<32x512xf32> to vector<32x512xbf16>
    %c128 = arith.constant 128 : index
    %c0_64 = arith.constant 0 : index
    %101 = vector.load %arg10[%c128, %c0_64] : memref<432x512xbf16, #tpu.memory_space<vmem>>, vector<32x512xbf16>
    tpu.vector_store %arg10[%c128, %c0_64], %100 {strides = array<i32>} : memref<432x512xbf16, #tpu.memory_space<vmem>>, vector<32x512xbf16>,
    %c511_i32_65 = arith.constant 511 : i32
    %102 = tpu.dynamic_rotate %67 by %c511_i32_65 dim 1 : vector<32x512xf32>, i32 -> vector<32x512xf32>
    %c5_66 = arith.constant 5 : index
    %c0_67 = arith.constant 0 : index
    %c0_68 = arith.constant 0 : index
    %103 = vector.load %arg2[%c5_66, %c0_67, %c0_68] : memref<9x1x512xf32, #tpu.memory_space<vmem>>, vector<1x1x512xf32>
    %104 = vector.shape_cast %103 : vector<1x1x512xf32> to vector<1x512xf32>
    %105 = vector.broadcast %104 : vector<1x512xf32> to vector<32x512xf32>
    %106 = arith.mulf %102, %105 : vector<32x512xf32>
    %107 = arith.truncf %106 : vector<32x512xf32> to vector<32x512xbf16>
    %c160 = arith.constant 160 : index
    %c0_69 = arith.constant 0 : index
    %108 = vector.load %arg10[%c160, %c0_69] : memref<432x512xbf16, #tpu.memory_space<vmem>>, vector<32x512xbf16>
    tpu.vector_store %arg10[%c160, %c0_69], %107 {strides = array<i32>} : memref<432x512xbf16, #tpu.memory_space<vmem>>, vector<32x512xbf16>,
    %c497_i32_70 = arith.constant 497 : i32
    %109 = tpu.dynamic_rotate %67 by %c497_i32_70 dim 1 : vector<32x512xf32>, i32 -> vector<32x512xf32>
    %c6_71 = arith.constant 6 : index
    %c0_72 = arith.constant 0 : index
    %c0_73 = arith.constant 0 : index
    %110 = vector.load %arg2[%c6_71, %c0_72, %c0_73] : memref<9x1x512xf32, #tpu.memory_space<vmem>>, vector<1x1x512xf32>
    %111 = vector.shape_cast %110 : vector<1x1x512xf32> to vector<1x512xf32>
    %112 = vector.broadcast %111 : vector<1x512xf32> to vector<32x512xf32>
    %113 = arith.mulf %109, %112 : vector<32x512xf32>
    %114 = arith.truncf %113 : vector<32x512xf32> to vector<32x512xbf16>
    %c192_74 = arith.constant 192 : index
    %c0_75 = arith.constant 0 : index
    %115 = vector.load %arg10[%c192_74, %c0_75] : memref<432x512xbf16, #tpu.memory_space<vmem>>, vector<32x512xbf16>
    tpu.vector_store %arg10[%c192_74, %c0_75], %114 {strides = array<i32>} : memref<432x512xbf16, #tpu.memory_space<vmem>>, vector<32x512xbf16>,
    %c496_i32_76 = arith.constant 496 : i32
    %116 = tpu.dynamic_rotate %67 by %c496_i32_76 dim 1 : vector<32x512xf32>, i32 -> vector<32x512xf32>
    %c7_77 = arith.constant 7 : index
    %c0_78 = arith.constant 0 : index
    %c0_79 = arith.constant 0 : index
    %117 = vector.load %arg2[%c7_77, %c0_78, %c0_79] : memref<9x1x512xf32, #tpu.memory_space<vmem>>, vector<1x1x512xf32>
    %118 = vector.shape_cast %117 : vector<1x1x512xf32> to vector<1x512xf32>
    %119 = vector.broadcast %118 : vector<1x512xf32> to vector<32x512xf32>
    %120 = arith.mulf %116, %119 : vector<32x512xf32>
    %121 = arith.truncf %120 : vector<32x512xf32> to vector<32x512xbf16>
    %c224 = arith.constant 224 : index
    %c0_80 = arith.constant 0 : index
    %122 = vector.load %arg10[%c224, %c0_80] : memref<432x512xbf16, #tpu.memory_space<vmem>>, vector<32x512xbf16>
    tpu.vector_store %arg10[%c224, %c0_80], %121 {strides = array<i32>} : memref<432x512xbf16, #tpu.memory_space<vmem>>, vector<32x512xbf16>,
    %c495_i32_81 = arith.constant 495 : i32
    %123 = tpu.dynamic_rotate %67 by %c495_i32_81 dim 1 : vector<32x512xf32>, i32 -> vector<32x512xf32>
    %c8_82 = arith.constant 8 : index
    %c0_83 = arith.constant 0 : index
    %c0_84 = arith.constant 0 : index
    %124 = vector.load %arg2[%c8_82, %c0_83, %c0_84] : memref<9x1x512xf32, #tpu.memory_space<vmem>>, vector<1x1x512xf32>
    %125 = vector.shape_cast %124 : vector<1x1x512xf32> to vector<1x512xf32>
    %126 = vector.broadcast %125 : vector<1x512xf32> to vector<32x512xf32>
    %127 = arith.mulf %123, %126 : vector<32x512xf32>
    %128 = arith.truncf %127 : vector<32x512xf32> to vector<32x512xbf16>
    %c256 = arith.constant 256 : index
    %c0_85 = arith.constant 0 : index
    %129 = vector.load %arg10[%c256, %c0_85] : memref<432x512xbf16, #tpu.memory_space<vmem>>, vector<32x512xbf16>
    tpu.vector_store %arg10[%c256, %c0_85], %128 {strides = array<i32>} : memref<432x512xbf16, #tpu.memory_space<vmem>>, vector<32x512xbf16>,
    %c0_86 = arith.constant 0 : index
    %c0_87 = arith.constant 0 : index
    %130 = vector.load %arg10[%c0_86, %c0_87] : memref<432x512xbf16, #tpu.memory_space<vmem>>, vector<288x512xbf16>
    %cst_88 = arith.constant dense<0.000000e+00> : vector<32x512xf32>
    %131 = tpu.matmul %69, %130, %cst_88 {dimension_numbers = #tpu.dot_dimension_numbers<[1], [0], [0], [1], [0, 0, 1, 1], [], []>} : vector<32x288xbf16>, vector<288x512xbf16>, vector<32x512xf32> -> vector<32x512xf32>
    %132 = vector.broadcast %71 : vector<32x1xf32> to vector<32x512xf32>
    %133 = arith.addf %131, %132 : vector<32x512xf32>
    %cst_89 = arith.constant 0.000000e+00 : f32
    %134 = vector.broadcast %cst_89 : f32 to vector<32x512xf32>
    %135 = arith.maximumf %133, %134 : vector<32x512xf32>
    %c1_90 = arith.constant 1 : index
    %c0_91 = arith.constant 0 : index
    %c0_92 = arith.constant 0 : index
    %136 = vector.load %arg5[%c1_90, %c0_91, %c0_92] : memref<4x32x288xbf16, #tpu.memory_space<vmem>>, vector<1x32x288xbf16>
    %137 = vector.shape_cast %136 : vector<1x32x288xbf16> to vector<32x288xbf16>
    %c1_93 = arith.constant 1 : index
    %c0_94 = arith.constant 0 : index
    %c0_95 = arith.constant 0 : index
    %138 = vector.load %arg6[%c1_93, %c0_94, %c0_95] : memref<4x32x1xf32, #tpu.memory_space<vmem>>, vector<1x32x1xf32>
    %139 = vector.shape_cast %138 : vector<1x32x1xf32> to vector<32x1xf32>
    %c17_i32_96 = arith.constant 17 : i32
    %140 = tpu.dynamic_rotate %135 by %c17_i32_96 dim 1 : vector<32x512xf32>, i32 -> vector<32x512xf32>
    %c0_97 = arith.constant 0 : index
    %c0_98 = arith.constant 0 : index
    %c0_99 = arith.constant 0 : index
    %141 = vector.load %arg2[%c0_97, %c0_98, %c0_99] : memref<9x1x512xf32, #tpu.memory_space<vmem>>, vector<1x1x512xf32>
    %142 = vector.shape_cast %141 : vector<1x1x512xf32> to vector<1x512xf32>
    %143 = vector.broadcast %142 : vector<1x512xf32> to vector<32x512xf32>
    %144 = arith.mulf %140, %143 : vector<32x512xf32>
    %145 = arith.truncf %144 : vector<32x512xf32> to vector<32x512xbf16>
    %c0_100 = arith.constant 0 : index
    %c0_101 = arith.constant 0 : index
    %146 = vector.load %arg10[%c0_100, %c0_101] : memref<432x512xbf16, #tpu.memory_space<vmem>>, vector<32x512xbf16>
    tpu.vector_store %arg10[%c0_100, %c0_101], %145 {strides = array<i32>} : memref<432x512xbf16, #tpu.memory_space<vmem>>, vector<32x512xbf16>,
    %c16_i32_102 = arith.constant 16 : i32
    %147 = tpu.dynamic_rotate %135 by %c16_i32_102 dim 1 : vector<32x512xf32>, i32 -> vector<32x512xf32>
    %c1_103 = arith.constant 1 : index
    %c0_104 = arith.constant 0 : index
    %c0_105 = arith.constant 0 : index
    %148 = vector.load %arg2[%c1_103, %c0_104, %c0_105] : memref<9x1x512xf32, #tpu.memory_space<vmem>>, vector<1x1x512xf32>
    %149 = vector.shape_cast %148 : vector<1x1x512xf32> to vector<1x512xf32>
    %150 = vector.broadcast %149 : vector<1x512xf32> to vector<32x512xf32>
    %151 = arith.mulf %147, %150 : vector<32x512xf32>
    %152 = arith.truncf %151 : vector<32x512xf32> to vector<32x512xbf16>
    %c32_106 = arith.constant 32 : index
    %c0_107 = arith.constant 0 : index
    %153 = vector.load %arg10[%c32_106, %c0_107] : memref<432x512xbf16, #tpu.memory_space<vmem>>, vector<32x512xbf16>
    tpu.vector_store %arg10[%c32_106, %c0_107], %152 {strides = array<i32>} : memref<432x512xbf16, #tpu.memory_space<vmem>>, vector<32x512xbf16>,
    %c15_i32_108 = arith.constant 15 : i32
    %154 = tpu.dynamic_rotate %135 by %c15_i32_108 dim 1 : vector<32x512xf32>, i32 -> vector<32x512xf32>
    %c2_109 = arith.constant 2 : index
    %c0_110 = arith.constant 0 : index
    %c0_111 = arith.constant 0 : index
    %155 = vector.load %arg2[%c2_109, %c0_110, %c0_111] : memref<9x1x512xf32, #tpu.memory_space<vmem>>, vector<1x1x512xf32>
    %156 = vector.shape_cast %155 : vector<1x1x512xf32> to vector<1x512xf32>
    %157 = vector.broadcast %156 : vector<1x512xf32> to vector<32x512xf32>
    %158 = arith.mulf %154, %157 : vector<32x512xf32>
    %159 = arith.truncf %158 : vector<32x512xf32> to vector<32x512xbf16>
    %c64_112 = arith.constant 64 : index
    %c0_113 = arith.constant 0 : index
    %160 = vector.load %arg10[%c64_112, %c0_113] : memref<432x512xbf16, #tpu.memory_space<vmem>>, vector<32x512xbf16>
    tpu.vector_store %arg10[%c64_112, %c0_113], %159 {strides = array<i32>} : memref<432x512xbf16, #tpu.memory_space<vmem>>, vector<32x512xbf16>,
    %c1_i32_114 = arith.constant 1 : i32
    %161 = tpu.dynamic_rotate %135 by %c1_i32_114 dim 1 : vector<32x512xf32>, i32 -> vector<32x512xf32>
    %c3_115 = arith.constant 3 : index
    %c0_116 = arith.constant 0 : index
    %c0_117 = arith.constant 0 : index
    %162 = vector.load %arg2[%c3_115, %c0_116, %c0_117] : memref<9x1x512xf32, #tpu.memory_space<vmem>>, vector<1x1x512xf32>
    %163 = vector.shape_cast %162 : vector<1x1x512xf32> to vector<1x512xf32>
    %164 = vector.broadcast %163 : vector<1x512xf32> to vector<32x512xf32>
    %165 = arith.mulf %161, %164 : vector<32x512xf32>
    %166 = arith.truncf %165 : vector<32x512xf32> to vector<32x512xbf16>
    %c96_118 = arith.constant 96 : index
    %c0_119 = arith.constant 0 : index
    %167 = vector.load %arg10[%c96_118, %c0_119] : memref<432x512xbf16, #tpu.memory_space<vmem>>, vector<32x512xbf16>
    tpu.vector_store %arg10[%c96_118, %c0_119], %166 {strides = array<i32>} : memref<432x512xbf16, #tpu.memory_space<vmem>>, vector<32x512xbf16>,
    %168 = arith.truncf %135 : vector<32x512xf32> to vector<32x512xbf16>
    %c128_120 = arith.constant 128 : index
    %c0_121 = arith.constant 0 : index
    %169 = vector.load %arg10[%c128_120, %c0_121] : memref<432x512xbf16, #tpu.memory_space<vmem>>, vector<32x512xbf16>
    tpu.vector_store %arg10[%c128_120, %c0_121], %168 {strides = array<i32>} : memref<432x512xbf16, #tpu.memory_space<vmem>>, vector<32x512xbf16>,
    %c511_i32_122 = arith.constant 511 : i32
    %170 = tpu.dynamic_rotate %135 by %c511_i32_122 dim 1 : vector<32x512xf32>, i32 -> vector<32x512xf32>
    %c5_123 = arith.constant 5 : index
    %c0_124 = arith.constant 0 : index
    %c0_125 = arith.constant 0 : index
    %171 = vector.load %arg2[%c5_123, %c0_124, %c0_125] : memref<9x1x512xf32, #tpu.memory_space<vmem>>, vector<1x1x512xf32>
    %172 = vector.shape_cast %171 : vector<1x1x512xf32> to vector<1x512xf32>
    %173 = vector.broadcast %172 : vector<1x512xf32> to vector<32x512xf32>
    %174 = arith.mulf %170, %173 : vector<32x512xf32>
    %175 = arith.truncf %174 : vector<32x512xf32> to vector<32x512xbf16>
    %c160_126 = arith.constant 160 : index
    %c0_127 = arith.constant 0 : index
    %176 = vector.load %arg10[%c160_126, %c0_127] : memref<432x512xbf16, #tpu.memory_space<vmem>>, vector<32x512xbf16>
    tpu.vector_store %arg10[%c160_126, %c0_127], %175 {strides = array<i32>} : memref<432x512xbf16, #tpu.memory_space<vmem>>, vector<32x512xbf16>,
    %c497_i32_128 = arith.constant 497 : i32
    %177 = tpu.dynamic_rotate %135 by %c497_i32_128 dim 1 : vector<32x512xf32>, i32 -> vector<32x512xf32>
    %c6_129 = arith.constant 6 : index
    %c0_130 = arith.constant 0 : index
    %c0_131 = arith.constant 0 : index
    %178 = vector.load %arg2[%c6_129, %c0_130, %c0_131] : memref<9x1x512xf32, #tpu.memory_space<vmem>>, vector<1x1x512xf32>
    %179 = vector.shape_cast %178 : vector<1x1x512xf32> to vector<1x512xf32>
    %180 = vector.broadcast %179 : vector<1x512xf32> to vector<32x512xf32>
    %181 = arith.mulf %177, %180 : vector<32x512xf32>
    %182 = arith.truncf %181 : vector<32x512xf32> to vector<32x512xbf16>
    %c192_132 = arith.constant 192 : index
    %c0_133 = arith.constant 0 : index
    %183 = vector.load %arg10[%c192_132, %c0_133] : memref<432x512xbf16, #tpu.memory_space<vmem>>, vector<32x512xbf16>
    tpu.vector_store %arg10[%c192_132, %c0_133], %182 {strides = array<i32>} : memref<432x512xbf16, #tpu.memory_space<vmem>>, vector<32x512xbf16>,
    %c496_i32_134 = arith.constant 496 : i32
    %184 = tpu.dynamic_rotate %135 by %c496_i32_134 dim 1 : vector<32x512xf32>, i32 -> vector<32x512xf32>
    %c7_135 = arith.constant 7 : index
    %c0_136 = arith.constant 0 : index
    %c0_137 = arith.constant 0 : index
    %185 = vector.load %arg2[%c7_135, %c0_136, %c0_137] : memref<9x1x512xf32, #tpu.memory_space<vmem>>, vector<1x1x512xf32>
    %186 = vector.shape_cast %185 : vector<1x1x512xf32> to vector<1x512xf32>
    %187 = vector.broadcast %186 : vector<1x512xf32> to vector<32x512xf32>
    %188 = arith.mulf %184, %187 : vector<32x512xf32>
    %189 = arith.truncf %188 : vector<32x512xf32> to vector<32x512xbf16>
    %c224_138 = arith.constant 224 : index
    %c0_139 = arith.constant 0 : index
    %190 = vector.load %arg10[%c224_138, %c0_139] : memref<432x512xbf16, #tpu.memory_space<vmem>>, vector<32x512xbf16>
    tpu.vector_store %arg10[%c224_138, %c0_139], %189 {strides = array<i32>} : memref<432x512xbf16, #tpu.memory_space<vmem>>, vector<32x512xbf16>,
    %c495_i32_140 = arith.constant 495 : i32
    %191 = tpu.dynamic_rotate %135 by %c495_i32_140 dim 1 : vector<32x512xf32>, i32 -> vector<32x512xf32>
    %c8_141 = arith.constant 8 : index
    %c0_142 = arith.constant 0 : index
    %c0_143 = arith.constant 0 : index
    %192 = vector.load %arg2[%c8_141, %c0_142, %c0_143] : memref<9x1x512xf32, #tpu.memory_space<vmem>>, vector<1x1x512xf32>
    %193 = vector.shape_cast %192 : vector<1x1x512xf32> to vector<1x512xf32>
    %194 = vector.broadcast %193 : vector<1x512xf32> to vector<32x512xf32>
    %195 = arith.mulf %191, %194 : vector<32x512xf32>
    %196 = arith.truncf %195 : vector<32x512xf32> to vector<32x512xbf16>
    %c256_144 = arith.constant 256 : index
    %c0_145 = arith.constant 0 : index
    %197 = vector.load %arg10[%c256_144, %c0_145] : memref<432x512xbf16, #tpu.memory_space<vmem>>, vector<32x512xbf16>
    tpu.vector_store %arg10[%c256_144, %c0_145], %196 {strides = array<i32>} : memref<432x512xbf16, #tpu.memory_space<vmem>>, vector<32x512xbf16>,
    %c0_146 = arith.constant 0 : index
    %c0_147 = arith.constant 0 : index
    %198 = vector.load %arg10[%c0_146, %c0_147] : memref<432x512xbf16, #tpu.memory_space<vmem>>, vector<288x512xbf16>
    %cst_148 = arith.constant dense<0.000000e+00> : vector<32x512xf32>
    %199 = tpu.matmul %137, %198, %cst_148 {dimension_numbers = #tpu.dot_dimension_numbers<[1], [0], [0], [1], [0, 0, 1, 1], [], []>} : vector<32x288xbf16>, vector<288x512xbf16>, vector<32x512xf32> -> vector<32x512xf32>
    %200 = vector.broadcast %139 : vector<32x1xf32> to vector<32x512xf32>
    %201 = arith.addf %199, %200 : vector<32x512xf32>
    %202 = arith.addf %201, %67 : vector<32x512xf32>
    %c2_149 = arith.constant 2 : index
    %c0_150 = arith.constant 0 : index
    %c0_151 = arith.constant 0 : index
    %203 = vector.load %arg5[%c2_149, %c0_150, %c0_151] : memref<4x32x288xbf16, #tpu.memory_space<vmem>>, vector<1x32x288xbf16>
    %204 = vector.shape_cast %203 : vector<1x32x288xbf16> to vector<32x288xbf16>
    %c2_152 = arith.constant 2 : index
    %c0_153 = arith.constant 0 : index
    %c0_154 = arith.constant 0 : index
    %205 = vector.load %arg6[%c2_152, %c0_153, %c0_154] : memref<4x32x1xf32, #tpu.memory_space<vmem>>, vector<1x32x1xf32>
    %206 = vector.shape_cast %205 : vector<1x32x1xf32> to vector<32x1xf32>
    %c17_i32_155 = arith.constant 17 : i32
    %207 = tpu.dynamic_rotate %202 by %c17_i32_155 dim 1 : vector<32x512xf32>, i32 -> vector<32x512xf32>
    %c0_156 = arith.constant 0 : index
    %c0_157 = arith.constant 0 : index
    %c0_158 = arith.constant 0 : index
    %208 = vector.load %arg2[%c0_156, %c0_157, %c0_158] : memref<9x1x512xf32, #tpu.memory_space<vmem>>, vector<1x1x512xf32>
    %209 = vector.shape_cast %208 : vector<1x1x512xf32> to vector<1x512xf32>
    %210 = vector.broadcast %209 : vector<1x512xf32> to vector<32x512xf32>
    %211 = arith.mulf %207, %210 : vector<32x512xf32>
    %212 = arith.truncf %211 : vector<32x512xf32> to vector<32x512xbf16>
    %c0_159 = arith.constant 0 : index
    %c0_160 = arith.constant 0 : index
    %213 = vector.load %arg10[%c0_159, %c0_160] : memref<432x512xbf16, #tpu.memory_space<vmem>>, vector<32x512xbf16>
    tpu.vector_store %arg10[%c0_159, %c0_160], %212 {strides = array<i32>} : memref<432x512xbf16, #tpu.memory_space<vmem>>, vector<32x512xbf16>,
    %c16_i32_161 = arith.constant 16 : i32
    %214 = tpu.dynamic_rotate %202 by %c16_i32_161 dim 1 : vector<32x512xf32>, i32 -> vector<32x512xf32>
    %c1_162 = arith.constant 1 : index
    %c0_163 = arith.constant 0 : index
    %c0_164 = arith.constant 0 : index
    %215 = vector.load %arg2[%c1_162, %c0_163, %c0_164] : memref<9x1x512xf32, #tpu.memory_space<vmem>>, vector<1x1x512xf32>
    %216 = vector.shape_cast %215 : vector<1x1x512xf32> to vector<1x512xf32>
    %217 = vector.broadcast %216 : vector<1x512xf32> to vector<32x512xf32>
    %218 = arith.mulf %214, %217 : vector<32x512xf32>
    %219 = arith.truncf %218 : vector<32x512xf32> to vector<32x512xbf16>
    %c32_165 = arith.constant 32 : index
    %c0_166 = arith.constant 0 : index
    %220 = vector.load %arg10[%c32_165, %c0_166] : memref<432x512xbf16, #tpu.memory_space<vmem>>, vector<32x512xbf16>
    tpu.vector_store %arg10[%c32_165, %c0_166], %219 {strides = array<i32>} : memref<432x512xbf16, #tpu.memory_space<vmem>>, vector<32x512xbf16>,
    %c15_i32_167 = arith.constant 15 : i32
    %221 = tpu.dynamic_rotate %202 by %c15_i32_167 dim 1 : vector<32x512xf32>, i32 -> vector<32x512xf32>
    %c2_168 = arith.constant 2 : index
    %c0_169 = arith.constant 0 : index
    %c0_170 = arith.constant 0 : index
    %222 = vector.load %arg2[%c2_168, %c0_169, %c0_170] : memref<9x1x512xf32, #tpu.memory_space<vmem>>, vector<1x1x512xf32>
    %223 = vector.shape_cast %222 : vector<1x1x512xf32> to vector<1x512xf32>
    %224 = vector.broadcast %223 : vector<1x512xf32> to vector<32x512xf32>
    %225 = arith.mulf %221, %224 : vector<32x512xf32>
    %226 = arith.truncf %225 : vector<32x512xf32> to vector<32x512xbf16>
    %c64_171 = arith.constant 64 : index
    %c0_172 = arith.constant 0 : index
    %227 = vector.load %arg10[%c64_171, %c0_172] : memref<432x512xbf16, #tpu.memory_space<vmem>>, vector<32x512xbf16>
    tpu.vector_store %arg10[%c64_171, %c0_172], %226 {strides = array<i32>} : memref<432x512xbf16, #tpu.memory_space<vmem>>, vector<32x512xbf16>,
    %c1_i32_173 = arith.constant 1 : i32
    %228 = tpu.dynamic_rotate %202 by %c1_i32_173 dim 1 : vector<32x512xf32>, i32 -> vector<32x512xf32>
    %c3_174 = arith.constant 3 : index
    %c0_175 = arith.constant 0 : index
    %c0_176 = arith.constant 0 : index
    %229 = vector.load %arg2[%c3_174, %c0_175, %c0_176] : memref<9x1x512xf32, #tpu.memory_space<vmem>>, vector<1x1x512xf32>
    %230 = vector.shape_cast %229 : vector<1x1x512xf32> to vector<1x512xf32>
    %231 = vector.broadcast %230 : vector<1x512xf32> to vector<32x512xf32>
    %232 = arith.mulf %228, %231 : vector<32x512xf32>
    %233 = arith.truncf %232 : vector<32x512xf32> to vector<32x512xbf16>
    %c96_177 = arith.constant 96 : index
    %c0_178 = arith.constant 0 : index
    %234 = vector.load %arg10[%c96_177, %c0_178] : memref<432x512xbf16, #tpu.memory_space<vmem>>, vector<32x512xbf16>
    tpu.vector_store %arg10[%c96_177, %c0_178], %233 {strides = array<i32>} : memref<432x512xbf16, #tpu.memory_space<vmem>>, vector<32x512xbf16>,
    %235 = arith.truncf %202 : vector<32x512xf32> to vector<32x512xbf16>
    %c128_179 = arith.constant 128 : index
    %c0_180 = arith.constant 0 : index
    %236 = vector.load %arg10[%c128_179, %c0_180] : memref<432x512xbf16, #tpu.memory_space<vmem>>, vector<32x512xbf16>
    tpu.vector_store %arg10[%c128_179, %c0_180], %235 {strides = array<i32>} : memref<432x512xbf16, #tpu.memory_space<vmem>>, vector<32x512xbf16>,
    %c511_i32_181 = arith.constant 511 : i32
    %237 = tpu.dynamic_rotate %202 by %c511_i32_181 dim 1 : vector<32x512xf32>, i32 -> vector<32x512xf32>
    %c5_182 = arith.constant 5 : index
    %c0_183 = arith.constant 0 : index
    %c0_184 = arith.constant 0 : index
    %238 = vector.load %arg2[%c5_182, %c0_183, %c0_184] : memref<9x1x512xf32, #tpu.memory_space<vmem>>, vector<1x1x512xf32>
    %239 = vector.shape_cast %238 : vector<1x1x512xf32> to vector<1x512xf32>
    %240 = vector.broadcast %239 : vector<1x512xf32> to vector<32x512xf32>
    %241 = arith.mulf %237, %240 : vector<32x512xf32>
    %242 = arith.truncf %241 : vector<32x512xf32> to vector<32x512xbf16>
    %c160_185 = arith.constant 160 : index
    %c0_186 = arith.constant 0 : index
    %243 = vector.load %arg10[%c160_185, %c0_186] : memref<432x512xbf16, #tpu.memory_space<vmem>>, vector<32x512xbf16>
    tpu.vector_store %arg10[%c160_185, %c0_186], %242 {strides = array<i32>} : memref<432x512xbf16, #tpu.memory_space<vmem>>, vector<32x512xbf16>,
    %c497_i32_187 = arith.constant 497 : i32
    %244 = tpu.dynamic_rotate %202 by %c497_i32_187 dim 1 : vector<32x512xf32>, i32 -> vector<32x512xf32>
    %c6_188 = arith.constant 6 : index
    %c0_189 = arith.constant 0 : index
    %c0_190 = arith.constant 0 : index
    %245 = vector.load %arg2[%c6_188, %c0_189, %c0_190] : memref<9x1x512xf32, #tpu.memory_space<vmem>>, vector<1x1x512xf32>
    %246 = vector.shape_cast %245 : vector<1x1x512xf32> to vector<1x512xf32>
    %247 = vector.broadcast %246 : vector<1x512xf32> to vector<32x512xf32>
    %248 = arith.mulf %244, %247 : vector<32x512xf32>
    %249 = arith.truncf %248 : vector<32x512xf32> to vector<32x512xbf16>
    %c192_191 = arith.constant 192 : index
    %c0_192 = arith.constant 0 : index
    %250 = vector.load %arg10[%c192_191, %c0_192] : memref<432x512xbf16, #tpu.memory_space<vmem>>, vector<32x512xbf16>
    tpu.vector_store %arg10[%c192_191, %c0_192], %249 {strides = array<i32>} : memref<432x512xbf16, #tpu.memory_space<vmem>>, vector<32x512xbf16>,
    %c496_i32_193 = arith.constant 496 : i32
    %251 = tpu.dynamic_rotate %202 by %c496_i32_193 dim 1 : vector<32x512xf32>, i32 -> vector<32x512xf32>
    %c7_194 = arith.constant 7 : index
    %c0_195 = arith.constant 0 : index
    %c0_196 = arith.constant 0 : index
    %252 = vector.load %arg2[%c7_194, %c0_195, %c0_196] : memref<9x1x512xf32, #tpu.memory_space<vmem>>, vector<1x1x512xf32>
    %253 = vector.shape_cast %252 : vector<1x1x512xf32> to vector<1x512xf32>
    %254 = vector.broadcast %253 : vector<1x512xf32> to vector<32x512xf32>
    %255 = arith.mulf %251, %254 : vector<32x512xf32>
    %256 = arith.truncf %255 : vector<32x512xf32> to vector<32x512xbf16>
    %c224_197 = arith.constant 224 : index
    %c0_198 = arith.constant 0 : index
    %257 = vector.load %arg10[%c224_197, %c0_198] : memref<432x512xbf16, #tpu.memory_space<vmem>>, vector<32x512xbf16>
    tpu.vector_store %arg10[%c224_197, %c0_198], %256 {strides = array<i32>} : memref<432x512xbf16, #tpu.memory_space<vmem>>, vector<32x512xbf16>,
    %c495_i32_199 = arith.constant 495 : i32
    %258 = tpu.dynamic_rotate %202 by %c495_i32_199 dim 1 : vector<32x512xf32>, i32 -> vector<32x512xf32>
    %c8_200 = arith.constant 8 : index
    %c0_201 = arith.constant 0 : index
    %c0_202 = arith.constant 0 : index
    %259 = vector.load %arg2[%c8_200, %c0_201, %c0_202] : memref<9x1x512xf32, #tpu.memory_space<vmem>>, vector<1x1x512xf32>
    %260 = vector.shape_cast %259 : vector<1x1x512xf32> to vector<1x512xf32>
    %261 = vector.broadcast %260 : vector<1x512xf32> to vector<32x512xf32>
    %262 = arith.mulf %258, %261 : vector<32x512xf32>
    %263 = arith.truncf %262 : vector<32x512xf32> to vector<32x512xbf16>
    %c256_203 = arith.constant 256 : index
    %c0_204 = arith.constant 0 : index
    %264 = vector.load %arg10[%c256_203, %c0_204] : memref<432x512xbf16, #tpu.memory_space<vmem>>, vector<32x512xbf16>
    tpu.vector_store %arg10[%c256_203, %c0_204], %263 {strides = array<i32>} : memref<432x512xbf16, #tpu.memory_space<vmem>>, vector<32x512xbf16>,
    %c0_205 = arith.constant 0 : index
    %c0_206 = arith.constant 0 : index
    %265 = vector.load %arg10[%c0_205, %c0_206] : memref<432x512xbf16, #tpu.memory_space<vmem>>, vector<288x512xbf16>
    %cst_207 = arith.constant dense<0.000000e+00> : vector<32x512xf32>
    %266 = tpu.matmul %204, %265, %cst_207 {dimension_numbers = #tpu.dot_dimension_numbers<[1], [0], [0], [1], [0, 0, 1, 1], [], []>} : vector<32x288xbf16>, vector<288x512xbf16>, vector<32x512xf32> -> vector<32x512xf32>
    %267 = vector.broadcast %206 : vector<32x1xf32> to vector<32x512xf32>
    %268 = arith.addf %266, %267 : vector<32x512xf32>
    %cst_208 = arith.constant 0.000000e+00 : f32
    %269 = vector.broadcast %cst_208 : f32 to vector<32x512xf32>
    %270 = arith.maximumf %268, %269 : vector<32x512xf32>
    %c3_209 = arith.constant 3 : index
    %c0_210 = arith.constant 0 : index
    %c0_211 = arith.constant 0 : index
    %271 = vector.load %arg5[%c3_209, %c0_210, %c0_211] : memref<4x32x288xbf16, #tpu.memory_space<vmem>>, vector<1x32x288xbf16>
    %272 = vector.shape_cast %271 : vector<1x32x288xbf16> to vector<32x288xbf16>
    %c3_212 = arith.constant 3 : index
    %c0_213 = arith.constant 0 : index
    %c0_214 = arith.constant 0 : index
    %273 = vector.load %arg6[%c3_212, %c0_213, %c0_214] : memref<4x32x1xf32, #tpu.memory_space<vmem>>, vector<1x32x1xf32>
    %274 = vector.shape_cast %273 : vector<1x32x1xf32> to vector<32x1xf32>
    %c17_i32_215 = arith.constant 17 : i32
    %275 = tpu.dynamic_rotate %270 by %c17_i32_215 dim 1 : vector<32x512xf32>, i32 -> vector<32x512xf32>
    %c0_216 = arith.constant 0 : index
    %c0_217 = arith.constant 0 : index
    %c0_218 = arith.constant 0 : index
    %276 = vector.load %arg2[%c0_216, %c0_217, %c0_218] : memref<9x1x512xf32, #tpu.memory_space<vmem>>, vector<1x1x512xf32>
    %277 = vector.shape_cast %276 : vector<1x1x512xf32> to vector<1x512xf32>
    %278 = vector.broadcast %277 : vector<1x512xf32> to vector<32x512xf32>
    %279 = arith.mulf %275, %278 : vector<32x512xf32>
    %280 = arith.truncf %279 : vector<32x512xf32> to vector<32x512xbf16>
    %c0_219 = arith.constant 0 : index
    %c0_220 = arith.constant 0 : index
    %281 = vector.load %arg10[%c0_219, %c0_220] : memref<432x512xbf16, #tpu.memory_space<vmem>>, vector<32x512xbf16>
    tpu.vector_store %arg10[%c0_219, %c0_220], %280 {strides = array<i32>} : memref<432x512xbf16, #tpu.memory_space<vmem>>, vector<32x512xbf16>,
    %c16_i32_221 = arith.constant 16 : i32
    %282 = tpu.dynamic_rotate %270 by %c16_i32_221 dim 1 : vector<32x512xf32>, i32 -> vector<32x512xf32>
    %c1_222 = arith.constant 1 : index
    %c0_223 = arith.constant 0 : index
    %c0_224 = arith.constant 0 : index
    %283 = vector.load %arg2[%c1_222, %c0_223, %c0_224] : memref<9x1x512xf32, #tpu.memory_space<vmem>>, vector<1x1x512xf32>
    %284 = vector.shape_cast %283 : vector<1x1x512xf32> to vector<1x512xf32>
    %285 = vector.broadcast %284 : vector<1x512xf32> to vector<32x512xf32>
    %286 = arith.mulf %282, %285 : vector<32x512xf32>
    %287 = arith.truncf %286 : vector<32x512xf32> to vector<32x512xbf16>
    %c32_225 = arith.constant 32 : index
    %c0_226 = arith.constant 0 : index
    %288 = vector.load %arg10[%c32_225, %c0_226] : memref<432x512xbf16, #tpu.memory_space<vmem>>, vector<32x512xbf16>
    tpu.vector_store %arg10[%c32_225, %c0_226], %287 {strides = array<i32>} : memref<432x512xbf16, #tpu.memory_space<vmem>>, vector<32x512xbf16>,
    %c15_i32_227 = arith.constant 15 : i32
    %289 = tpu.dynamic_rotate %270 by %c15_i32_227 dim 1 : vector<32x512xf32>, i32 -> vector<32x512xf32>
    %c2_228 = arith.constant 2 : index
    %c0_229 = arith.constant 0 : index
    %c0_230 = arith.constant 0 : index
    %290 = vector.load %arg2[%c2_228, %c0_229, %c0_230] : memref<9x1x512xf32, #tpu.memory_space<vmem>>, vector<1x1x512xf32>
    %291 = vector.shape_cast %290 : vector<1x1x512xf32> to vector<1x512xf32>
    %292 = vector.broadcast %291 : vector<1x512xf32> to vector<32x512xf32>
    %293 = arith.mulf %289, %292 : vector<32x512xf32>
    %294 = arith.truncf %293 : vector<32x512xf32> to vector<32x512xbf16>
    %c64_231 = arith.constant 64 : index
    %c0_232 = arith.constant 0 : index
    %295 = vector.load %arg10[%c64_231, %c0_232] : memref<432x512xbf16, #tpu.memory_space<vmem>>, vector<32x512xbf16>
    tpu.vector_store %arg10[%c64_231, %c0_232], %294 {strides = array<i32>} : memref<432x512xbf16, #tpu.memory_space<vmem>>, vector<32x512xbf16>,
    %c1_i32_233 = arith.constant 1 : i32
    %296 = tpu.dynamic_rotate %270 by %c1_i32_233 dim 1 : vector<32x512xf32>, i32 -> vector<32x512xf32>
    %c3_234 = arith.constant 3 : index
    %c0_235 = arith.constant 0 : index
    %c0_236 = arith.constant 0 : index
    %297 = vector.load %arg2[%c3_234, %c0_235, %c0_236] : memref<9x1x512xf32, #tpu.memory_space<vmem>>, vector<1x1x512xf32>
    %298 = vector.shape_cast %297 : vector<1x1x512xf32> to vector<1x512xf32>
    %299 = vector.broadcast %298 : vector<1x512xf32> to vector<32x512xf32>
    %300 = arith.mulf %296, %299 : vector<32x512xf32>
    %301 = arith.truncf %300 : vector<32x512xf32> to vector<32x512xbf16>
    %c96_237 = arith.constant 96 : index
    %c0_238 = arith.constant 0 : index
    %302 = vector.load %arg10[%c96_237, %c0_238] : memref<432x512xbf16, #tpu.memory_space<vmem>>, vector<32x512xbf16>
    tpu.vector_store %arg10[%c96_237, %c0_238], %301 {strides = array<i32>} : memref<432x512xbf16, #tpu.memory_space<vmem>>, vector<32x512xbf16>,
    %303 = arith.truncf %270 : vector<32x512xf32> to vector<32x512xbf16>
    %c128_239 = arith.constant 128 : index
    %c0_240 = arith.constant 0 : index
    %304 = vector.load %arg10[%c128_239, %c0_240] : memref<432x512xbf16, #tpu.memory_space<vmem>>, vector<32x512xbf16>
    tpu.vector_store %arg10[%c128_239, %c0_240], %303 {strides = array<i32>} : memref<432x512xbf16, #tpu.memory_space<vmem>>, vector<32x512xbf16>,
    %c511_i32_241 = arith.constant 511 : i32
    %305 = tpu.dynamic_rotate %270 by %c511_i32_241 dim 1 : vector<32x512xf32>, i32 -> vector<32x512xf32>
    %c5_242 = arith.constant 5 : index
    %c0_243 = arith.constant 0 : index
    %c0_244 = arith.constant 0 : index
    %306 = vector.load %arg2[%c5_242, %c0_243, %c0_244] : memref<9x1x512xf32, #tpu.memory_space<vmem>>, vector<1x1x512xf32>
    %307 = vector.shape_cast %306 : vector<1x1x512xf32> to vector<1x512xf32>
    %308 = vector.broadcast %307 : vector<1x512xf32> to vector<32x512xf32>
    %309 = arith.mulf %305, %308 : vector<32x512xf32>
    %310 = arith.truncf %309 : vector<32x512xf32> to vector<32x512xbf16>
    %c160_245 = arith.constant 160 : index
    %c0_246 = arith.constant 0 : index
    %311 = vector.load %arg10[%c160_245, %c0_246] : memref<432x512xbf16, #tpu.memory_space<vmem>>, vector<32x512xbf16>
    tpu.vector_store %arg10[%c160_245, %c0_246], %310 {strides = array<i32>} : memref<432x512xbf16, #tpu.memory_space<vmem>>, vector<32x512xbf16>,
    %c497_i32_247 = arith.constant 497 : i32
    %312 = tpu.dynamic_rotate %270 by %c497_i32_247 dim 1 : vector<32x512xf32>, i32 -> vector<32x512xf32>
    %c6_248 = arith.constant 6 : index
    %c0_249 = arith.constant 0 : index
    %c0_250 = arith.constant 0 : index
    %313 = vector.load %arg2[%c6_248, %c0_249, %c0_250] : memref<9x1x512xf32, #tpu.memory_space<vmem>>, vector<1x1x512xf32>
    %314 = vector.shape_cast %313 : vector<1x1x512xf32> to vector<1x512xf32>
    %315 = vector.broadcast %314 : vector<1x512xf32> to vector<32x512xf32>
    %316 = arith.mulf %312, %315 : vector<32x512xf32>
    %317 = arith.truncf %316 : vector<32x512xf32> to vector<32x512xbf16>
    %c192_251 = arith.constant 192 : index
    %c0_252 = arith.constant 0 : index
    %318 = vector.load %arg10[%c192_251, %c0_252] : memref<432x512xbf16, #tpu.memory_space<vmem>>, vector<32x512xbf16>
    tpu.vector_store %arg10[%c192_251, %c0_252], %317 {strides = array<i32>} : memref<432x512xbf16, #tpu.memory_space<vmem>>, vector<32x512xbf16>,
    %c496_i32_253 = arith.constant 496 : i32
    %319 = tpu.dynamic_rotate %270 by %c496_i32_253 dim 1 : vector<32x512xf32>, i32 -> vector<32x512xf32>
    %c7_254 = arith.constant 7 : index
    %c0_255 = arith.constant 0 : index
    %c0_256 = arith.constant 0 : index
    %320 = vector.load %arg2[%c7_254, %c0_255, %c0_256] : memref<9x1x512xf32, #tpu.memory_space<vmem>>, vector<1x1x512xf32>
    %321 = vector.shape_cast %320 : vector<1x1x512xf32> to vector<1x512xf32>
    %322 = vector.broadcast %321 : vector<1x512xf32> to vector<32x512xf32>
    %323 = arith.mulf %319, %322 : vector<32x512xf32>
    %324 = arith.truncf %323 : vector<32x512xf32> to vector<32x512xbf16>
    %c224_257 = arith.constant 224 : index
    %c0_258 = arith.constant 0 : index
    %325 = vector.load %arg10[%c224_257, %c0_258] : memref<432x512xbf16, #tpu.memory_space<vmem>>, vector<32x512xbf16>
    tpu.vector_store %arg10[%c224_257, %c0_258], %324 {strides = array<i32>} : memref<432x512xbf16, #tpu.memory_space<vmem>>, vector<32x512xbf16>,
    %c495_i32_259 = arith.constant 495 : i32
    %326 = tpu.dynamic_rotate %270 by %c495_i32_259 dim 1 : vector<32x512xf32>, i32 -> vector<32x512xf32>
    %c8_260 = arith.constant 8 : index
    %c0_261 = arith.constant 0 : index
    %c0_262 = arith.constant 0 : index
    %327 = vector.load %arg2[%c8_260, %c0_261, %c0_262] : memref<9x1x512xf32, #tpu.memory_space<vmem>>, vector<1x1x512xf32>
    %328 = vector.shape_cast %327 : vector<1x1x512xf32> to vector<1x512xf32>
    %329 = vector.broadcast %328 : vector<1x512xf32> to vector<32x512xf32>
    %330 = arith.mulf %326, %329 : vector<32x512xf32>
    %331 = arith.truncf %330 : vector<32x512xf32> to vector<32x512xbf16>
    %c256_263 = arith.constant 256 : index
    %c0_264 = arith.constant 0 : index
    %332 = vector.load %arg10[%c256_263, %c0_264] : memref<432x512xbf16, #tpu.memory_space<vmem>>, vector<32x512xbf16>
    tpu.vector_store %arg10[%c256_263, %c0_264], %331 {strides = array<i32>} : memref<432x512xbf16, #tpu.memory_space<vmem>>, vector<32x512xbf16>,
    %c0_265 = arith.constant 0 : index
    %c0_266 = arith.constant 0 : index
    %333 = vector.load %arg10[%c0_265, %c0_266] : memref<432x512xbf16, #tpu.memory_space<vmem>>, vector<288x512xbf16>
    %cst_267 = arith.constant dense<0.000000e+00> : vector<32x512xf32>
    %334 = tpu.matmul %272, %333, %cst_267 {dimension_numbers = #tpu.dot_dimension_numbers<[1], [0], [0], [1], [0, 0, 1, 1], [], []>} : vector<32x288xbf16>, vector<288x512xbf16>, vector<32x512xf32> -> vector<32x512xf32>
    %335 = vector.broadcast %274 : vector<32x1xf32> to vector<32x512xf32>
    %336 = arith.addf %334, %335 : vector<32x512xf32>
    %337 = arith.addf %336, %202 : vector<32x512xf32>
    %c0_268 = arith.constant 0 : index
    %c0_269 = arith.constant 0 : index
    %338 = vector.load %arg7[%c0_268, %c0_269] : memref<32x288xbf16, #tpu.memory_space<vmem>>, vector<32x288xbf16>
    %c0_270 = arith.constant 0 : index
    %c0_271 = arith.constant 0 : index
    %339 = vector.load %arg8[%c0_270, %c0_271] : memref<32x1xf32, #tpu.memory_space<vmem>>, vector<32x1xf32>
    %c17_i32_272 = arith.constant 17 : i32
    %340 = tpu.dynamic_rotate %337 by %c17_i32_272 dim 1 : vector<32x512xf32>, i32 -> vector<32x512xf32>
    %c0_273 = arith.constant 0 : index
    %c0_274 = arith.constant 0 : index
    %c0_275 = arith.constant 0 : index
    %341 = vector.load %arg2[%c0_273, %c0_274, %c0_275] : memref<9x1x512xf32, #tpu.memory_space<vmem>>, vector<1x1x512xf32>
    %342 = vector.shape_cast %341 : vector<1x1x512xf32> to vector<1x512xf32>
    %343 = vector.broadcast %342 : vector<1x512xf32> to vector<32x512xf32>
    %344 = arith.mulf %340, %343 : vector<32x512xf32>
    %345 = arith.truncf %344 : vector<32x512xf32> to vector<32x512xbf16>
    %c0_276 = arith.constant 0 : index
    %c0_277 = arith.constant 0 : index
    %346 = vector.load %arg10[%c0_276, %c0_277] : memref<432x512xbf16, #tpu.memory_space<vmem>>, vector<32x512xbf16>
    tpu.vector_store %arg10[%c0_276, %c0_277], %345 {strides = array<i32>} : memref<432x512xbf16, #tpu.memory_space<vmem>>, vector<32x512xbf16>,
    %c16_i32_278 = arith.constant 16 : i32
    %347 = tpu.dynamic_rotate %337 by %c16_i32_278 dim 1 : vector<32x512xf32>, i32 -> vector<32x512xf32>
    %c1_279 = arith.constant 1 : index
    %c0_280 = arith.constant 0 : index
    %c0_281 = arith.constant 0 : index
    %348 = vector.load %arg2[%c1_279, %c0_280, %c0_281] : memref<9x1x512xf32, #tpu.memory_space<vmem>>, vector<1x1x512xf32>
    %349 = vector.shape_cast %348 : vector<1x1x512xf32> to vector<1x512xf32>
    %350 = vector.broadcast %349 : vector<1x512xf32> to vector<32x512xf32>
    %351 = arith.mulf %347, %350 : vector<32x512xf32>
    %352 = arith.truncf %351 : vector<32x512xf32> to vector<32x512xbf16>
    %c32_282 = arith.constant 32 : index
    %c0_283 = arith.constant 0 : index
    %353 = vector.load %arg10[%c32_282, %c0_283] : memref<432x512xbf16, #tpu.memory_space<vmem>>, vector<32x512xbf16>
    tpu.vector_store %arg10[%c32_282, %c0_283], %352 {strides = array<i32>} : memref<432x512xbf16, #tpu.memory_space<vmem>>, vector<32x512xbf16>,
    %c15_i32_284 = arith.constant 15 : i32
    %354 = tpu.dynamic_rotate %337 by %c15_i32_284 dim 1 : vector<32x512xf32>, i32 -> vector<32x512xf32>
    %c2_285 = arith.constant 2 : index
    %c0_286 = arith.constant 0 : index
    %c0_287 = arith.constant 0 : index
    %355 = vector.load %arg2[%c2_285, %c0_286, %c0_287] : memref<9x1x512xf32, #tpu.memory_space<vmem>>, vector<1x1x512xf32>
    %356 = vector.shape_cast %355 : vector<1x1x512xf32> to vector<1x512xf32>
    %357 = vector.broadcast %356 : vector<1x512xf32> to vector<32x512xf32>
    %358 = arith.mulf %354, %357 : vector<32x512xf32>
    %359 = arith.truncf %358 : vector<32x512xf32> to vector<32x512xbf16>
    %c64_288 = arith.constant 64 : index
    %c0_289 = arith.constant 0 : index
    %360 = vector.load %arg10[%c64_288, %c0_289] : memref<432x512xbf16, #tpu.memory_space<vmem>>, vector<32x512xbf16>
    tpu.vector_store %arg10[%c64_288, %c0_289], %359 {strides = array<i32>} : memref<432x512xbf16, #tpu.memory_space<vmem>>, vector<32x512xbf16>,
    %c1_i32_290 = arith.constant 1 : i32
    %361 = tpu.dynamic_rotate %337 by %c1_i32_290 dim 1 : vector<32x512xf32>, i32 -> vector<32x512xf32>
    %c3_291 = arith.constant 3 : index
    %c0_292 = arith.constant 0 : index
    %c0_293 = arith.constant 0 : index
    %362 = vector.load %arg2[%c3_291, %c0_292, %c0_293] : memref<9x1x512xf32, #tpu.memory_space<vmem>>, vector<1x1x512xf32>
    %363 = vector.shape_cast %362 : vector<1x1x512xf32> to vector<1x512xf32>
    %364 = vector.broadcast %363 : vector<1x512xf32> to vector<32x512xf32>
    %365 = arith.mulf %361, %364 : vector<32x512xf32>
    %366 = arith.truncf %365 : vector<32x512xf32> to vector<32x512xbf16>
    %c96_294 = arith.constant 96 : index
    %c0_295 = arith.constant 0 : index
    %367 = vector.load %arg10[%c96_294, %c0_295] : memref<432x512xbf16, #tpu.memory_space<vmem>>, vector<32x512xbf16>
    tpu.vector_store %arg10[%c96_294, %c0_295], %366 {strides = array<i32>} : memref<432x512xbf16, #tpu.memory_space<vmem>>, vector<32x512xbf16>,
    %368 = arith.truncf %337 : vector<32x512xf32> to vector<32x512xbf16>
    %c128_296 = arith.constant 128 : index
    %c0_297 = arith.constant 0 : index
    %369 = vector.load %arg10[%c128_296, %c0_297] : memref<432x512xbf16, #tpu.memory_space<vmem>>, vector<32x512xbf16>
    tpu.vector_store %arg10[%c128_296, %c0_297], %368 {strides = array<i32>} : memref<432x512xbf16, #tpu.memory_space<vmem>>, vector<32x512xbf16>,
    %c511_i32_298 = arith.constant 511 : i32
    %370 = tpu.dynamic_rotate %337 by %c511_i32_298 dim 1 : vector<32x512xf32>, i32 -> vector<32x512xf32>
    %c5_299 = arith.constant 5 : index
    %c0_300 = arith.constant 0 : index
    %c0_301 = arith.constant 0 : index
    %371 = vector.load %arg2[%c5_299, %c0_300, %c0_301] : memref<9x1x512xf32, #tpu.memory_space<vmem>>, vector<1x1x512xf32>
    %372 = vector.shape_cast %371 : vector<1x1x512xf32> to vector<1x512xf32>
    %373 = vector.broadcast %372 : vector<1x512xf32> to vector<32x512xf32>
    %374 = arith.mulf %370, %373 : vector<32x512xf32>
    %375 = arith.truncf %374 : vector<32x512xf32> to vector<32x512xbf16>
    %c160_302 = arith.constant 160 : index
    %c0_303 = arith.constant 0 : index
    %376 = vector.load %arg10[%c160_302, %c0_303] : memref<432x512xbf16, #tpu.memory_space<vmem>>, vector<32x512xbf16>
    tpu.vector_store %arg10[%c160_302, %c0_303], %375 {strides = array<i32>} : memref<432x512xbf16, #tpu.memory_space<vmem>>, vector<32x512xbf16>,
    %c497_i32_304 = arith.constant 497 : i32
    %377 = tpu.dynamic_rotate %337 by %c497_i32_304 dim 1 : vector<32x512xf32>, i32 -> vector<32x512xf32>
    %c6_305 = arith.constant 6 : index
    %c0_306 = arith.constant 0 : index
    %c0_307 = arith.constant 0 : index
    %378 = vector.load %arg2[%c6_305, %c0_306, %c0_307] : memref<9x1x512xf32, #tpu.memory_space<vmem>>, vector<1x1x512xf32>
    %379 = vector.shape_cast %378 : vector<1x1x512xf32> to vector<1x512xf32>
    %380 = vector.broadcast %379 : vector<1x512xf32> to vector<32x512xf32>
    %381 = arith.mulf %377, %380 : vector<32x512xf32>
    %382 = arith.truncf %381 : vector<32x512xf32> to vector<32x512xbf16>
    %c192_308 = arith.constant 192 : index
    %c0_309 = arith.constant 0 : index
    %383 = vector.load %arg10[%c192_308, %c0_309] : memref<432x512xbf16, #tpu.memory_space<vmem>>, vector<32x512xbf16>
    tpu.vector_store %arg10[%c192_308, %c0_309], %382 {strides = array<i32>} : memref<432x512xbf16, #tpu.memory_space<vmem>>, vector<32x512xbf16>,
    %c496_i32_310 = arith.constant 496 : i32
    %384 = tpu.dynamic_rotate %337 by %c496_i32_310 dim 1 : vector<32x512xf32>, i32 -> vector<32x512xf32>
    %c7_311 = arith.constant 7 : index
    %c0_312 = arith.constant 0 : index
    %c0_313 = arith.constant 0 : index
    %385 = vector.load %arg2[%c7_311, %c0_312, %c0_313] : memref<9x1x512xf32, #tpu.memory_space<vmem>>, vector<1x1x512xf32>
    %386 = vector.shape_cast %385 : vector<1x1x512xf32> to vector<1x512xf32>
    %387 = vector.broadcast %386 : vector<1x512xf32> to vector<32x512xf32>
    %388 = arith.mulf %384, %387 : vector<32x512xf32>
    %389 = arith.truncf %388 : vector<32x512xf32> to vector<32x512xbf16>
    %c224_314 = arith.constant 224 : index
    %c0_315 = arith.constant 0 : index
    %390 = vector.load %arg10[%c224_314, %c0_315] : memref<432x512xbf16, #tpu.memory_space<vmem>>, vector<32x512xbf16>
    tpu.vector_store %arg10[%c224_314, %c0_315], %389 {strides = array<i32>} : memref<432x512xbf16, #tpu.memory_space<vmem>>, vector<32x512xbf16>,
    %c495_i32_316 = arith.constant 495 : i32
    %391 = tpu.dynamic_rotate %337 by %c495_i32_316 dim 1 : vector<32x512xf32>, i32 -> vector<32x512xf32>
    %c8_317 = arith.constant 8 : index
    %c0_318 = arith.constant 0 : index
    %c0_319 = arith.constant 0 : index
    %392 = vector.load %arg2[%c8_317, %c0_318, %c0_319] : memref<9x1x512xf32, #tpu.memory_space<vmem>>, vector<1x1x512xf32>
    %393 = vector.shape_cast %392 : vector<1x1x512xf32> to vector<1x512xf32>
    %394 = vector.broadcast %393 : vector<1x512xf32> to vector<32x512xf32>
    %395 = arith.mulf %391, %394 : vector<32x512xf32>
    %396 = arith.truncf %395 : vector<32x512xf32> to vector<32x512xbf16>
    %c256_320 = arith.constant 256 : index
    %c0_321 = arith.constant 0 : index
    %397 = vector.load %arg10[%c256_320, %c0_321] : memref<432x512xbf16, #tpu.memory_space<vmem>>, vector<32x512xbf16>
    tpu.vector_store %arg10[%c256_320, %c0_321], %396 {strides = array<i32>} : memref<432x512xbf16, #tpu.memory_space<vmem>>, vector<32x512xbf16>,
    %c0_322 = arith.constant 0 : index
    %c0_323 = arith.constant 0 : index
    %398 = vector.load %arg10[%c0_322, %c0_323] : memref<432x512xbf16, #tpu.memory_space<vmem>>, vector<288x512xbf16>
    %cst_324 = arith.constant dense<0.000000e+00> : vector<32x512xf32>
    %399 = tpu.matmul %338, %398, %cst_324 {dimension_numbers = #tpu.dot_dimension_numbers<[1], [0], [0], [1], [0, 0, 1, 1], [], []>} : vector<32x288xbf16>, vector<288x512xbf16>, vector<32x512xf32> -> vector<32x512xf32>
    %400 = vector.broadcast %339 : vector<32x1xf32> to vector<32x512xf32>
    %401 = arith.addf %399, %400 : vector<32x512xf32>
    %402 = arith.addf %401, %67 : vector<32x512xf32>
    %c0_325 = arith.constant 0 : index
    %c0_326 = arith.constant 0 : index
    %c0_327 = arith.constant 0 : index
    %403 = vector.load %arg9[%c0_325, %c0_326, %c0_327] : memref<1x32x512xf32, #tpu.memory_space<vmem>>, vector<1x32x512xf32>
    %404 = vector.shape_cast %403 : vector<1x32x512xf32> to vector<32x512xf32>
    %405 = vector.shape_cast %402 : vector<32x512xf32> to vector<1x32x512xf32>
    tpu.vector_store %arg9[%c0_325, %c0_326, %c0_327], %405 {strides = array<i32>} : memref<1x32x512xf32, #tpu.memory_space<vmem>>, vector<1x32x512xf32>,
    return
  }
  func.func @transform_0(%arg0: i32) -> (i32, i32, i32) {
    %c0_i32 = arith.constant 0 : i32
    %c0_i32_0 = arith.constant 0 : i32
    %c0_i32_1 = arith.constant 0 : i32
    return %arg0, %c0_i32, %c0_i32_0 : i32, i32, i32
  }
  func.func @transform_1(%arg0: i32) -> (i32, i32, i32) {
    %c0_i32 = arith.constant 0 : i32
    %c0_i32_0 = arith.constant 0 : i32
    %c0_i32_1 = arith.constant 0 : i32
    %c0_i32_2 = arith.constant 0 : i32
    return %c0_i32, %c0_i32_0, %c0_i32_1 : i32, i32, i32
  }
  func.func @transform_2(%arg0: i32) -> (i32, i32) {
    %c0_i32 = arith.constant 0 : i32
    %c0_i32_0 = arith.constant 0 : i32
    %c0_i32_1 = arith.constant 0 : i32
    return %c0_i32, %c0_i32_0 : i32, i32
  }
  func.func @transform_3(%arg0: i32) -> (i32, i32) {
    %c0_i32 = arith.constant 0 : i32
    %c0_i32_0 = arith.constant 0 : i32
    %c0_i32_1 = arith.constant 0 : i32
    return %c0_i32, %c0_i32_0 : i32, i32
  }
  func.func @transform_4(%arg0: i32) -> (i32, i32, i32) {
    %c0_i32 = arith.constant 0 : i32
    %c0_i32_0 = arith.constant 0 : i32
    %c0_i32_1 = arith.constant 0 : i32
    %c0_i32_2 = arith.constant 0 : i32
    return %c0_i32, %c0_i32_0, %c0_i32_1 : i32, i32, i32
  }
  func.func @transform_5(%arg0: i32) -> (i32, i32, i32) {
    %c0_i32 = arith.constant 0 : i32
    %c0_i32_0 = arith.constant 0 : i32
    %c0_i32_1 = arith.constant 0 : i32
    %c0_i32_2 = arith.constant 0 : i32
    return %c0_i32, %c0_i32_0, %c0_i32_1 : i32, i32, i32
  }
  func.func @transform_6(%arg0: i32) -> (i32, i32) {
    %c0_i32 = arith.constant 0 : i32
    %c0_i32_0 = arith.constant 0 : i32
    %c0_i32_1 = arith.constant 0 : i32
    return %c0_i32, %c0_i32_0 : i32, i32
  }
  func.func @transform_7(%arg0: i32) -> (i32, i32) {
    %c0_i32 = arith.constant 0 : i32
    %c0_i32_0 = arith.constant 0 : i32
    %c0_i32_1 = arith.constant 0 : i32
    return %c0_i32, %c0_i32_0 : i32, i32
  }
  func.func @transform_8(%arg0: i32) -> (i32, i32, i32) {
    %c0_i32 = arith.constant 0 : i32
    %c0_i32_0 = arith.constant 0 : i32
    %c0_i32_1 = arith.constant 0 : i32
    return %arg0, %c0_i32, %c0_i32_0 : i32, i32, i32
  }
}

</mosaic_0001>

<bundles_post_ra>
// kernel: fe_forward.1
= control target key start
LH: loop header
LB: loop body
LE: loop exit
PB: predicated region body
PF: predicated region fallthrough
CT: control target
= control target key end

     0   :  { %s8500_s27 = smov 0   ;;  %s16294_s0 = inlined_call_operand.vmem [shape: f32[2,48,512], index: 0, kind: input, shape index: {}]   ;;  %s16295_s1 = inlined_call_operand.vmem [shape: f32[9,1,512], index: 1, kind: input, shape index: {}]   ;;  %s16296_s2 = inlined_call_operand.vmem [shape: bf16[32,432], index: 2, kind: input, shape index: {}]   ;;  %s16297_s3 = inlined_call_operand.vmem [shape: f32[32,1], index: 3, kind: input, shape index: {}]   ;;  %s16298_s4 = inlined_call_operand.vmem [shape: bf16[4,32,288], index: 4, kind: input, shape index: {}]   ;;  %s16299_s5 = inlined_call_operand.vmem [shape: f32[4,32,1], index: 5, kind: input, shape index: {}]   ;;  %s16300_s6 = inlined_call_operand.vmem [shape: bf16[32,288], index: 6, kind: input, shape index: {}]   ;;  %s16301_s7 = inlined_call_operand.vmem [shape: f32[32,1], index: 7, kind: input, shape index: {}]   ;;  %s16302_s8 = inlined_call_operand.vmem [shape: f32[2,32,512], index: 8, kind: output, shape index: {}]  }
   0x1 LB: > { %s7999_s28 = sadd.s32 4294967295, %s8444_s27   ;;  %p8003_p0 = scmp.ge.s32.totalorder %s8444_s27, 1  ;;  %s8444_s27 = sphi %s8500_s27, %s18_s27  }
   0x2   : > { %p262_p1 = scmp.lt.s32.totalorder %s8444_s27, 3 }
   0x4   : > { %p263_p2 = pnand %p8003_p0, %p262_p1 }
   0x6   : > { %266 = sbr.rel (%p263_p2) target bundleno = 3717 (0xe85), region = 52 }
   0xd   : > { %p296_p3 = scmp.lt.s32.totalorder %s7999_s28, 1  ;;  %s8446_s11 = smov 17   ;;  %v391_v24 = vlaneseq  ;;  %v418_v28 = vld [vmem:[%s16295_s1] sm:$0xf]  ;;  %vm1686_vm6 = vcmask 392192   ;;  %vm2887_vm9 = vcmask 261120  }
   0xe   : > { %s8447_s12 = smov 16   ;;  %s8448_s13 = smov 15  }
   0xf   : > { %s17494_s28 = smov (!%p296_p3, %s7999_s28), 1  ;;  %v421_v25 = vshrl.u32 %v391_v24, 7  ;;  %v8700_v26 = vand.u32 127, %v391_v24  ;;  %s8449_s16 = smov 1  }
  0x10   : > { %s8342_s29 = smul.u32 192, %s17494_s28  ;;  %s8450_s19 = smov 127  }
  0x11   : > { %v8706_v27 = vsub.s32 1, %v421_v25  ;;  %vm393_vm0 = vcmp.lt.s32.totalorder %v8700_v26, 17  ;;  %v8721_v35 = vsub.s32 2, %v421_v25  ;;  %v8731_v39 = vsub.s32 0, %v421_v25  ;;  %s8451_s24 = smov 113   ;;  %s8453_s15 = smov 111  }
  0x12   : > { %s8514_s10 = scalar_lea.vmem %s16294_s0, %s8342_s29  ;;  %v8733_v40 = vsub.s32 3, %v421_v25  ;;  %vm536_vm1 = vcmp.lt.s32.totalorder %v8700_v26, 16  ;;  %vm680_vm2 = vcmp.lt.s32.totalorder %v8700_v26, 15  ;;  %vm824_vm3 = vcmp.lt.s32.totalorder %v8700_v26, 1  ;;  %s8452_s29 = smov 112  }
  0x13   : > { %v8517_v0 = vld [vmem:[%s8514_s10 + $0x8] sm:$0xff]  ;;  %v8520_v1 = vld [vmem:[%s8514_s10] sm:$0xff]  ;;  %v8537_v4 = vld [vmem:[%s8514_s10 + $0x30] sm:$0xff]  ;;  %16707 = vst [vmem:[#allocation3_spill] sm:$0xff] %v8706_v27  ;;  %v8717_v31 = vrot.slane %v418_v28, %v8706_v27  ;;  %v8736_v44 = vrot.slane %v418_v28, %v8721_v35  ;;  %v8747_v47 = vrot.slane %v418_v28, %v8731_v39  ;;  %vm992_vm4 = vcmp.lt.s32.totalorder %v8700_v26, 127 }
  0x14   : > { %355 = vrot.lane.b32.xlu1 %v8517_v0, %s8446_s11  ;;  %343 = vrot.lane.b32.xlu0 %v8520_v1, %s8446_s11  ;;  %v8527_v2 = vld [vmem:[%s8514_s10 + $0x28] sm:$0xff]  ;;  %v8530_v3 = vld [vmem:[%s8514_s10 + $0x20] sm:$0xff]  ;;  %16708 = vst [vmem:[#allocation4_spill] sm:$0xff] %v8721_v35  ;;  %16709 = vst [vmem:[#allocation5_spill] sm:$0xff] %v8731_v39  ;;  %v8750_v48 = vrot.slane %v418_v28, %v8733_v40  ;;  %vm1136_vm5 = vcmp.lt.s32.totalorder %v8700_v26, 113  ;;  %vm1280_vm7 = vcmp.lt.s32.totalorder %v8700_v26, 112 }
  0x15   : > { %v8540_v5 = vld [vmem:[%s8514_s10 + $0x10] sm:$0xff]  ;;  %v8543_v6 = vld [vmem:[%s8514_s10 + $0x38] sm:$0xff]  ;;  %v8553_v8 = vld [vmem:[%s8514_s10 + $0x60] sm:$0xff]  ;;  %16710 = vst [vmem:[#allocation6_spill] sm:$0xff] %v8733_v40  ;;  %vm1424_vm8 = vcmp.lt.s32.totalorder %v8700_v26, 111 }
  0x16   : > { %v8546_v7 = vld [vmem:[%s8514_s10 + $0x18] sm:$0xff]  ;;  %v8556_v9 = vld [vmem:[%s8514_s10 + $0x40] sm:$0xff]  ;;  %v8563_v10 = vld [vmem:[%s8514_s10 + $0x68] sm:$0xff] }
  0x17   : > { %v8566_v11 = vld [vmem:[%s8514_s10 + $0x48] sm:$0xff]  ;;  %v8577_v12 = vld [vmem:[%s8514_s10 + $0x70] sm:$0xff]  ;;  %v8587_v14 = vld [vmem:[%s8514_s10 + $0x78] sm:$0xff] }
  0x18   : > { %357 = vrot.lane.b32.xlu1 %v8527_v2, %s8446_s11  ;;  %345 = vrot.lane.b32.xlu0 %v8530_v3, %s8446_s11  ;;  %v8580_v13 = vld [vmem:[%s8514_s10 + $0x50] sm:$0xff]  ;;  %v8590_v15 = vld [vmem:[%s8514_s10 + $0x58] sm:$0xff] }
  0x19   : > { %v8597_v16 = vld [vmem:[%s8514_s10 + $0xa0] sm:$0xff]  ;;  %v8607_v18 = vld [vmem:[%s8514_s10 + $0xa8] sm:$0xff]  ;;  %v8617_v20 = vld [vmem:[%s8514_s10 + $0xb0] sm:$0xff] }
  0x1a   : > { %v8600_v17 = vld [vmem:[%s8514_s10 + $0x80] sm:$0xff]  ;;  %v8610_v19 = vld [vmem:[%s8514_s10 + $0x88] sm:$0xff]  ;;  %v8620_v21 = vld [vmem:[%s8514_s10 + $0x90] sm:$0xff] }
  0x1b   : > { %v8627_v22 = vld [vmem:[%s8514_s10 + $0xb8] sm:$0xff]  ;;  %v8412_v26 = vld [vmem:[%s16300_s6 + $0x8] ss:$12 sps:$4 sm:$0xff]  }
  0x1c   : > { %369 = vrot.lane.b32.xlu1 %v8537_v4, %s8446_s11  ;;  %367 = vrot.lane.b32.xlu0 %v8540_v5, %s8446_s11  ;;  %v8630_v23 = vld [vmem:[%s8514_s10 + $0x98] sm:$0xff] }
  0x20   : > { %381 = vrot.lane.b32.xlu1 %v8543_v6, %s8446_s11  ;;  %379 = vrot.lane.b32.xlu0 %v8546_v7, %s8446_s11 }
  0x24   : > { %349 = vrot.lane.b32.xlu1 %v8553_v8, %s8446_s11  ;;  %347 = vrot.lane.b32.xlu0 %v8556_v9, %s8446_s11 }
  0x28   : > { %361 = vrot.lane.b32.xlu1 %v8563_v10, %s8446_s11  ;;  %359 = vrot.lane.b32.xlu0 %v8566_v11, %s8446_s11 }
  0x2c   : > { %373 = vrot.lane.b32.xlu1 %v8577_v12, %s8446_s11  ;;  %371 = vrot.lane.b32.xlu0 %v8580_v13, %s8446_s11 }
  0x30   : > { %385 = vrot.lane.b32.xlu1 %v8587_v14, %s8446_s11  ;;  %383 = vrot.lane.b32.xlu0 %v8590_v15, %s8446_s11 }
  0x34   : > { %353 = vrot.lane.b32.xlu1 %v8597_v16, %s8446_s11  ;;  %351 = vrot.lane.b32.xlu0 %v8600_v17, %s8446_s11 }
  0x38   : > { %365 = vrot.lane.b32.xlu1 %v8607_v18, %s8446_s11  ;;  %363 = vrot.lane.b32.xlu0 %v8610_v19, %s8446_s11 }
  0x3c   : > { %377 = vrot.lane.b32.xlu1 %v8617_v20, %s8446_s11  ;;  %375 = vrot.lane.b32.xlu0 %v8620_v21, %s8446_s11 }
  0x40   : > { %389 = vrot.lane.b32.xlu1 %v8627_v22, %s8446_s11  ;;  %387 = vrot.lane.b32.xlu0 %v8630_v23, %s8446_s11 }
  0x44   : > { %490 = vrot.lane.b32.xlu1 %v8530_v3, %s8447_s12  ;;  %488 = vrot.lane.b32.xlu0 %v8520_v1, %s8447_s12 }
  0x48   : > { %502 = vrot.lane.b32.xlu1 %v8527_v2, %s8447_s12  ;;  %500 = vrot.lane.b32.xlu0 %v8517_v0, %s8447_s12 }
  0x4c   : > { %514 = vrot.lane.b32.xlu1 %v8537_v4, %s8447_s12  ;;  %512 = vrot.lane.b32.xlu0 %v8540_v5, %s8447_s12 }
  0x50   : > { %526 = vrot.lane.b32.xlu1 %v8543_v6, %s8447_s12  ;;  %524 = vrot.lane.b32.xlu0 %v8546_v7, %s8447_s12 }
  0x54   : > { %494 = vrot.lane.b32.xlu1 %v8553_v8, %s8447_s12  ;;  %492 = vrot.lane.b32.xlu0 %v8556_v9, %s8447_s12 }
  0x58   : > { %506 = vrot.lane.b32.xlu1 %v8563_v10, %s8447_s12  ;;  %504 = vrot.lane.b32.xlu0 %v8566_v11, %s8447_s12 }
  0x5c   : > { %518 = vrot.lane.b32.xlu1 %v8577_v12, %s8447_s12  ;;  %516 = vrot.lane.b32.xlu0 %v8580_v13, %s8447_s12 }
  0x60   : > { %530 = vrot.lane.b32.xlu1 %v8587_v14, %s8447_s12  ;;  %528 = vrot.lane.b32.xlu0 %v8590_v15, %s8447_s12 }
  0x64   : > { %498 = vrot.lane.b32.xlu1 %v8597_v16, %s8447_s12  ;;  %496 = vrot.lane.b32.xlu0 %v8600_v17, %s8447_s12 }
  0x68   : > { %510 = vrot.lane.b32.xlu1 %v8607_v18, %s8447_s12  ;;  %508 = vrot.lane.b32.xlu0 %v8610_v19, %s8447_s12 }
  0x6c   : > { %522 = vrot.lane.b32.xlu1 %v8617_v20, %s8447_s12  ;;  %520 = vrot.lane.b32.xlu0 %v8620_v21, %s8447_s12 }
  0x70   : > { %534 = vrot.lane.b32.xlu1 %v8627_v22, %s8447_s12  ;;  %532 = vrot.lane.b32.xlu0 %v8630_v23, %s8447_s12 }
  0x74   : > { %634 = vrot.lane.b32.xlu1 %v8530_v3, %s8448_s13  ;;  %632 = vrot.lane.b32.xlu0 %v8520_v1, %s8448_s13 }
  0x78   : > { %646 = vrot.lane.b32.xlu1 %v8527_v2, %s8448_s13  ;;  %644 = vrot.lane.b32.xlu0 %v8517_v0, %s8448_s13 }
  0x7c   : > { %658 = vrot.lane.b32.xlu1 %v8537_v4, %s8448_s13  ;;  %656 = vrot.lane.b32.xlu0 %v8540_v5, %s8448_s13 }
  0x80   : > { %670 = vrot.lane.b32.xlu1 %v8543_v6, %s8448_s13  ;;  %668 = vrot.lane.b32.xlu0 %v8546_v7, %s8448_s13 }
  0x84   : > { %638 = vrot.lane.b32.xlu1 %v8553_v8, %s8448_s13  ;;  %636 = vrot.lane.b32.xlu0 %v8556_v9, %s8448_s13 }
  0x86   : > { %v356_v29 = vpop.permute.xlu1 %355  ;;  %v344_v30 = vpop.permute.xlu0 %343 }
  0x87   : > { %v406_v32 = vsel %vm393_vm0, %v344_v30, %v356_v29 }
  0x88   : > { %650 = vrot.lane.b32.xlu1 %v8563_v10, %s8448_s13  ;;  %648 = vrot.lane.b32.xlu0 %v8566_v11, %s8448_s13  ;;  %v441_v37 = vmul.f32 %v8717_v31, %v406_v32 }
  0x8a   : > { %v358_v33 = vpop.permute.xlu1 %357  ;;  %v346_v34 = vpop.permute.xlu0 %345 }
  0x8b   : > { %v407_v36 = vsel %vm393_vm0, %v346_v34, %v358_v33 }
  0x8c   : > { %662 = vrot.lane.b32.xlu1 %v8577_v12, %s8448_s13  ;;  %660 = vrot.lane.b32.xlu0 %v8580_v13, %s8448_s13  ;;  %v445_v38 = vmul.f32 %v8717_v31, %v407_v36 }
  0x8e   : > { %v370_v41 = vpop.permute.xlu1 %369  ;;  %v368_v42 = vpop.permute.xlu0 %367  ;;  %v465_v43 = vpack.c.bf16 %v445_v38, %v441_v37 }
  0x8f   : > { %v401_v45 = vsel %vm393_vm0, %v358_v33, %v370_v41  ;;  %v400_v46 = vsel %vm393_vm0, %v356_v29, %v368_v42 }
  0x90   : > { %674 = vrot.lane.b32.xlu1 %v8587_v14, %s8448_s13  ;;  %672 = vrot.lane.b32.xlu0 %v8590_v15, %s8448_s13  ;;  %v442_v51 = vmul.f32 %v8736_v44, %v400_v46  ;;  %v446_v52 = vmul.f32 %v8736_v44, %v401_v45 }
  0x91   : > { %1693 = vmatprep.subr.bf16.mxu0 %v465_v43 }
  0x92   : > { %v382_v49 = vpop.permute.xlu1 %381  ;;  %v380_v50 = vpop.permute.xlu0 %379  ;;  %v466_v25 = vpack.c.bf16 %v446_v52, %v442_v51 }
  0x93   : > { %v413_v53 = vsel %vm393_vm0, %v382_v49, %v346_v34  ;;  %v412_v54 = vsel %vm393_vm0, %v380_v50, %v344_v30  ;;  %v394_v55 = vsel %vm393_vm0, %v368_v42, %v380_v50  ;;  %v395_v56 = vsel %vm393_vm0, %v370_v41, %v382_v49 }
  0x94   : > { %642 = vrot.lane.b32.xlu1 %v8597_v16, %s8448_s13  ;;  %640 = vrot.lane.b32.xlu0 %v8600_v17, %s8448_s13  ;;  %v440_v57 = vmul.f32 %v8747_v47, %v412_v54  ;;  %v444_v58 = vmul.f32 %v8747_v47, %v413_v53  ;;  %v443_v59 = vmul.f32 %v8750_v48, %v394_v55 }
  0x95   : > { %v447_v60 = vmul.f32 %v8750_v48, %v395_v56 }
  0x96   : > { %v350_v61 = vpop.permute.xlu1 %349  ;;  %v348_v62 = vpop.permute.xlu0 %347  ;;  %v464_v63 = vpack.c.bf16 %v444_v58, %v440_v57 }
  0x97   : > { %v467_v24 = vpack.c.bf16 %v447_v60, %v443_v59 }
  0x98   : > { %654 = vrot.lane.b32.xlu1 %v8607_v18, %s8448_s13  ;;  %652 = vrot.lane.b32.xlu0 %v8610_v19, %s8448_s13 }
  0x99   : > { %1694 = vmatpush1.bf16.msra.mxu0 %v464_v63  ;;  %1799 = vmatprep.subr.bf16.mxu1 %v467_v24 }
  0x9a   : > { %1800 = vmatpush1.bf16.msra.mxu1 %v466_v25  ;;  %v362_v28 = vpop.permute.xlu1 %361  ;;  %v360_v29 = vpop.permute.xlu0 %359 }
  0x9b   : > { %v409_v30 = vsel %vm393_vm0, %v350_v61, %v362_v28  ;;  %v408_v32 = vsel %vm393_vm0, %v348_v62, %v360_v29 }
  0x9c   : > { %v453_v33 = vmul.f32 %v8717_v31, %v409_v30  ;;  %v449_v34 = vmul.f32 %v8717_v31, %v408_v32  ;;  %666 = vrot.lane.b32.xlu1 %v8617_v20, %s8448_s13  ;;  %664 = vrot.lane.b32.xlu0 %v8620_v21, %s8448_s13 }
  0x9e   : > { %v374_v36 = vpop.permute.xlu1 %373  ;;  %v372_v37 = vpop.permute.xlu0 %371  ;;  %v469_v38 = vpack.c.bf16 %v453_v33, %v449_v34 }
  0x9f   : > { %v403_v41 = vsel %vm393_vm0, %v362_v28, %v374_v36  ;;  %v402_v42 = vsel %vm393_vm0, %v360_v29, %v372_v37 }
  0xa0   : > { %678 = vrot.lane.b32.xlu1 %v8627_v22, %s8448_s13  ;;  %676 = vrot.lane.b32.xlu0 %v8630_v23, %s8448_s13  ;;  %v454_v43 = vmul.f32 %v8736_v44, %v403_v41  ;;  %v450_v45 = vmul.f32 %v8736_v44, %v402_v42 }
  0xa1   : > { %1695 = vmatprep.subr.bf16.mxu0 %v469_v38 }
  0xa2   : > { %v386_v46 = vpop.permute.xlu1 %385  ;;  %v384_v49 = vpop.permute.xlu0 %383 }
  0xa3   : > { %v397_v50 = vsel %vm393_vm0, %v374_v36, %v386_v46  ;;  %v415_v51 = vsel %vm393_vm0, %v386_v46, %v350_v61  ;;  %v396_v52 = vsel %vm393_vm0, %v372_v37, %v384_v49  ;;  %v414_v53 = vsel %vm393_vm0, %v384_v49, %v348_v62 }
  0xa4   : > { %v452_v54 = vmul.f32 %v8747_v47, %v415_v51  ;;  %v455_v55 = vmul.f32 %v8750_v48, %v397_v50  ;;  %v448_v56 = vmul.f32 %v8747_v47, %v414_v53  ;;  %v451_v57 = vmul.f32 %v8750_v48, %v396_v52  ;;  %778 = vrot.lane.b32.xlu1 %v8530_v3, %s8449_s16  ;;  %v8007_v53 = vld [vmem:[%s16295_s1 + $0x4] sm:$0xf] }
  0xa5   : > { %776 = vrot.lane.b32.xlu0 %v8520_v1, %s8449_s16  ;;  %v470_v62 = vpack.c.bf16 %v454_v43, %v450_v45 }
  0xa6   : > { %v354_v58 = vpop.permute.xlu1 %353  ;;  %v352_v59 = vpop.permute.xlu0 %351  ;;  %v468_v60 = vpack.c.bf16 %v452_v54, %v448_v56  ;;  %v471_v61 = vpack.c.bf16 %v455_v55, %v451_v57 }
  0xa8   : > { %790 = vrot.lane.b32.xlu1 %v8527_v2, %s8449_s16  ;;  %1696 = vmatpush1.bf16.msra.mxu0 %v468_v60 }
  0xa9   : > { %788 = vrot.lane.b32.xlu0 %v8517_v0, %s8449_s16  ;;  %1801 = vmatprep.subr.bf16.mxu1 %v471_v61 }
  0xaa   : > { %1802 = vmatpush1.bf16.msra.mxu1 %v470_v62  ;;  %v366_v63 = vpop.permute.xlu1 %365  ;;  %v364_v24 = vpop.permute.xlu0 %363 }
  0xab   : > { %v411_v25 = vsel %vm393_vm0, %v354_v58, %v366_v63  ;;  %v410_v28 = vsel %vm393_vm0, %v352_v59, %v364_v24 }
  0xac   : > { %v461_v29 = vmul.f32 %v8717_v31, %v411_v25  ;;  %v457_v30 = vmul.f32 %v8717_v31, %v410_v28  ;;  %802 = vrot.lane.b32.xlu1 %v8537_v4, %s8449_s16 }
  0xad   : > { %800 = vrot.lane.b32.xlu0 %v8540_v5, %s8449_s16 }
  0xae   : > { %v378_v32 = vpop.permute.xlu1 %377  ;;  %v376_v33 = vpop.permute.xlu0 %375  ;;  %v473_v34 = vpack.c.bf16 %v461_v29, %v457_v30 }
  0xaf   : > { %v405_v36 = vsel %vm393_vm0, %v366_v63, %v378_v32  ;;  %v404_v37 = vsel %vm393_vm0, %v364_v24, %v376_v33  ;;  %v8872_v24 = vrot.slane %v8007_v53, %v8721_v35 }
  0xb0   : > { %814 = vrot.lane.b32.xlu1 %v8543_v6, %s8449_s16  ;;  %1697 = vmatprep.subr.bf16.mxu0 %v473_v34  ;;  %v462_v31 = vmul.f32 %v8736_v44, %v405_v36  ;;  %v458_v38 = vmul.f32 %v8736_v44, %v404_v37  ;;  %v8884_v34 = vrot.slane %v8007_v53, %v8733_v40 }
  0xb1   : > { %812 = vrot.lane.b32.xlu0 %v8546_v7, %s8449_s16 }
  0xb2   : > { %v390_v41 = vpop.permute.xlu1 %389  ;;  %v388_v42 = vpop.permute.xlu0 %387 }
  0xb3   : > { %v399_v43 = vsel %vm393_vm0, %v378_v32, %v390_v41  ;;  %v417_v45 = vsel %vm393_vm0, %v390_v41, %v354_v58  ;;  %v398_v46 = vsel %vm393_vm0, %v376_v33, %v388_v42  ;;  %v416_v49 = vsel %vm393_vm0, %v388_v42, %v352_v59 }
  0xb4   : > { %v460_v50 = vmul.f32 %v8747_v47, %v417_v45  ;;  %v463_v51 = vmul.f32 %v8750_v48, %v399_v43  ;;  %v456_v44 = vmul.f32 %v8747_v47, %v416_v49  ;;  %v459_v52 = vmul.f32 %v8750_v48, %v398_v46  ;;  %782 = vrot.lane.b32.xlu1 %v8553_v8, %s8449_s16 }
  0xb5   : > { %780 = vrot.lane.b32.xlu0 %v8556_v9, %s8449_s16  ;;  %v474_v47 = vpack.c.bf16 %v462_v31, %v458_v38  ;;  %v8857_v48 = vrot.slane %v8007_v53, %v8706_v27  ;;  %v8881_v33 = vrot.slane %v8007_v53, %v8731_v39 }
  0xb6   : > { %v491_v54 = vpop.permute.xlu1 %490  ;;  %v489_v55 = vpop.permute.xlu0 %488  ;;  %v472_v56 = vpack.c.bf16 %v460_v50, %v456_v44  ;;  %v475_v57 = vpack.c.bf16 %v463_v51, %v459_v52 }
  0xb8   : > { %794 = vrot.lane.b32.xlu1 %v8563_v10, %s8449_s16  ;;  %1698 = vmatpush1.bf16.msra.mxu0 %v472_v56 }
  0xb9   : > { %792 = vrot.lane.b32.xlu0 %v8566_v11, %s8449_s16  ;;  %1803 = vmatprep.subr.bf16.mxu1 %v475_v57 }
  0xba   : > { %1804 = vmatpush1.bf16.msra.mxu1 %v474_v47  ;;  %v503_v58 = vpop.permute.xlu1 %502  ;;  %v501_v59 = vpop.permute.xlu0 %500 }
  0xbb   : > { %v550_v60 = vsel %vm536_vm1, %v491_v54, %v503_v58  ;;  %v549_v61 = vsel %vm536_vm1, %v489_v55, %v501_v59 }
  0xbc   : > { %v589_v62 = vmul.f32 %v8857_v48, %v550_v60  ;;  %v585_v63 = vmul.f32 %v8857_v48, %v549_v61  ;;  %806 = vrot.lane.b32.xlu1 %v8577_v12, %s8449_s16 }
  0xbd   : > { %804 = vrot.lane.b32.xlu0 %v8580_v13, %s8449_s16 }
  0xbe   : > { %v515_v25 = vpop.permute.xlu1 %514  ;;  %v513_v28 = vpop.permute.xlu0 %512  ;;  %v609_v29 = vpack.c.bf16 %v589_v62, %v585_v63 }
  0xbf   : > { %v544_v30 = vsel %vm536_vm1, %v503_v58, %v515_v25  ;;  %v543_v32 = vsel %vm536_vm1, %v501_v59, %v513_v28 }
  0xc0   : > { %818 = vrot.lane.b32.xlu1 %v8587_v14, %s8449_s16  ;;  %1699 = vmatprep.subr.bf16.mxu0 %v609_v29  ;;  %v590_v36 = vmul.f32 %v8872_v24, %v544_v30  ;;  %v586_v37 = vmul.f32 %v8872_v24, %v543_v32 }
  0xc1   : > { %816 = vrot.lane.b32.xlu0 %v8590_v15, %s8449_s16 }
  0xc2   : > { %v527_v31 = vpop.permute.xlu1 %526  ;;  %v525_v38 = vpop.permute.xlu0 %524 }
  0xc3   : > { %v538_v41 = vsel %vm536_vm1, %v515_v25, %v527_v31  ;;  %v556_v42 = vsel %vm536_vm1, %v527_v31, %v491_v54  ;;  %v537_v43 = vsel %vm536_vm1, %v513_v28, %v525_v38  ;;  %v555_v45 = vsel %vm536_vm1, %v525_v38, %v489_v55 }
  0xc4   : > { %v588_v46 = vmul.f32 %v8881_v33, %v556_v42  ;;  %v591_v49 = vmul.f32 %v8884_v34, %v538_v41  ;;  %v584_v50 = vmul.f32 %v8881_v33, %v555_v45  ;;  %v587_v51 = vmul.f32 %v8884_v34, %v537_v43  ;;  %786 = vrot.lane.b32.xlu1 %v8597_v16, %s8449_s16 }
  0xc5   : > { %784 = vrot.lane.b32.xlu0 %v8600_v17, %s8449_s16  ;;  %v610_v55 = vpack.c.bf16 %v590_v36, %v586_v37 }
  0xc6   : > { %v495_v44 = vpop.permute.xlu1 %494  ;;  %v493_v52 = vpop.permute.xlu0 %492  ;;  %v608_v53 = vpack.c.bf16 %v588_v46, %v584_v50  ;;  %v611_v54 = vpack.c.bf16 %v591_v49, %v587_v51 }
  0xc8   : > { %798 = vrot.lane.b32.xlu1 %v8607_v18, %s8449_s16  ;;  %1700 = vmatpush1.bf16.msra.mxu0 %v608_v53 }
  0xc9   : > { %796 = vrot.lane.b32.xlu0 %v8610_v19, %s8449_s16  ;;  %1805 = vmatprep.subr.bf16.mxu1 %v611_v54 }
  0xca   : > { %1806 = vmatpush1.bf16.msra.mxu1 %v610_v55  ;;  %v507_v56 = vpop.permute.xlu1 %506  ;;  %v505_v57 = vpop.permute.xlu0 %504 }
  0xcb   : > { %v552_v47 = vsel %vm536_vm1, %v495_v44, %v507_v56  ;;  %v551_v58 = vsel %vm536_vm1, %v493_v52, %v505_v57 }
  0xcc   : > { %v597_v59 = vmul.f32 %v8857_v48, %v552_v47  ;;  %v593_v60 = vmul.f32 %v8857_v48, %v551_v58  ;;  %810 = vrot.lane.b32.xlu1 %v8617_v20, %s8449_s16 }
  0xcd   : > { %808 = vrot.lane.b32.xlu0 %v8620_v21, %s8449_s16 }
  0xce   : > { %v519_v61 = vpop.permute.xlu1 %518  ;;  %v517_v62 = vpop.permute.xlu0 %516  ;;  %v613_v63 = vpack.c.bf16 %v597_v59, %v593_v60 }
  0xcf   : > { %v546_v25 = vsel %vm536_vm1, %v507_v56, %v519_v61  ;;  %v545_v28 = vsel %vm536_vm1, %v505_v57, %v517_v62 }
  0xd0   : > { %822 = vrot.lane.b32.xlu1 %v8627_v22, %s8449_s16  ;;  %1701 = vmatprep.subr.bf16.mxu0 %v613_v63  ;;  %v598_v29 = vmul.f32 %v8872_v24, %v546_v25  ;;  %v594_v30 = vmul.f32 %v8872_v24, %v545_v28 }
  0xd1   : > { %820 = vrot.lane.b32.xlu0 %v8630_v23, %s8449_s16 }
  0xd2   : > { %v531_v32 = vpop.permute.xlu1 %530  ;;  %v529_v36 = vpop.permute.xlu0 %528 }
  0xd3   : > { %v540_v37 = vsel %vm536_vm1, %v519_v61, %v531_v32  ;;  %v558_v31 = vsel %vm536_vm1, %v531_v32, %v495_v44  ;;  %v539_v38 = vsel %vm536_vm1, %v517_v62, %v529_v36  ;;  %v557_v41 = vsel %vm536_vm1, %v529_v36, %v493_v52 }
  0xd4   : > { %v596_v42 = vmul.f32 %v8881_v33, %v558_v31  ;;  %v599_v43 = vmul.f32 %v8884_v34, %v540_v37  ;;  %v592_v45 = vmul.f32 %v8881_v33, %v557_v41  ;;  %v595_v46 = vmul.f32 %v8884_v34, %v539_v38  ;;  %946 = vrot.lane.b32.xlu1 %v8530_v3, %s8450_s19  ;;  %v8364_v41 = vld [vmem:[%s16296_s2 + $0x4] ss:$16 sps:$4 sm:$0xff]  }
  0xd5   : > { %944 = vrot.lane.b32.xlu0 %v8520_v1, %s8450_s19  ;;  %v614_v52 = vpack.c.bf16 %v598_v29, %v594_v30  ;;  %1725 = vmatprep.mubr.bf16.mxu0 %v8364_v41 }
  0xd6   : > { %v499_v49 = vpop.permute.xlu1 %498  ;;  %v497_v50 = vpop.permute.xlu0 %496  ;;  %v612_v51 = vpack.c.bf16 %v596_v42, %v592_v45  ;;  %v615_v44 = vpack.c.bf16 %v599_v43, %v595_v46  ;;  %v8008_v42 = vld [vmem:[%s16295_s1 + $0x8] sm:$0xf]  ;;  %1831 = vmatprep.mubr.bf16.mxu1 %v8364_v41 }
  0xd8   : > { %958 = vrot.lane.b32.xlu1 %v8527_v2, %s8450_s19  ;;  %1702 = vmatpush1.bf16.msra.mxu0 %v612_v51 }
  0xd9   : > { %956 = vrot.lane.b32.xlu0 %v8517_v0, %s8450_s19  ;;  %1807 = vmatprep.subr.bf16.mxu1 %v615_v44 }
  0xda   : > { %1808 = vmatpush1.bf16.msra.mxu1 %v614_v52  ;;  %v511_v53 = vpop.permute.xlu1 %510  ;;  %v509_v54 = vpop.permute.xlu0 %508 }
  0xdb   : > { %v554_v55 = vsel %vm536_vm1, %v499_v49, %v511_v53  ;;  %v553_v56 = vsel %vm536_vm1, %v497_v50, %v509_v54 }
  0xdc   : > { %v605_v57 = vmul.f32 %v8857_v48, %v554_v55  ;;  %v601_v47 = vmul.f32 %v8857_v48, %v553_v56  ;;  %970 = vrot.lane.b32.xlu1 %v8537_v4, %s8450_s19  ;;  %v9011_v55 = vrot.slane %v8008_v42, %v8721_v35 }
  0xdd   : > { %968 = vrot.lane.b32.xlu0 %v8540_v5, %s8450_s19 }
  0xde   : > { %v523_v58 = vpop.permute.xlu1 %522  ;;  %v521_v59 = vpop.permute.xlu0 %520  ;;  %v617_v60 = vpack.c.bf16 %v605_v57, %v601_v47 }
  0xdf   : > { %v548_v61 = vsel %vm536_vm1, %v511_v53, %v523_v58  ;;  %v547_v62 = vsel %vm536_vm1, %v509_v54, %v521_v59 }
  0xe0   : > { %982 = vrot.lane.b32.xlu1 %v8543_v6, %s8450_s19  ;;  %1703 = vmatprep.subr.bf16.mxu0 %v617_v60  ;;  %v606_v48 = vmul.f32 %v8872_v24, %v548_v61  ;;  %v602_v63 = vmul.f32 %v8872_v24, %v547_v62  ;;  %v9020_v60 = vrot.slane %v8008_v42, %v8731_v39 }
  0xe1   : > { %980 = vrot.lane.b32.xlu0 %v8546_v7, %s8450_s19  ;;  %v9023_v61 = vrot.slane %v8008_v42, %v8733_v40 }
  0xe2   : > { %v535_v25 = vpop.permute.xlu1 %534  ;;  %v533_v28 = vpop.permute.xlu0 %532 }
  0xe3   : > { %v542_v29 = vsel %vm536_vm1, %v523_v58, %v535_v25  ;;  %v560_v30 = vsel %vm536_vm1, %v535_v25, %v499_v49  ;;  %v541_v32 = vsel %vm536_vm1, %v521_v59, %v533_v28  ;;  %v559_v36 = vsel %vm536_vm1, %v533_v28, %v497_v50 }
  0xe4   : > { %v604_v37 = vmul.f32 %v8881_v33, %v560_v30  ;;  %v607_v31 = vmul.f32 %v8884_v34, %v542_v29  ;;  %v600_v24 = vmul.f32 %v8881_v33, %v559_v36  ;;  %v603_v38 = vmul.f32 %v8884_v34, %v541_v32  ;;  %950 = vrot.lane.b32.xlu1 %v8553_v8, %s8450_s19 }
  0xe5   : > { %948 = vrot.lane.b32.xlu0 %v8556_v9, %s8450_s19  ;;  %v618_v34 = vpack.c.bf16 %v606_v48, %v602_v63  ;;  %v8996_v49 = vrot.slane %v8008_v42, %v8706_v27 }
  0xe6   : > { %v635_v43 = vpop.permute.xlu1 %634  ;;  %v633_v45 = vpop.permute.xlu0 %632  ;;  %v616_v46 = vpack.c.bf16 %v604_v37, %v600_v24  ;;  %v619_v33 = vpack.c.bf16 %v607_v31, %v603_v38 }
  0xe8   : > { %962 = vrot.lane.b32.xlu1 %v8563_v10, %s8450_s19  ;;  %1704 = vmatpush1.bf16.msra.mxu0 %v616_v46 }
  0xe9   : > { %960 = vrot.lane.b32.xlu0 %v8566_v11, %s8450_s19  ;;  %1809 = vmatprep.subr.bf16.mxu1 %v619_v33 }
  0xea   : > { %1810 = vmatpush1.bf16.msra.mxu1 %v618_v34  ;;  %v647_v50 = vpop.permute.xlu1 %646  ;;  %v645_v51 = vpop.permute.xlu0 %644 }
  0xeb   : > { %v694_v44 = vsel %vm680_vm2, %v635_v43, %v647_v50  ;;  %v693_v52 = vsel %vm680_vm2, %v633_v45, %v645_v51 }
  0xec   : > { %v733_v53 = vmul.f32 %v8996_v49, %v694_v44  ;;  %v729_v54 = vmul.f32 %v8996_v49, %v693_v52  ;;  %974 = vrot.lane.b32.xlu1 %v8577_v12, %s8450_s19 }
  0xed   : > { %972 = vrot.lane.b32.xlu0 %v8580_v13, %s8450_s19 }
  0xee   : > { %v659_v56 = vpop.permute.xlu1 %658  ;;  %v657_v57 = vpop.permute.xlu0 %656  ;;  %v753_v47 = vpack.c.bf16 %v733_v53, %v729_v54 }
  0xef   : > { %v688_v58 = vsel %vm680_vm2, %v647_v50, %v659_v56  ;;  %v687_v59 = vsel %vm680_vm2, %v645_v51, %v657_v57 }
  0xf0   : > { %986 = vrot.lane.b32.xlu1 %v8587_v14, %s8450_s19  ;;  %1705 = vmatprep.subr.bf16.mxu0 %v753_v47  ;;  %v734_v62 = vmul.f32 %v9011_v55, %v688_v58  ;;  %v730_v48 = vmul.f32 %v9011_v55, %v687_v59 }
  0xf1   : > { %984 = vrot.lane.b32.xlu0 %v8590_v15, %s8450_s19 }
  0xf2   : > { %v671_v63 = vpop.permute.xlu1 %670  ;;  %v669_v25 = vpop.permute.xlu0 %668 }
  0xf3   : > { %v682_v28 = vsel %vm680_vm2, %v659_v56, %v671_v63  ;;  %v700_v29 = vsel %vm680_vm2, %v671_v63, %v635_v43  ;;  %v681_v30 = vsel %vm680_vm2, %v657_v57, %v669_v25  ;;  %v699_v32 = vsel %vm680_vm2, %v669_v25, %v633_v45 }
  0xf4   : > { %v732_v36 = vmul.f32 %v9020_v60, %v700_v29  ;;  %v735_v37 = vmul.f32 %v9023_v61, %v682_v28  ;;  %v728_v31 = vmul.f32 %v9020_v60, %v699_v32  ;;  %v731_v24 = vmul.f32 %v9023_v61, %v681_v30  ;;  %954 = vrot.lane.b32.xlu1 %v8597_v16, %s8450_s19 }
  0xf5   : > { %952 = vrot.lane.b32.xlu0 %v8600_v17, %s8450_s19  ;;  %v754_v45 = vpack.c.bf16 %v734_v62, %v730_v48 }
  0xf6   : > { %v639_v38 = vpop.permute.xlu1 %638  ;;  %v637_v41 = vpop.permute.xlu0 %636  ;;  %v752_v42 = vpack.c.bf16 %v732_v36, %v728_v31  ;;  %v755_v43 = vpack.c.bf16 %v735_v37, %v731_v24 }
  0xf8   : > { %966 = vrot.lane.b32.xlu1 %v8607_v18, %s8450_s19  ;;  %1706 = vmatpush1.bf16.msra.mxu0 %v752_v42 }
  0xf9   : > { %964 = vrot.lane.b32.xlu0 %v8610_v19, %s8450_s19  ;;  %1811 = vmatprep.subr.bf16.mxu1 %v755_v43 }
  0xfa   : > { %1812 = vmatpush1.bf16.msra.mxu1 %v754_v45  ;;  %v651_v46 = vpop.permute.xlu1 %650  ;;  %v649_v33 = vpop.permute.xlu0 %648 }
  0xfb   : > { %v696_v34 = vsel %vm680_vm2, %v639_v38, %v651_v46  ;;  %v695_v50 = vsel %vm680_vm2, %v637_v41, %v649_v33 }
  0xfc   : > { %v741_v51 = vmul.f32 %v8996_v49, %v696_v34  ;;  %v737_v44 = vmul.f32 %v8996_v49, %v695_v50  ;;  %978 = vrot.lane.b32.xlu1 %v8617_v20, %s8450_s19 }
  0xfd   : > { %976 = vrot.lane.b32.xlu0 %v8620_v21, %s8450_s19 }
  0xfe   : > { %v663_v52 = vpop.permute.xlu1 %662  ;;  %v661_v53 = vpop.permute.xlu0 %660  ;;  %v757_v54 = vpack.c.bf16 %v741_v51, %v737_v44 }
  0xff   : > { %v690_v56 = vsel %vm680_vm2, %v651_v46, %v663_v52  ;;  %v689_v57 = vsel %vm680_vm2, %v649_v33, %v661_v53 }
 0x100   : > { %990 = vrot.lane.b32.xlu1 %v8627_v22, %s8450_s19  ;;  %1707 = vmatprep.subr.bf16.mxu0 %v757_v54  ;;  %v742_v47 = vmul.f32 %v9011_v55, %v690_v56  ;;  %v738_v58 = vmul.f32 %v9011_v55, %v689_v57  ;;  %v8009_v57 = vld [vmem:[%s16295_s1 + $0xc] sm:$0xf] }
 0x101   : > { %988 = vrot.lane.b32.xlu0 %v8630_v23, %s8450_s19 }
 0x102   : > { %v675_v59 = vpop.permute.xlu1 %674  ;;  %v673_v62 = vpop.permute.xlu0 %672 }
 0x103   : > { %v684_v48 = vsel %vm680_vm2, %v663_v52, %v675_v59  ;;  %v702_v63 = vsel %vm680_vm2, %v675_v59, %v639_v38  ;;  %v683_v25 = vsel %vm680_vm2, %v661_v53, %v673_v62  ;;  %v701_v28 = vsel %vm680_vm2, %v673_v62, %v637_v41 }
 0x104   : > { %v740_v29 = vmul.f32 %v9020_v60, %v702_v63  ;;  %v743_v30 = vmul.f32 %v9023_v61, %v684_v48  ;;  %v736_v32 = vmul.f32 %v9020_v60, %v701_v28  ;;  %v739_v36 = vmul.f32 %v9023_v61, %v683_v25  ;;  %1090 = vrot.lane.b32.xlu1 %v8530_v3, %s8451_s24 }
 0x105   : > { %1088 = vrot.lane.b32.xlu0 %v8520_v1, %s8451_s24  ;;  %v758_v41 = vpack.c.bf16 %v742_v47, %v738_v58 }
 0x106   : > { %v643_v37 = vpop.permute.xlu1 %642  ;;  %v641_v31 = vpop.permute.xlu0 %640  ;;  %v756_v24 = vpack.c.bf16 %v740_v29, %v736_v32  ;;  %v759_v38 = vpack.c.bf16 %v743_v30, %v739_v36  ;;  %v9149_v30 = vrot.slane %v8009_v57, %v8731_v39  ;;  %v9152_v32 = vrot.slane %v8009_v57, %v8733_v40 }
 0x107   : > { %v9155_v36 = vrot.slane %v8009_v57, %v8721_v35 }
 0x108   : > { %1102 = vrot.lane.b32.xlu1 %v8527_v2, %s8451_s24  ;;  %1708 = vmatpush1.bf16.msra.mxu0 %v756_v24 }
 0x109   : > { %1100 = vrot.lane.b32.xlu0 %v8517_v0, %s8451_s24  ;;  %1813 = vmatprep.subr.bf16.mxu1 %v759_v38 }
 0x10a   : > { %1814 = vmatpush1.bf16.msra.mxu1 %v758_v41  ;;  %v655_v42 = vpop.permute.xlu1 %654  ;;  %v653_v43 = vpop.permute.xlu0 %652 }
 0x10b   : > { %v698_v3 = vsel %vm680_vm2, %v643_v37, %v655_v42  ;;  %v697_v1 = vsel %vm680_vm2, %v641_v31, %v653_v43 }
 0x10c   : > { %v749_v45 = vmul.f32 %v8996_v49, %v698_v3  ;;  %v745_v46 = vmul.f32 %v8996_v49, %v697_v1  ;;  %1114 = vrot.lane.b32.xlu1 %v8537_v4, %s8451_s24 }
 0x10d   : > { %1112 = vrot.lane.b32.xlu0 %v8540_v5, %s8451_s24 }
 0x10e   : > { %v667_v0 = vpop.permute.xlu1 %666  ;;  %v665_v2 = vpop.permute.xlu0 %664  ;;  %v761_v33 = vpack.c.bf16 %v749_v45, %v745_v46 }
 0x10f   : > { %v692_v34 = vsel %vm680_vm2, %v655_v42, %v667_v0  ;;  %v691_v50 = vsel %vm680_vm2, %v653_v43, %v665_v2 }
 0x110   : > { %1126 = vrot.lane.b32.xlu1 %v8543_v6, %s8451_s24  ;;  %1709 = vmatprep.subr.bf16.mxu0 %v761_v33  ;;  %v750_v4 = vmul.f32 %v9011_v55, %v692_v34  ;;  %v746_v5 = vmul.f32 %v9011_v55, %v691_v50 }
 0x111   : > { %1124 = vrot.lane.b32.xlu0 %v8546_v7, %s8451_s24 }
 0x112   : > { %v679_v49 = vpop.permute.xlu1 %678  ;;  %v677_v51 = vpop.permute.xlu0 %676 }
 0x113   : > { %v686_v44 = vsel %vm680_vm2, %v667_v0, %v679_v49  ;;  %v704_v52 = vsel %vm680_vm2, %v679_v49, %v643_v37  ;;  %v685_v53 = vsel %vm680_vm2, %v665_v2, %v677_v51  ;;  %v703_v6 = vsel %vm680_vm2, %v677_v51, %v641_v31 }
 0x114   : > { %v748_v7 = vmul.f32 %v9020_v60, %v704_v52  ;;  %v751_v54 = vmul.f32 %v9023_v61, %v686_v44  ;;  %v744_v55 = vmul.f32 %v9020_v60, %v703_v6  ;;  %v747_v56 = vmul.f32 %v9023_v61, %v685_v53  ;;  %1094 = vrot.lane.b32.xlu1 %v8553_v8, %s8451_s24 }
 0x115   : > { %1092 = vrot.lane.b32.xlu0 %v8556_v9, %s8451_s24  ;;  %v762_v60 = vpack.c.bf16 %v750_v4, %v746_v5  ;;  %v9132_v8 = vrot.slane %v8009_v57, %v8706_v27 }
 0x116   : > { %v779_v47 = vpop.permute.xlu1 %778  ;;  %v760_v58 = vpack.c.bf16 %v748_v7, %v744_v55  ;;  %v763_v59 = vpack.c.bf16 %v751_v54, %v747_v56  ;;  %v9214_v55 = vld [vmem:[%s8514_s10 + $0x20] sm:$0xff] }
 0x117   : > { %v777_v62 = vpop.permute.xlu0 %776 }
 0x118   : > { %1106 = vrot.lane.b32.xlu1 %v8563_v10, %s8451_s24  ;;  %1710 = vmatpush1.bf16.msra.mxu0 %v760_v58 }
 0x119   : > { %1104 = vrot.lane.b32.xlu0 %v8566_v11, %s8451_s24  ;;  %1815 = vmatprep.subr.bf16.mxu1 %v763_v59  ;;  %v9223_v59 = vld [vmem:[%s8514_s10] sm:$0xff] }
 0x11a   : > { %1816 = vmatpush1.bf16.msra.mxu1 %v762_v60  ;;  %v791_v9 = vpop.permute.xlu1 %790 }
 0x11b   : > { %v838_v61 = vsel %vm824_vm3, %v779_v47, %v791_v9  ;;  %v789_v48 = vpop.permute.xlu0 %788 }
 0x11c   : > { %v877_v63 = vmul.f32 %v9132_v8, %v838_v61  ;;  %v837_v10 = vsel %vm824_vm3, %v777_v62, %v789_v48  ;;  %1118 = vrot.lane.b32.xlu1 %v8577_v12, %s8451_s24 }
 0x11d   : > { %v873_v25 = vmul.f32 %v9132_v8, %v837_v10  ;;  %1116 = vrot.lane.b32.xlu0 %v8580_v13, %s8451_s24 }
 0x11e   : > { %v803_v11 = vpop.permute.xlu1 %802 }
 0x11f   : > { %v801_v28 = vpop.permute.xlu0 %800  ;;  %v897_v29 = vpack.c.bf16 %v877_v63, %v873_v25  ;;  %v832_v12 = vsel %vm824_vm3, %v791_v9, %v803_v11  ;;  %v9233_v63 = vld [vmem:[%s8514_s10 + $0x8] sm:$0xff] }
 0x120   : > { %1130 = vrot.lane.b32.xlu1 %v8587_v14, %s8451_s24  ;;  %v831_v13 = vsel %vm824_vm3, %v789_v48, %v801_v28  ;;  %v878_v43 = vmul.f32 %v9155_v36, %v832_v12  ;;  %v9228_v48 = vld [vmem:[%s8514_s10 + $0x28] sm:$0xff] }
 0x121   : > { %1128 = vrot.lane.b32.xlu0 %v8590_v15, %s8451_s24  ;;  %1711 = vmatprep.subr.bf16.mxu0 %v897_v29  ;;  %v874_v3 = vmul.f32 %v9155_v36, %v831_v13  ;;  %v9243_v13 = vld [vmem:[%s8514_s10 + $0x30] sm:$0xff] }
 0x122   : > { %v815_v14 = vpop.permute.xlu1 %814 }
 0x123   : > { %v826_v37 = vsel %vm824_vm3, %v803_v11, %v815_v14  ;;  %v844_v31 = vsel %vm824_vm3, %v815_v14, %v779_v47  ;;  %v813_v24 = vpop.permute.xlu0 %812 }
 0x124   : > { %v876_v38 = vmul.f32 %v9149_v30, %v844_v31  ;;  %v879_v41 = vmul.f32 %v9152_v32, %v826_v37  ;;  %v825_v15 = vsel %vm824_vm3, %v801_v28, %v813_v24  ;;  %v843_v42 = vsel %vm824_vm3, %v813_v24, %v777_v62  ;;  %1098 = vrot.lane.b32.xlu1 %v8597_v16, %s8451_s24  ;;  %v9249_v37 = vld [vmem:[%s8514_s10 + $0x10] sm:$0xff] }
 0x125   : > { %v872_v1 = vmul.f32 %v9149_v30, %v843_v42  ;;  %v875_v45 = vmul.f32 %v9152_v32, %v825_v15  ;;  %1096 = vrot.lane.b32.xlu0 %v8600_v17, %s8451_s24  ;;  %v898_v16 = vpack.c.bf16 %v878_v43, %v874_v3  ;;  %v9259_v15 = vld [vmem:[%s8514_s10 + $0x18] sm:$0xff] }
 0x126   : > { %v783_v46 = vpop.permute.xlu1 %782 }
 0x127   : > { %v781_v0 = vpop.permute.xlu0 %780  ;;  %v896_v2 = vpack.c.bf16 %v876_v38, %v872_v1  ;;  %v899_v33 = vpack.c.bf16 %v879_v41, %v875_v45  ;;  %v9254_v41 = vld [vmem:[%s8514_s10 + $0x38] sm:$0xff] }
 0x128   : > { %1110 = vrot.lane.b32.xlu1 %v8607_v18, %s8451_s24 }
 0x129   : > { %1108 = vrot.lane.b32.xlu0 %v8610_v19, %s8451_s24  ;;  %1712 = vmatpush1.bf16.msra.mxu0 %v896_v2 }
 0x12a   : > { %1817 = vmatprep.subr.bf16.mxu1 %v899_v33  ;;  %v795_v34 = vpop.permute.xlu1 %794 }
 0x12b   : > { %1818 = vmatpush1.bf16.msra.mxu1 %v898_v16  ;;  %v840_v50 = vsel %vm824_vm3, %v783_v46, %v795_v34  ;;  %v793_v4 = vpop.permute.xlu0 %792  ;;  %v9278_v16 = vld [vmem:[%s8514_s10 + $0x60] sm:$0xff] }
 0x12c   : > { %v885_v17 = vmul.f32 %v9132_v8, %v840_v50  ;;  %v839_v5 = vsel %vm824_vm3, %v781_v0, %v793_v4  ;;  %1122 = vrot.lane.b32.xlu1 %v8617_v20, %s8451_s24 }
 0x12d   : > { %v881_v18 = vmul.f32 %v9132_v8, %v839_v5  ;;  %1120 = vrot.lane.b32.xlu0 %v8620_v21, %s8451_s24  ;;  %v9287_v5 = vld [vmem:[%s8514_s10 + $0x40] sm:$0xff] }
 0x12e   : > { %v807_v19 = vpop.permute.xlu1 %806 }
 0x12f   : > { %v805_v49 = vpop.permute.xlu0 %804  ;;  %v901_v51 = vpack.c.bf16 %v885_v17, %v881_v18  ;;  %v834_v44 = vsel %vm824_vm3, %v795_v34, %v807_v19 }
 0x130   : > { %1134 = vrot.lane.b32.xlu1 %v8627_v22, %s8451_s24  ;;  %v833_v20 = vsel %vm824_vm3, %v793_v4, %v805_v49  ;;  %v886_v56 = vmul.f32 %v9155_v36, %v834_v44 }
 0x131   : > { %1132 = vrot.lane.b32.xlu0 %v8630_v23, %s8451_s24  ;;  %1713 = vmatprep.subr.bf16.mxu0 %v901_v51  ;;  %v882_v57 = vmul.f32 %v9155_v36, %v833_v20  ;;  %v9298_v20 = vld [vmem:[%s8514_s10 + $0x68] sm:$0xff] }
 0x132   : > { %v819_v52 = vpop.permute.xlu1 %818 }
 0x133   : > { %v828_v21 = vsel %vm824_vm3, %v807_v19, %v819_v52  ;;  %v846_v53 = vsel %vm824_vm3, %v819_v52, %v783_v46  ;;  %v817_v6 = vpop.permute.xlu0 %816  ;;  %v902_v10 = vpack.c.bf16 %v886_v56, %v882_v57  ;;  %v921_v19 = vpack.c.bf16 %v9228_v48, %v9233_v63  ;;  %v9328_v56 = vld [vmem:[%s8514_s10 + $0x78] sm:$0xff] }
 0x134   : > { %v884_v22 = vmul.f32 %v9149_v30, %v846_v53  ;;  %v887_v23 = vmul.f32 %v9152_v32, %v828_v21  ;;  %v827_v7 = vsel %vm824_vm3, %v805_v49, %v817_v6  ;;  %v845_v54 = vsel %vm824_vm3, %v817_v6, %v781_v0  ;;  %1234 = vrot.lane.b32.xlu1 %v9214_v55, %s8452_s29  ;;  %v8010_v6 = vld [vmem:[%s16295_s1 + $0x14] sm:$0xf]  ;;  %v9331_v57 = vld [vmem:[%s8514_s10 + $0x58] sm:$0xff] }
 0x135   : > { %v880_v47 = vmul.f32 %v9149_v30, %v845_v54  ;;  %v883_v58 = vmul.f32 %v9152_v32, %v827_v7  ;;  %1232 = vrot.lane.b32.xlu0 %v9223_v59, %s8452_s29  ;;  %v920_v52 = vpack.c.bf16 %v9214_v55, %v9223_v59  ;;  %v9320_v7 = vld [vmem:[%s8514_s10 + $0x70] sm:$0xff]  ;;  %v9325_v54 = vrot.slane %v8010_v6, %v8706_v27 }
 0x136   : > { %v787_v62 = vpop.permute.xlu1 %786 }
 0x137   : > { %v785_v60 = vpop.permute.xlu0 %784  ;;  %v900_v9 = vpack.c.bf16 %v884_v22, %v880_v47  ;;  %v903_v61 = vpack.c.bf16 %v887_v23, %v883_v58  ;;  %v922_v23 = vpack.c.bf16 %v9243_v13, %v9249_v37  ;;  %v927_v47 = vpack.c.bf16 %v9328_v56, %v9331_v57  ;;  %v9336_v58 = vld [vmem:[%s8514_s10 + $0x50] sm:$0xff] }
 0x138   : > { %1246 = vrot.lane.b32.xlu1 %v9228_v48, %s8452_s29 }
 0x139   : > { %1244 = vrot.lane.b32.xlu0 %v9233_v63, %s8452_s29  ;;  %1714 = vmatpush1.bf16.msra.mxu0 %v900_v9 }
 0x13a   : > { %1819 = vmatprep.subr.bf16.mxu1 %v903_v61  ;;  %v799_v25 = vpop.permute.xlu1 %798  ;;  %v926_v61 = vpack.c.bf16 %v9320_v7, %v9336_v58 }
 0x13b   : > { %1820 = vmatpush1.bf16.msra.mxu1 %v902_v10  ;;  %v842_v11 = vsel %vm824_vm3, %v787_v62, %v799_v25  ;;  %v797_v28 = vpop.permute.xlu0 %796  ;;  %v9348_v10 = vld [vmem:[%s8514_s10 + $0xa8] sm:$0xff] }
 0x13c   : > { %v893_v29 = vmul.f32 %v9132_v8, %v842_v11  ;;  %v841_v12 = vsel %vm824_vm3, %v785_v60, %v797_v28  ;;  %1258 = vrot.lane.b32.xlu1 %v9243_v13, %s8452_s29 }
 0x13d   : > { %v889_v14 = vmul.f32 %v9132_v8, %v841_v12  ;;  %1256 = vrot.lane.b32.xlu0 %v9249_v37, %s8452_s29 }
 0x13e   : > { %v811_v31 = vpop.permute.xlu1 %810 }
 0x13f   : > { %v809_v24 = vpop.permute.xlu0 %808  ;;  %v905_v38 = vpack.c.bf16 %v893_v29, %v889_v14  ;;  %v836_v8 = vsel %vm824_vm3, %v799_v25, %v811_v31  ;;  %v9351_v25 = vld [vmem:[%s8514_s10 + $0x88] sm:$0xff]  ;;  %v9361_v14 = vrot.slane %v8010_v6, %v8721_v35 }
 0x140   : > { %1270 = vrot.lane.b32.xlu1 %v9254_v41, %s8452_s29  ;;  %v835_v42 = vsel %vm824_vm3, %v797_v28, %v809_v24  ;;  %v894_v34 = vmul.f32 %v9155_v36, %v836_v8  ;;  %v929_v11 = vpack.c.bf16 %v9348_v10, %v9351_v25 }
 0x141   : > { %1268 = vrot.lane.b32.xlu0 %v9259_v15, %s8452_s29  ;;  %1715 = vmatprep.subr.bf16.mxu0 %v905_v38  ;;  %v890_v50 = vmul.f32 %v9155_v36, %v835_v42 }
 0x142   : > { %v823_v43 = vpop.permute.xlu1 %822 }
 0x143   : > { %v830_v3 = vsel %vm824_vm3, %v811_v31, %v823_v43  ;;  %v848_v1 = vsel %vm824_vm3, %v823_v43, %v787_v62  ;;  %v821_v45 = vpop.permute.xlu0 %820  ;;  %v906_v36 = vpack.c.bf16 %v894_v34, %v890_v50  ;;  %v924_v62 = vpack.c.bf16 %v9278_v16, %v9287_v5  ;;  %v9378_v43 = vld [vmem:[%s8514_s10 + $0xa0] sm:$0xff]  ;;  %v9395_v34 = vld [vmem:[%s8514_s10 + $0xb0] sm:$0xff] }
 0x144   : > { %v892_v46 = vmul.f32 %v9149_v30, %v848_v1  ;;  %v895_v0 = vmul.f32 %v9152_v32, %v830_v3  ;;  %v829_v2 = vsel %vm824_vm3, %v809_v24, %v821_v45  ;;  %v847_v33 = vsel %vm824_vm3, %v821_v45, %v785_v60  ;;  %1238 = vrot.lane.b32.xlu1 %v9278_v16, %s8452_s29  ;;  %v9381_v3 = vld [vmem:[%s8514_s10 + $0x80] sm:$0xff]  ;;  %v9398_v50 = vld [vmem:[%s8514_s10 + $0x90] sm:$0xff] }
 0x145   : > { %v888_v4 = vmul.f32 %v9149_v30, %v847_v33  ;;  %v891_v17 = vmul.f32 %v9152_v32, %v829_v2  ;;  %1236 = vrot.lane.b32.xlu0 %v9287_v5, %s8452_s29  ;;  %v923_v30 = vpack.c.bf16 %v9254_v41, %v9259_v15  ;;  %v9305_v32 = vld [vmem:[%s8514_s10 + $0x48] sm:$0xff]  ;;  %v9343_v60 = vrot.slane %v8010_v6, %v8731_v39  ;;  %v9390_v2 = vld [vmem:[%s8514_s10 + $0x98] sm:$0xff] }
 0x146   : > { %v9291_v18 = vpop.permute.xlu1 %946  ;;  %v925_v53 = vpack.c.bf16 %v9298_v20, %v9305_v32  ;;  %v9364_v31 = vrot.slane %v8010_v6, %v8733_v40  ;;  %v928_v1 = vpack.c.bf16 %v9378_v43, %v9381_v3 }
 0x147   : > { %v9295_v49 = vpop.permute.xlu0 %944  ;;  %v904_v51 = vpack.c.bf16 %v892_v46, %v888_v4  ;;  %v907_v44 = vpack.c.bf16 %v895_v0, %v891_v17  ;;  %v9387_v0 = vld [vmem:[%s8514_s10 + $0xb8] sm:$0xff]  ;;  %v930_v4 = vpack.c.bf16 %v9395_v34, %v9398_v50 }
 0x148   : > { %1250 = vrot.lane.b32.xlu1 %v9298_v20, %s8452_s29  ;;  %v931_v33 = vpack.c.bf16 %v9387_v0, %v9390_v2 }
 0x149   : > { %1248 = vrot.lane.b32.xlu0 %v9305_v32, %s8452_s29  ;;  %1716 = vmatpush1.bf16.msra.mxu0 %v904_v51 }
 0x14a   : > { %1821 = vmatprep.subr.bf16.mxu1 %v907_v44  ;;  %v959_v21 = vpop.permute.xlu1 %958  ;;  %1717 = vmatprep.subr.bf16.mxu0 %v921_v19 }
 0x14b   : > { %1822 = vmatpush1.bf16.msra.mxu1 %v906_v36  ;;  %v957_v22 = vpop.permute.xlu0 %956  ;;  %v1006_v28 = vsel %vm992_vm4, %v9291_v18, %v959_v21 }
 0x14c   : > { %1262 = vrot.lane.b32.xlu1 %v9320_v7, %s8452_s29  ;;  %1823 = vmatprep.subr.bf16.mxu1 %v923_v30  ;;  %v1005_v24 = vsel %vm992_vm4, %v9295_v49, %v957_v22  ;;  %v1044_v45 = vmul.f32 %v9343_v60, %v1006_v28 }
 0x14d   : > { %1260 = vrot.lane.b32.xlu0 %v9336_v58, %s8452_s29  ;;  %1718 = vmatpush1.bf16.msra.mxu0 %v920_v52  ;;  %v1040_v17 = vmul.f32 %v9343_v60, %v1005_v24 }
 0x14e   : > { %v971_v9 = vpop.permute.xlu1 %970  ;;  %1719 = vmatprep.subr.bf16.mxu0 %v925_v53 }
 0x14f   : > { %1824 = vmatpush1.bf16.msra.mxu1 %v922_v23  ;;  %v1000_v29 = vsel %vm992_vm4, %v959_v21, %v971_v9  ;;  %v969_v12 = vpop.permute.xlu0 %968 }
 0x150   : > { %v1045_v38 = vmul.f32 %v9325_v54, %v1000_v29  ;;  %v999_v8 = vsel %vm992_vm4, %v957_v22, %v969_v12  ;;  %1274 = vrot.lane.b32.xlu1 %v9328_v56, %s8452_s29  ;;  %1825 = vmatprep.subr.bf16.mxu1 %v927_v47  ;;  %v1064_v47 = vpack.c.bf16 %v1044_v45, %v1040_v17 }
 0x151   : > { %v1041_v42 = vmul.f32 %v9325_v54, %v999_v8  ;;  %1272 = vrot.lane.b32.xlu0 %v9331_v57, %s8452_s29  ;;  %1720 = vmatpush1.bf16.msra.mxu0 %v924_v62 }
 0x152   : > { %v983_v46 = vpop.permute.xlu1 %982  ;;  %1721 = vmatprep.subr.bf16.mxu0 %v929_v11 }
 0x153   : > { %1826 = vmatpush1.bf16.msra.mxu1 %v926_v61  ;;  %v994_v19 = vsel %vm992_vm4, %v971_v9, %v983_v46  ;;  %v1012_v51 = vsel %vm992_vm4, %v983_v46, %v9291_v18  ;;  %v981_v44 = vpop.permute.xlu0 %980  ;;  %v1065_v30 = vpack.c.bf16 %v1045_v38, %v1041_v42 }
 0x154   : > { %v1046_v36 = vmul.f32 %v9361_v14, %v994_v19  ;;  %v1047_v52 = vmul.f32 %v9364_v31, %v1012_v51  ;;  %v993_v21 = vsel %vm992_vm4, %v969_v12, %v981_v44  ;;  %v1011_v53 = vsel %vm992_vm4, %v981_v44, %v9295_v49  ;;  %1242 = vrot.lane.b32.xlu1 %v9378_v43, %s8452_s29  ;;  %v8362_v49 = vld [vmem:[%s16296_s2] ss:$16 sps:$4 sm:$0xff]  }
 0x155   : > { %v1042_v6 = vmul.f32 %v9361_v14, %v993_v21  ;;  %v1043_v18 = vmul.f32 %v9364_v31, %v1011_v53  ;;  %1240 = vrot.lane.b32.xlu0 %v9381_v3, %s8452_s29  ;;  %1722 = vmatpush1.bf16.msra.mxu0 %v928_v1 }
 0x156   : > { %1827 = vmatprep.subr.bf16.mxu1 %v931_v33  ;;  %1723 = vmatprep.subr.bf16.mxu0 %v1065_v30  ;;  %v951_v22 = vpop.permute.xlu1 %950 }
 0x157   : > { %1828 = vmatpush1.bf16.msra.mxu1 %v930_v4  ;;  %v949_v23 = vpop.permute.xlu0 %948  ;;  %v1067_v62 = vpack.c.bf16 %v1047_v52, %v1043_v18  ;;  %v1066_v9 = vpack.c.bf16 %v1046_v36, %v1042_v6 }
 0x158   : > { %1254 = vrot.lane.b32.xlu1 %v9348_v10, %s8452_s29 }
 0x159   : > { %1252 = vrot.lane.b32.xlu0 %v9351_v25, %s8452_s29  ;;  %1724 = vmatpush1.bf16.msra.mxu0 %v1064_v47 }
 0x15a   : > { %1829 = vmatprep.subr.bf16.mxu1 %v1067_v62  ;;  %v963_v61 = vpop.permute.xlu1 %962 }
 0x15b   : > { %1830 = vmatpush1.bf16.msra.mxu1 %v1066_v9  ;;  %v961_v11 = vpop.permute.xlu0 %960  ;;  %v1008_v28 = vsel %vm992_vm4, %v951_v22, %v963_v61 }
 0x15c   : > { %v1007_v29 = vsel %vm992_vm4, %v949_v23, %v961_v11  ;;  %1266 = vrot.lane.b32.xlu1 %v9395_v34, %s8452_s29  ;;  %1726 = vmatmul.mubr.bf16.vlgmr.msra.gmra.mrb[0].mxu0 %v8362_v49  ;;  %v1052_v24 = vmul.f32 %v9343_v60, %v1008_v28 }
 0x15d   : > { %1264 = vrot.lane.b32.xlu0 %v9398_v50, %s8452_s29  ;;  %v1048_v38 = vmul.f32 %v9343_v60, %v1007_v29 }
 0x15e   : > { %v975_v12 = vpop.permute.xlu1 %974  ;;  %1832 = vmatmul.mubr.bf16.vlgmr.msra.gmra.mrb[0].mxu1 %v8362_v49 }
 0x15f   : > { %v1002_v8 = vsel %vm992_vm4, %v963_v61, %v975_v12  ;;  %v973_v42 = vpop.permute.xlu0 %972  ;;  %v1068_v4 = vpack.c.bf16 %v1052_v24, %v1048_v38 }
 0x160   : > { %v1053_v1 = vmul.f32 %v9325_v54, %v1002_v8  ;;  %v1001_v45 = vsel %vm992_vm4, %v961_v11, %v973_v42  ;;  %1278 = vrot.lane.b32.xlu1 %v9387_v0, %s8452_s29 }
 0x161   : > { %v1049_v46 = vmul.f32 %v9325_v54, %v1001_v45  ;;  %1276 = vrot.lane.b32.xlu0 %v9390_v2, %s8452_s29 }
 0x162   : > { %v987_v33 = vpop.permute.xlu1 %986 }
 0x163   : > { %v996_v17 = vsel %vm992_vm4, %v975_v12, %v987_v33  ;;  %v1014_v19 = vsel %vm992_vm4, %v987_v33, %v951_v22  ;;  %v985_v51 = vpop.permute.xlu0 %984  ;;  %v1069_v44 = vpack.c.bf16 %v1053_v1, %v1049_v46 }
 0x164   : > { %v1054_v30 = vmul.f32 %v9361_v14, %v996_v17  ;;  %v1055_v36 = vmul.f32 %v9364_v31, %v1014_v19  ;;  %v995_v52 = vsel %vm992_vm4, %v973_v42, %v985_v51  ;;  %v1013_v21 = vsel %vm992_vm4, %v985_v51, %v949_v23  ;;  %1378 = vrot.lane.b32.xlu1 %v9214_v55, %s8453_s15 }
 0x165   : > { %v1050_v53 = vmul.f32 %v9361_v14, %v995_v52  ;;  %v1051_v6 = vmul.f32 %v9364_v31, %v1013_v21  ;;  %1376 = vrot.lane.b32.xlu0 %v9223_v59, %s8453_s15  ;;  %1746 = vmatprep.subr.bf16.mxu0 %v1069_v44  ;;  %v8365_v21 = vld [vmem:[%s16296_s2 + $0x24] ss:$16 sps:$4 sm:$0xff]  }
 0x166   : > { %1747 = vmatpush1.bf16.msra.mxu0 %v1068_v4  ;;  %v955_v18 = vpop.permute.xlu1 %954  ;;  %1735 = vmatprep.mubr.bf16.mxu0 %v8365_v21 }
 0x167   : > { %v1070_v22 = vpack.c.bf16 %v1054_v30, %v1050_v53  ;;  %v953_v47 = vpop.permute.xlu0 %952  ;;  %v1071_v62 = vpack.c.bf16 %v1055_v36, %v1051_v6  ;;  %1841 = vmatprep.mubr.bf16.mxu1 %v8365_v21 }
 0x168   : > { %1390 = vrot.lane.b32.xlu1 %v9228_v48, %s8453_s15 }
 0x169   : > { %1388 = vrot.lane.b32.xlu0 %v9233_v63, %s8453_s15  ;;  %1852 = vmatprep.subr.bf16.mxu1 %v1071_v62 }
 0x16a   : > { %1853 = vmatpush1.bf16.msra.mxu1 %v1070_v22  ;;  %v967_v55 = vpop.permute.xlu1 %966 }
 0x16b   : > { %v965_v23 = vpop.permute.xlu0 %964  ;;  %v1010_v9 = vsel %vm992_vm4, %v955_v18, %v967_v55 }
 0x16c   : > { %v1009_v59 = vsel %vm992_vm4, %v953_v47, %v965_v23  ;;  %1402 = vrot.lane.b32.xlu1 %v9243_v13, %s8453_s15  ;;  %v1060_v49 = vmul.f32 %v9343_v60, %v1010_v9 }
 0x16d   : > { %1400 = vrot.lane.b32.xlu0 %v9249_v37, %s8453_s15  ;;  %v1056_v63 = vmul.f32 %v9343_v60, %v1009_v59 }
 0x16e   : > { %v979_v48 = vpop.permute.xlu1 %978 }
 0x16f   : > { %v1004_v61 = vsel %vm992_vm4, %v967_v55, %v979_v48  ;;  %v977_v11 = vpop.permute.xlu0 %976  ;;  %v1072_v12 = vpack.c.bf16 %v1060_v49, %v1056_v63 }
 0x170   : > { %v1061_v28 = vmul.f32 %v9325_v54, %v1004_v61  ;;  %v1003_v29 = vsel %vm992_vm4, %v965_v23, %v977_v11  ;;  %1414 = vrot.lane.b32.xlu1 %v9254_v41, %s8453_s15 }
 0x171   : > { %v1057_v13 = vmul.f32 %v9325_v54, %v1003_v29  ;;  %1412 = vrot.lane.b32.xlu0 %v9259_v15, %s8453_s15 }
 0x172   : > { %v991_v37 = vpop.permute.xlu1 %990 }
 0x173   : > { %v998_v60 = vsel %vm992_vm4, %v979_v48, %v991_v37  ;;  %v1016_v24 = vsel %vm992_vm4, %v991_v37, %v955_v18  ;;  %v989_v38 = vpop.permute.xlu0 %988  ;;  %v1073_v8 = vpack.c.bf16 %v1061_v28, %v1057_v13  ;;  %v8367_v18 = vld [vmem:[%s16296_s2 + $0x20] ss:$16 sps:$4 sm:$0xff]   ;;  %v8370_v37 = vld [vmem:[%s16296_s2 + $0xc] ss:$16 sps:$4 sm:$0xff]  }
 0x174   : > { %v1062_v42 = vmul.f32 %v9361_v14, %v998_v60  ;;  %v1063_v1 = vmul.f32 %v9364_v31, %v1016_v24  ;;  %v997_v41 = vsel %vm992_vm4, %v977_v11, %v989_v38  ;;  %v1015_v15 = vsel %vm992_vm4, %v989_v38, %v953_v47  ;;  %1382 = vrot.lane.b32.xlu1 %v9278_v16, %s8453_s15  ;;  %v8011_v16 = vld [vmem:[%s16295_s1 + $0x18] sm:$0xf] }
 0x175   : > { %v1058_v54 = vmul.f32 %v9361_v14, %v997_v41  ;;  %v1059_v45 = vmul.f32 %v9364_v31, %v1015_v15  ;;  %1380 = vrot.lane.b32.xlu0 %v9287_v5, %s8453_s15  ;;  %1748 = vmatprep.subr.bf16.mxu0 %v1073_v8  ;;  %v9513_v14 = vrot.slane %v8011_v16, %v8731_v39 }
 0x176   : > { %1749 = vmatpush1.bf16.msra.mxu0 %v1072_v12  ;;  %v1091_v46 = vpop.permute.xlu1 %1090  ;;  %v9522_v51 = vrot.slane %v8011_v16, %v8706_v27  ;;  %v9542_v6 = vrot.slane %v8011_v16, %v8733_v40  ;;  %1842 = vmatmul.mubr.bf16.gmra.mrb[4].mxu1 %v8367_v18 }
 0x177   : > { %v1074_v33 = vpack.c.bf16 %v1062_v42, %v1058_v54  ;;  %v1089_v4 = vpop.permute.xlu0 %1088  ;;  %v1075_v17 = vpack.c.bf16 %v1063_v1, %v1059_v45  ;;  %1736 = vmatmul.mubr.bf16.gmra.mrb[4].mxu0 %v8367_v18  ;;  %8024 = vmatprep.mubr.msk.bf16.mxu1 %vm1686_vm6, %v8370_v37 }
 0x178   : > { %1394 = vrot.lane.b32.xlu1 %v9298_v20, %s8453_s15  ;;  %8022 = vmatprep.mubr.msk.bf16.mxu0 %vm1686_vm6, %v8370_v37 }
 0x179   : > { %1392 = vrot.lane.b32.xlu0 %v9305_v32, %s8453_s15  ;;  %1854 = vmatprep.subr.bf16.mxu1 %v1075_v17 }
 0x17a   : > { %1855 = vmatpush1.bf16.msra.mxu1 %v1074_v33  ;;  %v1103_v5 = vpop.permute.xlu1 %1102 }
 0x17b   : > { %v1101_v31 = vpop.permute.xlu0 %1100  ;;  %v1150_v19 = vsel %vm1136_vm5, %v1091_v46, %v1103_v5 }
 0x17c   : > { %v1149_v20 = vsel %vm1136_vm5, %v1089_v4, %v1101_v31  ;;  %1406 = vrot.lane.b32.xlu1 %v9320_v7, %s8453_s15  ;;  %v1188_v44 = vmul.f32 %v9513_v14, %v1150_v19 }
 0x17d   : > { %1404 = vrot.lane.b32.xlu0 %v9336_v58, %s8453_s15  ;;  %v1184_v30 = vmul.f32 %v9513_v14, %v1149_v20  ;;  %v9539_v58 = vrot.slane %v8011_v16, %v8721_v35  ;;  %v16303_v20 = vmov 0  }
 0x17e   : > { %v1115_v32 = vpop.permute.xlu1 %1114  ;;  %8361 = vset.pattern.permute.xlu1 %v16303_v20  ;;  %8360 = vset.pattern.permute.xlu0 %v16303_v20 }
 0x17f   : > { %v1144_v36 = vsel %vm1136_vm5, %v1103_v5, %v1115_v32  ;;  %v1113_v52 = vpop.permute.xlu0 %1112  ;;  %v340_v5 = vld [vmem:[%s16297_s3 + $0x8] sm:$0xff] }
 0x180   : > { %v1189_v7 = vmul.f32 %v9522_v51, %v1144_v36  ;;  %v1143_v53 = vsel %vm1136_vm5, %v1101_v31, %v1113_v52  ;;  %1418 = vrot.lane.b32.xlu1 %v9328_v56, %s8453_s15  ;;  %v1208_v56 = vpack.c.bf16 %v1188_v44, %v1184_v30  ;;  %v339_v31 = vld [vmem:[%s16297_s3] sm:$0xff]  ;;  %v341_v36 = vld [vmem:[%s16297_s3 + $0x10] sm:$0xff] }
 0x181   : > { %v1185_v22 = vmul.f32 %v9522_v51, %v1143_v53  ;;  %1416 = vrot.lane.b32.xlu0 %v9331_v57, %s8453_s15 }
 0x182   : > { %v1127_v47 = vpop.permute.xlu1 %1126 }
 0x183   : > { %v1138_v62 = vsel %vm1136_vm5, %v1115_v32, %v1127_v47  ;;  %v1156_v55 = vsel %vm1136_vm5, %v1127_v47, %v1091_v46  ;;  %v1125_v23 = vpop.permute.xlu0 %1124  ;;  %v1209_v9 = vpack.c.bf16 %v1189_v7, %v1185_v22 }
 0x184   : > { %v1190_v59 = vmul.f32 %v9539_v58, %v1138_v62  ;;  %v1191_v48 = vmul.f32 %v9542_v6, %v1156_v55  ;;  %v1137_v57 = vsel %vm1136_vm5, %v1113_v52, %v1125_v23  ;;  %v1155_v49 = vsel %vm1136_vm5, %v1125_v23, %v1089_v4  ;;  %1386 = vrot.lane.b32.xlu1 %v9378_v43, %s8453_s15  ;;  %v342_v52 = vld [vmem:[%s16297_s3 + $0x18] sm:$0xff] }
 0x185   : > { %v1186_v63 = vmul.f32 %v9539_v58, %v1137_v57  ;;  %v1187_v61 = vmul.f32 %v9542_v6, %v1155_v49  ;;  %1384 = vrot.lane.b32.xlu0 %v9381_v3, %s8453_s15  ;;  %1750 = vmatprep.subr.bf16.mxu0 %v1209_v9 }
 0x186   : > { %1751 = vmatpush1.bf16.msra.mxu0 %v1208_v56  ;;  %v1095_v11 = vpop.permute.xlu1 %1094 }
 0x187   : > { %v1210_v28 = vpack.c.bf16 %v1190_v59, %v1186_v63  ;;  %v1093_v29 = vpop.permute.xlu0 %1092  ;;  %v1211_v13 = vpack.c.bf16 %v1191_v48, %v1187_v61 }
 0x188   : > { %1398 = vrot.lane.b32.xlu1 %v9348_v10, %s8453_s15 }
 0x189   : > { %1396 = vrot.lane.b32.xlu0 %v9351_v25, %s8453_s15  ;;  %1856 = vmatprep.subr.bf16.mxu1 %v1211_v13 }
 0x18a   : > { %1857 = vmatpush1.bf16.msra.mxu1 %v1210_v28  ;;  %v1107_v43 = vpop.permute.xlu1 %1106 }
 0x18b   : > { %v1105_v3 = vpop.permute.xlu0 %1104  ;;  %v1152_v12 = vsel %vm1136_vm5, %v1095_v11, %v1107_v43 }
 0x18c   : > { %v1151_v60 = vsel %vm1136_vm5, %v1093_v29, %v1105_v3  ;;  %1410 = vrot.lane.b32.xlu1 %v9395_v34, %s8453_s15  ;;  %v1196_v25 = vmul.f32 %v9513_v14, %v1152_v12 }
 0x18d   : > { %1408 = vrot.lane.b32.xlu0 %v9398_v50, %s8453_s15  ;;  %v1192_v24 = vmul.f32 %v9513_v14, %v1151_v60 }
 0x18e   : > { %v1119_v10 = vpop.permute.xlu1 %1118 }
 0x18f   : > { %v1146_v38 = vsel %vm1136_vm5, %v1107_v43, %v1119_v10  ;;  %v1117_v8 = vpop.permute.xlu0 %1116  ;;  %v1212_v41 = vpack.c.bf16 %v1196_v25, %v1192_v24 }
 0x190   : > { %v1197_v42 = vmul.f32 %v9522_v51, %v1146_v38  ;;  %v1145_v1 = vsel %vm1136_vm5, %v1105_v3, %v1117_v8  ;;  %1422 = vrot.lane.b32.xlu1 %v9387_v0, %s8453_s15 }
 0x191   : > { %v1193_v34 = vmul.f32 %v9522_v51, %v1145_v1  ;;  %1420 = vrot.lane.b32.xlu0 %v9390_v2, %s8453_s15 }
 0x192   : > { %v1131_v50 = vpop.permute.xlu1 %1130 }
 0x193   : > { %v1140_v15 = vsel %vm1136_vm5, %v1119_v10, %v1131_v50  ;;  %v1158_v54 = vsel %vm1136_vm5, %v1131_v50, %v1095_v11  ;;  %v1129_v45 = vpop.permute.xlu0 %1128  ;;  %v1213_v46 = vpack.c.bf16 %v1197_v42, %v1193_v34  ;;  %v8012_v10 = vld [vmem:[%s16295_s1 + $0x1c] sm:$0xf] }
 0x194   : > { %v1198_v33 = vmul.f32 %v9539_v58, %v1140_v15  ;;  %v1199_v4 = vmul.f32 %v9542_v6, %v1158_v54  ;;  %v1139_v0 = vsel %vm1136_vm5, %v1117_v8, %v1129_v45  ;;  %v1157_v2 = vsel %vm1136_vm5, %v1129_v45, %v1093_v29  ;;  %1635 = vperm.xlu1 %8361, %v340_v5  }
 0x195   : > { %v1194_v17 = vmul.f32 %v9539_v58, %v1139_v0  ;;  %v1195_v16 = vmul.f32 %v9542_v6, %v1157_v2  ;;  %1752 = vmatprep.subr.bf16.mxu0 %v1213_v46  ;;  %1630 = vperm.xlu0 %8360, %v339_v31   ;;  %v9650_v24 = vrot.slane %v8012_v10, %v8731_v39 }
 0x196   : > { %1753 = vmatpush1.bf16.msra.mxu0 %v1212_v41  ;;  %v1099_v19 = vpop.permute.xlu1 %1098  ;;  %v9657_v8 = vrot.slane %v8012_v10, %v8706_v27  ;;  %v9667_v45 = vrot.slane %v8012_v10, %v8721_v35  ;;  %v9670_v46 = vrot.slane %v8012_v10, %v8733_v40 }
 0x197   : > { %v1214_v32 = vpack.c.bf16 %v1198_v33, %v1194_v17  ;;  %v1097_v44 = vpop.permute.xlu0 %1096  ;;  %v1215_v30 = vpack.c.bf16 %v1199_v4, %v1195_v16 }
 0x198   : > { %1640 = vperm.xlu1 %8361, %v341_v36  }
 0x199   : > { %1858 = vmatprep.subr.bf16.mxu1 %v1215_v30  ;;  %1645 = vperm.xlu0 %8360, %v342_v52  }
 0x19a   : > { %1859 = vmatpush1.bf16.msra.mxu1 %v1214_v32  ;;  %v1111_v21 = vpop.permute.xlu1 %1110 }
 0x19b   : > { %v1109_v7 = vpop.permute.xlu0 %1108  ;;  %v1154_v53 = vsel %vm1136_vm5, %v1099_v19, %v1111_v21 }
 0x19c   : > { %v1153_v18 = vsel %vm1136_vm5, %v1097_v44, %v1109_v7  ;;  %v1204_v47 = vmul.f32 %v9513_v14, %v1154_v53 }
 0x19d   : > { %v1200_v56 = vmul.f32 %v9513_v14, %v1153_v18 }
 0x19e   : > { %v1123_v22 = vpop.permute.xlu1 %1122 }
 0x19f   : > { %v1148_v62 = vsel %vm1136_vm5, %v1111_v21, %v1123_v22  ;;  %v1121_v55 = vpop.permute.xlu0 %1120  ;;  %v1216_v57 = vpack.c.bf16 %v1204_v47, %v1200_v56 }
 0x1a0   : > { %v1205_v23 = vmul.f32 %v9522_v51, %v1148_v62  ;;  %v1147_v9 = vsel %vm1136_vm5, %v1109_v7, %v1121_v55 }
 0x1a1   : > { %v1201_v59 = vmul.f32 %v9522_v51, %v1147_v9 }
 0x1a2   : > { %v1135_v48 = vpop.permute.xlu1 %1134 }
 0x1a3   : > { %v1142_v49 = vsel %vm1136_vm5, %v1123_v22, %v1135_v48  ;;  %v1160_v63 = vsel %vm1136_vm5, %v1135_v48, %v1099_v19  ;;  %v1133_v14 = vpop.permute.xlu0 %1132  ;;  %v1217_v61 = vpack.c.bf16 %v1205_v23, %v1201_v59 }
 0x1a4   : > { %v1206_v11 = vmul.f32 %v9539_v58, %v1142_v49  ;;  %v1207_v28 = vmul.f32 %v9542_v6, %v1160_v63  ;;  %v1141_v29 = vsel %vm1136_vm5, %v1121_v55, %v1133_v14  ;;  %v1159_v51 = vsel %vm1136_vm5, %v1133_v14, %v1097_v44 }
 0x1a5   : > { %v1202_v13 = vmul.f32 %v9539_v58, %v1141_v29  ;;  %v1203_v37 = vmul.f32 %v9542_v6, %v1159_v51  ;;  %1754 = vmatprep.subr.bf16.mxu0 %v1217_v61 }
 0x1a6   : > { %1755 = vmatpush1.bf16.msra.mxu0 %v1216_v57  ;;  %v1235_v43 = vpop.permute.xlu1 %1234 }
 0x1a7   : > { %v1218_v3 = vpack.c.bf16 %v1206_v11, %v1202_v13  ;;  %v1233_v12 = vpop.permute.xlu0 %1232  ;;  %v1219_v60 = vpack.c.bf16 %v1207_v28, %v1203_v37 }
 0x1a9   : > { %1860 = vmatprep.subr.bf16.mxu1 %v1219_v60 }
 0x1aa   : > { %1861 = vmatpush1.bf16.msra.mxu1 %v1218_v3  ;;  %v1247_v25 = vpop.permute.xlu1 %1246 }
 0x1ab   : > { %v1245_v58 = vpop.permute.xlu0 %1244  ;;  %v1294_v6 = vsel %vm1280_vm7, %v1235_v43, %v1247_v25 }
 0x1ac   : > { %v1293_v38 = vsel %vm1280_vm7, %v1233_v12, %v1245_v58  ;;  %v1332_v1 = vmul.f32 %v9650_v24, %v1294_v6 }
 0x1ad   : > { %v1328_v34 = vmul.f32 %v9650_v24, %v1293_v38 }
 0x1ae   : > { %v1259_v42 = vpop.permute.xlu1 %1258 }
 0x1af   : > { %v1288_v50 = vsel %vm1280_vm7, %v1247_v25, %v1259_v42  ;;  %v1257_v41 = vpop.permute.xlu0 %1256  ;;  %v1352_v0 = vpack.c.bf16 %v1332_v1, %v1328_v34 }
 0x1b0   : > { %v1333_v15 = vmul.f32 %v9657_v8, %v1288_v50  ;;  %v1287_v54 = vsel %vm1280_vm7, %v1245_v58, %v1257_v41 }
 0x1b1   : > { %v1329_v33 = vmul.f32 %v9657_v8, %v1287_v54 }
 0x1b2   : > { %v1271_v4 = vpop.permute.xlu1 %1270 }
 0x1b3   : > { %v1282_v2 = vsel %vm1280_vm7, %v1259_v42, %v1271_v4  ;;  %v1300_v17 = vsel %vm1280_vm7, %v1271_v4, %v1235_v43  ;;  %v1269_v16 = vpop.permute.xlu0 %1268  ;;  %v1353_v5 = vpack.c.bf16 %v1333_v15, %v1329_v33 }
 0x1b4   : > { %v1334_v31 = vmul.f32 %v9667_v45, %v1282_v2  ;;  %v1335_v19 = vmul.f32 %v9670_v46, %v1300_v17  ;;  %v1281_v32 = vsel %vm1280_vm7, %v1257_v41, %v1269_v16  ;;  %v1299_v44 = vsel %vm1280_vm7, %v1269_v16, %v1233_v12 }
 0x1b5   : > { %v1330_v30 = vmul.f32 %v9667_v45, %v1281_v32  ;;  %v1331_v36 = vmul.f32 %v9670_v46, %v1299_v44  ;;  %1756 = vmatprep.subr.bf16.mxu0 %v1353_v5 }
 0x1b6   : > { %1757 = vmatpush1.bf16.msra.mxu0 %v1352_v0  ;;  %v1239_v52 = vpop.permute.xlu1 %1238 }
 0x1b7   : > { %v1354_v21 = vpack.c.bf16 %v1334_v31, %v1330_v30  ;;  %v1237_v7 = vpop.permute.xlu0 %1236  ;;  %v1355_v53 = vpack.c.bf16 %v1335_v19, %v1331_v36 }
 0x1b9   : > { %1862 = vmatprep.subr.bf16.mxu1 %v1355_v53 }
 0x1ba   : > { %1863 = vmatpush1.bf16.msra.mxu1 %v1354_v21  ;;  %v1251_v18 = vpop.permute.xlu1 %1250 }
 0x1bb   : > { %v1249_v22 = vpop.permute.xlu0 %1248  ;;  %v1296_v47 = vsel %vm1280_vm7, %v1239_v52, %v1251_v18 }
 0x1bc   : > { %v1295_v56 = vsel %vm1280_vm7, %v1237_v7, %v1249_v22  ;;  %v1340_v55 = vmul.f32 %v9650_v24, %v1296_v47 }
 0x1bd   : > { %v1336_v23 = vmul.f32 %v9650_v24, %v1295_v56 }
 0x1be   : > { %v1263_v62 = vpop.permute.xlu1 %1262 }
 0x1bf   : > { %v1290_v9 = vsel %vm1280_vm7, %v1251_v18, %v1263_v62  ;;  %v1261_v59 = vpop.permute.xlu0 %1260  ;;  %v1356_v14 = vpack.c.bf16 %v1340_v55, %v1336_v23  ;;  %v8013_v18 = vld [vmem:[%s16295_s1 + $0x20] sm:$0xf] }
 0x1c0   : > { %v1341_v48 = vmul.f32 %v9657_v8, %v1290_v9  ;;  %v1289_v57 = vsel %vm1280_vm7, %v1249_v22, %v1261_v59  ;;  %v9738_v47 = vrot.slane %v8013_v18, %v8731_v39 }
 0x1c1   : > { %v1337_v49 = vmul.f32 %v9657_v8, %v1289_v57 }
 0x1c2   : > { %v1275_v63 = vpop.permute.xlu1 %1274 }
 0x1c3   : > { %v1284_v61 = vsel %vm1280_vm7, %v1263_v62, %v1275_v63  ;;  %v1302_v11 = vsel %vm1280_vm7, %v1275_v63, %v1239_v52  ;;  %v1273_v28 = vpop.permute.xlu0 %1272  ;;  %v1357_v29 = vpack.c.bf16 %v1341_v48, %v1337_v49  ;;  %v9745_v62 = vrot.slane %v8013_v18, %v8706_v27 }
 0x1c4   : > { %v1342_v51 = vmul.f32 %v9667_v45, %v1284_v61  ;;  %v1343_v13 = vmul.f32 %v9670_v46, %v1302_v11  ;;  %v1283_v37 = vsel %vm1280_vm7, %v1261_v59, %v1273_v28  ;;  %v1301_v43 = vsel %vm1280_vm7, %v1273_v28, %v1237_v7 }
 0x1c5   : > { %v1338_v3 = vmul.f32 %v9667_v45, %v1283_v37  ;;  %v1339_v12 = vmul.f32 %v9670_v46, %v1301_v43  ;;  %1758 = vmatprep.subr.bf16.mxu0 %v1357_v29  ;;  %v9755_v63 = vrot.slane %v8013_v18, %v8721_v35 }
 0x1c6   : > { %1759 = vmatpush1.bf16.msra.mxu0 %v1356_v14  ;;  %v1243_v60 = vpop.permute.xlu1 %1242  ;;  %v9758_v14 = vrot.slane %v8013_v18, %v8733_v40 }
 0x1c7   : > { %v1358_v10 = vpack.c.bf16 %v1342_v51, %v1338_v3  ;;  %v1241_v25 = vpop.permute.xlu0 %1240  ;;  %v1359_v58 = vpack.c.bf16 %v1343_v13, %v1339_v12 }
 0x1c9   : > { %1864 = vmatprep.subr.bf16.mxu1 %v1359_v58 }
 0x1ca   : > { %1865 = vmatpush1.bf16.msra.mxu1 %v1358_v10  ;;  %v1255_v6 = vpop.permute.xlu1 %1254 }
 0x1cb   : > { %v1253_v38 = vpop.permute.xlu0 %1252  ;;  %v1298_v42 = vsel %vm1280_vm7, %v1243_v60, %v1255_v6 }
 0x1cc   : > { %v1297_v1 = vsel %vm1280_vm7, %v1241_v25, %v1253_v38  ;;  %v1348_v50 = vmul.f32 %v9650_v24, %v1298_v42 }
 0x1cd   : > { %v1344_v41 = vmul.f32 %v9650_v24, %v1297_v1 }
 0x1ce   : > { %v1267_v34 = vpop.permute.xlu1 %1266 }
 0x1cf   : > { %v1292_v15 = vsel %vm1280_vm7, %v1255_v6, %v1267_v34  ;;  %v1265_v54 = vpop.permute.xlu0 %1264  ;;  %v1360_v17 = vpack.c.bf16 %v1348_v50, %v1344_v41 }
 0x1d0   : > { %v1349_v33 = vmul.f32 %v9657_v8, %v1292_v15  ;;  %v1291_v4 = vsel %vm1280_vm7, %v1253_v38, %v1265_v54 }
 0x1d1   : > { %v1345_v0 = vmul.f32 %v9657_v8, %v1291_v4 }
 0x1d2   : > { %v1279_v2 = vpop.permute.xlu1 %1278 }
 0x1d3   : > { %v1286_v16 = vsel %vm1280_vm7, %v1267_v34, %v1279_v2  ;;  %v1304_v5 = vsel %vm1280_vm7, %v1279_v2, %v1243_v60  ;;  %v1277_v24 = vpop.permute.xlu0 %1276  ;;  %v1361_v31 = vpack.c.bf16 %v1349_v33, %v1345_v0 }
 0x1d4   : > { %v1350_v19 = vmul.f32 %v9667_v45, %v1286_v16  ;;  %v1351_v32 = vmul.f32 %v9670_v46, %v1304_v5  ;;  %v1285_v44 = vsel %vm1280_vm7, %v1265_v54, %v1277_v24  ;;  %v1303_v8 = vsel %vm1280_vm7, %v1277_v24, %v1241_v25 }
 0x1d5   : > { %v1346_v30 = vmul.f32 %v9667_v45, %v1285_v44  ;;  %v1347_v36 = vmul.f32 %v9670_v46, %v1303_v8  ;;  %1760 = vmatprep.subr.bf16.mxu0 %v1361_v31 }
 0x1d6   : > { %1761 = vmatpush1.bf16.msra.mxu0 %v1360_v17  ;;  %v1379_v52 = vpop.permute.xlu1 %1378 }
 0x1d7   : > { %v1362_v21 = vpack.c.bf16 %v1350_v19, %v1346_v30  ;;  %v1377_v7 = vpop.permute.xlu0 %1376  ;;  %v1363_v53 = vpack.c.bf16 %v1351_v32, %v1347_v36 }
 0x1d9   : > { %1866 = vmatprep.subr.bf16.mxu1 %v1363_v53 }
 0x1da   : > { %1867 = vmatpush1.bf16.msra.mxu1 %v1362_v21  ;;  %v1391_v22 = vpop.permute.xlu1 %1390 }
 0x1db   : > { %v1389_v45 = vpop.permute.xlu0 %1388  ;;  %v1438_v46 = vsel %vm1424_vm8, %v1379_v52, %v1391_v22 }
 0x1dc   : > { %v1437_v56 = vsel %vm1424_vm8, %v1377_v7, %v1389_v45  ;;  %v1476_v23 = vmul.f32 %v9738_v47, %v1438_v46 }
 0x1dd   : > { %v1472_v9 = vmul.f32 %v9738_v47, %v1437_v56 }
 0x1de   : > { %v1403_v55 = vpop.permute.xlu1 %1402 }
 0x1df   : > { %v1432_v59 = vsel %vm1424_vm8, %v1391_v22, %v1403_v55  ;;  %v1401_v48 = vpop.permute.xlu0 %1400  ;;  %v1496_v28 = vpack.c.bf16 %v1476_v23, %v1472_v9 }
 0x1e0   : > { %v1477_v57 = vmul.f32 %v9745_v62, %v1432_v59  ;;  %v1431_v49 = vsel %vm1424_vm8, %v1389_v45, %v1401_v48 }
 0x1e1   : > { %v1473_v61 = vmul.f32 %v9745_v62, %v1431_v49 }
 0x1e2   : > { %v1415_v11 = vpop.permute.xlu1 %1414 }
 0x1e3   : > { %v1426_v29 = vsel %vm1424_vm8, %v1403_v55, %v1415_v11  ;;  %v1444_v51 = vsel %vm1424_vm8, %v1415_v11, %v1379_v52  ;;  %v1413_v13 = vpop.permute.xlu0 %1412  ;;  %v1497_v37 = vpack.c.bf16 %v1477_v57, %v1473_v61 }
 0x1e4   : > { %v1478_v43 = vmul.f32 %v9755_v63, %v1426_v29  ;;  %v1479_v3 = vmul.f32 %v9758_v14, %v1444_v51  ;;  %v1425_v12 = vsel %vm1424_vm8, %v1401_v48, %v1413_v13  ;;  %v1443_v60 = vsel %vm1424_vm8, %v1413_v13, %v1377_v7 }
 0x1e5   : > { %v1474_v10 = vmul.f32 %v9755_v63, %v1425_v12  ;;  %v1475_v25 = vmul.f32 %v9758_v14, %v1443_v60  ;;  %1762 = vmatprep.subr.bf16.mxu0 %v1497_v37 }
 0x1e6   : > { %1763 = vmatpush1.bf16.msra.mxu0 %v1496_v28  ;;  %v1383_v58 = vpop.permute.xlu1 %1382 }
 0x1e7   : > { %v1498_v6 = vpack.c.bf16 %v1478_v43, %v1474_v10  ;;  %v1381_v38 = vpop.permute.xlu0 %1380  ;;  %v1499_v42 = vpack.c.bf16 %v1479_v3, %v1475_v25 }
 0x1e9   : > { %1868 = vmatprep.subr.bf16.mxu1 %v1499_v42 }
 0x1ea   : > { %1869 = vmatpush1.bf16.msra.mxu1 %v1498_v6  ;;  %v1395_v1 = vpop.permute.xlu1 %1394  ;;  %v8371_v6 = vld [vmem:[%s16296_s2 + $0x2c] ss:$16 sps:$4 sm:$0xff]  }
 0x1eb   : > { %v1393_v34 = vpop.permute.xlu0 %1392  ;;  %v1440_v50 = vsel %vm1424_vm8, %v1383_v58, %v1395_v1 }
 0x1ec   : > { %v1439_v41 = vsel %vm1424_vm8, %v1381_v38, %v1393_v34  ;;  %v1484_v54 = vmul.f32 %v9738_v47, %v1440_v50 }
 0x1ed   : > { %v1480_v33 = vmul.f32 %v9738_v47, %v1439_v41 }
 0x1ee   : > { %v1407_v15 = vpop.permute.xlu1 %1406 }
 0x1ef   : > { %v1434_v4 = vsel %vm1424_vm8, %v1395_v1, %v1407_v15  ;;  %v1405_v0 = vpop.permute.xlu0 %1404  ;;  %v1500_v24 = vpack.c.bf16 %v1484_v54, %v1480_v33 }
 0x1f0   : > { %v1485_v2 = vmul.f32 %v9745_v62, %v1434_v4  ;;  %v1433_v17 = vsel %vm1424_vm8, %v1393_v34, %v1405_v0 }
 0x1f1   : > { %v1481_v16 = vmul.f32 %v9745_v62, %v1433_v17 }
 0x1f2   : > { %v1419_v5 = vpop.permute.xlu1 %1418 }
 0x1f3   : > { %v1428_v31 = vsel %vm1424_vm8, %v1407_v15, %v1419_v5  ;;  %v1446_v19 = vsel %vm1424_vm8, %v1419_v5, %v1383_v58  ;;  %v1417_v32 = vpop.permute.xlu0 %1416  ;;  %v1501_v44 = vpack.c.bf16 %v1485_v2, %v1481_v16  ;;  %v8368_v58 = vld [vmem:[%s16296_s2 + $0x8] ss:$16 sps:$4 sm:$0xff]  }
 0x1f4   : > { %v1486_v8 = vmul.f32 %v9755_v63, %v1428_v31  ;;  %v1487_v30 = vmul.f32 %v9758_v14, %v1446_v19  ;;  %v1427_v36 = vsel %vm1424_vm8, %v1405_v0, %v1417_v32  ;;  %v1445_v52 = vsel %vm1424_vm8, %v1417_v32, %v1381_v38 }
 0x1f5   : > { %v1482_v21 = vmul.f32 %v9755_v63, %v1427_v36  ;;  %v1483_v7 = vmul.f32 %v9758_v14, %v1445_v52  ;;  %1764 = vmatprep.subr.bf16.mxu0 %v1501_v44 }
 0x1f6   : > { %1765 = vmatpush1.bf16.msra.mxu0 %v1500_v24  ;;  %v1387_v53 = vpop.permute.xlu1 %1386 }
 0x1f7   : > { %v1502_v18 = vpack.c.bf16 %v1486_v8, %v1482_v21  ;;  %v1385_v22 = vpop.permute.xlu0 %1384  ;;  %v1503_v45 = vpack.c.bf16 %v1487_v30, %v1483_v7 }
 0x1f9   : > { %1870 = vmatprep.subr.bf16.mxu1 %v1503_v45 }
 0x1fa   : > { %1871 = vmatpush1.bf16.msra.mxu1 %v1502_v18  ;;  %v1399_v46 = vpop.permute.xlu1 %1398 }
 0x1fb   : > { %v1397_v56 = vpop.permute.xlu0 %1396  ;;  %v1442_v55 = vsel %vm1424_vm8, %v1387_v53, %v1399_v46 }
 0x1fc   : > { %v1441_v23 = vsel %vm1424_vm8, %v1385_v22, %v1397_v56  ;;  %v1492_v59 = vmul.f32 %v9738_v47, %v1442_v55 }
 0x1fd   : > { %v1488_v48 = vmul.f32 %v9738_v47, %v1441_v23 }
 0x1fe   : > { %v1411_v9 = vpop.permute.xlu1 %1410 }
 0x1ff   : > { %v1436_v57 = vsel %vm1424_vm8, %v1399_v46, %v1411_v9  ;;  %v1409_v49 = vpop.permute.xlu0 %1408  ;;  %v1504_v51 = vpack.c.bf16 %v1492_v59, %v1488_v48 }
 0x200   : > { %v1493_v61 = vmul.f32 %v9745_v62, %v1436_v57  ;;  %v1435_v11 = vsel %vm1424_vm8, %v1397_v56, %v1409_v49 }
 0x201   : > { %v1489_v28 = vmul.f32 %v9745_v62, %v1435_v11 }
 0x202   : > { %v1423_v29 = vpop.permute.xlu1 %1422 }
 0x203   : > { %v1430_v13 = vsel %vm1424_vm8, %v1411_v9, %v1423_v29  ;;  %v1448_v37 = vsel %vm1424_vm8, %v1423_v29, %v1387_v53  ;;  %v1421_v47 = vpop.permute.xlu0 %1420  ;;  %v1505_v43 = vpack.c.bf16 %v1493_v61, %v1489_v28 }
 0x204   : > { %v1494_v3 = vmul.f32 %v9755_v63, %v1430_v13  ;;  %v1495_v12 = vmul.f32 %v9758_v14, %v1448_v37  ;;  %v1429_v60 = vsel %vm1424_vm8, %v1409_v49, %v1421_v47  ;;  %v1447_v62 = vsel %vm1424_vm8, %v1421_v47, %v1385_v22 }
 0x205   : > { %v1490_v10 = vmul.f32 %v9755_v63, %v1429_v60  ;;  %v1491_v25 = vmul.f32 %v9758_v14, %v1447_v62  ;;  %1766 = vmatprep.subr.bf16.mxu0 %v1505_v43  ;;  %v8373_v63 = vld [vmem:[%s16296_s2 + $0x28] ss:$16 sps:$4 sm:$0xff]  }
 0x206   : > { %1767 = vmatpush1.bf16.msra.mxu0 %v1504_v51 }
 0x207   : > { %v1506_v38 = vpack.c.bf16 %v1494_v3, %v1490_v10  ;;  %v1507_v42 = vpack.c.bf16 %v1495_v12, %v1491_v25 }
 0x209   : > { %1779 = vmatmul.mubr.bf16.vlgmr.msra.gmra.mrb[0].mxu0 %v8368_v58  ;;  %1872 = vmatprep.subr.bf16.mxu1 %v1507_v42 }
 0x20a   : > { %1873 = vmatpush1.bf16.msra.mxu1 %v1506_v38  ;;  %8023 = vmatprep.mubr.msk.bf16.mxu0 %vm1686_vm6, %v8371_v6 }
 0x20d   : > { %1885 = vmatmul.mubr.bf16.vlgmr.msra.gmra.mrb[0].mxu1 %v8368_v58 }
 0x20e   : > { %8025 = vmatprep.mubr.msk.bf16.mxu1 %vm1686_vm6, %v8371_v6 }
 0x211   : > { %1789 = vmatmul.mubr.bf16.gmra.mrb[4].mxu0 %v8373_v63 }
 0x213   : > { %v1636_v41 = vpop.permute.xlu1 %1635 }
 0x214   : > { %v1631_v14 = vpop.permute.xlu0 %1630 }
 0x215   : > { %1895 = vmatmul.mubr.bf16.gmra.mrb[4].mxu1 %v8373_v63 }
 0x217   : > { %v1641_v57 = vpop.permute.xlu1 %1640 }
 0x218   : > { %v1646_v59 = vpop.permute.xlu0 %1645 }
 0x2dc   : > { %v1780_v1 = vpop.f32.mrb[0].mxu0 }
 0x2dd   : > { %v8150_v34 = vadd.f32 %v1780_v1, %v1631_v14  ;;  %v1782_v50 = vpop.f32.mrb[1].mxu0 }
 0x2de   : > { %v1784_v15 = vpop.f32.mrb[2].mxu0  ;;  %v8151_v18 = vadd.f32 %v1782_v50, %v1631_v14  ;;  %v1981_v50 = vld [vmem:[%s16295_s1] sm:$0xf] }
 0x2df   : > { %v9832_v54 = vmax.f32 %v8150_v34, 0.0  ;;  %v8152_v33 = vadd.f32 %v1784_v15, %v1636_v41  ;;  %v1786_v4 = vpop.f32.mrb[3].mxu0  ;;  %v10016_v15 = vrot.slane %v1981_v50, %v8706_v27 }
 0x2e0   : > { %v1886_v0 = vpop.f32.mrb[0].mxu1  ;;  %v8153_v22 = vadd.f32 %v1786_v4, %v1636_v41  ;;  %v9858_v45 = vmax.f32 %v8151_v18, 0.0 }
 0x2e1   : > { %16711 = vst [vmem:[#allocation7_spill] sm:$0xff] %v9832_v54  ;;  %v9834_v2 = vmax.f32 %v8152_v33, 0.0  ;;  %v8158_v17 = vadd.f32 %v1886_v0, %v1631_v14  ;;  %v1888_v16 = vpop.f32.mrb[1].mxu1  ;;  %1933 = vrot.lane.b32.xlu1 %v9832_v54, %s8446_s11 }
 0x2e2   : > { %v1890_v5 = vpop.f32.mrb[2].mxu1  ;;  %16715 = vst [vmem:[#allocation11_spill] sm:$0xff] %v9858_v45  ;;  %v8159_v46 = vadd.f32 %v1888_v16, %v1631_v14  ;;  %v9862_v56 = vmax.f32 %v8153_v22, 0.0  ;;  %v10025_v16 = vrot.slane %v1981_v50, %v8731_v39 }
 0x2e3   : > { %16712 = vst [vmem:[#allocation8_spill] sm:$0xff] %v9834_v2  ;;  %v9838_v24 = vmax.f32 %v8158_v17, 0.0  ;;  %v8160_v31 = vadd.f32 %v1890_v5, %v1636_v41  ;;  %v1892_v19 = vpop.f32.mrb[3].mxu1  ;;  %1935 = vrot.lane.b32.xlu0 %v9834_v2, %s8446_s11 }
 0x2e4   : > { %v1790_v32 = vpop.f32.mrb[4].mxu0  ;;  %16716 = vst [vmem:[#allocation12_spill] sm:$0xff] %v9862_v56  ;;  %v8161_v55 = vadd.f32 %v1892_v19, %v1636_v41  ;;  %v9866_v23 = vmax.f32 %v8159_v46, 0.0 }
 0x2e5   : > { %16713 = vst [vmem:[#allocation9_spill] sm:$0xff] %v9838_v24  ;;  %v9842_v44 = vmax.f32 %v8160_v31, 0.0  ;;  %v1792_v8 = vpop.f32.mrb[5].mxu0  ;;  %1949 = vrot.lane.b32.xlu1 %v9838_v24, %s8446_s11  ;;  %v8154_v49 = vadd.f32 %v1790_v32, %v1641_v57  ;;  %v10034_v32 = vrot.slane %v1981_v50, %v8733_v40 }
 0x2e6   : > { %v1794_v30 = vpop.f32.mrb[6].mxu0  ;;  %16717 = vst [vmem:[#allocation13_spill] sm:$0xff] %v9866_v23  ;;  %v9870_v9 = vmax.f32 %v8161_v55, 0.0  ;;  %v8155_v47 = vadd.f32 %v1792_v8, %v1641_v57 }
 0x2e7   : > { %16714 = vst [vmem:[#allocation10_spill] sm:$0xff] %v9842_v44  ;;  %v1796_v36 = vpop.f32.mrb[7].mxu0  ;;  %1951 = vrot.lane.b32.xlu0 %v9842_v44, %s8446_s11  ;;  %v8156_v48 = vadd.f32 %v1794_v30, %v1646_v59  ;;  %v9888_v28 = vmax.f32 %v8154_v49, 0.0  ;;  %v10037_v30 = vrot.slane %v1981_v50, %v8721_v35 }
 0x2e8   : > { %v1896_v52 = vpop.f32.mrb[4].mxu1  ;;  %16718 = vst [vmem:[#allocation14_spill] sm:$0xff] %v9870_v9  ;;  %v8157_v37 = vadd.f32 %v1796_v36, %v1646_v59  ;;  %v9912_v12 = vmax.f32 %v8155_v47, 0.0 }
 0x2e9   : > { %v1898_v21 = vpop.f32.mrb[5].mxu1  ;;  %2035 = vrot.lane.b32.xlu1 %v9832_v54, %s8447_s12  ;;  %v9884_v61 = vmax.f32 %v8156_v48, 0.0  ;;  %16720 = vst [vmem:[#allocation16_spill] sm:$0xff] %v9888_v28  ;;  %v8162_v29 = vadd.f32 %v1896_v52, %v1641_v57 }
 0x2ea   : > { %v1900_v7 = vpop.f32.mrb[6].mxu1  ;;  %v9908_v43 = vmax.f32 %v8157_v37, 0.0  ;;  %16724 = vst [vmem:[#allocation20_spill] sm:$0xff] %v9912_v12  ;;  %v8163_v60 = vadd.f32 %v1898_v21, %v1641_v57 }
 0x2eb   : > { %v1902_v53 = vpop.f32.mrb[7].mxu1  ;;  %2037 = vrot.lane.b32.xlu0 %v9834_v2, %s8447_s12  ;;  %16719 = vst [vmem:[#allocation15_spill] sm:$0xff] %v9884_v61  ;;  %v8164_v11 = vadd.f32 %v1900_v7, %v1646_v59  ;;  %v9896_v13 = vmax.f32 %v8162_v29, 0.0 }
 0x2ec   : > { %16723 = vst [vmem:[#allocation19_spill] sm:$0xff] %v9908_v43  ;;  %v8165_v3 = vadd.f32 %v1902_v53, %v1646_v59  ;;  %v9920_v10 = vmax.f32 %v8163_v60, 0.0 }
 0x2ed   : > { %2051 = vrot.lane.b32.xlu1 %v9838_v24, %s8447_s12  ;;  %v9892_v51 = vmax.f32 %v8164_v11, 0.0  ;;  %16722 = vst [vmem:[#allocation18_spill] sm:$0xff] %v9896_v13 }
 0x2ee   : > { %v9916_v62 = vmax.f32 %v8165_v3, 0.0  ;;  %16726 = vst [vmem:[#allocation22_spill] sm:$0xff] %v9920_v10 }
 0x2ef   : > { %2053 = vrot.lane.b32.xlu0 %v9842_v44, %s8447_s12  ;;  %16721 = vst [vmem:[#allocation17_spill] sm:$0xff] %v9892_v51 }
 0x2f0   : > { %16725 = vst [vmem:[#allocation21_spill] sm:$0xff] %v9916_v62 }
 0x2f1   : > { %2137 = vrot.lane.b32.xlu1 %v9832_v54, %s8448_s13 }
 0x2f3   : > { %2139 = vrot.lane.b32.xlu0 %v9834_v2, %s8448_s13 }
 0x2f5   : > { %1941 = vrot.lane.b32.xlu1 %v9858_v45, %s8446_s11 }
 0x2f7   : > { %1943 = vrot.lane.b32.xlu0 %v9862_v56, %s8446_s11 }
 0x2f9   : > { %1957 = vrot.lane.b32.xlu1 %v9866_v23, %s8446_s11 }
 0x2fb   : > { %1959 = vrot.lane.b32.xlu0 %v9870_v9, %s8446_s11 }
 0x2fd   : > { %2043 = vrot.lane.b32.xlu1 %v9858_v45, %s8447_s12 }
 0x2ff   : > { %2045 = vrot.lane.b32.xlu0 %v9862_v56, %s8447_s12 }
 0x301   : > { %2059 = vrot.lane.b32.xlu1 %v9866_v23, %s8447_s12 }
 0x303   : > { %2061 = vrot.lane.b32.xlu0 %v9870_v9, %s8447_s12 }
 0x305   : > { %2145 = vrot.lane.b32.xlu1 %v9858_v45, %s8448_s13 }
 0x307   : > { %1939 = vrot.lane.b32.xlu0 %v9884_v61, %s8446_s11 }
 0x309   : > { %1937 = vrot.lane.b32.xlu1 %v9888_v28, %s8446_s11 }
 0x30b   : > { %1955 = vrot.lane.b32.xlu0 %v9892_v51, %s8446_s11 }
 0x30d   : > { %1953 = vrot.lane.b32.xlu1 %v9896_v13, %s8446_s11 }
 0x30f   : > { %2041 = vrot.lane.b32.xlu0 %v9884_v61, %s8447_s12 }
 0x311   : > { %2039 = vrot.lane.b32.xlu1 %v9888_v28, %s8447_s12 }
 0x313   : > { %2057 = vrot.lane.b32.xlu0 %v9892_v51, %s8447_s12 }
 0x315   : > { %2055 = vrot.lane.b32.xlu1 %v9896_v13, %s8447_s12 }
 0x317   : > { %1947 = vrot.lane.b32.xlu0 %v9908_v43, %s8446_s11 }
 0x319   : > { %1945 = vrot.lane.b32.xlu1 %v9912_v12, %s8446_s11 }
 0x31b   : > { %1963 = vrot.lane.b32.xlu0 %v9916_v62, %s8446_s11 }
 0x31d   : > { %1961 = vrot.lane.b32.xlu1 %v9920_v10, %s8446_s11 }
 0x31f   : > { %2049 = vrot.lane.b32.xlu0 %v9908_v43, %s8447_s12 }
 0x321   : > { %2047 = vrot.lane.b32.xlu1 %v9912_v12, %s8447_s12 }
 0x323   : > { %2065 = vrot.lane.b32.xlu0 %v9916_v62, %s8447_s12 }
 0x325   : > { %2063 = vrot.lane.b32.xlu1 %v9920_v10, %s8447_s12 }
 0x327   : > { %2147 = vrot.lane.b32.xlu0 %v9862_v56, %s8448_s13 }
 0x329   : > { %2153 = vrot.lane.b32.xlu1 %v9838_v24, %s8448_s13 }
 0x32b   : > { %2155 = vrot.lane.b32.xlu0 %v9842_v44, %s8448_s13 }
 0x32d   : > { %2161 = vrot.lane.b32.xlu1 %v9866_v23, %s8448_s13 }
 0x32f   : > { %2163 = vrot.lane.b32.xlu0 %v9870_v9, %s8448_s13 }
 0x331   : > { %2141 = vrot.lane.b32.xlu1 %v9888_v28, %s8448_s13 }
 0x333   : > { %2143 = vrot.lane.b32.xlu0 %v9884_v61, %s8448_s13 }
 0x335   : > { %2149 = vrot.lane.b32.xlu1 %v9912_v12, %s8448_s13 }
 0x337   : > { %2151 = vrot.lane.b32.xlu0 %v9908_v43, %s8448_s13 }
 0x339   : > { %2157 = vrot.lane.b32.xlu1 %v9896_v13, %s8448_s13 }
 0x33b   : > { %2159 = vrot.lane.b32.xlu0 %v9892_v51, %s8448_s13 }
 0x33d   : > { %2165 = vrot.lane.b32.xlu1 %v9920_v10, %s8448_s13 }
 0x33f   : > { %2167 = vrot.lane.b32.xlu0 %v9916_v62, %s8448_s13 }
 0x341   : > { %2239 = vrot.lane.b32.xlu1 %v9832_v54, %s8449_s16 }
 0x343   : > { %2241 = vrot.lane.b32.xlu0 %v9834_v2, %s8449_s16 }
 0x345   : > { %2247 = vrot.lane.b32.xlu1 %v9858_v45, %s8449_s16 }
 0x347   : > { %2249 = vrot.lane.b32.xlu0 %v9862_v56, %s8449_s16 }
 0x349   : > { %2255 = vrot.lane.b32.xlu1 %v9838_v24, %s8449_s16 }
 0x34b   : > { %2257 = vrot.lane.b32.xlu0 %v9842_v44, %s8449_s16 }
 0x34d   : > { %2263 = vrot.lane.b32.xlu1 %v9866_v23, %s8449_s16 }
 0x34f   : > { %2265 = vrot.lane.b32.xlu0 %v9870_v9, %s8449_s16 }
 0x351   : > { %2243 = vrot.lane.b32.xlu1 %v9888_v28, %s8449_s16 }
 0x353   : > { %2245 = vrot.lane.b32.xlu0 %v9884_v61, %s8449_s16  ;;  %v1934_v25 = vpop.permute.xlu1 %1933 }
 0x355   : > { %v1936_v58 = vpop.permute.xlu0 %1935  ;;  %2251 = vrot.lane.b32.xlu1 %v9912_v12, %s8449_s16 }
 0x357   : > { %2253 = vrot.lane.b32.xlu0 %v9908_v43, %s8449_s16  ;;  %v1950_v6 = vpop.permute.xlu1 %1949 }
 0x359   : > { %v1952_v38 = vpop.permute.xlu0 %1951  ;;  %2259 = vrot.lane.b32.xlu1 %v9896_v13, %s8449_s16 }
 0x35b   : > { %2261 = vrot.lane.b32.xlu0 %v9892_v51, %s8449_s16  ;;  %v9988_v42 = vpop.permute.xlu1 %2035 }
 0x35d   : > { %v9990_v63 = vpop.permute.xlu0 %2037  ;;  %2267 = vrot.lane.b32.xlu1 %v9920_v10, %s8449_s16 }
 0x35f   : > { %2269 = vrot.lane.b32.xlu0 %v9916_v62, %s8449_s16  ;;  %v9996_v14 = vpop.permute.xlu1 %2051 }
 0x361   : > { %v9998_v1 = vpop.permute.xlu0 %2053  ;;  %2357 = vrot.lane.b32.xlu1 %v9832_v54, %s8450_s19 }
 0x363   : > { %2359 = vrot.lane.b32.xlu0 %v9834_v2, %s8450_s19  ;;  %v10004_v34 = vpop.permute.xlu1 %2137 }
 0x365   : > { %v10009_v41 = vpop.permute.xlu0 %2139  ;;  %2365 = vrot.lane.b32.xlu1 %v9858_v45, %s8450_s19 }
 0x367   : > { %2367 = vrot.lane.b32.xlu0 %v9862_v56, %s8450_s19  ;;  %v1942_v33 = vpop.permute.xlu1 %1941 }
 0x368   : > { %v1973_v4 = vsel %vm393_vm0, %v1934_v25, %v1942_v33  ;;  %v1969_v21 = vsel %vm393_vm0, %v1942_v33, %v1950_v6 }
 0x369   : > { %v1944_v0 = vpop.permute.xlu0 %1943  ;;  %2373 = vrot.lane.b32.xlu1 %v9838_v24, %s8450_s19  ;;  %v2004_v5 = vmul.f32 %v10016_v15, %v1973_v4  ;;  %v2005_v11 = vmul.f32 %v10037_v30, %v1969_v21 }
 0x36a   : > { %v1974_v17 = vsel %vm393_vm0, %v1936_v58, %v1944_v0  ;;  %v1970_v31 = vsel %vm393_vm0, %v1944_v0, %v1952_v38 }
 0x36b   : > { %v2008_v19 = vmul.f32 %v10016_v15, %v1974_v17  ;;  %2375 = vrot.lane.b32.xlu0 %v9842_v44, %s8450_s19  ;;  %v1958_v8 = vpop.permute.xlu1 %1957  ;;  %v2009_v18 = vmul.f32 %v10037_v30, %v1970_v31  ;;  %v8026_v17 = vld [vmem:[%s16295_s1 + $0x4] sm:$0xf] }
 0x36c   : > { %v1965_v36 = vsel %vm393_vm0, %v1950_v6, %v1958_v8  ;;  %v1977_v52 = vsel %vm393_vm0, %v1958_v8, %v1934_v25  ;;  %v10093_v31 = vrot.slane %v8026_v17, %v8706_v27  ;;  %v10100_v8 = vrot.slane %v8026_v17, %v8721_v35 }
 0x36d   : > { %v1960_v7 = vpop.permute.xlu0 %1959  ;;  %2381 = vrot.lane.b32.xlu1 %v9866_v23, %s8450_s19  ;;  %v2020_v53 = vpack.c.bf16 %v2008_v19, %v2004_v5  ;;  %v2003_v22 = vmul.f32 %v10025_v16, %v1977_v52  ;;  %v2006_v59 = vmul.f32 %v10034_v32, %v1965_v36  ;;  %v2021_v3 = vpack.c.bf16 %v2009_v18, %v2005_v11  ;;  %v10108_v52 = vld [vmem:[%s16295_s1 + $0x8] sm:$0xf] }
 0x36e   : > { %v1966_v46 = vsel %vm393_vm0, %v1952_v38, %v1960_v7  ;;  %v1978_v55 = vsel %vm393_vm0, %v1960_v7, %v1936_v58 }
 0x36f   : > { %v2007_v48 = vmul.f32 %v10025_v16, %v1978_v55  ;;  %v2010_v57 = vmul.f32 %v10034_v32, %v1966_v46  ;;  %2383 = vrot.lane.b32.xlu0 %v9870_v9, %s8450_s19  ;;  %2894 = vmatprep.subr.bf16.mxu0 %v2020_v53  ;;  %v2044_v49 = vpop.permute.xlu1 %2043  ;;  %v10125_v55 = vrot.slane %v8026_v17, %v8731_v39 }
 0x370   : > { %v2075_v36 = vsel %vm536_vm1, %v9988_v42, %v2044_v49  ;;  %v2071_v21 = vsel %vm536_vm1, %v2044_v49, %v9996_v14 }
 0x371   : > { %v2019_v29 = vpack.c.bf16 %v2007_v48, %v2003_v22  ;;  %v2046_v37 = vpop.permute.xlu0 %2045  ;;  %2361 = vrot.lane.b32.xlu1 %v9888_v28, %s8450_s19  ;;  %v2022_v47 = vpack.c.bf16 %v2010_v57, %v2006_v59  ;;  %v2106_v46 = vmul.f32 %v10093_v31, %v2075_v36  ;;  %v10128_v59 = vrot.slane %v8026_v17, %v8733_v40 }
 0x372   : > { %v2076_v7 = vsel %vm536_vm1, %v9990_v63, %v2046_v37  ;;  %v2072_v18 = vsel %vm536_vm1, %v2046_v37, %v9998_v1  ;;  %v10132_v48 = vrot.slane %v10108_v52, %v8706_v27  ;;  %v10137_v49 = vmul.f32 %v10100_v8, %v2071_v21 }
 0x373   : > { %2363 = vrot.lane.b32.xlu0 %v9884_v61, %s8450_s19  ;;  %2895 = vmatpush1.bf16.msra.mxu0 %v2019_v29  ;;  %v2060_v60 = vpop.permute.xlu1 %2059  ;;  %v2110_v11 = vmul.f32 %v10093_v31, %v2076_v7 }
 0x374   : > { %3000 = vmatprep.subr.bf16.mxu1 %v2022_v47  ;;  %v10146_v47 = vmul.f32 %v10100_v8, %v2072_v18  ;;  %v2079_v7 = vsel %vm536_vm1, %v2060_v60, %v9988_v42 }
 0x375   : > { %3001 = vmatpush1.bf16.msra.mxu1 %v2021_v3  ;;  %v2062_v25 = vpop.permute.xlu0 %2061  ;;  %2369 = vrot.lane.b32.xlu1 %v9912_v12, %s8450_s19 }
 0x376   : > { %v2068_v29 = vsel %vm536_vm1, %v9998_v1, %v2062_v25  ;;  %v2067_v1 = vsel %vm536_vm1, %v9996_v14, %v2060_v60 }
 0x377   : > { %2371 = vrot.lane.b32.xlu0 %v9908_v43, %s8450_s19  ;;  %v10067_v58 = vpop.permute.xlu1 %2145 }
 0x379   : > { %v1940_v6 = vpop.permute.xlu0 %1939  ;;  %2377 = vrot.lane.b32.xlu1 %v9896_v13, %s8450_s19 }
 0x37b   : > { %2379 = vrot.lane.b32.xlu0 %v9892_v51, %s8450_s19  ;;  %v1938_v38 = vpop.permute.xlu1 %1937 }
 0x37d   : > { %v1956_v50 = vpop.permute.xlu0 %1955  ;;  %2385 = vrot.lane.b32.xlu1 %v9920_v10, %s8450_s19 }
 0x37f   : > { %2387 = vrot.lane.b32.xlu0 %v9916_v62, %s8450_s19  ;;  %v1954_v33 = vpop.permute.xlu1 %1953 }
 0x381   : > { %v10077_v4 = vpop.permute.xlu0 %2041  ;;  %2459 = vrot.lane.b32.xlu1 %v9832_v54, %s8451_s24 }
 0x383   : > { %2461 = vrot.lane.b32.xlu0 %v9834_v2, %s8451_s24  ;;  %v10083_v0 = vpop.permute.xlu1 %2039 }
 0x385   : > { %v10088_v5 = vpop.permute.xlu0 %2057  ;;  %2467 = vrot.lane.b32.xlu1 %v9858_v45, %s8451_s24 }
 0x387   : > { %2469 = vrot.lane.b32.xlu0 %v9862_v56, %s8451_s24  ;;  %v10097_v19 = vpop.permute.xlu1 %2055 }
 0x389   : > { %v1948_v53 = vpop.permute.xlu0 %1947  ;;  %2475 = vrot.lane.b32.xlu1 %v9838_v24, %s8451_s24 }
 0x38a   : > { %v1976_v22 = vsel %vm393_vm0, %v1940_v6, %v1948_v53 }
 0x38b   : > { %2477 = vrot.lane.b32.xlu0 %v9842_v44, %s8451_s24  ;;  %v1946_v57 = vpop.permute.xlu1 %1945  ;;  %v2016_v3 = vmul.f32 %v10016_v15, %v1976_v22 }
 0x38c   : > { %v1975_v37 = vsel %vm393_vm0, %v1938_v38, %v1946_v57  ;;  %v1971_v17 = vsel %vm393_vm0, %v1946_v57, %v1954_v33  ;;  %v2112_v57 = vmul.f32 %v10128_v59, %v2068_v29 }
 0x38d   : > { %v2012_v36 = vmul.f32 %v10016_v15, %v1975_v37  ;;  %v1964_v21 = vpop.permute.xlu0 %1963  ;;  %2483 = vrot.lane.b32.xlu1 %v9866_v23, %s8451_s24  ;;  %v2080_v15 = vsel %vm536_vm1, %v2062_v25, %v9990_v63  ;;  %v1972_v37 = vsel %vm393_vm0, %v1948_v53, %v1956_v50  ;;  %v2013_v60 = vmul.f32 %v10037_v30, %v1971_v17 }
 0x38e   : > { %v1968_v18 = vsel %vm393_vm0, %v1956_v50, %v1964_v21  ;;  %v1980_v22 = vsel %vm393_vm0, %v1964_v21, %v1940_v6  ;;  %v2105_v17 = vmul.f32 %v10125_v55, %v2079_v7 }
 0x38f   : > { %2485 = vrot.lane.b32.xlu0 %v9870_v9, %s8451_s24  ;;  %v1962_v14 = vpop.permute.xlu1 %1961  ;;  %v2024_v42 = vpack.c.bf16 %v2016_v3, %v2012_v36  ;;  %v2015_v20 = vmul.f32 %v10025_v16, %v1980_v22  ;;  %v2018_v25 = vmul.f32 %v10034_v32, %v1968_v18  ;;  %v2123_v3 = vpack.c.bf16 %v10146_v47, %v10137_v49 }
 0x390   : > { %v1967_v6 = vsel %vm393_vm0, %v1954_v33, %v1962_v14  ;;  %v1979_v63 = vsel %vm393_vm0, %v1962_v14, %v1938_v38  ;;  %v2108_v33 = vmul.f32 %v10128_v59, %v2067_v1  ;;  %v2109_v38 = vmul.f32 %v10125_v55, %v2080_v15 }
 0x391   : > { %v2011_v29 = vmul.f32 %v10025_v16, %v1979_v63  ;;  %v2014_v50 = vmul.f32 %v10034_v32, %v1967_v6  ;;  %v2050_v53 = vpop.permute.xlu0 %2049  ;;  %2463 = vrot.lane.b32.xlu1 %v9888_v28, %s8451_s24  ;;  %2896 = vmatprep.subr.bf16.mxu0 %v2024_v42  ;;  %v2017_v36 = vmul.f32 %v10037_v30, %v1972_v37 }
 0x392   : > { %v2078_v16 = vsel %vm536_vm1, %v10077_v4, %v2050_v53  ;;  %v2177_v49 = vsel %vm680_vm2, %v10004_v34, %v10067_v58  ;;  %v2122_v30 = vpack.c.bf16 %v2110_v11, %v2106_v46  ;;  %v2124_v15 = vpack.c.bf16 %v2112_v57, %v2108_v33 }
 0x393   : > { %v2023_v21 = vpack.c.bf16 %v2015_v20, %v2011_v29  ;;  %2465 = vrot.lane.b32.xlu0 %v9884_v61, %s8451_s24  ;;  %v2048_v32 = vpop.permute.xlu1 %2047  ;;  %v2026_v18 = vpack.c.bf16 %v2018_v25, %v2014_v50  ;;  %v2025_v1 = vpack.c.bf16 %v2017_v36, %v2013_v60  ;;  %v2118_v37 = vmul.f32 %v10093_v31, %v2078_v16 }
 0x394   : > { %v2073_v47 = vsel %vm536_vm1, %v2048_v32, %v10097_v19  ;;  %v2077_v20 = vsel %vm536_vm1, %v10083_v0, %v2048_v32  ;;  %v2121_v46 = vpack.c.bf16 %v2109_v38, %v2105_v17  ;;  %v2074_v11 = vsel %vm536_vm1, %v2050_v53, %v10088_v5 }
 0x395   : > { %v2114_v7 = vmul.f32 %v10093_v31, %v2077_v20  ;;  %v2066_v22 = vpop.permute.xlu0 %2065  ;;  %2471 = vrot.lane.b32.xlu1 %v9912_v12, %s8451_s24  ;;  %2897 = vmatpush1.bf16.msra.mxu0 %v2023_v21  ;;  %v2115_v60 = vmul.f32 %v10100_v8, %v2073_v47  ;;  %v2208_v53 = vmul.f32 %v10132_v48, %v2177_v49 }
 0x396   : > { %v2070_v14 = vsel %vm536_vm1, %v10088_v5, %v2066_v22  ;;  %v2082_v42 = vsel %vm536_vm1, %v2066_v22, %v10077_v4  ;;  %3002 = vmatprep.subr.bf16.mxu1 %v2026_v18  ;;  %2898 = vmatprep.subr.bf16.mxu0 %v2122_v30  ;;  %v2202_v16 = vrot.slane %v10108_v52, %v8733_v40 }
 0x397   : > { %3003 = vmatpush1.bf16.msra.mxu1 %v2025_v1  ;;  %2473 = vrot.lane.b32.xlu0 %v9908_v43, %s8451_s24  ;;  %v2064_v31 = vpop.permute.xlu1 %2063  ;;  %v2117_v57 = vmul.f32 %v10125_v55, %v2082_v42  ;;  %v2126_v63 = vpack.c.bf16 %v2118_v37, %v2114_v7  ;;  %v2120_v5 = vmul.f32 %v10128_v59, %v2070_v14 }
 0x398   : > { %3004 = vmatprep.subr.bf16.mxu1 %v2124_v15  ;;  %v2069_v4 = vsel %vm536_vm1, %v10097_v19, %v2064_v31  ;;  %v2081_v6 = vsel %vm536_vm1, %v2064_v31, %v10083_v0  ;;  %v2119_v19 = vmul.f32 %v10100_v8, %v2074_v11  ;;  %v2198_v18 = vrot.slane %v10108_v52, %v8721_v35 }
 0x399   : > { %v2113_v25 = vmul.f32 %v10125_v55, %v2081_v6  ;;  %v2116_v29 = vmul.f32 %v10128_v59, %v2069_v4  ;;  %v2148_v50 = vpop.permute.xlu0 %2147  ;;  %2479 = vrot.lane.b32.xlu1 %v9896_v13, %s8451_s24  ;;  %2899 = vmatpush1.bf16.msra.mxu0 %v2121_v46 }
 0x39a   : > { %v2178_v0 = vsel %vm680_vm2, %v10009_v41, %v2148_v50  ;;  %2900 = vmatprep.subr.bf16.mxu0 %v2126_v63  ;;  %v2127_v38 = vpack.c.bf16 %v2119_v19, %v2115_v60 }
 0x39b   : > { %v2125_v17 = vpack.c.bf16 %v2117_v57, %v2113_v25  ;;  %v2212_v33 = vmul.f32 %v10132_v48, %v2178_v0  ;;  %3005 = vmatpush1.bf16.msra.mxu1 %v2123_v3  ;;  %2481 = vrot.lane.b32.xlu0 %v9892_v51, %s8451_s24  ;;  %v2154_v55 = vpop.permute.xlu1 %2153  ;;  %v2128_v59 = vpack.c.bf16 %v2120_v5, %v2116_v29 }
 0x39c   : > { %v2190_v3 = vrot.slane %v10108_v52, %v8731_v39  ;;  %v2173_v30 = vsel %vm680_vm2, %v10067_v58, %v2154_v55 }
 0x39d   : > { %v2156_v36 = vpop.permute.xlu0 %2155  ;;  %2487 = vrot.lane.b32.xlu1 %v9920_v10, %s8451_s24  ;;  %2901 = vmatpush1.bf16.msra.mxu0 %v2125_v17  ;;  %v2224_v8 = vpack.c.bf16 %v2212_v33, %v2208_v53  ;;  %v2209_v42 = vmul.f32 %v2198_v18, %v2173_v30 }
 0x39e   : > { %3006 = vmatprep.subr.bf16.mxu1 %v2128_v59  ;;  %v2174_v21 = vsel %vm680_vm2, %v2148_v50, %v2156_v36 }
 0x39f   : > { %3007 = vmatpush1.bf16.msra.mxu1 %v2127_v38  ;;  %2489 = vrot.lane.b32.xlu0 %v9916_v62, %s8451_s24  ;;  %v2162_v32 = vpop.permute.xlu1 %2161  ;;  %v2213_v1 = vmul.f32 %v2198_v18, %v2174_v21 }
 0x3a0   : > { %2902 = vmatprep.subr.bf16.mxu0 %v2224_v8  ;;  %v2169_v49 = vsel %vm680_vm2, %v2154_v55, %v2162_v32  ;;  %v2181_v47 = vsel %vm680_vm2, %v2162_v32, %v10004_v34 }
 0x3a1   : > { %v2164_v20 = vpop.permute.xlu0 %2163  ;;  %2561 = vrot.lane.b32.xlu1 %v9832_v54, %s8452_s29  ;;  %v2207_v22 = vmul.f32 %v2190_v3, %v2181_v47  ;;  %v2210_v15 = vmul.f32 %v2202_v16, %v2169_v49  ;;  %v2225_v60 = vpack.c.bf16 %v2213_v1, %v2209_v42  ;;  %v8028_v49 = vld [vmem:[%s16295_s1 + $0xc] sm:$0xf] }
 0x3a2   : > { %v2170_v52 = vsel %vm680_vm2, %v2156_v36, %v2164_v20  ;;  %v2182_v7 = vsel %vm680_vm2, %v2164_v20, %v10009_v41 }
 0x3a3   : > { %v2211_v37 = vmul.f32 %v2190_v3, %v2182_v7  ;;  %v2214_v34 = vmul.f32 %v2202_v16, %v2170_v52  ;;  %2563 = vrot.lane.b32.xlu0 %v9834_v2, %s8452_s29  ;;  %v2142_v14 = vpop.permute.xlu1 %2141 }
 0x3a5   : > { %v2223_v46 = vpack.c.bf16 %v2211_v37, %v2207_v22  ;;  %v2144_v11 = vpop.permute.xlu0 %2143  ;;  %2569 = vrot.lane.b32.xlu1 %v9858_v45, %s8452_s29  ;;  %v2226_v58 = vpack.c.bf16 %v2214_v34, %v2210_v15 }
 0x3a7   : > { %2571 = vrot.lane.b32.xlu0 %v9862_v56, %s8452_s29  ;;  %2903 = vmatpush1.bf16.msra.mxu0 %v2223_v46  ;;  %v2150_v41 = vpop.permute.xlu1 %2149 }
 0x3a8   : > { %3008 = vmatprep.subr.bf16.mxu1 %v2226_v58  ;;  %v2179_v31 = vsel %vm680_vm2, %v2142_v14, %v2150_v41  ;;  %v2304_v58 = vrot.slane %v8028_v49, %v8733_v40 }
 0x3a9   : > { %3009 = vmatpush1.bf16.msra.mxu1 %v2225_v60  ;;  %v2152_v57 = vpop.permute.xlu0 %2151  ;;  %2577 = vrot.lane.b32.xlu1 %v9838_v24, %s8452_s29  ;;  %v2216_v6 = vmul.f32 %v10132_v48, %v2179_v31 }
 0x3aa   : > { %v2180_v4 = vsel %vm680_vm2, %v2144_v11, %v2152_v57 }
 0x3ab   : > { %v2220_v63 = vmul.f32 %v10132_v48, %v2180_v4  ;;  %2579 = vrot.lane.b32.xlu0 %v9842_v44, %s8452_s29  ;;  %v2158_v5 = vpop.permute.xlu1 %2157 }
 0x3ac   : > { %v2175_v17 = vsel %vm680_vm2, %v2150_v41, %v2158_v5  ;;  %v2300_v41 = vrot.slane %v8028_v49, %v8721_v35 }
 0x3ad   : > { %v2160_v25 = vpop.permute.xlu0 %2159  ;;  %2585 = vrot.lane.b32.xlu1 %v9866_v23, %s8452_s29  ;;  %v2228_v29 = vpack.c.bf16 %v2220_v63, %v2216_v6  ;;  %v2217_v47 = vmul.f32 %v2198_v18, %v2175_v17 }
 0x3ae   : > { %v2176_v50 = vsel %vm680_vm2, %v2152_v57, %v2160_v25 }
 0x3af   : > { %2587 = vrot.lane.b32.xlu0 %v9870_v9, %s8452_s29  ;;  %2904 = vmatprep.subr.bf16.mxu0 %v2228_v29  ;;  %v2166_v53 = vpop.permute.xlu1 %2165  ;;  %v2221_v33 = vmul.f32 %v2198_v18, %v2176_v50  ;;  %v8376_v29 = vld [vmem:[%s16298_s4 + $0x4] ss:$12 sps:$4 sm:$0xff]  }
 0x3b0   : > { %v2171_v48 = vsel %vm680_vm2, %v2158_v5, %v2166_v53  ;;  %v2183_v19 = vsel %vm680_vm2, %v2166_v53, %v2142_v14  ;;  %2926 = vmatprep.mubr.bf16.mxu0 %v8376_v29  ;;  %3032 = vmatprep.mubr.bf16.mxu1 %v8376_v29 }
 0x3b1   : > { %v2168_v0 = vpop.permute.xlu0 %2167  ;;  %2565 = vrot.lane.b32.xlu1 %v9888_v28, %s8452_s29  ;;  %v2215_v38 = vmul.f32 %v2190_v3, %v2183_v19  ;;  %v2218_v36 = vmul.f32 %v2202_v16, %v2171_v48  ;;  %v2229_v52 = vpack.c.bf16 %v2221_v33, %v2217_v47 }
 0x3b2   : > { %v2172_v55 = vsel %vm680_vm2, %v2160_v25, %v2168_v0  ;;  %v2184_v59 = vsel %vm680_vm2, %v2168_v0, %v2144_v11  ;;  %v2292_v11 = vrot.slane %v8028_v49, %v8731_v39 }
 0x3b3   : > { %v2219_v8 = vmul.f32 %v2190_v3, %v2184_v59  ;;  %v2222_v21 = vmul.f32 %v2202_v16, %v2172_v55  ;;  %2567 = vrot.lane.b32.xlu0 %v9884_v61, %s8452_s29  ;;  %v2240_v32 = vpop.permute.xlu1 %2239  ;;  %v2296_v3 = vrot.slane %v8028_v49, %v8706_v27 }
 0x3b5   : > { %v2227_v20 = vpack.c.bf16 %v2219_v8, %v2215_v38  ;;  %v2242_v30 = vpop.permute.xlu0 %2241  ;;  %2573 = vrot.lane.b32.xlu1 %v9912_v12, %s8452_s29  ;;  %v2230_v1 = vpack.c.bf16 %v2222_v21, %v2218_v36 }
 0x3b7   : > { %2575 = vrot.lane.b32.xlu0 %v9908_v43, %s8452_s29  ;;  %2905 = vmatpush1.bf16.msra.mxu0 %v2227_v20  ;;  %v2248_v16 = vpop.permute.xlu1 %2247 }
 0x3b8   : > { %3010 = vmatprep.subr.bf16.mxu1 %v2230_v1  ;;  %v2279_v7 = vsel %vm824_vm3, %v2240_v32, %v2248_v16 }
 0x3b9   : > { %3011 = vmatpush1.bf16.msra.mxu1 %v2229_v52  ;;  %v2250_v18 = vpop.permute.xlu0 %2249  ;;  %2581 = vrot.lane.b32.xlu1 %v9896_v13, %s8452_s29  ;;  %v2310_v15 = vmul.f32 %v2296_v3, %v2279_v7 }
 0x3ba   : > { %v2280_v22 = vsel %vm824_vm3, %v2242_v30, %v2250_v18 }
 0x3bb   : > { %v2314_v37 = vmul.f32 %v2296_v3, %v2280_v22  ;;  %2583 = vrot.lane.b32.xlu0 %v9892_v51, %s8452_s29  ;;  %v2256_v34 = vpop.permute.xlu1 %2255 }
 0x3bc   : > { %v2275_v6 = vsel %vm824_vm3, %v2248_v16, %v2256_v34 }
 0x3bd   : > { %v2258_v14 = vpop.permute.xlu0 %2257  ;;  %2589 = vrot.lane.b32.xlu1 %v9920_v10, %s8452_s29  ;;  %v2326_v42 = vpack.c.bf16 %v2314_v37, %v2310_v15  ;;  %v2311_v17 = vmul.f32 %v2300_v41, %v2275_v6 }
 0x3be   : > { %v2276_v46 = vsel %vm824_vm3, %v2250_v18, %v2258_v14 }
 0x3bf   : > { %2591 = vrot.lane.b32.xlu0 %v9916_v62, %s8452_s29  ;;  %2906 = vmatprep.subr.bf16.mxu0 %v2326_v42  ;;  %v2264_v60 = vpop.permute.xlu1 %2263  ;;  %v2315_v63 = vmul.f32 %v2300_v41, %v2276_v46 }
 0x3c0   : > { %v2271_v31 = vsel %vm824_vm3, %v2256_v34, %v2264_v60  ;;  %v2283_v57 = vsel %vm824_vm3, %v2264_v60, %v2240_v32 }
 0x3c1   : > { %v2266_v4 = vpop.permute.xlu0 %2265  ;;  %2663 = vrot.lane.b32.xlu1 %v9832_v54, %s8453_s15  ;;  %v2309_v50 = vmul.f32 %v2292_v11, %v2283_v57  ;;  %v2312_v53 = vmul.f32 %v2304_v58, %v2271_v31  ;;  %v2327_v38 = vpack.c.bf16 %v2315_v63, %v2311_v17  ;;  %v2343_v17 = vpack.c.bf16 %v9842_v44, %v9838_v24 }
 0x3c2   : > { %v2272_v5 = vsel %vm824_vm3, %v2258_v14, %v2266_v4  ;;  %v2284_v25 = vsel %vm824_vm3, %v2266_v4, %v2242_v30 }
 0x3c3   : > { %v2313_v48 = vmul.f32 %v2292_v11, %v2284_v25  ;;  %v2316_v19 = vmul.f32 %v2304_v58, %v2272_v5  ;;  %2665 = vrot.lane.b32.xlu0 %v9834_v2, %s8453_s15  ;;  %v2244_v0 = vpop.permute.xlu1 %2243  ;;  %v2342_v5 = vpack.c.bf16 %v9862_v56, %v9858_v45 }
 0x3c5   : > { %v2325_v33 = vpack.c.bf16 %v2313_v48, %v2309_v50  ;;  %v2246_v55 = vpop.permute.xlu0 %2245  ;;  %2671 = vrot.lane.b32.xlu1 %v9858_v45, %s8453_s15  ;;  %v2328_v59 = vpack.c.bf16 %v2316_v19, %v2312_v53  ;;  %v2341_v50 = vpack.c.bf16 %v9834_v2, %v9832_v54  ;;  %v2346_v53 = vpack.c.bf16 %v9908_v43, %v9912_v12 }
 0x3c7   : > { %2673 = vrot.lane.b32.xlu0 %v9862_v56, %s8453_s15  ;;  %2907 = vmatpush1.bf16.msra.mxu0 %v2325_v33  ;;  %v2252_v36 = vpop.permute.xlu1 %2251 }
 0x3c8   : > { %3012 = vmatprep.subr.bf16.mxu1 %v2328_v59  ;;  %v2281_v8 = vsel %vm824_vm3, %v2244_v0, %v2252_v36  ;;  %v2348_v59 = vpack.c.bf16 %v9916_v62, %v9920_v10 }
 0x3c9   : > { %3013 = vmatpush1.bf16.msra.mxu1 %v2327_v38  ;;  %v2254_v21 = vpop.permute.xlu0 %2253  ;;  %2679 = vrot.lane.b32.xlu1 %v9838_v24, %s8453_s15  ;;  %v2318_v49 = vmul.f32 %v2296_v3, %v2281_v8  ;;  %v2345_v8 = vpack.c.bf16 %v9884_v61, %v9888_v28 }
 0x3ca   : > { %v2282_v32 = vsel %vm824_vm3, %v2246_v55, %v2254_v21 }
 0x3cb   : > { %v2322_v47 = vmul.f32 %v2296_v3, %v2282_v32  ;;  %2681 = vrot.lane.b32.xlu0 %v9842_v44, %s8453_s15  ;;  %v2260_v20 = vpop.permute.xlu1 %2259 }
 0x3cc   : > { %v2277_v22 = vsel %vm824_vm3, %v2252_v36, %v2260_v20 }
 0x3cd   : > { %v2262_v30 = vpop.permute.xlu0 %2261  ;;  %2687 = vrot.lane.b32.xlu1 %v9866_v23, %s8453_s15  ;;  %v2330_v1 = vpack.c.bf16 %v2322_v47, %v2318_v49  ;;  %v2319_v57 = vmul.f32 %v2300_v41, %v2277_v22  ;;  %v2347_v47 = vpack.c.bf16 %v9892_v51, %v9896_v13  ;;  %v1930_v22 = vld [vmem:[%s16299_s5 + $0x8] sm:$0xff] }
 0x3ce   : > { %v2278_v52 = vsel %vm824_vm3, %v2254_v21, %v2262_v30 }
 0x3cf   : > { %2689 = vrot.lane.b32.xlu0 %v9870_v9, %s8453_s15  ;;  %2908 = vmatprep.subr.bf16.mxu0 %v2330_v1  ;;  %v2268_v16 = vpop.permute.xlu1 %2267  ;;  %v2323_v15 = vmul.f32 %v2300_v41, %v2278_v52  ;;  %v8029_v41 = vld [vmem:[%s16295_s1 + $0x14] sm:$0xf] }
 0x3d0   : > { %v2273_v3 = vsel %vm824_vm3, %v2260_v20, %v2268_v16  ;;  %v2285_v7 = vsel %vm824_vm3, %v2268_v16, %v2244_v0  ;;  %v10399_v19 = vrot.slane %v8029_v41, %v8706_v27  ;;  %v2410_v33 = vrot.slane %v8029_v41, %v8731_v39  ;;  %v1929_v20 = vld [vmem:[%s16299_s5] sm:$0xff] }
 0x3d1   : > { %v2270_v18 = vpop.permute.xlu0 %2269  ;;  %2667 = vrot.lane.b32.xlu1 %v9888_v28, %s8453_s15  ;;  %v2317_v14 = vmul.f32 %v2292_v11, %v2285_v7  ;;  %v2320_v42 = vmul.f32 %v2304_v58, %v2273_v3  ;;  %v2331_v25 = vpack.c.bf16 %v2323_v15, %v2319_v57  ;;  %v2418_v49 = vrot.slane %v8029_v41, %v8721_v35  ;;  %v3184_v28 = vld [vmem:[%s16295_s1] sm:$0xf] }
 0x3d2   : > { %v2274_v37 = vsel %vm824_vm3, %v2262_v30, %v2270_v18  ;;  %v2286_v34 = vsel %vm824_vm3, %v2270_v18, %v2246_v55  ;;  %v2422_v52 = vrot.slane %v8029_v41, %v8733_v40  ;;  %v10908_v45 = vrot.slane %v3184_v28, %v8706_v27 }
 0x3d3   : > { %v2321_v46 = vmul.f32 %v2292_v11, %v2286_v34  ;;  %v2324_v60 = vmul.f32 %v2304_v58, %v2274_v37  ;;  %2669 = vrot.lane.b32.xlu0 %v9884_v61, %s8453_s15  ;;  %v2358_v31 = vpop.permute.xlu1 %2357  ;;  %v2344_v58 = vpack.c.bf16 %v9870_v9, %v9866_v23 }
 0x3d5   : > { %v2329_v4 = vpack.c.bf16 %v2321_v46, %v2317_v14  ;;  %v2360_v6 = vpop.permute.xlu0 %2359  ;;  %2675 = vrot.lane.b32.xlu1 %v9912_v12, %s8453_s15  ;;  %v2332_v63 = vpack.c.bf16 %v2324_v60, %v2320_v42  ;;  %v1931_v60 = vld [vmem:[%s16299_s5 + $0x10] sm:$0xff] }
 0x3d7   : > { %2677 = vrot.lane.b32.xlu0 %v9908_v43, %s8453_s15  ;;  %2909 = vmatpush1.bf16.msra.mxu0 %v2329_v4  ;;  %v2366_v11 = vpop.permute.xlu1 %2365 }
 0x3d8   : > { %3014 = vmatprep.subr.bf16.mxu1 %v2332_v63  ;;  %2910 = vmatprep.subr.bf16.mxu0 %v2342_v5  ;;  %v2397_v38 = vsel %vm992_vm4, %v2358_v31, %v2366_v11  ;;  %v1932_v5 = vld [vmem:[%s16299_s5 + $0x18] sm:$0xff] }
 0x3d9   : > { %3015 = vmatpush1.bf16.msra.mxu1 %v2331_v25  ;;  %v2368_v29 = vpop.permute.xlu0 %2367  ;;  %2683 = vrot.lane.b32.xlu1 %v9896_v13, %s8453_s15  ;;  %v2427_v3 = vmul.f32 %v2410_v33, %v2397_v38 }
 0x3da   : > { %3016 = vmatprep.subr.bf16.mxu1 %v2344_v58  ;;  %v2398_v48 = vsel %vm992_vm4, %v2360_v6, %v2368_v29 }
 0x3db   : > { %2685 = vrot.lane.b32.xlu0 %v9892_v51, %s8453_s15  ;;  %v2374_v0 = vpop.permute.xlu1 %2373  ;;  %2911 = vmatpush1.bf16.msra.mxu0 %v2341_v50  ;;  %v2431_v21 = vmul.f32 %v2410_v33, %v2398_v48 }
 0x3dc   : > { %v2393_v55 = vsel %vm992_vm4, %v2366_v11, %v2374_v0  ;;  %2912 = vmatprep.subr.bf16.mxu0 %v2346_v53 }
 0x3dd   : > { %3017 = vmatpush1.bf16.msra.mxu1 %v2343_v17  ;;  %v2376_v36 = vpop.permute.xlu0 %2375  ;;  %2691 = vrot.lane.b32.xlu1 %v9920_v10, %s8453_s15  ;;  %v2428_v30 = vmul.f32 %v10399_v19, %v2393_v55  ;;  %v2443_v34 = vpack.c.bf16 %v2431_v21, %v2427_v3 }
 0x3de   : > { %v2394_v32 = vsel %vm992_vm4, %v2368_v29, %v2376_v36  ;;  %3018 = vmatprep.subr.bf16.mxu1 %v2348_v59 }
 0x3df   : > { %v2432_v1 = vmul.f32 %v10399_v19, %v2394_v32  ;;  %2693 = vrot.lane.b32.xlu0 %v9916_v62, %s8453_s15  ;;  %v2382_v16 = vpop.permute.xlu1 %2381  ;;  %2913 = vmatpush1.bf16.msra.mxu0 %v2345_v8 }
 0x3e0   : > { %v2389_v7 = vsel %vm992_vm4, %v2374_v0, %v2382_v16  ;;  %v2401_v18 = vsel %vm992_vm4, %v2382_v16, %v2358_v31 }
 0x3e1   : > { %3019 = vmatpush1.bf16.msra.mxu1 %v2347_v47  ;;  %v2384_v15 = vpop.permute.xlu0 %2383  ;;  %2839 = vperm.xlu1 %8361, %v1929_v20   ;;  %v2444_v37 = vpack.c.bf16 %v2432_v1, %v2428_v30  ;;  %v2429_v14 = vmul.f32 %v2418_v49, %v2389_v7  ;;  %v2430_v31 = vmul.f32 %v2422_v52, %v2401_v18 }
 0x3e2   : > { %v2390_v42 = vsel %vm992_vm4, %v2376_v36, %v2384_v15  ;;  %v2402_v46 = vsel %vm992_vm4, %v2384_v15, %v2360_v6 }
 0x3e3   : > { %v2433_v57 = vmul.f32 %v2418_v49, %v2390_v42  ;;  %v2434_v4 = vmul.f32 %v2422_v52, %v2402_v46  ;;  %2844 = vperm.xlu0 %8360, %v1930_v22   ;;  %v2362_v63 = vpop.permute.xlu1 %2361  ;;  %2914 = vmatprep.subr.bf16.mxu0 %v2444_v37 }
 0x3e4   : > { %2915 = vmatpush1.bf16.msra.mxu0 %v2443_v34 }
 0x3e5   : > { %v2445_v25 = vpack.c.bf16 %v2433_v57, %v2429_v14  ;;  %v2364_v11 = vpop.permute.xlu0 %2363  ;;  %2849 = vperm.xlu1 %8361, %v1931_v60   ;;  %v2446_v58 = vpack.c.bf16 %v2434_v4, %v2430_v31  ;;  %v8030_v14 = vld [vmem:[%s16295_s1 + $0x18] sm:$0xf] }
 0x3e6   : > { %v2512_v60 = vrot.slane %v8030_v14, %v8731_v39 }
 0x3e7   : > { %2854 = vperm.xlu0 %8360, %v1932_v5   ;;  %3020 = vmatprep.subr.bf16.mxu1 %v2446_v58  ;;  %v2370_v6 = vpop.permute.xlu1 %2369  ;;  %v2520_v58 = vrot.slane %v8030_v14, %v8721_v35 }
 0x3e8   : > { %3021 = vmatpush1.bf16.msra.mxu1 %v2445_v25  ;;  %v2399_v48 = vsel %vm992_vm4, %v2362_v63, %v2370_v6 }
 0x3e9   : > { %v2372_v41 = vpop.permute.xlu0 %2371  ;;  %v2435_v8 = vmul.f32 %v2410_v33, %v2399_v48 }
 0x3ea   : > { %v2400_v29 = vsel %vm992_vm4, %v2364_v11, %v2372_v41 }
 0x3eb   : > { %v2378_v50 = vpop.permute.xlu1 %2377  ;;  %v2439_v17 = vmul.f32 %v2410_v33, %v2400_v29 }
 0x3ec   : > { %v2395_v53 = vsel %vm992_vm4, %v2370_v6, %v2378_v50  ;;  %v2524_v6 = vrot.slane %v8030_v14, %v8733_v40 }
 0x3ed   : > { %v2380_v0 = vpop.permute.xlu0 %2379  ;;  %v2436_v59 = vmul.f32 %v10399_v19, %v2395_v53  ;;  %v2447_v30 = vpack.c.bf16 %v2439_v17, %v2435_v8 }
 0x3ee   : > { %v2396_v55 = vsel %vm992_vm4, %v2372_v41, %v2380_v0 }
 0x3ef   : > { %v2440_v38 = vmul.f32 %v10399_v19, %v2396_v55  ;;  %v2386_v36 = vpop.permute.xlu1 %2385 }
 0x3f0   : > { %v2391_v21 = vsel %vm992_vm4, %v2378_v50, %v2386_v36  ;;  %v2403_v32 = vsel %vm992_vm4, %v2386_v36, %v2362_v63 }
 0x3f1   : > { %v2388_v47 = vpop.permute.xlu0 %2387  ;;  %v2448_v20 = vpack.c.bf16 %v2440_v38, %v2436_v59  ;;  %v2437_v3 = vmul.f32 %v2418_v49, %v2391_v21  ;;  %v2438_v7 = vmul.f32 %v2422_v52, %v2403_v32 }
 0x3f2   : > { %v2392_v1 = vsel %vm992_vm4, %v2380_v0, %v2388_v47  ;;  %v2404_v16 = vsel %vm992_vm4, %v2388_v47, %v2364_v11 }
 0x3f3   : > { %v2441_v19 = vmul.f32 %v2418_v49, %v2392_v1  ;;  %v2442_v18 = vmul.f32 %v2422_v52, %v2404_v16  ;;  %v2460_v33 = vpop.permute.xlu1 %2459  ;;  %2916 = vmatprep.subr.bf16.mxu0 %v2448_v20  ;;  %v2516_v49 = vrot.slane %v8030_v14, %v8706_v27 }
 0x3f4   : > { %2917 = vmatpush1.bf16.msra.mxu0 %v2447_v30 }
 0x3f5   : > { %v2449_v22 = vpack.c.bf16 %v2441_v19, %v2437_v3  ;;  %v2462_v15 = vpop.permute.xlu0 %2461  ;;  %v2450_v37 = vpack.c.bf16 %v2442_v18, %v2438_v7 }
 0x3f7   : > { %3022 = vmatprep.subr.bf16.mxu1 %v2450_v37  ;;  %v2468_v34 = vpop.permute.xlu1 %2467 }
 0x3f8   : > { %3023 = vmatpush1.bf16.msra.mxu1 %v2449_v22  ;;  %v2499_v57 = vsel %vm1136_vm5, %v2460_v33, %v2468_v34 }
 0x3f9   : > { %v2470_v42 = vpop.permute.xlu0 %2469  ;;  %v2529_v29 = vmul.f32 %v2512_v60, %v2499_v57 }
 0x3fa   : > { %v2500_v46 = vsel %vm1136_vm5, %v2462_v15, %v2470_v42 }
 0x3fb   : > { %v2476_v52 = vpop.permute.xlu1 %2475  ;;  %v2533_v63 = vmul.f32 %v2512_v60, %v2500_v46 }
 0x3fc   : > { %v2495_v31 = vsel %vm1136_vm5, %v2468_v34, %v2476_v52 }
 0x3fd   : > { %v2478_v4 = vpop.permute.xlu0 %2477  ;;  %v2530_v25 = vmul.f32 %v2516_v49, %v2495_v31  ;;  %v2545_v17 = vpack.c.bf16 %v2533_v63, %v2529_v29 }
 0x3fe   : > { %v2496_v5 = vsel %vm1136_vm5, %v2470_v42, %v2478_v4 }
 0x3ff   : > { %v2534_v11 = vmul.f32 %v2516_v49, %v2496_v5  ;;  %v2484_v41 = vpop.permute.xlu1 %2483 }
 0x400   : > { %v2491_v50 = vsel %vm1136_vm5, %v2476_v52, %v2484_v41  ;;  %v2503_v53 = vsel %vm1136_vm5, %v2484_v41, %v2460_v33 }
 0x401   : > { %v2486_v48 = vpop.permute.xlu0 %2485  ;;  %v2546_v0 = vpack.c.bf16 %v2534_v11, %v2530_v25  ;;  %v2531_v38 = vmul.f32 %v2520_v58, %v2491_v50  ;;  %v2532_v36 = vmul.f32 %v2524_v6, %v2503_v53 }
 0x402   : > { %v2492_v55 = vsel %vm1136_vm5, %v2478_v4, %v2486_v48  ;;  %v2504_v59 = vsel %vm1136_vm5, %v2486_v48, %v2462_v15 }
 0x403   : > { %v2535_v8 = vmul.f32 %v2520_v58, %v2492_v55  ;;  %v2536_v21 = vmul.f32 %v2524_v6, %v2504_v59  ;;  %v2464_v32 = vpop.permute.xlu1 %2463  ;;  %2918 = vmatprep.subr.bf16.mxu0 %v2546_v0  ;;  %v8031_v0 = vld [vmem:[%s16295_s1 + $0x1c] sm:$0xf] }
 0x404   : > { %2919 = vmatpush1.bf16.msra.mxu0 %v2545_v17  ;;  %v2614_v59 = vrot.slane %v8031_v0, %v8731_v39 }
 0x405   : > { %v2547_v47 = vpack.c.bf16 %v2535_v8, %v2531_v38  ;;  %v2466_v20 = vpop.permute.xlu0 %2465  ;;  %v2548_v30 = vpack.c.bf16 %v2536_v21, %v2532_v36 }
 0x407   : > { %3024 = vmatprep.subr.bf16.mxu1 %v2548_v30  ;;  %v2472_v1 = vpop.permute.xlu1 %2471  ;;  %v2622_v30 = vrot.slane %v8031_v0, %v8721_v35 }
 0x408   : > { %3025 = vmatpush1.bf16.msra.mxu1 %v2547_v47  ;;  %v2501_v18 = vsel %vm1136_vm5, %v2464_v32, %v2472_v1 }
 0x409   : > { %v2474_v16 = vpop.permute.xlu0 %2473  ;;  %v2537_v42 = vmul.f32 %v2512_v60, %v2501_v18 }
 0x40a   : > { %v2502_v3 = vsel %vm1136_vm5, %v2466_v20, %v2474_v16 }
 0x40b   : > { %v2480_v7 = vpop.permute.xlu1 %2479  ;;  %v2541_v22 = vmul.f32 %v2512_v60, %v2502_v3 }
 0x40c   : > { %v2497_v19 = vsel %vm1136_vm5, %v2472_v1, %v2480_v7  ;;  %v2626_v1 = vrot.slane %v8031_v0, %v8733_v40 }
 0x40d   : > { %v2482_v33 = vpop.permute.xlu0 %2481  ;;  %v2538_v37 = vmul.f32 %v2516_v49, %v2497_v19  ;;  %v2549_v4 = vpack.c.bf16 %v2541_v22, %v2537_v42 }
 0x40e   : > { %v2498_v15 = vsel %vm1136_vm5, %v2474_v16, %v2482_v33 }
 0x40f   : > { %v2542_v34 = vmul.f32 %v2516_v49, %v2498_v15  ;;  %v2488_v14 = vpop.permute.xlu1 %2487 }
 0x410   : > { %v2493_v46 = vsel %vm1136_vm5, %v2480_v7, %v2488_v14  ;;  %v2505_v52 = vsel %vm1136_vm5, %v2488_v14, %v2464_v32 }
 0x411   : > { %v2490_v31 = vpop.permute.xlu0 %2489  ;;  %v2550_v57 = vpack.c.bf16 %v2542_v34, %v2538_v37  ;;  %v2539_v25 = vmul.f32 %v2520_v58, %v2493_v46  ;;  %v2540_v11 = vmul.f32 %v2524_v6, %v2505_v52 }
 0x412   : > { %v2494_v63 = vsel %vm1136_vm5, %v2482_v33, %v2490_v31  ;;  %v2506_v5 = vsel %vm1136_vm5, %v2490_v31, %v2466_v20 }
 0x413   : > { %v2543_v49 = vmul.f32 %v2520_v58, %v2494_v63  ;;  %v2544_v41 = vmul.f32 %v2524_v6, %v2506_v5  ;;  %v2562_v60 = vpop.permute.xlu1 %2561  ;;  %2920 = vmatprep.subr.bf16.mxu0 %v2550_v57  ;;  %v2618_v58 = vrot.slane %v8031_v0, %v8706_v27 }
 0x414   : > { %2921 = vmatpush1.bf16.msra.mxu0 %v2549_v4 }
 0x415   : > { %v2551_v29 = vpack.c.bf16 %v2543_v49, %v2539_v25  ;;  %v2564_v50 = vpop.permute.xlu0 %2563  ;;  %v2552_v53 = vpack.c.bf16 %v2544_v41, %v2540_v11 }
 0x417   : > { %3026 = vmatprep.subr.bf16.mxu1 %v2552_v53  ;;  %v2570_v48 = vpop.permute.xlu1 %2569 }
 0x418   : > { %3027 = vmatpush1.bf16.msra.mxu1 %v2551_v29  ;;  %v2601_v36 = vsel %vm1280_vm7, %v2562_v60, %v2570_v48 }
 0x419   : > { %v2572_v17 = vpop.permute.xlu0 %2571  ;;  %v2631_v3 = vmul.f32 %v2614_v59, %v2601_v36 }
 0x41a   : > { %v2602_v55 = vsel %vm1280_vm7, %v2564_v50, %v2572_v17 }
 0x41b   : > { %v2578_v6 = vpop.permute.xlu1 %2577  ;;  %v2635_v21 = vmul.f32 %v2614_v59, %v2602_v55 }
 0x41c   : > { %v2597_v38 = vsel %vm1280_vm7, %v2570_v48, %v2578_v6 }
 0x41d   : > { %v2580_v8 = vpop.permute.xlu0 %2579  ;;  %v2632_v47 = vmul.f32 %v2618_v58, %v2597_v38  ;;  %v2647_v22 = vpack.c.bf16 %v2635_v21, %v2631_v3  ;;  %v8374_v3 = vld [vmem:[%s16298_s4] ss:$12 sps:$4 sm:$0xff]  }
 0x41e   : > { %v2598_v32 = vsel %vm1280_vm7, %v2572_v17, %v2580_v8 }
 0x41f   : > { %v2636_v20 = vmul.f32 %v2618_v58, %v2598_v32  ;;  %v2586_v16 = vpop.permute.xlu1 %2585 }
 0x420   : > { %v2593_v7 = vsel %vm1280_vm7, %v2578_v6, %v2586_v16  ;;  %v2605_v19 = vsel %vm1280_vm7, %v2586_v16, %v2562_v60 }
 0x421   : > { %v2588_v18 = vpop.permute.xlu0 %2587  ;;  %v2648_v33 = vpack.c.bf16 %v2636_v20, %v2632_v47  ;;  %v2633_v34 = vmul.f32 %v2622_v30, %v2593_v7  ;;  %v2634_v14 = vmul.f32 %v2626_v1, %v2605_v19  ;;  %v8377_v7 = vld [vmem:[%s16298_s4 + $0x1c] ss:$12 sps:$4 sm:$0xff]  }
 0x422   : > { %v2594_v15 = vsel %vm1280_vm7, %v2580_v8, %v2588_v18  ;;  %v2606_v37 = vsel %vm1280_vm7, %v2588_v18, %v2564_v50 }
 0x423   : > { %v2637_v42 = vmul.f32 %v2622_v30, %v2594_v15  ;;  %v2638_v46 = vmul.f32 %v2626_v1, %v2606_v37  ;;  %v2566_v52 = vpop.permute.xlu1 %2565  ;;  %2922 = vmatprep.subr.bf16.mxu0 %v2648_v33 }
 0x424   : > { %2923 = vmatpush1.bf16.msra.mxu0 %v2647_v22 }
 0x425   : > { %v2649_v31 = vpack.c.bf16 %v2637_v42, %v2633_v34  ;;  %v2568_v57 = vpop.permute.xlu0 %2567  ;;  %v2650_v4 = vpack.c.bf16 %v2638_v46, %v2634_v14  ;;  %v8379_v14 = vld [vmem:[%s16298_s4 + $0x18] ss:$12 sps:$4 sm:$0xff]  }
 0x427   : > { %3028 = vmatprep.subr.bf16.mxu1 %v2650_v4  ;;  %v2574_v63 = vpop.permute.xlu1 %2573 }
 0x428   : > { %3029 = vmatpush1.bf16.msra.mxu1 %v2649_v31  ;;  %v2603_v41 = vsel %vm1280_vm7, %v2566_v52, %v2574_v63 }
 0x429   : > { %v2576_v5 = vpop.permute.xlu0 %2575  ;;  %v2639_v17 = vmul.f32 %v2614_v59, %v2603_v41 }
 0x42a   : > { %v2604_v25 = vsel %vm1280_vm7, %v2568_v57, %v2576_v5 }
 0x42b   : > { %v2582_v11 = vpop.permute.xlu1 %2581  ;;  %v2643_v29 = vmul.f32 %v2614_v59, %v2604_v25 }
 0x42c   : > { %v2599_v49 = vsel %vm1280_vm7, %v2574_v63, %v2582_v11 }
 0x42d   : > { %v2584_v60 = vpop.permute.xlu0 %2583  ;;  %v2640_v53 = vmul.f32 %v2618_v58, %v2599_v49  ;;  %v2651_v8 = vpack.c.bf16 %v2643_v29, %v2639_v17 }
 0x42e   : > { %v2600_v50 = vsel %vm1280_vm7, %v2576_v5, %v2584_v60 }
 0x42f   : > { %v2644_v48 = vmul.f32 %v2618_v58, %v2600_v50  ;;  %v2590_v0 = vpop.permute.xlu1 %2589  ;;  %v16727_v50 = vmov 0  }
 0x430   : > { %v2595_v55 = vsel %vm1280_vm7, %v2582_v11, %v2590_v0  ;;  %v2607_v6 = vsel %vm1280_vm7, %v2590_v0, %v2566_v52 }
 0x431   : > { %v2592_v38 = vpop.permute.xlu0 %2591  ;;  %v2652_v36 = vpack.c.bf16 %v2644_v48, %v2640_v53  ;;  %v2641_v47 = vmul.f32 %v2622_v30, %v2595_v55  ;;  %v2642_v20 = vmul.f32 %v2626_v1, %v2607_v6 }
 0x432   : > { %v2596_v21 = vsel %vm1280_vm7, %v2584_v60, %v2592_v38  ;;  %v2608_v32 = vsel %vm1280_vm7, %v2592_v38, %v2568_v57 }
 0x433   : > { %v2645_v58 = vmul.f32 %v2622_v30, %v2596_v21  ;;  %v2646_v16 = vmul.f32 %v2626_v1, %v2608_v32  ;;  %v2664_v59 = vpop.permute.xlu1 %2663  ;;  %2924 = vmatprep.subr.bf16.mxu0 %v2652_v36  ;;  %v8032_v30 = vld [vmem:[%s16295_s1 + $0x20] sm:$0xf] }
 0x434   : > { %2925 = vmatpush1.bf16.msra.mxu0 %v2651_v8  ;;  %v2720_v37 = vrot.slane %v8032_v30, %v8706_v27  ;;  %v2716_v42 = vrot.slane %v8032_v30, %v8731_v39  ;;  %v2724_v63 = vrot.slane %v8032_v30, %v8721_v35  ;;  %v2728_v11 = vrot.slane %v8032_v30, %v8733_v40 }
 0x435   : > { %v2653_v19 = vpack.c.bf16 %v2645_v58, %v2641_v47  ;;  %v2666_v18 = vpop.permute.xlu0 %2665  ;;  %v2654_v33 = vpack.c.bf16 %v2646_v16, %v2642_v20 }
 0x437   : > { %3030 = vmatprep.subr.bf16.mxu1 %v2654_v33  ;;  %v2672_v22 = vpop.permute.xlu1 %2671  ;;  %2927 = vmatmul.mubr.bf16.vlgmr.msra.gmra.mrb[8].mxu0 %v8374_v3 }
 0x438   : > { %3031 = vmatpush1.bf16.msra.mxu1 %v2653_v19  ;;  %2936 = vmatprep.mubr.bf16.mxu0 %v8377_v7  ;;  %v2703_v52 = vsel %vm1424_vm8, %v2664_v59, %v2672_v22 }
 0x439   : > { %v2674_v1 = vpop.permute.xlu0 %2673  ;;  %v2733_v41 = vmul.f32 %v2716_v42, %v2703_v52 }
 0x43a   : > { %v2704_v15 = vsel %vm1424_vm8, %v2666_v18, %v2674_v1 }
 0x43b   : > { %v2680_v34 = vpop.permute.xlu1 %2679  ;;  %3033 = vmatmul.mubr.bf16.vlgmr.msra.gmra.mrb[8].mxu1 %v8374_v3  ;;  %v2737_v57 = vmul.f32 %v2716_v42, %v2704_v15 }
 0x43c   : > { %v2699_v46 = vsel %vm1424_vm8, %v2672_v22, %v2680_v34  ;;  %3042 = vmatprep.mubr.bf16.mxu1 %v8377_v7 }
 0x43d   : > { %v2682_v31 = vpop.permute.xlu0 %2681  ;;  %v2734_v5 = vmul.f32 %v2720_v37, %v2699_v46  ;;  %v2749_v0 = vpack.c.bf16 %v2737_v57, %v2733_v41 }
 0x43e   : > { %v2700_v4 = vsel %vm1424_vm8, %v2674_v1, %v2682_v31 }
 0x43f   : > { %v2738_v25 = vmul.f32 %v2720_v37, %v2700_v4  ;;  %v2688_v49 = vpop.permute.xlu1 %2687  ;;  %2937 = vmatmul.mubr.bf16.gmra.mrb[12].mxu0 %v8379_v14 }
 0x440   : > { %v2695_v60 = vsel %vm1424_vm8, %v2680_v34, %v2688_v49  ;;  %v2707_v29 = vsel %vm1424_vm8, %v2688_v49, %v2664_v59  ;;  %2979 = vmatprep.mubr.bf16.mxu0 %v16727_v50 }
 0x441   : > { %v2690_v53 = vpop.permute.xlu0 %2689  ;;  %v2750_v48 = vpack.c.bf16 %v2738_v25, %v2734_v5  ;;  %v2735_v17 = vmul.f32 %v2724_v63, %v2695_v60  ;;  %v2736_v38 = vmul.f32 %v2728_v11, %v2707_v29 }
 0x442   : > { %v2696_v55 = vsel %vm1424_vm8, %v2682_v31, %v2690_v53  ;;  %v2708_v6 = vsel %vm1424_vm8, %v2690_v53, %v2666_v18 }
 0x443   : > { %v2739_v36 = vmul.f32 %v2724_v63, %v2696_v55  ;;  %v2740_v8 = vmul.f32 %v2728_v11, %v2708_v6  ;;  %v2668_v21 = vpop.permute.xlu1 %2667  ;;  %2947 = vmatprep.subr.bf16.mxu0 %v2750_v48  ;;  %3043 = vmatmul.mubr.bf16.gmra.mrb[12].mxu1 %v8379_v14 }
 0x444   : > { %2948 = vmatpush1.bf16.msra.mxu0 %v2749_v0  ;;  %3085 = vmatprep.mubr.bf16.mxu1 %v16727_v50 }
 0x445   : > { %v2751_v32 = vpack.c.bf16 %v2739_v36, %v2735_v17  ;;  %v2670_v47 = vpop.permute.xlu0 %2669  ;;  %v2752_v20 = vpack.c.bf16 %v2740_v8, %v2736_v38 }
 0x447   : > { %3053 = vmatprep.subr.bf16.mxu1 %v2752_v20  ;;  %v2676_v58 = vpop.permute.xlu1 %2675 }
 0x448   : > { %3054 = vmatpush1.bf16.msra.mxu1 %v2751_v32  ;;  %v2705_v19 = vsel %vm1424_vm8, %v2668_v21, %v2676_v58 }
 0x449   : > { %v2678_v16 = vpop.permute.xlu0 %2677  ;;  %v2741_v34 = vmul.f32 %v2716_v42, %v2705_v19 }
 0x44a   : > { %v2706_v59 = vsel %vm1424_vm8, %v2670_v47, %v2678_v16 }
 0x44b   : > { %v2684_v3 = vpop.permute.xlu1 %2683  ;;  %v2745_v33 = vmul.f32 %v2716_v42, %v2706_v59  ;;  %v8380_v42 = vld [vmem:[%s16298_s4 + $0x8] ss:$12 sps:$4 sm:$0xff]  }
 0x44c   : > { %v2701_v7 = vsel %vm1424_vm8, %v2676_v58, %v2684_v3 }
 0x44d   : > { %v2686_v18 = vpop.permute.xlu0 %2685  ;;  %v2742_v30 = vmul.f32 %v2720_v37, %v2701_v7  ;;  %v2753_v57 = vpack.c.bf16 %v2745_v33, %v2741_v34 }
 0x44e   : > { %v2702_v22 = vsel %vm1424_vm8, %v2678_v16, %v2686_v18 }
 0x44f   : > { %v2746_v1 = vmul.f32 %v2720_v37, %v2702_v22  ;;  %v2692_v15 = vpop.permute.xlu1 %2691 }
 0x450   : > { %v2697_v14 = vsel %vm1424_vm8, %v2684_v3, %v2692_v15  ;;  %v2709_v46 = vsel %vm1424_vm8, %v2692_v15, %v2668_v21 }
 0x451   : > { %v2694_v52 = vpop.permute.xlu0 %2693  ;;  %v2754_v31 = vpack.c.bf16 %v2746_v1, %v2742_v30  ;;  %v2743_v25 = vmul.f32 %v2724_v63, %v2697_v14  ;;  %v2744_v49 = vmul.f32 %v2728_v11, %v2709_v46 }
 0x452   : > { %v2698_v4 = vsel %vm1424_vm8, %v2686_v18, %v2694_v52  ;;  %v2710_v5 = vsel %vm1424_vm8, %v2694_v52, %v2670_v47 }
 0x453   : > { %v2747_v37 = vmul.f32 %v2724_v63, %v2698_v4  ;;  %v2748_v41 = vmul.f32 %v2728_v11, %v2710_v5  ;;  %2949 = vmatprep.subr.bf16.mxu0 %v2754_v31  ;;  %v8381_v63 = vld [vmem:[%s16298_s4 + $0x20] ss:$12 sps:$4 sm:$0xff]  }
 0x454   : > { %2950 = vmatpush1.bf16.msra.mxu0 %v2753_v57 }
 0x455   : > { %v2755_v60 = vpack.c.bf16 %v2747_v37, %v2743_v25  ;;  %v2756_v29 = vpack.c.bf16 %v2748_v41, %v2744_v49 }
 0x457   : > { %8039 = vmatmul.mubr.msk.bf16.vlgmr.msra.gmra.mrb[8].mxu0 %vm2887_vm9, %v8380_v42  ;;  %3055 = vmatprep.subr.bf16.mxu1 %v2756_v29 }
 0x458   : > { %3056 = vmatpush1.bf16.msra.mxu1 %v2755_v60  ;;  %2989 = vmatprep.mubr.bf16.mxu0 %v16727_v50 }
 0x45b   : > { %8041 = vmatmul.mubr.msk.bf16.vlgmr.msra.gmra.mrb[8].mxu1 %vm2887_vm9, %v8380_v42 }
 0x45c   : > { %3095 = vmatprep.mubr.bf16.mxu1 %v16727_v50  ;;  %v10936_v50 = vrot.slane %v3184_v28, %v8721_v35 }
 0x45f   : > { %8040 = vmatmul.mubr.msk.bf16.gmra.mrb[12].mxu0 %vm2887_vm9, %v8381_v63 }
 0x460   : > { %v2840_v11 = vpop.permute.xlu1 %2839 }
 0x462   : > { %v2845_v17 = vpop.permute.xlu0 %2844 }
 0x463   : > { %8042 = vmatmul.mubr.msk.bf16.gmra.mrb[12].mxu1 %vm2887_vm9, %v8381_v63 }
 0x464   : > { %v10746_v49 = vpop.permute.xlu1 %2849 }
 0x466   : > { %v10750_v37 = vpop.permute.xlu0 %2854 }
 0x52a   : > { %v2981_v53 = vpop.f32.mrb[8].mxu0 }
 0x52b   : > { %v8166_v48 = vadd.f32 %v2981_v53, %v2840_v11  ;;  %v2983_v0 = vpop.f32.mrb[9].mxu0 }
 0x52c   : > { %v2985_v55 = vpop.f32.mrb[10].mxu0  ;;  %v8167_v14 = vadd.f32 %v2983_v0, %v2840_v11 }
 0x52d   : > { %v10602_v6 = vmax.f32 %v8166_v48, 0.0  ;;  %v8168_v38 = vadd.f32 %v2985_v55, %v2845_v17  ;;  %v2987_v36 = vpop.f32.mrb[11].mxu0 }
 0x52e   : > { %v3087_v8 = vpop.f32.mrb[8].mxu1  ;;  %v8169_v46 = vadd.f32 %v2987_v36, %v2845_v17  ;;  %v10686_v52 = vmax.f32 %v8167_v14, 0.0 }
 0x52f   : > { %16728 = vst [vmem:[#allocation23_spill] sm:$0xff] %v10602_v6  ;;  %v10604_v21 = vmax.f32 %v8168_v38, 0.0  ;;  %v8174_v32 = vadd.f32 %v3087_v8, %v2840_v11  ;;  %v3089_v47 = vpop.f32.mrb[9].mxu1  ;;  %3136 = vrot.lane.b32.xlu1 %v10602_v6, %s8446_s11 }
 0x530   : > { %v3091_v20 = vpop.f32.mrb[10].mxu1  ;;  %16732 = vst [vmem:[#allocation27_spill] sm:$0xff] %v10686_v52  ;;  %v8175_v31 = vadd.f32 %v3089_v47, %v2840_v11  ;;  %v10690_v57 = vmax.f32 %v8169_v46, 0.0 }
 0x531   : > { %16729 = vst [vmem:[#allocation24_spill] sm:$0xff] %v10604_v21  ;;  %v10608_v58 = vmax.f32 %v8174_v32, 0.0  ;;  %v8176_v16 = vadd.f32 %v3091_v20, %v2845_v17  ;;  %v3093_v59 = vpop.f32.mrb[11].mxu1  ;;  %3138 = vrot.lane.b32.xlu0 %v10604_v21, %s8446_s11 }
 0x532   : > { %v10614_v7 = vpop.f32.mrb[12].mxu0  ;;  %16733 = vst [vmem:[#allocation28_spill] sm:$0xff] %v10690_v57  ;;  %v8177_v4 = vadd.f32 %v3093_v59, %v2845_v17  ;;  %v10694_v5 = vmax.f32 %v8175_v31, 0.0 }
 0x533   : > { %16730 = vst [vmem:[#allocation25_spill] sm:$0xff] %v10608_v58  ;;  %v10616_v19 = vmax.f32 %v8176_v16, 0.0  ;;  %v10618_v18 = vpop.f32.mrb[13].mxu0  ;;  %3152 = vrot.lane.b32.xlu1 %v10608_v58, %s8446_s11  ;;  %v8170_v42 = vadd.f32 %v10614_v7, %v10746_v49 }
 0x534   : > { %v10622_v33 = vpop.f32.mrb[14].mxu0  ;;  %16734 = vst [vmem:[#allocation29_spill] sm:$0xff] %v10694_v5  ;;  %v10698_v25 = vmax.f32 %v8177_v4, 0.0  ;;  %v8171_v13 = vadd.f32 %v10618_v18, %v10746_v49 }
 0x535   : > { %16731 = vst [vmem:[#allocation26_spill] sm:$0xff] %v10616_v19  ;;  %v10624_v22 = vpop.f32.mrb[15].mxu0  ;;  %3154 = vrot.lane.b32.xlu0 %v10616_v19, %s8446_s11  ;;  %v8172_v41 = vadd.f32 %v10622_v33, %v10750_v37  ;;  %v10770_v53 = vmax.f32 %v8170_v42, 0.0 }
 0x536   : > { %v10628_v30 = vpop.f32.mrb[12].mxu1  ;;  %16735 = vst [vmem:[#allocation30_spill] sm:$0xff] %v10698_v25  ;;  %v8173_v12 = vadd.f32 %v10624_v22, %v10750_v37  ;;  %v10903_v56 = vmax.f32 %v8171_v13, 0.0 }
 0x537   : > { %v10630_v1 = vpop.f32.mrb[13].mxu1  ;;  %3238 = vrot.lane.b32.xlu1 %v10602_v6, %s8447_s12  ;;  %v10762_v29 = vmax.f32 %v8172_v41, 0.0  ;;  %16737 = vst [vmem:[#allocation32_spill] sm:$0xff] %v10770_v53  ;;  %v8178_v48 = vadd.f32 %v10628_v30, %v10746_v49 }
 0x538   : > { %v10634_v15 = vpop.f32.mrb[14].mxu1  ;;  %v10893_v9 = vmax.f32 %v8173_v12, 0.0  ;;  %v8179_v18 = vadd.f32 %v10630_v1, %v10746_v49  ;;  %16755 = vst [vmem:[#allocation50_spill] sm:$0xff] %v10903_v56  ;;  %v10923_v49 = vrot.slane %v3184_v28, %v8731_v39 }
 0x539   : > { %v10636_v34 = vpop.f32.mrb[15].mxu1  ;;  %3240 = vrot.lane.b32.xlu0 %v10604_v21, %s8447_s12  ;;  %16736 = vst [vmem:[#allocation31_spill] sm:$0xff] %v10762_v29  ;;  %v8180_v63 = vadd.f32 %v10634_v15, %v10750_v37  ;;  %v10784_v38 = vmax.f32 %v8178_v48, 0.0 }
 0x53a   : > { %16753 = vst [vmem:[#allocation48_spill] sm:$0xff] %v10893_v9  ;;  %v8181_v22 = vadd.f32 %v10636_v34, %v10750_v37  ;;  %v10917_v1 = vmax.f32 %v8179_v18, 0.0  ;;  %v10933_v18 = vrot.slane %v3184_v28, %v8733_v40 }
 0x53b   : > { %3254 = vrot.lane.b32.xlu1 %v10608_v58, %s8447_s12  ;;  %v10778_v17 = vmax.f32 %v8180_v63, 0.0  ;;  %16739 = vst [vmem:[#allocation34_spill] sm:$0xff] %v10784_v38 }
 0x53c   : > { %v10913_v37 = vmax.f32 %v8181_v22, 0.0  ;;  %16757 = vst [vmem:[#allocation52_spill] sm:$0xff] %v10917_v1 }
 0x53d   : > { %3256 = vrot.lane.b32.xlu0 %v10616_v19, %s8447_s12  ;;  %16738 = vst [vmem:[#allocation33_spill] sm:$0xff] %v10778_v17 }
 0x53e   : > { %16756 = vst [vmem:[#allocation51_spill] sm:$0xff] %v10913_v37 }
 0x53f   : > { %3340 = vrot.lane.b32.xlu1 %v10602_v6, %s8448_s13 }
 0x541   : > { %3342 = vrot.lane.b32.xlu0 %v10604_v21, %s8448_s13 }
 0x543   : > { %3356 = vrot.lane.b32.xlu1 %v10608_v58, %s8448_s13 }
 0x545   : > { %3358 = vrot.lane.b32.xlu0 %v10616_v19, %s8448_s13 }
 0x547   : > { %3442 = vrot.lane.b32.xlu1 %v10602_v6, %s8449_s16 }
 0x549   : > { %3444 = vrot.lane.b32.xlu0 %v10604_v21, %s8449_s16 }
 0x54b   : > { %3458 = vrot.lane.b32.xlu1 %v10608_v58, %s8449_s16 }
 0x54d   : > { %3460 = vrot.lane.b32.xlu0 %v10616_v19, %s8449_s16 }
 0x54f   : > { %3560 = vrot.lane.b32.xlu1 %v10602_v6, %s8450_s19 }
 0x551   : > { %3562 = vrot.lane.b32.xlu0 %v10604_v21, %s8450_s19 }
 0x553   : > { %3576 = vrot.lane.b32.xlu1 %v10608_v58, %s8450_s19 }
 0x555   : > { %3578 = vrot.lane.b32.xlu0 %v10616_v19, %s8450_s19 }
 0x557   : > { %3662 = vrot.lane.b32.xlu1 %v10602_v6, %s8451_s24 }
 0x559   : > { %3664 = vrot.lane.b32.xlu0 %v10604_v21, %s8451_s24 }
 0x55b   : > { %3678 = vrot.lane.b32.xlu1 %v10608_v58, %s8451_s24 }
 0x55d   : > { %3680 = vrot.lane.b32.xlu0 %v10616_v19, %s8451_s24 }
 0x55f   : > { %3764 = vrot.lane.b32.xlu1 %v10602_v6, %s8452_s29 }
 0x561   : > { %3766 = vrot.lane.b32.xlu0 %v10604_v21, %s8452_s29 }
 0x563   : > { %3780 = vrot.lane.b32.xlu1 %v10608_v58, %s8452_s29 }
 0x565   : > { %3782 = vrot.lane.b32.xlu0 %v10616_v19, %s8452_s29 }
 0x567   : > { %3866 = vrot.lane.b32.xlu1 %v10602_v6, %s8453_s15 }
 0x569   : > { %3868 = vrot.lane.b32.xlu0 %v10604_v21, %s8453_s15 }
 0x56b   : > { %3144 = vrot.lane.b32.xlu1 %v10686_v52, %s8446_s11 }
 0x56d   : > { %3146 = vrot.lane.b32.xlu0 %v10690_v57, %s8446_s11 }
 0x56f   : > { %3160 = vrot.lane.b32.xlu1 %v10694_v5, %s8446_s11 }
 0x571   : > { %3162 = vrot.lane.b32.xlu0 %v10698_v25, %s8446_s11 }
 0x573   : > { %3246 = vrot.lane.b32.xlu1 %v10686_v52, %s8447_s12 }
 0x575   : > { %3248 = vrot.lane.b32.xlu0 %v10690_v57, %s8447_s12 }
 0x577   : > { %3262 = vrot.lane.b32.xlu1 %v10694_v5, %s8447_s12 }
 0x579   : > { %3264 = vrot.lane.b32.xlu0 %v10698_v25, %s8447_s12 }
 0x57b   : > { %3348 = vrot.lane.b32.xlu1 %v10686_v52, %s8448_s13 }
 0x57d   : > { %3350 = vrot.lane.b32.xlu0 %v10690_v57, %s8448_s13 }
 0x57f   : > { %3364 = vrot.lane.b32.xlu1 %v10694_v5, %s8448_s13 }
 0x581   : > { %3366 = vrot.lane.b32.xlu0 %v10698_v25, %s8448_s13 }
 0x583   : > { %3450 = vrot.lane.b32.xlu1 %v10686_v52, %s8449_s16 }
 0x585   : > { %3452 = vrot.lane.b32.xlu0 %v10690_v57, %s8449_s16 }
 0x587   : > { %3466 = vrot.lane.b32.xlu1 %v10694_v5, %s8449_s16 }
 0x589   : > { %3468 = vrot.lane.b32.xlu0 %v10698_v25, %s8449_s16 }
 0x58b   : > { %3568 = vrot.lane.b32.xlu1 %v10686_v52, %s8450_s19 }
 0x58d   : > { %3570 = vrot.lane.b32.xlu0 %v10690_v57, %s8450_s19 }
 0x58f   : > { %3584 = vrot.lane.b32.xlu1 %v10694_v5, %s8450_s19 }
 0x591   : > { %3586 = vrot.lane.b32.xlu0 %v10698_v25, %s8450_s19 }
 0x593   : > { %3670 = vrot.lane.b32.xlu1 %v10686_v52, %s8451_s24 }
 0x595   : > { %3672 = vrot.lane.b32.xlu0 %v10690_v57, %s8451_s24 }
 0x597   : > { %3686 = vrot.lane.b32.xlu1 %v10694_v5, %s8451_s24 }
 0x599   : > { %3688 = vrot.lane.b32.xlu0 %v10698_v25, %s8451_s24 }
 0x59b   : > { %3772 = vrot.lane.b32.xlu1 %v10686_v52, %s8452_s29 }
 0x59d   : > { %3774 = vrot.lane.b32.xlu0 %v10690_v57, %s8452_s29 }
 0x59f   : > { %3788 = vrot.lane.b32.xlu1 %v10694_v5, %s8452_s29 }
 0x5a1   : > { %3790 = vrot.lane.b32.xlu0 %v10698_v25, %s8452_s29  ;;  %v10760_v60 = vpop.permute.xlu1 %3136 }
 0x5a3   : > { %v10766_v11 = vpop.permute.xlu0 %3138  ;;  %3874 = vrot.lane.b32.xlu1 %v10686_v52, %s8453_s15 }
 0x5a5   : > { %3142 = vrot.lane.b32.xlu0 %v10762_v29, %s8446_s11  ;;  %v10776_v0 = vpop.permute.xlu1 %3152 }
 0x5a7   : > { %v10780_v55 = vpop.permute.xlu0 %3154  ;;  %3140 = vrot.lane.b32.xlu1 %v10770_v53, %s8446_s11 }
 0x5a9   : > { %3158 = vrot.lane.b32.xlu0 %v10778_v17, %s8446_s11  ;;  %v10788_v36 = vpop.permute.xlu1 %3238 }
 0x5ab   : > { %v10790_v8 = vpop.permute.xlu0 %3240  ;;  %3156 = vrot.lane.b32.xlu1 %v10784_v38, %s8446_s11 }
 0x5ad   : > { %3244 = vrot.lane.b32.xlu0 %v10762_v29, %s8447_s12  ;;  %v10796_v32 = vpop.permute.xlu1 %3254 }
 0x5af   : > { %v10798_v47 = vpop.permute.xlu0 %3256  ;;  %3242 = vrot.lane.b32.xlu1 %v10770_v53, %s8447_s12 }
 0x5b1   : > { %3260 = vrot.lane.b32.xlu0 %v10778_v17, %s8447_s12  ;;  %v10804_v20 = vpop.permute.xlu1 %3340 }
 0x5b3   : > { %v10806_v16 = vpop.permute.xlu0 %3342  ;;  %3258 = vrot.lane.b32.xlu1 %v10784_v38, %s8447_s12 }
 0x5b5   : > { %3346 = vrot.lane.b32.xlu0 %v10762_v29, %s8448_s13  ;;  %v10812_v59 = vpop.permute.xlu1 %3356 }
 0x5b7   : > { %v10814_v7 = vpop.permute.xlu0 %3358  ;;  %3344 = vrot.lane.b32.xlu1 %v10770_v53, %s8448_s13 }
 0x5b9   : > { %3362 = vrot.lane.b32.xlu0 %v10778_v17, %s8448_s13  ;;  %v10820_v33 = vpop.permute.xlu1 %3442 }
 0x5bb   : > { %v10822_v30 = vpop.permute.xlu0 %3444  ;;  %3360 = vrot.lane.b32.xlu1 %v10784_v38, %s8448_s13 }
 0x5bd   : > { %3448 = vrot.lane.b32.xlu0 %v10762_v29, %s8449_s16  ;;  %v10828_v15 = vpop.permute.xlu1 %3458 }
 0x5bf   : > { %v10830_v14 = vpop.permute.xlu0 %3460  ;;  %3446 = vrot.lane.b32.xlu1 %v10770_v53, %s8449_s16 }
 0x5c1   : > { %3464 = vrot.lane.b32.xlu0 %v10778_v17, %s8449_s16  ;;  %v10836_v46 = vpop.permute.xlu1 %3560 }
 0x5c2   : > { %16740 = vst [vmem:[#allocation35_spill] sm:$0xff] %v10836_v46 }
 0x5c3   : > { %v10838_v31 = vpop.permute.xlu0 %3562  ;;  %3462 = vrot.lane.b32.xlu1 %v10784_v38, %s8449_s16 }
 0x5c4   : > { %16741 = vst [vmem:[#allocation36_spill] sm:$0xff] %v10838_v31  ;;  %v8051_v31 = vld [vmem:[%s16299_s5 + $0x20] sm:$0xff] }
 0x5c5   : > { %3566 = vrot.lane.b32.xlu0 %v10762_v29, %s8450_s19  ;;  %v10844_v4 = vpop.permute.xlu1 %3576 }
 0x5c6   : > { %16742 = vst [vmem:[#allocation37_spill] sm:$0xff] %v10844_v4 }
 0x5c7   : > { %v10846_v41 = vpop.permute.xlu0 %3578  ;;  %3564 = vrot.lane.b32.xlu1 %v10770_v53, %s8450_s19 }
 0x5c8   : > { %16743 = vst [vmem:[#allocation38_spill] sm:$0xff] %v10846_v41  ;;  %v8052_v41 = vld [vmem:[%s16299_s5 + $0x28] sm:$0xff] }
 0x5c9   : > { %3582 = vrot.lane.b32.xlu0 %v10778_v17, %s8450_s19  ;;  %v10852_v42 = vpop.permute.xlu1 %3662 }
 0x5ca   : > { %16744 = vst [vmem:[#allocation39_spill] sm:$0xff] %v10852_v42 }
 0x5cb   : > { %v10854_v63 = vpop.permute.xlu0 %3664  ;;  %3580 = vrot.lane.b32.xlu1 %v10784_v38, %s8450_s19 }
 0x5cc   : > { %16745 = vst [vmem:[#allocation40_spill] sm:$0xff] %v10854_v63 }
 0x5cd   : > { %3668 = vrot.lane.b32.xlu0 %v10762_v29, %s8451_s24  ;;  %v10860_v48 = vpop.permute.xlu1 %3678 }
 0x5ce   : > { %16746 = vst [vmem:[#allocation41_spill] sm:$0xff] %v10860_v48 }
 0x5cf   : > { %v10862_v3 = vpop.permute.xlu0 %3680  ;;  %3666 = vrot.lane.b32.xlu1 %v10770_v53, %s8451_s24 }
 0x5d0   : > { %16747 = vst [vmem:[#allocation42_spill] sm:$0xff] %v10862_v3 }
 0x5d1   : > { %3684 = vrot.lane.b32.xlu0 %v10778_v17, %s8451_s24  ;;  %v10868_v62 = vpop.permute.xlu1 %3764 }
 0x5d2   : > { %16748 = vst [vmem:[#allocation43_spill] sm:$0xff] %v10868_v62 }
 0x5d3   : > { %v10870_v10 = vpop.permute.xlu0 %3766  ;;  %3682 = vrot.lane.b32.xlu1 %v10784_v38, %s8451_s24 }
 0x5d4   : > { %16749 = vst [vmem:[#allocation44_spill] sm:$0xff] %v10870_v10 }
 0x5d5   : > { %3770 = vrot.lane.b32.xlu0 %v10762_v29, %s8452_s29  ;;  %v10876_v43 = vpop.permute.xlu1 %3780 }
 0x5d6   : > { %16750 = vst [vmem:[#allocation45_spill] sm:$0xff] %v10876_v43 }
 0x5d7   : > { %v10880_v51 = vpop.permute.xlu0 %3782  ;;  %3768 = vrot.lane.b32.xlu1 %v10770_v53, %s8452_s29 }
 0x5d8   : > { %16751 = vst [vmem:[#allocation46_spill] sm:$0xff] %v10880_v51 }
 0x5d9   : > { %3786 = vrot.lane.b32.xlu0 %v10778_v17, %s8452_s29  ;;  %v10888_v61 = vpop.permute.xlu1 %3866 }
 0x5da   : > { %16752 = vst [vmem:[#allocation47_spill] sm:$0xff] %v10888_v61 }
 0x5db   : > { %v10897_v23 = vpop.permute.xlu0 %3868  ;;  %3784 = vrot.lane.b32.xlu1 %v10784_v38, %s8452_s29 }
 0x5dc   : > { %16754 = vst [vmem:[#allocation49_spill] sm:$0xff] %v10897_v23 }
 0x5dd   : > { %3150 = vrot.lane.b32.xlu0 %v10893_v9, %s8446_s11  ;;  %v3145_v12 = vpop.permute.xlu1 %3144 }
 0x5de   : > { %v3176_v34 = vsel %vm393_vm0, %v10760_v60, %v3145_v12 }
 0x5df   : > { %v3147_v44 = vpop.permute.xlu0 %3146  ;;  %3148 = vrot.lane.b32.xlu1 %v10903_v56, %s8446_s11  ;;  %v3207_v24 = vmul.f32 %v10908_v45, %v3176_v34 }
 0x5e0   : > { %v3177_v13 = vsel %vm393_vm0, %v10766_v11, %v3147_v44  ;;  %v3173_v22 = vsel %vm393_vm0, %v3147_v44, %v10780_v55 }
 0x5e1   : > { %v3211_v2 = vmul.f32 %v10908_v45, %v3177_v13  ;;  %3166 = vrot.lane.b32.xlu0 %v10913_v37, %s8446_s11  ;;  %v3161_v54 = vpop.permute.xlu1 %3160  ;;  %v3172_v13 = vsel %vm393_vm0, %v3145_v12, %v10776_v0  ;;  %v3212_v28 = vmul.f32 %v10936_v50, %v3173_v22 }
 0x5e2   : > { %v3168_v34 = vsel %vm393_vm0, %v10776_v0, %v3161_v54  ;;  %v3180_v44 = vsel %vm393_vm0, %v3161_v54, %v10760_v60 }
 0x5e3   : > { %v3163_v61 = vpop.permute.xlu0 %3162  ;;  %3164 = vrot.lane.b32.xlu1 %v10917_v1, %s8446_s11  ;;  %v3223_v23 = vpack.c.bf16 %v3211_v2, %v3207_v24  ;;  %v3206_v51 = vmul.f32 %v10923_v49, %v3180_v44  ;;  %v3209_v60 = vmul.f32 %v10933_v18, %v3168_v34  ;;  %v3208_v24 = vmul.f32 %v10936_v50, %v3172_v13 }
 0x5e4   : > { %v3169_v10 = vsel %vm393_vm0, %v10780_v55, %v3163_v61  ;;  %v3181_v54 = vsel %vm393_vm0, %v3163_v61, %v10766_v11 }
 0x5e5   : > { %v3210_v0 = vmul.f32 %v10923_v49, %v3181_v54  ;;  %v3213_v12 = vmul.f32 %v10933_v18, %v3169_v10  ;;  %3252 = vrot.lane.b32.xlu0 %v10893_v9, %s8447_s12  ;;  %4096 = vmatprep.subr.bf16.mxu0 %v3223_v23  ;;  %v10962_v2 = vpop.permute.xlu1 %3246  ;;  %v3224_v11 = vpack.c.bf16 %v3212_v28, %v3208_v24 }
 0x5e7   : > { %v3222_v22 = vpack.c.bf16 %v3210_v0, %v3206_v51  ;;  %v10965_v55 = vpop.permute.xlu0 %3248  ;;  %3250 = vrot.lane.b32.xlu1 %v10903_v56, %s8447_s12  ;;  %v3225_v61 = vpack.c.bf16 %v3213_v12, %v3209_v60 }
 0x5e9   : > { %3268 = vrot.lane.b32.xlu0 %v10913_v37, %s8447_s12  ;;  %4097 = vmatpush1.bf16.msra.mxu0 %v3222_v22  ;;  %v10971_v10 = vpop.permute.xlu1 %3262 }
 0x5ea   : > { %4202 = vmatprep.subr.bf16.mxu1 %v3225_v61 }
 0x5eb   : > { %4203 = vmatpush1.bf16.msra.mxu1 %v3224_v11  ;;  %v10973_v23 = vpop.permute.xlu0 %3264  ;;  %3266 = vrot.lane.b32.xlu1 %v10917_v1, %s8447_s12 }
 0x5ed   : > { %3354 = vrot.lane.b32.xlu0 %v10893_v9, %s8448_s13  ;;  %v10979_v51 = vpop.permute.xlu1 %3348 }
 0x5ef   : > { %v10981_v34 = vpop.permute.xlu0 %3350  ;;  %3352 = vrot.lane.b32.xlu1 %v10903_v56, %s8448_s13 }
 0x5f1   : > { %3370 = vrot.lane.b32.xlu0 %v10913_v37, %s8448_s13  ;;  %v10987_v44 = vpop.permute.xlu1 %3364 }
 0x5f3   : > { %v10989_v13 = vpop.permute.xlu0 %3366  ;;  %3368 = vrot.lane.b32.xlu1 %v10917_v1, %s8448_s13 }
 0x5f5   : > { %3456 = vrot.lane.b32.xlu0 %v10893_v9, %s8449_s16  ;;  %v10995_v28 = vpop.permute.xlu1 %3450 }
 0x5f7   : > { %v10997_v54 = vpop.permute.xlu0 %3452  ;;  %3454 = vrot.lane.b32.xlu1 %v10903_v56, %s8449_s16 }
 0x5f9   : > { %3472 = vrot.lane.b32.xlu0 %v10913_v37, %s8449_s16  ;;  %v11003_v60 = vpop.permute.xlu1 %3466 }
 0x5fb   : > { %v11005_v0 = vpop.permute.xlu0 %3468  ;;  %3470 = vrot.lane.b32.xlu1 %v10917_v1, %s8449_s16 }
 0x5fc   : > { %16758 = vst [vmem:[#allocation53_spill] sm:$0xff] %v11005_v0 }
 0x5fd   : > { %3574 = vrot.lane.b32.xlu0 %v10893_v9, %s8450_s19  ;;  %v11011_v12 = vpop.permute.xlu1 %3568 }
 0x5fe   : > { %16759 = vst [vmem:[#allocation54_spill] sm:$0xff] %v11011_v12  ;;  %v8054_v12 = vld [vmem:[%s16299_s5 + $0x38] sm:$0xff] }
 0x5ff   : > { %v11013_v24 = vpop.permute.xlu0 %3570  ;;  %3572 = vrot.lane.b32.xlu1 %v10903_v56, %s8450_s19 }
 0x600   : > { %16760 = vst [vmem:[#allocation55_spill] sm:$0xff] %v11013_v24 }
 0x601   : > { %3590 = vrot.lane.b32.xlu0 %v10913_v37, %s8450_s19  ;;  %v11019_v22 = vpop.permute.xlu1 %3584 }
 0x602   : > { %16761 = vst [vmem:[#allocation56_spill] sm:$0xff] %v11019_v22 }
 0x603   : > { %v11021_v61 = vpop.permute.xlu0 %3586  ;;  %3588 = vrot.lane.b32.xlu1 %v10917_v1, %s8450_s19 }
 0x604   : > { %16762 = vst [vmem:[#allocation57_spill] sm:$0xff] %v11021_v61 }
 0x605   : > { %3676 = vrot.lane.b32.xlu0 %v10893_v9, %s8451_s24  ;;  %v11027_v11 = vpop.permute.xlu1 %3670 }
 0x606   : > { %16763 = vst [vmem:[#allocation58_spill] sm:$0xff] %v11027_v11 }
 0x607   : > { %v11029_v43 = vpop.permute.xlu0 %3672  ;;  %3674 = vrot.lane.b32.xlu1 %v10903_v56, %s8451_s24 }
 0x608   : > { %16764 = vst [vmem:[#allocation59_spill] sm:$0xff] %v11029_v43 }
 0x609   : > { %3692 = vrot.lane.b32.xlu0 %v10913_v37, %s8451_s24  ;;  %v11035_v62 = vpop.permute.xlu1 %3686 }
 0x60a   : > { %16765 = vst [vmem:[#allocation60_spill] sm:$0xff] %v11035_v62 }
 0x60b   : > { %v11037_v6 = vpop.permute.xlu0 %3688  ;;  %3690 = vrot.lane.b32.xlu1 %v10917_v1, %s8451_s24 }
 0x60c   : > { %16766 = vst [vmem:[#allocation61_spill] sm:$0xff] %v11037_v6  ;;  %v8384_v6 = vld [vmem:[%s16298_s4 + $0x34] ss:$12 sps:$4 sm:$0xff]  }
 0x60d   : > { %3778 = vrot.lane.b32.xlu0 %v10893_v9, %s8452_s29  ;;  %v11043_v21 = vpop.permute.xlu1 %3772  ;;  %4128 = vmatprep.mubr.bf16.mxu0 %v8384_v6 }
 0x60e   : > { %16767 = vst [vmem:[#allocation62_spill] sm:$0xff] %v11043_v21  ;;  %4234 = vmatprep.mubr.bf16.mxu1 %v8384_v6 }
 0x60f   : > { %v11045_v48 = vpop.permute.xlu0 %3774  ;;  %3776 = vrot.lane.b32.xlu1 %v10903_v56, %s8452_s29 }
 0x610   : > { %16768 = vst [vmem:[#allocation63_spill] sm:$0xff] %v11045_v48 }
 0x611   : > { %3794 = vrot.lane.b32.xlu0 %v10913_v37, %s8452_s29  ;;  %v11051_v3 = vpop.permute.xlu1 %3788 }
 0x612   : > { %16769 = vst [vmem:[#allocation64_spill] sm:$0xff] %v11051_v3 }
 0x613   : > { %v11053_v62 = vpop.permute.xlu0 %3790  ;;  %3792 = vrot.lane.b32.xlu1 %v10917_v1, %s8452_s29 }
 0x614   : > { %16770 = vst [vmem:[#allocation65_spill] sm:$0xff] %v11053_v62 }
 0x615   : > { %3876 = vrot.lane.b32.xlu0 %v10690_v57, %s8453_s15  ;;  %v11062_v48 = vpop.permute.xlu1 %3874  ;;  %v3274_v57 = vsel %vm536_vm1, %v10962_v2, %v10796_v32 }
 0x616   : > { %16771 = vst [vmem:[#allocation66_spill] sm:$0xff] %v11062_v48 }
 0x617   : > { %v11064_v21 = vpop.permute.xlu0 %3142  ;;  %3882 = vrot.lane.b32.xlu1 %v10608_v58, %s8453_s15  ;;  %v8059_v58 = vld [vmem:[%s16295_s1 + $0x18] sm:$0xf] }
 0x619   : > { %3884 = vrot.lane.b32.xlu0 %v10616_v19, %s8453_s15  ;;  %v11070_v62 = vpop.permute.xlu1 %3140  ;;  %v8060_v19 = vld [vmem:[%s16295_s1 + $0x1c] sm:$0xf] }
 0x61b   : > { %v11072_v3 = vpop.permute.xlu0 %3158  ;;  %3890 = vrot.lane.b32.xlu1 %v10694_v5, %s8453_s15 }
 0x61d   : > { %3892 = vrot.lane.b32.xlu0 %v10698_v25, %s8453_s15  ;;  %v11078_v48 = vpop.permute.xlu1 %3156 }
 0x61f   : > { %v11080_v6 = vpop.permute.xlu0 %3244  ;;  %3870 = vrot.lane.b32.xlu1 %v10770_v53, %s8453_s15 }
 0x621   : > { %3872 = vrot.lane.b32.xlu0 %v10762_v29, %s8453_s15  ;;  %v11086_v42 = vpop.permute.xlu1 %3242 }
 0x623   : > { %v11088_v11 = vpop.permute.xlu0 %3260  ;;  %3878 = vrot.lane.b32.xlu1 %v10903_v56, %s8453_s15 }
 0x625   : > { %3880 = vrot.lane.b32.xlu0 %v10893_v9, %s8453_s15  ;;  %v11094_v63 = vpop.permute.xlu1 %3258 }
 0x627   : > { %v11096_v43 = vpop.permute.xlu0 %3346  ;;  %3886 = vrot.lane.b32.xlu1 %v10784_v38, %s8453_s15 }
 0x628   : > { %16772 = vst [vmem:[#allocation67_spill] sm:$0xff] %v11096_v43 }
 0x629   : > { %3888 = vrot.lane.b32.xlu0 %v10778_v17, %s8453_s15  ;;  %v11102_v61 = vpop.permute.xlu1 %3344 }
 0x62a   : > { %16773 = vst [vmem:[#allocation68_spill] sm:$0xff] %v11102_v61 }
 0x62b   : > { %v11104_v22 = vpop.permute.xlu0 %3362  ;;  %3894 = vrot.lane.b32.xlu1 %v10917_v1, %s8453_s15  ;;  %v3275_v1 = vsel %vm536_vm1, %v10965_v55, %v10798_v47 }
 0x62c   : > { %16774 = vst [vmem:[#allocation69_spill] sm:$0xff] %v11104_v22  ;;  %v8053_v22 = vld [vmem:[%s16299_s5 + $0x30] sm:$0xff] }
 0x62d   : > { %3896 = vrot.lane.b32.xlu0 %v10913_v37, %s8453_s15  ;;  %v11113_v24 = vpop.permute.xlu1 %3360 }
 0x62e   : > { %16775 = vst [vmem:[#allocation70_spill] sm:$0xff] %v11113_v24 }
 0x62f   : > { %v11118_v46 = vpop.permute.xlu0 %3448  ;;  %4042 = vperm.xlu1 %8361, %v8051_v31  }
 0x630   : > { %16776 = vst [vmem:[#allocation71_spill] sm:$0xff] %v11118_v46 }
 0x631   : > { %4047 = vperm.xlu0 %8360, %v8052_v41   ;;  %v11123_v61 = vpop.permute.xlu1 %3446  ;;  %v8055_v41 = vld [vmem:[%s16295_s1 + $0x4] sm:$0xf] }
 0x632   : > { %16777 = vst [vmem:[#allocation72_spill] sm:$0xff] %v11123_v61  ;;  %v11167_v52 = vrot.slane %v8055_v41, %v8721_v35 }
 0x633   : > { %v11128_v4 = vpop.permute.xlu0 %3464  ;;  %4052 = vperm.xlu1 %8361, %v8053_v22   ;;  %v11164_v22 = vrot.slane %v8055_v41, %v8706_v27 }
 0x634   : > { %16778 = vst [vmem:[#allocation73_spill] sm:$0xff] %v11128_v4  ;;  %v11180_v4 = vrot.slane %v8055_v41, %v8733_v40 }
 0x635   : > { %4057 = vperm.xlu0 %8360, %v8054_v12   ;;  %v11130_v24 = vpop.permute.xlu1 %3462  ;;  %v8056_v12 = vld [vmem:[%s16295_s1 + $0x8] sm:$0xf] }
 0x636   : > { %16779 = vst [vmem:[#allocation74_spill] sm:$0xff] %v11130_v24  ;;  %v11183_v53 = vrot.slane %v8056_v12, %v8706_v27  ;;  %v11186_v29 = vrot.slane %v8056_v12, %v8721_v35  ;;  %v11197_v38 = vrot.slane %v8056_v12, %v8733_v40  ;;  %v11240_v24 = vrot.slane %v8059_v58, %v8706_v27 }
 0x637   : > { %v11132_v43 = vpop.permute.xlu0 %3566 }
 0x638   : > { %16780 = vst [vmem:[#allocation75_spill] sm:$0xff] %v11132_v43  ;;  %v8057_v43 = vld [vmem:[%s16295_s1 + $0xc] sm:$0xf]  ;;  %16792 = vst [vmem:[#allocation87_spill] sm:$0xff] %v11240_v24  ;;  %v11274_v24 = vrot.slane %v8060_v19, %v8706_v27 }
 0x639   : > { %v11134_v31 = vpop.permute.xlu1 %3564  ;;  %v11203_v17 = vrot.slane %v8057_v43, %v8721_v35  ;;  %v11210_v37 = vrot.slane %v8057_v43, %v8731_v39 }
 0x63a   : > { %16781 = vst [vmem:[#allocation76_spill] sm:$0xff] %v11134_v31  ;;  %16797 = vst [vmem:[#allocation92_spill] sm:$0xff] %v11274_v24 }
 0x63b   : > { %v11136_v46 = vpop.permute.xlu0 %3582 }
 0x63c   : > { %16782 = vst [vmem:[#allocation77_spill] sm:$0xff] %v11136_v46 }
 0x63d   : > { %v11138_v0 = vpop.permute.xlu1 %3580 }
 0x63e   : > { %16783 = vst [vmem:[#allocation78_spill] sm:$0xff] %v11138_v0  ;;  %v11194_v0 = vrot.slane %v8056_v12, %v8731_v39 }
 0x63f   : > { %v11143_v61 = vpop.permute.xlu0 %3668 }
 0x640   : > { %16784 = vst [vmem:[#allocation79_spill] sm:$0xff] %v11143_v61  ;;  %v11177_v61 = vrot.slane %v8055_v41, %v8731_v39  ;;  %v11200_v41 = vrot.slane %v8057_v43, %v8706_v27 }
 0x641   : > { %v11153_v46 = vpop.permute.xlu1 %3666 }
 0x642   : > { %16785 = vst [vmem:[#allocation80_spill] sm:$0xff] %v11153_v46  ;;  %v8058_v46 = vld [vmem:[%s16295_s1 + $0x14] sm:$0xf] }
 0x643   : > { %v11191_v31 = vpop.permute.xlu0 %3684  ;;  %v11216_v12 = vrot.slane %v8058_v46, %v8731_v39  ;;  %v11224_v9 = vrot.slane %v8058_v46, %v8706_v27  ;;  %v11227_v5 = vrot.slane %v8058_v46, %v8721_v35  ;;  %v11230_v25 = vrot.slane %v8058_v46, %v8733_v40  ;;  %v11251_v46 = vld [vmem:[%s16295_s1 + $0x20] sm:$0xf] }
 0x644   : > { %16786 = vst [vmem:[#allocation81_spill] sm:$0xff] %v11191_v31  ;;  %v11213_v31 = vrot.slane %v8057_v43, %v8733_v40  ;;  %v11233_v43 = vrot.slane %v8059_v58, %v8731_v39 }
 0x645   : > { %v11221_v56 = vpop.permute.xlu1 %3682  ;;  %16788 = vst [vmem:[#allocation83_spill] sm:$0xff] %v11224_v9  ;;  %16789 = vst [vmem:[#allocation84_spill] sm:$0xff] %v11227_v5  ;;  %v11246_v9 = vrot.slane %v8059_v58, %v8733_v40  ;;  %v11280_v5 = vrot.slane %v8060_v19, %v8733_v40 }
 0x646   : > { %16787 = vst [vmem:[#allocation82_spill] sm:$0xff] %v11221_v56  ;;  %16790 = vst [vmem:[#allocation85_spill] sm:$0xff] %v11230_v25  ;;  %v11243_v56 = vrot.slane %v8059_v58, %v8721_v35  ;;  %v3278_v25 = vsel %vm536_vm1, %v10788_v36, %v10962_v2  ;;  %v11264_v58 = vmul.f32 %v11167_v52, %v3275_v1 }
 0x647   : > { %16791 = vst [vmem:[#allocation86_spill] sm:$0xff] %v11233_v43  ;;  %16794 = vst [vmem:[#allocation89_spill] sm:$0xff] %v11246_v9  ;;  %v11253_v43 = vpop.permute.xlu0 %3770  ;;  %v11267_v9 = vrot.slane %v8060_v19, %v8731_v39  ;;  %v11277_v2 = vrot.slane %v8060_v19, %v8721_v35  ;;  %v11285_v1 = vmul.f32 %v11167_v52, %v3274_v57 }
 0x648   : > { %16793 = vst [vmem:[#allocation88_spill] sm:$0xff] %v11243_v56  ;;  %16795 = vst [vmem:[#allocation90_spill] sm:$0xff] %v11253_v43  ;;  %v3279_v56 = vsel %vm536_vm1, %v10790_v8, %v10965_v55  ;;  %v3283_v43 = vsel %vm536_vm1, %v10973_v23, %v10790_v8  ;;  %v3377_v8 = vsel %vm680_vm2, %v10981_v34, %v10814_v7 }
 0x649   : > { %16796 = vst [vmem:[#allocation91_spill] sm:$0xff] %v11267_v9  ;;  %16798 = vst [vmem:[#allocation93_spill] sm:$0xff] %v11277_v2  ;;  %v11282_v55 = vpop.permute.xlu1 %3768  ;;  %v3271_v9 = vsel %vm536_vm1, %v10798_v47, %v10973_v23  ;;  %v11297_v2 = vrot.slane %v11251_v46, %v8731_v39  ;;  %v11300_v19 = vmul.f32 %v11164_v22, %v3278_v25 }
 0x64a   : > { %16799 = vst [vmem:[#allocation94_spill] sm:$0xff] %v11280_v5  ;;  %16800 = vst [vmem:[#allocation95_spill] sm:$0xff] %v11282_v55  ;;  %v11303_v57 = vmul.f32 %v11164_v22, %v3279_v56  ;;  %v3282_v47 = vsel %vm536_vm1, %v10971_v10, %v10788_v36  ;;  %v3381_v23 = vsel %vm680_vm2, %v10806_v16, %v10981_v34 }
 0x64b   : > { %16801 = vst [vmem:[#allocation96_spill] sm:$0xff] %v11297_v2  ;;  %v11313_v55 = vpop.permute.xlu0 %3786  ;;  %v3270_v56 = vsel %vm536_vm1, %v10796_v32, %v10971_v10  ;;  %v11322_v25 = vmul.f32 %v11177_v61, %v3283_v43  ;;  %v3376_v36 = vsel %vm680_vm2, %v10979_v51, %v10812_v59  ;;  %v11329_v34 = vmul.f32 %v11180_v4, %v3271_v9 }
 0x64c   : > { %16802 = vst [vmem:[#allocation97_spill] sm:$0xff] %v11313_v55  ;;  %v3380_v39 = vsel %vm680_vm2, %v10804_v20, %v10979_v51  ;;  %v11336_v2 = vmul.f32 %v11186_v29, %v3377_v8  ;;  %v3385_v32 = vsel %vm680_vm2, %v10989_v13, %v10806_v16  ;;  %v11345_v43 = vmul.f32 %v11177_v61, %v3282_v47 }
 0x64d   : > { %v11342_v10 = vpop.permute.xlu1 %3784  ;;  %v11348_v9 = vmul.f32 %v11183_v53, %v3381_v23  ;;  %v3372_v51 = vsel %vm680_vm2, %v10812_v59, %v10987_v44  ;;  %v3384_v8 = vsel %vm680_vm2, %v10987_v44, %v10804_v20  ;;  %v11359_v16 = vmul.f32 %v11180_v4, %v3270_v56 }
 0x64e   : > { %16803 = vst [vmem:[#allocation98_spill] sm:$0xff] %v11342_v10  ;;  %v11362_v55 = vmul.f32 %v11186_v29, %v3376_v36  ;;  %v3373_v47 = vsel %vm680_vm2, %v10814_v7, %v10989_v13  ;;  %v3325_v59 = vpack.c.bf16 %v11303_v57, %v11300_v19  ;;  %v11373_v20 = vmul.f32 %v11183_v53, %v3380_v39 }
 0x64f   : > { %v3151_v23 = vpop.permute.xlu0 %3150  ;;  %v11376_v44 = vmul.f32 %v11194_v0, %v3385_v32  ;;  %v11384_v13 = vmul.f32 %v11194_v0, %v3384_v8  ;;  %v11387_v19 = vmul.f32 %v11197_v38, %v3372_v51  ;;  %v3327_v39 = vpack.c.bf16 %v11329_v34, %v11359_v16 }
 0x650   : > { %v3179_v56 = vsel %vm393_vm0, %v11064_v21, %v3151_v23  ;;  %v11392_v36 = vmul.f32 %v11197_v38, %v3373_v47  ;;  %v3482_v32 = vsel %vm824_vm3, %v10820_v33, %v10995_v28  ;;  %v3479_v34 = vsel %vm824_vm3, %v10997_v54, %v10830_v14 }
 0x651   : > { %v3149_v57 = vpop.permute.xlu1 %3148  ;;  %v3219_v16 = vmul.f32 %v10908_v45, %v3179_v56  ;;  %v3478_v51 = vsel %vm824_vm3, %v10995_v28, %v10828_v15  ;;  %v3175_v28 = vsel %vm393_vm0, %v3151_v23, %v11072_v3  ;;  %v11435_v40 = vmul.f32 %v11203_v17, %v3479_v34 }
 0x652   : > { %v3178_v8 = vsel %vm393_vm0, %v11070_v62, %v3149_v57  ;;  %v3174_v47 = vsel %vm393_vm0, %v3149_v57, %v11078_v48  ;;  %v11425_v57 = vmul.f32 %v11200_v41, %v3482_v32  ;;  %v11449_v34 = vmul.f32 %v11203_v17, %v3478_v51 }
 0x653   : > { %v3215_v7 = vmul.f32 %v10908_v45, %v3178_v8  ;;  %v3167_v10 = vpop.permute.xlu0 %3166  ;;  %v3483_v45 = vsel %vm824_vm3, %v10822_v30, %v10997_v54  ;;  %v3216_v35 = vmul.f32 %v10936_v50, %v3174_v47  ;;  %v3474_v47 = vsel %vm824_vm3, %v10828_v15, %v11003_v60 }
 0x654   : > { %v3171_v24 = vsel %vm393_vm0, %v11072_v3, %v3167_v10  ;;  %v3183_v56 = vsel %vm393_vm0, %v3167_v10, %v11064_v21 }
 0x655   : > { %v3165_v8 = vpop.permute.xlu1 %3164  ;;  %v3227_v5 = vpack.c.bf16 %v3219_v16, %v3215_v7  ;;  %v3218_v54 = vmul.f32 %v10923_v49, %v3183_v56  ;;  %v3221_v32 = vmul.f32 %v10933_v18, %v3171_v24  ;;  %v3220_v16 = vmul.f32 %v10936_v50, %v3175_v28 }
 0x656   : > { %v3170_v21 = vsel %vm393_vm0, %v11078_v48, %v3165_v8  ;;  %v3182_v10 = vsel %vm393_vm0, %v3165_v8, %v11070_v62  ;;  %v3429_v62 = vpack.c.bf16 %v11392_v36, %v11387_v19  ;;  %v11458_v24 = vmul.f32 %v11200_v41, %v3483_v45 }
 0x657   : > { %v3214_v3 = vmul.f32 %v10923_v49, %v3182_v10  ;;  %v3217_v23 = vmul.f32 %v10933_v18, %v3170_v21  ;;  %v3253_v7 = vpop.permute.xlu0 %3252  ;;  %4098 = vmatprep.subr.bf16.mxu0 %v3227_v5  ;;  %v3486_v5 = vsel %vm824_vm3, %v11003_v60, %v10820_v33  ;;  %v3530_v50 = vpack.c.bf16 %v11435_v40, %v11449_v34 }
 0x658   : > { %v3281_v48 = vsel %vm536_vm1, %v11080_v6, %v3253_v7  ;;  %v3228_v56 = vpack.c.bf16 %v3220_v16, %v3216_v35  ;;  %v11479_v10 = vmul.f32 %v11210_v37, %v3486_v5  ;;  %v11488_v60 = vmul.f32 %v11213_v31, %v3474_v47 }
 0x659   : > { %v3226_v49 = vpack.c.bf16 %v3218_v54, %v3214_v3  ;;  %v3251_v18 = vpop.permute.xlu1 %3250  ;;  %v3229_v51 = vpack.c.bf16 %v3221_v32, %v3217_v23  ;;  %v3321_v28 = vmul.f32 %v11164_v22, %v3281_v48  ;;  %v3277_v32 = vsel %vm536_vm1, %v3253_v7, %v11088_v11 }
 0x65a   : > { %v3280_v45 = vsel %vm536_vm1, %v11086_v42, %v3251_v18  ;;  %v3276_v33 = vsel %vm536_vm1, %v3251_v18, %v11094_v63  ;;  %v16806_v18 = vld [vmem:[#allocation67_spill] sm:$0xff]  ;;  %v3529_v47 = vpack.c.bf16 %v11458_v24, %v11425_v57 }
 0x65b   : > { %v3317_v8 = vmul.f32 %v11164_v22, %v3280_v45  ;;  %v3269_v21 = vpop.permute.xlu0 %3268  ;;  %4099 = vmatpush1.bf16.msra.mxu0 %v3226_v49  ;;  %4204 = vmatprep.subr.bf16.mxu1 %v3229_v51  ;;  %v16804_v22 = vld [vmem:[#allocation53_spill] sm:$0xff] }
 0x65c   : > { %v3273_v35 = vsel %vm536_vm1, %v11088_v11, %v3269_v21  ;;  %v3285_v15 = vsel %vm536_vm1, %v3269_v21, %v11080_v6  ;;  %4100 = vmatprep.subr.bf16.mxu0 %v3325_v59  ;;  %4205 = vmatpush1.bf16.msra.mxu1 %v3228_v56  ;;  %v3487_v54 = vsel %vm824_vm3, %v16804_v22, %v10822_v30  ;;  %v16808_v56 = vld [vmem:[#allocation37_spill] sm:$0xff] }
 0x65d   : > { %4206 = vmatprep.subr.bf16.mxu1 %v3327_v39  ;;  %v3267_v3 = vpop.permute.xlu1 %3266  ;;  %v3329_v23 = vpack.c.bf16 %v3321_v28, %v3317_v8  ;;  %v3475_v6 = vsel %vm824_vm3, %v10830_v14, %v16804_v22  ;;  %v3318_v59 = vmul.f32 %v11167_v52, %v3276_v33  ;;  %v3320_v11 = vmul.f32 %v11177_v61, %v3285_v15  ;;  %v16810_v28 = vld [vmem:[#allocation35_spill] sm:$0xff]  ;;  %v16811_v33 = vld [vmem:[#allocation68_spill] sm:$0xff] }
 0x65e   : > { %v3272_v16 = vsel %vm536_vm1, %v11094_v63, %v3267_v3  ;;  %v3284_v30 = vsel %vm536_vm1, %v3267_v3, %v11086_v42  ;;  %v3323_v39 = vmul.f32 %v11180_v4, %v3273_v35  ;;  %v16805_v14 = vpack.c.bf16 %v11322_v25, %v11345_v43  ;;  %v16812_v35 = vld [vmem:[#allocation70_spill] sm:$0xff] }
 0x65f   : > { %v3316_v7 = vmul.f32 %v11177_v61, %v3284_v30  ;;  %v3319_v48 = vmul.f32 %v11180_v4, %v3272_v16  ;;  %v3355_v5 = vpop.permute.xlu0 %3354  ;;  %v11516_v49 = vmul.f32 %v11210_v37, %v3487_v54  ;;  %v3322_v63 = vmul.f32 %v11167_v52, %v3277_v32  ;;  %v16809_v52 = vld [vmem:[#allocation54_spill] sm:$0xff]  ;;  %v16813_v54 = vld [vmem:[#allocation69_spill] sm:$0xff] }
 0x660   : > { %4101 = vmatpush1.bf16.msra.mxu0 %v16805_v14  ;;  %v3383_v42 = vsel %vm680_vm2, %v16806_v18, %v3355_v5  ;;  %v16807_v61 = vpack.c.bf16 %v11264_v58, %v11285_v1  ;;  %v11526_v4 = vmul.f32 %v11213_v31, %v3475_v6  ;;  %v3596_v45 = vsel %vm992_vm4, %v16809_v52, %v16808_v56  ;;  %v16815_v6 = vld [vmem:[#allocation38_spill] sm:$0xff] }
 0x661   : > { %4102 = vmatprep.subr.bf16.mxu0 %v3329_v23  ;;  %v3328_v51 = vpack.c.bf16 %v3320_v11, %v3316_v7  ;;  %v3353_v25 = vpop.permute.xlu1 %3352  ;;  %v3331_v43 = vpack.c.bf16 %v3323_v39, %v3319_v48  ;;  %v3600_v58 = vsel %vm992_vm4, %v16810_v28, %v16809_v52  ;;  %v3330_v1 = vpack.c.bf16 %v3322_v63, %v3318_v59  ;;  %v16816_v59 = vld [vmem:[#allocation55_spill] sm:$0xff]  ;;  %v16822_v52 = vld [vmem:[#allocation56_spill] sm:$0xff] }
 0x662   : > { %4207 = vmatpush1.bf16.msra.mxu1 %v16807_v61  ;;  %v3382_v8 = vsel %vm680_vm2, %v16811_v33, %v3353_v25  ;;  %v3423_v21 = vmul.f32 %v11183_v53, %v3383_v42  ;;  %v3378_v57 = vsel %vm680_vm2, %v3353_v25, %v16812_v35  ;;  %v3528_v22 = vpack.c.bf16 %v11516_v49, %v11479_v10  ;;  %v16819_v63 = vld [vmem:[#allocation83_spill] sm:$0xff] }
 0x663   : > { %v3419_v24 = vmul.f32 %v11183_v53, %v3382_v8  ;;  %v3371_v15 = vpop.permute.xlu0 %3370  ;;  %4208 = vmatprep.subr.bf16.mxu1 %v3331_v43  ;;  %v16814_v23 = vpack.c.bf16 %v11348_v9, %v11373_v20  ;;  %v11558_v53 = vmul.f32 %v11216_v12, %v3600_v58  ;;  %v3597_v10 = vsel %vm992_vm4, %v16816_v59, %v16815_v6  ;;  %v16817_v20 = vld [vmem:[#allocation36_spill] sm:$0xff]  ;;  %v16820_v61 = vld [vmem:[#allocation71_spill] sm:$0xff] }
 0x664   : > { %4103 = vmatpush1.bf16.msra.mxu0 %v3328_v51  ;;  %v3375_v32 = vsel %vm680_vm2, %v16813_v54, %v3371_v15  ;;  %v3387_v3 = vsel %vm680_vm2, %v3371_v15, %v16806_v18  ;;  %v3379_v16 = vsel %vm680_vm2, %v3355_v5, %v16813_v54  ;;  %v3601_v11 = vsel %vm992_vm4, %v16817_v20, %v16816_v59 }
 0x665   : > { %4104 = vmatprep.subr.bf16.mxu0 %v16814_v23  ;;  %v3369_v30 = vpop.permute.xlu1 %3368  ;;  %v3431_v9 = vpack.c.bf16 %v3423_v21, %v3419_v24  ;;  %v3420_v39 = vmul.f32 %v11186_v29, %v3378_v57  ;;  %v3422_v19 = vmul.f32 %v11194_v0, %v3387_v3  ;;  %v3425_v36 = vmul.f32 %v11197_v38, %v3375_v32  ;;  %v16825_v21 = vld [vmem:[#allocation73_spill] sm:$0xff]  ;;  %v16827_v3 = vld [vmem:[#allocation59_spill] sm:$0xff] }
 0x666   : > { %4209 = vmatpush1.bf16.msra.mxu1 %v3330_v1  ;;  %v3374_v7 = vsel %vm680_vm2, %v16812_v35, %v3369_v30  ;;  %v3386_v48 = vsel %vm680_vm2, %v3369_v30, %v16811_v33  ;;  %v16818_v49 = vpack.c.bf16 %v11376_v44, %v11384_v13  ;;  %v11589_v18 = vmul.f32 %v16819_v63, %v3596_v45  ;;  %v16824_v33 = vld [vmem:[#allocation74_spill] sm:$0xff]  ;;  %v16826_v24 = vld [vmem:[#allocation57_spill] sm:$0xff] }
 0x667   : > { %4210 = vmatprep.subr.bf16.mxu1 %v3429_v62  ;;  %v3418_v62 = vmul.f32 %v11194_v0, %v3386_v48  ;;  %v3421_v5 = vmul.f32 %v11197_v38, %v3374_v7  ;;  %v3457_v14 = vpop.permute.xlu0 %3456  ;;  %v3424_v42 = vmul.f32 %v11186_v29, %v3379_v16  ;;  %v16821_v0 = vpack.c.bf16 %v11336_v2, %v11362_v55  ;;  %v16823_v2 = vld [vmem:[#allocation72_spill] sm:$0xff]  ;;  %v16830_v7 = vld [vmem:[#allocation39_spill] sm:$0xff] }
 0x668   : > { %4105 = vmatpush1.bf16.msra.mxu0 %v16818_v49  ;;  %v3485_v51 = vsel %vm824_vm3, %v16820_v61, %v3457_v14  ;;  %v11599_v38 = vmul.f32 %v11216_v12, %v3601_v11  ;;  %v3531_v43 = vpack.c.bf16 %v11526_v4, %v11488_v60  ;;  %v11604_v29 = vmul.f32 %v16819_v63, %v3597_v10 }
 0x669   : > { %4106 = vmatprep.subr.bf16.mxu0 %v3431_v9  ;;  %v3430_v25 = vpack.c.bf16 %v3422_v19, %v3418_v62  ;;  %v3455_v44 = vpop.permute.xlu1 %3454  ;;  %v3433_v13 = vpack.c.bf16 %v3425_v36, %v3421_v5  ;;  %v3592_v45 = vsel %vm992_vm4, %v16808_v56, %v16822_v52  ;;  %v3432_v58 = vpack.c.bf16 %v3424_v42, %v3420_v39  ;;  %v16829_v39 = vld [vmem:[#allocation58_spill] sm:$0xff]  ;;  %v16833_v42 = vld [vmem:[#allocation85_spill] sm:$0xff] }
 0x66a   : > { %4211 = vmatpush1.bf16.msra.mxu1 %v16821_v0  ;;  %v3484_v55 = vsel %vm824_vm3, %v16823_v2, %v3455_v44  ;;  %v3525_v1 = vmul.f32 %v11200_v41, %v3485_v51  ;;  %v3480_v8 = vsel %vm824_vm3, %v3455_v44, %v16824_v33  ;;  %v3604_v56 = vsel %vm992_vm4, %v16822_v52, %v16810_v28  ;;  %v16831_v19 = vld [vmem:[#allocation42_spill] sm:$0xff]  ;;  %v16834_v51 = vld [vmem:[#allocation41_spill] sm:$0xff]  ;;  %v16836_v44 = vld [vmem:[#allocation87_spill] sm:$0xff] }
 0x66b   : > { %v3521_v60 = vmul.f32 %v11200_v41, %v3484_v55  ;;  %v3473_v4 = vpop.permute.xlu0 %3472  ;;  %4212 = vmatprep.subr.bf16.mxu1 %v3433_v13  ;;  %v3593_v41 = vsel %vm992_vm4, %v16815_v6, %v16826_v24  ;;  %v3605_v28 = vsel %vm992_vm4, %v16826_v24, %v16817_v20  ;;  %v3481_v15 = vsel %vm824_vm3, %v3457_v14, %v16825_v21  ;;  %v16835_v0 = vld [vmem:[#allocation86_spill] sm:$0xff]  ;;  %v16837_v52 = vld [vmem:[#allocation60_spill] sm:$0xff] }
 0x66c   : > { %4107 = vmatpush1.bf16.msra.mxu0 %v3430_v25  ;;  %v3477_v35 = vsel %vm824_vm3, %v16825_v21, %v3473_v4  ;;  %v3489_v57 = vsel %vm824_vm3, %v3473_v4, %v16820_v61  ;;  %v3522_v59 = vmul.f32 %v11203_v17, %v3480_v8  ;;  %v3702_v48 = vsel %vm1136_vm5, %v16830_v7, %v16829_v39  ;;  %v16842_v21 = vld [vmem:[#allocation30_spill] sm:$0xff] }
 0x66d   : > { %4108 = vmatprep.subr.bf16.mxu0 %v3529_v47  ;;  %v3471_v54 = vpop.permute.xlu1 %3470  ;;  %v3533_v32 = vpack.c.bf16 %v3525_v1, %v3521_v60  ;;  %v16828_v47 = vld [vmem:[#allocation40_spill] sm:$0xff]  ;;  %v3524_v16 = vmul.f32 %v11210_v37, %v3489_v57  ;;  %v3527_v30 = vmul.f32 %v11213_v31, %v3477_v35  ;;  %v3699_v36 = vsel %vm1136_vm5, %v16827_v3, %v16831_v19  ;;  %v16843_v35 = vld [vmem:[#allocation29_spill] sm:$0xff] }
 0x66e   : > { %4213 = vmatpush1.bf16.msra.mxu1 %v3432_v58  ;;  %v3703_v23 = vsel %vm1136_vm5, %v16828_v47, %v16827_v3  ;;  %v3476_v6 = vsel %vm824_vm3, %v16824_v33, %v3471_v54  ;;  %v3488_v10 = vsel %vm824_vm3, %v3471_v54, %v16823_v2  ;;  %v3526_v62 = vmul.f32 %v11203_v17, %v3481_v15  ;;  %v16838_v2 = vld [vmem:[#allocation61_spill] sm:$0xff]  ;;  %v16839_v1 = vld [vmem:[#allocation28_spill] sm:$0xff]  ;;  %v16840_v33 = vld [vmem:[#allocation27_spill] sm:$0xff] }
 0x66f   : > { %4214 = vmatprep.subr.bf16.mxu1 %v3531_v43  ;;  %v3520_v9 = vmul.f32 %v11210_v37, %v3488_v10  ;;  %v3523_v20 = vmul.f32 %v11213_v31, %v3476_v6  ;;  %v11654_v11 = vpop.permute.xlu0 %3574  ;;  %v16832_v37 = vld [vmem:[#allocation84_spill] sm:$0xff]  ;;  %v3637_v61 = vmul.f32 %v16833_v42, %v3605_v28  ;;  %v3698_v17 = vsel %vm1136_vm5, %v16829_v39, %v16834_v51  ;;  %v16846_v3 = vld [vmem:[#allocation89_spill] sm:$0xff]  ;;  %v16849_v10 = vld [vmem:[#allocation23_spill] sm:$0xff] }
 0x670   : > { %4109 = vmatpush1.bf16.msra.mxu0 %v3528_v22  ;;  %v11669_v31 = vmul.f32 %v16832_v37, %v3592_v45  ;;  %v11672_v22 = vmul.f32 %v16832_v37, %v3593_v41  ;;  %v11680_v25 = vmul.f32 %v16835_v0, %v3703_v23  ;;  %v3534_v40 = vpack.c.bf16 %v3526_v62, %v3522_v59  ;;  %v16845_v54 = vld [vmem:[#allocation88_spill] sm:$0xff]  ;;  %v16857_v62 = vld [vmem:[#allocation26_spill] sm:$0xff] }
 0x671   : > { %4110 = vmatprep.subr.bf16.mxu0 %v3533_v32  ;;  %v3532_v5 = vpack.c.bf16 %v3524_v16, %v3520_v9  ;;  %v3573_v14 = vpop.permute.xlu1 %3572  ;;  %v3535_v49 = vpack.c.bf16 %v3527_v30, %v3523_v20  ;;  %v3633_v34 = vmul.f32 %v16833_v42, %v3604_v56  ;;  %v11687_v13 = vmul.f32 %v16836_v44, %v3699_v36  ;;  %v16851_v30 = vld [vmem:[#allocation62_spill] sm:$0xff]  ;;  %v16852_v9 = vld [vmem:[#allocation43_spill] sm:$0xff]  ;;  %v16853_v39 = vld [vmem:[#allocation76_spill] sm:$0xff] }
 0x672   : > { %4215 = vmatpush1.bf16.msra.mxu1 %v3530_v50  ;;  %v11684_v50 = vmul.f32 %v16835_v0, %v3702_v48  ;;  %v3694_v45 = vsel %vm1136_vm5, %v16834_v51, %v16837_v52  ;;  %v3706_v58 = vsel %vm1136_vm5, %v16837_v52, %v16830_v7  ;;  %v3695_v55 = vsel %vm1136_vm5, %v16831_v19, %v16838_v2  ;;  %v16854_v48 = vld [vmem:[#allocation48_spill] sm:$0xff]  ;;  %v16855_v19 = vld [vmem:[#allocation50_spill] sm:$0xff] }
 0x673   : > { %v3591_v43 = vpop.permute.xlu0 %3590  ;;  %4216 = vmatprep.subr.bf16.mxu1 %v3535_v49  ;;  %v16841_v8 = vpack.c.bf16 %v16839_v1, %v16840_v33  ;;  %v3646_v60 = vpack.c.bf16 %v11599_v38, %v11558_v53  ;;  %v3648_v4 = vpack.c.bf16 %v11672_v22, %v11669_v31  ;;  %v11709_v56 = vmul.f32 %v16836_v44, %v3698_v17  ;;  %v16858_v31 = vld [vmem:[#allocation25_spill] sm:$0xff]  ;;  %v16861_v17 = vld [vmem:[#allocation51_spill] sm:$0xff] }
 0x674   : > { %4111 = vmatpush1.bf16.msra.mxu0 %v3532_v5  ;;  %v16844_v57 = vpack.c.bf16 %v16842_v21, %v16843_v35  ;;  %v3647_v41 = vpack.c.bf16 %v11604_v29, %v11589_v18  ;;  %v3748_v28 = vpack.c.bf16 %v11680_v25, %v11684_v50  ;;  %v3707_v53 = vsel %vm1136_vm5, %v16838_v2, %v16828_v47  ;;  %v16847_v29 = vld [vmem:[#allocation78_spill] sm:$0xff]  ;;  %v16848_v47 = vld [vmem:[#allocation24_spill] sm:$0xff]  ;;  %v16866_v1 = vld [vmem:[#allocation45_spill] sm:$0xff] }
 0x675   : > { %4112 = vmatprep.subr.bf16.mxu0 %v16841_v8  ;;  %v3589_v24 = vpop.permute.xlu1 %3588  ;;  %v3649_v38 = vpack.c.bf16 %v3637_v61, %v3633_v34  ;;  %v11724_v15 = vrot.slane %v11251_v46, %v8706_v27  ;;  %v11727_v32 = vmul.f32 %v16845_v54, %v3694_v45  ;;  %v11730_v23 = vmul.f32 %v16846_v3, %v3706_v58  ;;  %v16860_v61 = vld [vmem:[#allocation77_spill] sm:$0xff]  ;;  %v16864_v45 = vld [vmem:[#allocation4_spill] sm:$0xff]  ;;  %v16865_v2 = vld [vmem:[#allocation6_spill] sm:$0xff] }
 0x676   : > { %4217 = vmatpush1.bf16.msra.mxu1 %v3534_v40  ;;  %v11733_v18 = vmul.f32 %v16845_v54, %v3695_v55  ;;  %v3598_v59 = vsel %vm992_vm4, %v3573_v14, %v16847_v29  ;;  %v16850_v16 = vpack.c.bf16 %v16848_v47, %v16849_v10  ;;  %v3804_v20 = vsel %vm1280_vm7, %v16852_v9, %v16851_v30  ;;  %v16862_v40 = vld [vmem:[#allocation52_spill] sm:$0xff]  ;;  %v16867_v35 = vld [vmem:[#allocation75_spill] sm:$0xff] }
 0x677   : > { %4218 = vmatprep.subr.bf16.mxu1 %v16844_v57  ;;  %v11738_v6 = vpop.permute.xlu0 %3676  ;;  %v3606_v7 = vsel %vm992_vm4, %v3589_v24, %v16853_v39  ;;  %v16856_v36 = vpack.c.bf16 %v16854_v48, %v16855_v19  ;;  %v16859_v22 = vpack.c.bf16 %v16857_v62, %v16858_v31  ;;  %v3749_v5 = vpack.c.bf16 %v11687_v13, %v11709_v56  ;;  %v16872_v48 = vld [vmem:[#allocation63_spill] sm:$0xff]  ;;  %v16873_v19 = vld [vmem:[#allocation44_spill] sm:$0xff]  ;;  %v16877_v31 = vld [vmem:[#allocation46_spill] sm:$0xff] }
 0x678   : > { %4113 = vmatpush1.bf16.msra.mxu0 %v16850_v16  ;;  %v11759_v49 = vmul.f32 %v16846_v3, %v3707_v53  ;;  %v3599_v51 = vsel %vm992_vm4, %v11654_v11, %v16860_v61  ;;  %v16863_v34 = vpack.c.bf16 %v16861_v17, %v16862_v40  ;;  %v11770_v58 = vrot.slane %v11251_v46, %v16864_v45 }
 0x679   : > { %4114 = vmatprep.subr.bf16.mxu0 %v16856_v36  ;;  %v3675_v52 = vpop.permute.xlu1 %3674  ;;  %v11774_v55 = vrot.slane %v11251_v46, %v16865_v2  ;;  %v3800_v33 = vsel %vm1280_vm7, %v16851_v30, %v16866_v1  ;;  %v3602_v8 = vsel %vm992_vm4, %v16853_v39, %v3573_v14  ;;  %v3639_v21 = vmul.f32 %v16819_v63, %v3598_v59  ;;  %v16868_v46 = vld [vmem:[#allocation91_spill] sm:$0xff]  ;;  %v16870_v39 = vld [vmem:[#allocation32_spill] sm:$0xff] }
 0x67a   : > { %4219 = vmatpush1.bf16.msra.mxu1 %v16859_v22  ;;  %v3607_v57 = vsel %vm992_vm4, %v3591_v43, %v16867_v35  ;;  %v3750_v53 = vpack.c.bf16 %v11733_v18, %v11727_v32  ;;  %v11790_v47 = vmul.f32 %v16868_v46, %v3804_v20  ;;  %v3594_v10 = vsel %vm992_vm4, %v16847_v29, %v3589_v24  ;;  %v16869_v14 = vld [vmem:[#allocation31_spill] sm:$0xff]  ;;  %v16874_v24 = vld [vmem:[#allocation33_spill] sm:$0xff]  ;;  %v16875_v29 = vld [vmem:[#allocation34_spill] sm:$0xff] }
 0x67b   : > { %4220 = vmatprep.subr.bf16.mxu1 %v16863_v34  ;;  %v3641_v16 = vmul.f32 %v16833_v42, %v3606_v7  ;;  %v3693_v30 = vpop.permute.xlu0 %3692  ;;  %v16871_v59 = vpack.c.bf16 %v16869_v14, %v16870_v39  ;;  %v3805_v36 = vsel %vm1280_vm7, %v16873_v19, %v16872_v48  ;;  %v3603_v20 = vsel %vm992_vm4, %v16867_v35, %v11654_v11 }
 0x67c   : > { %v3643_v62 = vmul.f32 %v16819_v63, %v3599_v51  ;;  %v16876_v7 = vpack.c.bf16 %v16874_v24, %v16875_v29  ;;  %v3801_v22 = vsel %vm1280_vm7, %v16872_v48, %v16877_v31  ;;  %v3638_v17 = vmul.f32 %v11216_v12, %v3602_v8 }
 0x67d   : > { %4115 = vmatpush1.bf16.msra.mxu0 %v16871_v59  ;;  %v3595_v40 = vsel %vm992_vm4, %v16860_v61, %v3591_v43  ;;  %v3645_v11 = vmul.f32 %v16833_v42, %v3607_v57  ;;  %v3691_v63 = vpop.permute.xlu1 %3690  ;;  %v3640_v34 = vmul.f32 %v16832_v37, %v3594_v10  ;;  %v3751_v14 = vpack.c.bf16 %v11759_v49, %v11730_v23  ;;  %v16879_v59 = vld [vmem:[#allocation82_spill] sm:$0xff]  ;;  %v16881_v49 = vld [vmem:[#allocation64_spill] sm:$0xff]  ;;  %v16882_v10 = vld [vmem:[#allocation81_spill] sm:$0xff] }
 0x67e   : > { %4116 = vmatprep.subr.bf16.mxu0 %v3647_v41  ;;  %4221 = vmatpush1.bf16.msra.mxu1 %v16876_v7  ;;  %v16878_v41 = vld [vmem:[#allocation92_spill] sm:$0xff]  ;;  %v3651_v35 = vpack.c.bf16 %v3643_v62, %v3639_v21  ;;  %v11827_v39 = vmul.f32 %v16868_v46, %v3805_v36  ;;  %v3642_v8 = vmul.f32 %v11216_v12, %v3603_v20  ;;  %v16883_v36 = vld [vmem:[#allocation79_spill] sm:$0xff] }
 0x67f   : > { %4222 = vmatprep.subr.bf16.mxu1 %v3649_v38  ;;  %v11821_v51 = vmul.f32 %v16878_v41, %v3800_v33  ;;  %v3700_v42 = vsel %vm1136_vm5, %v3675_v52, %v16879_v59  ;;  %v3779_v43 = vpop.permute.xlu0 %3778  ;;  %v3653_v38 = vpack.c.bf16 %v3645_v11, %v3641_v16  ;;  %v11834_v61 = vmul.f32 %v16878_v41, %v3801_v22  ;;  %v16880_v21 = vld [vmem:[#allocation80_spill] sm:$0xff] }
 0x680   : > { %v3644_v33 = vmul.f32 %v16832_v37, %v3595_v40  ;;  %v3708_v23 = vsel %vm1136_vm5, %v3691_v63, %v16880_v21  ;;  %v3796_v12 = vsel %vm1280_vm7, %v16866_v1, %v16881_v49  ;;  %v3650_v57 = vpack.c.bf16 %v3642_v8, %v3638_v17  ;;  %v16885_v40 = vld [vmem:[#allocation94_spill] sm:$0xff] }
 0x681   : > { %4117 = vmatpush1.bf16.msra.mxu0 %v3646_v60  ;;  %v3808_v60 = vsel %vm1280_vm7, %v16881_v49, %v16852_v9  ;;  %v3701_v37 = vsel %vm1136_vm5, %v11738_v6, %v16882_v10  ;;  %v3777_v16 = vpop.permute.xlu1 %3776  ;;  %v3741_v1 = vmul.f32 %v16836_v44, %v3700_v42  ;;  %v3709_v20 = vsel %vm1136_vm5, %v3693_v30, %v16883_v36  ;;  %v16884_v9 = vld [vmem:[#allocation65_spill] sm:$0xff]  ;;  %v16890_v49 = vld [vmem:[#allocation90_spill] sm:$0xff] }
 0x682   : > { %4118 = vmatprep.subr.bf16.mxu0 %v3651_v35  ;;  %4223 = vmatpush1.bf16.msra.mxu1 %v3648_v4  ;;  %v3652_v48 = vpack.c.bf16 %v3644_v33, %v3640_v34  ;;  %v3704_v4 = vsel %vm1136_vm5, %v16880_v21, %v3675_v52  ;;  %v3797_v62 = vsel %vm1280_vm7, %v16877_v31, %v16884_v9  ;;  %v16886_v35 = vld [vmem:[#allocation98_spill] sm:$0xff] }
 0x683   : > { %4224 = vmatprep.subr.bf16.mxu1 %v3653_v38  ;;  %v3809_v24 = vsel %vm1280_vm7, %v16884_v9, %v16873_v19  ;;  %v3696_v52 = vsel %vm1136_vm5, %v16879_v59, %v3691_v63  ;;  %v3743_v29 = vmul.f32 %v16846_v3, %v3708_v23  ;;  %v3795_v7 = vpop.permute.xlu0 %3794  ;;  %v3705_v22 = vsel %vm1136_vm5, %v16883_v36, %v11738_v6  ;;  %v16889_v38 = vld [vmem:[#allocation95_spill] sm:$0xff]  ;;  %v16892_v9 = vld [vmem:[#allocation49_spill] sm:$0xff] }
 0x684   : > { %v3745_v31 = vmul.f32 %v16836_v44, %v3701_v37  ;;  %v3697_v17 = vsel %vm1136_vm5, %v16882_v10, %v3693_v30  ;;  %v3850_v19 = vpack.c.bf16 %v11827_v39, %v11790_v47  ;;  %v3837_v11 = vmul.f32 %v16885_v40, %v3808_v60 }
 0x685   : > { %4119 = vmatpush1.bf16.msra.mxu0 %v3650_v57  ;;  %v3740_v63 = vmul.f32 %v16835_v0, %v3704_v4  ;;  %v3747_v6 = vmul.f32 %v16846_v3, %v3709_v20  ;;  %v3793_v44 = vpop.permute.xlu1 %3792  ;;  %v3841_v34 = vmul.f32 %v16885_v40, %v3809_v24  ;;  %v3742_v30 = vmul.f32 %v16845_v54, %v3696_v52  ;;  %v16893_v52 = vld [vmem:[#allocation47_spill] sm:$0xff] }
 0x686   : > { %4120 = vmatprep.subr.bf16.mxu0 %v3749_v5  ;;  %4225 = vmatpush1.bf16.msra.mxu1 %v3652_v48  ;;  %v3802_v13 = vsel %vm1280_vm7, %v3777_v16, %v16886_v35  ;;  %v3753_v56 = vpack.c.bf16 %v3745_v31, %v3741_v1  ;;  %v16887_v5 = vld [vmem:[#allocation93_spill] sm:$0xff]  ;;  %v3744_v47 = vmul.f32 %v16835_v0, %v3705_v22  ;;  %v16891_v48 = vld [vmem:[#allocation66_spill] sm:$0xff] }
 0x687   : > { %4226 = vmatprep.subr.bf16.mxu1 %v3751_v14  ;;  %v3840_v8 = vmul.f32 %v16887_v5, %v3797_v62  ;;  %v3746_v39 = vmul.f32 %v16845_v54, %v3697_v17  ;;  %v3877_v59 = vpop.permute.xlu0 %3876  ;;  %v3755_v3 = vpack.c.bf16 %v3747_v6, %v3743_v29  ;;  %v16888_v14 = vld [vmem:[#allocation97_spill] sm:$0xff]  ;;  %v3806_v33 = vsel %vm1280_vm7, %v16889_v38, %v3777_v16  ;;  %v16894_v6 = vld [vmem:[#allocation96_spill] sm:$0xff] }
 0x688   : > { %v3803_v42 = vsel %vm1280_vm7, %v3779_v43, %v16888_v14  ;;  %v3810_v0 = vsel %vm1280_vm7, %v3793_v44, %v16889_v38  ;;  %v3836_v25 = vmul.f32 %v16887_v5, %v3796_v12  ;;  %v3752_v50 = vpack.c.bf16 %v3744_v47, %v3740_v63 }
 0x689   : > { %4121 = vmatpush1.bf16.msra.mxu0 %v3748_v28  ;;  %v3843_v28 = vmul.f32 %v16878_v41, %v3802_v13  ;;  %v3883_v54 = vpop.permute.xlu1 %3882  ;;  %v3851_v21 = vpack.c.bf16 %v11834_v61, %v11821_v51  ;;  %v3754_v23 = vpack.c.bf16 %v3746_v39, %v3742_v30  ;;  %v3807_v60 = vsel %vm1280_vm7, %v16890_v49, %v3779_v43 }
 0x68a   : > { %4122 = vmatprep.subr.bf16.mxu0 %v3753_v56  ;;  %4227 = vmatpush1.bf16.msra.mxu1 %v3750_v53  ;;  %v3811_v32 = vsel %vm1280_vm7, %v3795_v7, %v16890_v49  ;;  %v3853_v18 = vpack.c.bf16 %v3841_v34, %v3837_v11  ;;  %v3847_v53 = vmul.f32 %v16878_v41, %v3803_v42 }
 0x68b   : > { %4228 = vmatprep.subr.bf16.mxu1 %v3755_v3  ;;  %v3842_v12 = vmul.f32 %v16868_v46, %v3806_v33  ;;  %v3798_v57 = vsel %vm1280_vm7, %v16886_v35, %v3793_v44  ;;  %v3845_v51 = vmul.f32 %v16885_v40, %v3810_v0  ;;  %v3885_v61 = vpop.permute.xlu0 %3884  ;;  %v3852_v10 = vpack.c.bf16 %v3840_v8, %v3836_v25  ;;  %v8382_v8 = vld [vmem:[%s16298_s4 + $0x30] ss:$12 sps:$4 sm:$0xff]  }
 0x68c   : > { %v3799_v43 = vsel %vm1280_vm7, %v16888_v14, %v3795_v7  ;;  %v3903_v37 = vsel %vm1424_vm8, %v3877_v59, %v3885_v61  ;;  %v3846_v41 = vmul.f32 %v16868_v46, %v3807_v60  ;;  %v3849_v16 = vmul.f32 %v16885_v40, %v3811_v32  ;;  %v8385_v14 = vld [vmem:[%s16298_s4 + $0x4c] ss:$12 sps:$4 sm:$0xff]  }
 0x68d   : > { %4123 = vmatpush1.bf16.msra.mxu0 %v3752_v50  ;;  %v3902_v4 = vsel %vm1424_vm8, %v16891_v48, %v3883_v54  ;;  %v3891_v1 = vpop.permute.xlu1 %3890  ;;  %v3855_v36 = vpack.c.bf16 %v3847_v53, %v3843_v28  ;;  %v3844_v20 = vmul.f32 %v16887_v5, %v3798_v57  ;;  %v3907_v62 = vsel %vm1424_vm8, %v16892_v9, %v3877_v59 }
 0x68e   : > { %4124 = vmatprep.subr.bf16.mxu0 %v3851_v21  ;;  %4229 = vmatpush1.bf16.msra.mxu1 %v3754_v23  ;;  %v3941_v24 = vmul.f32 %v11724_v15, %v3903_v37  ;;  %v3910_v46 = vsel %vm1424_vm8, %v3891_v1, %v16893_v52  ;;  %v3906_v29 = vsel %vm1424_vm8, %v16893_v52, %v16891_v48 }
 0x68f   : > { %4230 = vmatprep.subr.bf16.mxu1 %v3853_v18  ;;  %v3854_v7 = vpack.c.bf16 %v3846_v41, %v3842_v12  ;;  %v3848_v22 = vmul.f32 %v16887_v5, %v3799_v43  ;;  %v3893_v31 = vpop.permute.xlu0 %3892  ;;  %v3857_v17 = vpack.c.bf16 %v3849_v16, %v3845_v51  ;;  %v3937_v40 = vmul.f32 %v11724_v15, %v3902_v4 }
 0x690   : > { %v3899_v11 = vsel %vm1424_vm8, %v3885_v61, %v3893_v31  ;;  %v3911_v63 = vsel %vm1424_vm8, %v3893_v31, %v16892_v9  ;;  %v3940_v44 = vmul.f32 %v16894_v6, %v3907_v62  ;;  %v3898_v34 = vsel %vm1424_vm8, %v3883_v54, %v3891_v1  ;;  %v8387_v54 = vld [vmem:[%s16298_s4 + $0x48] ss:$12 sps:$4 sm:$0xff]  }
 0x691   : > { %4125 = vmatpush1.bf16.msra.mxu0 %v3850_v19  ;;  %v3939_v30 = vmul.f32 %v11774_v55, %v3910_v46  ;;  %v3943_v19 = vmul.f32 %v11774_v55, %v3911_v63  ;;  %v3871_v35 = vpop.permute.xlu1 %3870  ;;  %v3856_v13 = vpack.c.bf16 %v3848_v22, %v3844_v20  ;;  %v3942_v56 = vmul.f32 %v11770_v58, %v3899_v11 }
 0x692   : > { %4126 = vmatprep.subr.bf16.mxu0 %v3855_v36  ;;  %4231 = vmatpush1.bf16.msra.mxu1 %v3852_v10  ;;  %v3953_v5 = vpack.c.bf16 %v3941_v24, %v3937_v40  ;;  %v3936_v47 = vmul.f32 %v16894_v6, %v3906_v29  ;;  %v3938_v3 = vmul.f32 %v11770_v58, %v3898_v34  ;;  %v16895_v43 = vmov 0   ;;  %v8388_v36 = vld [vmem:[%s16298_s4 + $0x38] ss:$12 sps:$4 sm:$0xff]  }
 0x693   : > { %4232 = vmatprep.subr.bf16.mxu1 %v3857_v17  ;;  %v3873_v39 = vpop.permute.xlu0 %3872  ;;  %v3955_v59 = vpack.c.bf16 %v3943_v19, %v3939_v30  ;;  %v16900_v30 = vld [vmem:[#allocation9_spill] sm:$0xff] }
 0x694   : > { %v3952_v42 = vpack.c.bf16 %v3940_v44, %v3936_v47  ;;  %v3954_v33 = vpack.c.bf16 %v3942_v56, %v3938_v3  ;;  %v16902_v56 = vld [vmem:[#allocation10_spill] sm:$0xff] }
 0x695   : > { %4127 = vmatpush1.bf16.msra.mxu0 %v3854_v7  ;;  %v3879_v38 = vpop.permute.xlu1 %3878  ;;  %v16896_v7 = vld [vmem:[#allocation7_spill] sm:$0xff] }
 0x696   : > { %4149 = vmatprep.subr.bf16.mxu0 %v3953_v5  ;;  %4233 = vmatpush1.bf16.msra.mxu1 %v3856_v13  ;;  %v3908_v21 = vsel %vm1424_vm8, %v3871_v35, %v3879_v38 }
 0x697   : > { %4255 = vmatprep.subr.bf16.mxu1 %v3955_v59  ;;  %v3881_v0 = vpop.permute.xlu0 %3880  ;;  %v3944_v12 = vmul.f32 %v16894_v6, %v3908_v21 }
 0x698   : > { %4129 = vmatmul.mubr.bf16.vlgmr.msra.gmra.mrb[16].mxu0 %v8382_v8  ;;  %v3909_v25 = vsel %vm1424_vm8, %v3873_v39, %v3881_v0 }
 0x699   : > { %4150 = vmatpush1.bf16.msra.mxu0 %v3952_v42  ;;  %4235 = vmatmul.mubr.bf16.vlgmr.msra.gmra.mrb[16].mxu1 %v8382_v8  ;;  %v3887_v50 = vpop.permute.xlu1 %3886  ;;  %v3948_v49 = vmul.f32 %v16894_v6, %v3909_v25  ;;  %v16898_v6 = vld [vmem:[#allocation8_spill] sm:$0xff]  ;;  %v16904_v25 = vld [vmem:[#allocation11_spill] sm:$0xff] }
 0x69a   : > { %4256 = vmatpush1.bf16.msra.mxu1 %v3954_v33  ;;  %4138 = vmatprep.mubr.bf16.mxu0 %v8385_v14  ;;  %v3904_v28 = vsel %vm1424_vm8, %v3879_v38, %v3887_v50 }
 0x69b   : > { %4244 = vmatprep.mubr.bf16.mxu1 %v8385_v14  ;;  %v3889_v23 = vpop.permute.xlu0 %3888  ;;  %v3945_v32 = vmul.f32 %v11724_v15, %v3904_v28  ;;  %v3956_v37 = vpack.c.bf16 %v3948_v49, %v3944_v12  ;;  %v16908_v49 = vld [vmem:[#allocation13_spill] sm:$0xff] }
 0x69c   : > { %v3905_v60 = vsel %vm1424_vm8, %v3881_v0, %v3889_v23 }
 0x69d   : > { %v3949_v18 = vmul.f32 %v11724_v15, %v3905_v60  ;;  %v3895_v53 = vpop.permute.xlu1 %3894 }
 0x69e   : > { %v3900_v57 = vsel %vm1424_vm8, %v3887_v50, %v3895_v53  ;;  %v3912_v51 = vsel %vm1424_vm8, %v3895_v53, %v3871_v35 }
 0x69f   : > { %v3897_v61 = vpop.permute.xlu0 %3896  ;;  %v3957_v10 = vpack.c.bf16 %v3949_v18, %v3945_v32  ;;  %v3946_v16 = vmul.f32 %v11770_v58, %v3900_v57  ;;  %v3947_v48 = vmul.f32 %v11774_v55, %v3912_v51  ;;  %v16910_v32 = vld [vmem:[#allocation14_spill] sm:$0xff] }
 0x6a0   : > { %4139 = vmatmul.mubr.bf16.gmra.mrb[20].mxu0 %v8387_v54  ;;  %v3901_v41 = vsel %vm1424_vm8, %v3889_v23, %v3897_v61  ;;  %v3913_v15 = vsel %vm1424_vm8, %v3897_v61, %v3873_v39 }
 0x6a1   : > { %4245 = vmatmul.mubr.bf16.gmra.mrb[20].mxu1 %v8387_v54  ;;  %4181 = vmatprep.mubr.bf16.mxu0 %v16895_v43  ;;  %v3950_v4 = vmul.f32 %v11770_v58, %v3901_v41  ;;  %v3951_v1 = vmul.f32 %v11774_v55, %v3913_v15  ;;  %v8389_v58 = vld [vmem:[%s16298_s4 + $0x50] ss:$12 sps:$4 sm:$0xff]   ;;  %v16906_v54 = vld [vmem:[#allocation12_spill] sm:$0xff] }
 0x6a2   : > { %4287 = vmatprep.mubr.bf16.mxu1 %v16895_v43  ;;  %4151 = vmatprep.subr.bf16.mxu0 %v3957_v10 }
 0x6a3   : > { %4152 = vmatpush1.bf16.msra.mxu0 %v3956_v37  ;;  %v3958_v20 = vpack.c.bf16 %v3950_v4, %v3946_v16  ;;  %v3959_v9 = vpack.c.bf16 %v3951_v1, %v3947_v48  ;;  %v16912_v37 = vld [vmem:[#allocation16_spill] sm:$0xff]  ;;  %v16914_v48 = vld [vmem:[#allocation15_spill] sm:$0xff] }
 0x6a5   : > { %4257 = vmatprep.subr.bf16.mxu1 %v3959_v9 }
 0x6a6   : > { %4258 = vmatpush1.bf16.msra.mxu1 %v3958_v20  ;;  %v16916_v20 = vld [vmem:[#allocation18_spill] sm:$0xff] }
 0x6a8   : > { %8068 = vmatmul.mubr.msk.bf16.vlgmr.msra.gmra.mrb[16].mxu0 %vm2887_vm9, %v8388_v36 }
 0x6a9   : > { %4191 = vmatprep.mubr.bf16.mxu0 %v16895_v43  ;;  %8070 = vmatmul.mubr.msk.bf16.vlgmr.msra.gmra.mrb[16].mxu1 %vm2887_vm9, %v8388_v36 }
 0x6aa   : > { %4297 = vmatprep.mubr.bf16.mxu1 %v16895_v43 }
 0x6ae   : > { %v4043_v55 = vpop.permute.xlu1 %4042 }
 0x6b0   : > { %8069 = vmatmul.mubr.msk.bf16.gmra.mrb[20].mxu0 %vm2887_vm9, %v8389_v58  ;;  %v4048_v46 = vpop.permute.xlu0 %4047 }
 0x6b1   : > { %8071 = vmatmul.mubr.msk.bf16.gmra.mrb[20].mxu1 %vm2887_vm9, %v8389_v58 }
 0x6b2   : > { %v12160_v53 = vpop.permute.xlu1 %4052 }
 0x6b4   : > { %v12164_v12 = vpop.permute.xlu0 %4057 }
 0x77b   : > { %v4183_v62 = vpop.f32.mrb[16].mxu0 }
 0x77c   : > { %v8182_v24 = vadd.f32 %v4183_v62, %v4043_v55  ;;  %v4185_v52 = vpop.f32.mrb[17].mxu0  ;;  %v4289_v40 = vpop.f32.mrb[16].mxu1 }
 0x77d   : > { %v4187_v29 = vpop.f32.mrb[18].mxu0  ;;  %v8190_v11 = vadd.f32 %v4289_v40, %v4043_v55  ;;  %v4291_v63 = vpop.f32.mrb[17].mxu1  ;;  %v8183_v33 = vadd.f32 %v4185_v52, %v4043_v55 }
 0x77e   : > { %v12011_v22 = vadd.f32 %v8182_v24, %v16896_v7  ;;  %v8184_v31 = vadd.f32 %v4187_v29, %v4048_v46  ;;  %v4189_v17 = vpop.f32.mrb[19].mxu0  ;;  %v4293_v34 = vpop.f32.mrb[18].mxu1  ;;  %v8191_v28 = vadd.f32 %v4291_v63, %v4043_v55  ;;  %v16918_v55 = vld [vmem:[#allocation17_spill] sm:$0xff] }
 0x77f   : > { %v12019_v19 = vadd.f32 %v8190_v11, %v16900_v30  ;;  %v8192_v35 = vadd.f32 %v4293_v34, %v4048_v46  ;;  %v4295_v13 = vpop.f32.mrb[19].mxu1  ;;  %v8185_v0 = vadd.f32 %v4189_v17, %v4048_v46  ;;  %v12097_v50 = vadd.f32 %v8183_v33, %v16904_v25  ;;  %v16940_v7 = vld [vmem:[#allocation5_spill] sm:$0xff] }
 0x780   : > { %16897 = vst [vmem:[#allocation53_spill] sm:$0xff] %v12011_v22  ;;  %v12014_v44 = vadd.f32 %v8184_v31, %v16898_v6  ;;  %4338 = vrot.lane.b32.xlu1 %v12011_v22, %s8446_s11  ;;  %v8193_v23 = vadd.f32 %v4295_v13, %v4048_v46  ;;  %v12107_v60 = vadd.f32 %v8191_v28, %v16908_v49  ;;  %v16936_v6 = vld [vmem:[#allocation19_spill] sm:$0xff] }
 0x781   : > { %16901 = vst [vmem:[#allocation37_spill] sm:$0xff] %v12019_v19  ;;  %v12024_v5 = vadd.f32 %v8192_v35, %v16902_v56  ;;  %16905 = vst [vmem:[#allocation35_spill] sm:$0xff] %v12097_v50  ;;  %v12102_v21 = vadd.f32 %v8185_v0, %v16906_v54 }
 0x782   : > { %16899 = vst [vmem:[#allocation67_spill] sm:$0xff] %v12014_v44  ;;  %4340 = vrot.lane.b32.xlu0 %v12014_v44, %s8446_s11  ;;  %16909 = vst [vmem:[#allocation70_spill] sm:$0xff] %v12107_v60  ;;  %v12112_v18 = vadd.f32 %v8193_v23, %v16910_v32  ;;  %v16934_v32 = vld [vmem:[#allocation20_spill] sm:$0xff] }
 0x783   : > { %16903 = vst [vmem:[#allocation54_spill] sm:$0xff] %v12024_v5  ;;  %v12026_v8 = vpop.f32.mrb[20].mxu0  ;;  %16907 = vst [vmem:[#allocation68_spill] sm:$0xff] %v12102_v21 }
 0x784   : > { %v12028_v47 = vpop.f32.mrb[21].mxu0  ;;  %4354 = vrot.lane.b32.xlu1 %v12019_v19, %s8446_s11  ;;  %v12036_v3 = vpop.f32.mrb[20].mxu1  ;;  %16911 = vst [vmem:[#allocation69_spill] sm:$0xff] %v12112_v18  ;;  %v8186_v57 = vadd.f32 %v12026_v8, %v12160_v53 }
 0x785   : > { %v12032_v39 = vpop.f32.mrb[22].mxu0  ;;  %v12040_v14 = vpop.f32.mrb[21].mxu1  ;;  %v8194_v15 = vadd.f32 %v12036_v3, %v12160_v53 }
 0x786   : > { %v12034_v59 = vpop.f32.mrb[23].mxu0  ;;  %4356 = vrot.lane.b32.xlu0 %v12024_v5, %s8446_s11  ;;  %v12042_v42 = vpop.f32.mrb[22].mxu1  ;;  %v8188_v61 = vadd.f32 %v12032_v39, %v12164_v12  ;;  %v12181_v41 = vadd.f32 %v8186_v57, %v16912_v37 }
 0x787   : > { %v12046_v38 = vpop.f32.mrb[23].mxu1  ;;  %v8196_v1 = vadd.f32 %v12042_v42, %v12164_v12  ;;  %v12199_v9 = vadd.f32 %v8194_v15, %v16916_v20  ;;  %v8189_v20 = vadd.f32 %v12034_v59, %v12164_v12 }
 0x788   : > { %4440 = vrot.lane.b32.xlu1 %v12011_v22, %s8447_s12  ;;  %16913 = vst [vmem:[#allocation38_spill] sm:$0xff] %v12181_v41  ;;  %v12190_v4 = vadd.f32 %v8188_v61, %v16914_v48  ;;  %v4386_v48 = vld [vmem:[%s16295_s1] sm:$0xf] }
 0x789   : > { %16917 = vst [vmem:[#allocation36_spill] sm:$0xff] %v12199_v9  ;;  %v12206_v62 = vadd.f32 %v8196_v1, %v16918_v55  ;;  %v8187_v1 = vadd.f32 %v12028_v47, %v12160_v53  ;;  %v8195_v47 = vadd.f32 %v12040_v14, %v12160_v53  ;;  %v12323_v54 = vrot.slane %v4386_v48, %v8706_v27 }
 0x78a   : > { %4442 = vrot.lane.b32.xlu0 %v12014_v44, %s8447_s12  ;;  %16915 = vst [vmem:[#allocation55_spill] sm:$0xff] %v12190_v4  ;;  %v12329_v30 = vadd.f32 %v8189_v20, %v16936_v6  ;;  %v8197_v14 = vadd.f32 %v12046_v38, %v12164_v12  ;;  %v12342_v43 = vrot.slane %v4386_v48, %v16940_v7 }
 0x78b   : > { %16919 = vst [vmem:[#allocation83_spill] sm:$0xff] %v12206_v62  ;;  %v12318_v56 = vadd.f32 %v8187_v1, %v16934_v32  ;;  %v16938_v1 = vld [vmem:[#allocation22_spill] sm:$0xff] }
 0x78c   : > { %4456 = vrot.lane.b32.xlu1 %v12019_v19, %s8447_s12  ;;  %16937 = vst [vmem:[#allocation87_spill] sm:$0xff] %v12329_v30  ;;  %v12336_v32 = vadd.f32 %v8195_v47, %v16938_v1  ;;  %v12352_v47 = vrot.slane %v4386_v48, %v16865_v2  ;;  %v12355_v1 = vrot.slane %v4386_v48, %v16864_v45 }
 0x78d   : > { %16935 = vst [vmem:[#allocation86_spill] sm:$0xff] %v12318_v56 }
 0x78e   : > { %4458 = vrot.lane.b32.xlu0 %v12024_v5, %s8447_s12  ;;  %16939 = vst [vmem:[#allocation60_spill] sm:$0xff] %v12336_v32 }
 0x790   : > { %4542 = vrot.lane.b32.xlu1 %v12011_v22, %s8448_s13 }
 0x792   : > { %4544 = vrot.lane.b32.xlu0 %v12014_v44, %s8448_s13 }
 0x794   : > { %4558 = vrot.lane.b32.xlu1 %v12019_v19, %s8448_s13 }
 0x796   : > { %4560 = vrot.lane.b32.xlu0 %v12024_v5, %s8448_s13 }
 0x798   : > { %4644 = vrot.lane.b32.xlu1 %v12011_v22, %s8449_s16 }
 0x79a   : > { %4646 = vrot.lane.b32.xlu0 %v12014_v44, %s8449_s16 }
 0x79c   : > { %4660 = vrot.lane.b32.xlu1 %v12019_v19, %s8449_s16 }
 0x79e   : > { %4662 = vrot.lane.b32.xlu0 %v12024_v5, %s8449_s16 }
 0x7a0   : > { %4762 = vrot.lane.b32.xlu1 %v12011_v22, %s8450_s19 }
 0x7a2   : > { %4764 = vrot.lane.b32.xlu0 %v12014_v44, %s8450_s19 }
 0x7a4   : > { %4778 = vrot.lane.b32.xlu1 %v12019_v19, %s8450_s19 }
 0x7a6   : > { %4780 = vrot.lane.b32.xlu0 %v12024_v5, %s8450_s19 }
 0x7a8   : > { %4864 = vrot.lane.b32.xlu1 %v12011_v22, %s8451_s24 }
 0x7aa   : > { %4866 = vrot.lane.b32.xlu0 %v12014_v44, %s8451_s24 }
 0x7ac   : > { %4880 = vrot.lane.b32.xlu1 %v12019_v19, %s8451_s24 }
 0x7ae   : > { %4882 = vrot.lane.b32.xlu0 %v12024_v5, %s8451_s24 }
 0x7b0   : > { %4966 = vrot.lane.b32.xlu1 %v12011_v22, %s8452_s29 }
 0x7b2   : > { %4968 = vrot.lane.b32.xlu0 %v12014_v44, %s8452_s29 }
 0x7b4   : > { %4982 = vrot.lane.b32.xlu1 %v12019_v19, %s8452_s29 }
 0x7b6   : > { %4984 = vrot.lane.b32.xlu0 %v12024_v5, %s8452_s29 }
 0x7b8   : > { %5068 = vrot.lane.b32.xlu1 %v12011_v22, %s8453_s15 }
 0x7ba   : > { %5070 = vrot.lane.b32.xlu0 %v12014_v44, %s8453_s15 }
 0x7bc   : > { %4346 = vrot.lane.b32.xlu1 %v12097_v50, %s8446_s11 }
 0x7be   : > { %4348 = vrot.lane.b32.xlu0 %v12102_v21, %s8446_s11 }
 0x7c0   : > { %4362 = vrot.lane.b32.xlu1 %v12107_v60, %s8446_s11 }
 0x7c2   : > { %4364 = vrot.lane.b32.xlu0 %v12112_v18, %s8446_s11 }
 0x7c4   : > { %4448 = vrot.lane.b32.xlu1 %v12097_v50, %s8447_s12 }
 0x7c6   : > { %4450 = vrot.lane.b32.xlu0 %v12102_v21, %s8447_s12 }
 0x7c8   : > { %4464 = vrot.lane.b32.xlu1 %v12107_v60, %s8447_s12 }
 0x7ca   : > { %4466 = vrot.lane.b32.xlu0 %v12112_v18, %s8447_s12 }
 0x7cc   : > { %4550 = vrot.lane.b32.xlu1 %v12097_v50, %s8448_s13 }
 0x7ce   : > { %4552 = vrot.lane.b32.xlu0 %v12102_v21, %s8448_s13 }
 0x7d0   : > { %4566 = vrot.lane.b32.xlu1 %v12107_v60, %s8448_s13 }
 0x7d2   : > { %4568 = vrot.lane.b32.xlu0 %v12112_v18, %s8448_s13 }
 0x7d4   : > { %4652 = vrot.lane.b32.xlu1 %v12097_v50, %s8449_s16 }
 0x7d6   : > { %4654 = vrot.lane.b32.xlu0 %v12102_v21, %s8449_s16 }
 0x7d8   : > { %4668 = vrot.lane.b32.xlu1 %v12107_v60, %s8449_s16 }
 0x7da   : > { %4670 = vrot.lane.b32.xlu0 %v12112_v18, %s8449_s16 }
 0x7dc   : > { %4770 = vrot.lane.b32.xlu1 %v12097_v50, %s8450_s19 }
 0x7de   : > { %4772 = vrot.lane.b32.xlu0 %v12102_v21, %s8450_s19 }
 0x7e0   : > { %4786 = vrot.lane.b32.xlu1 %v12107_v60, %s8450_s19 }
 0x7e2   : > { %4788 = vrot.lane.b32.xlu0 %v12112_v18, %s8450_s19 }
 0x7e4   : > { %4872 = vrot.lane.b32.xlu1 %v12097_v50, %s8451_s24 }
 0x7e6   : > { %4874 = vrot.lane.b32.xlu0 %v12102_v21, %s8451_s24 }
 0x7e8   : > { %4888 = vrot.lane.b32.xlu1 %v12107_v60, %s8451_s24 }
 0x7ea   : > { %4890 = vrot.lane.b32.xlu0 %v12112_v18, %s8451_s24 }
 0x7ec   : > { %4974 = vrot.lane.b32.xlu1 %v12097_v50, %s8452_s29 }
 0x7ee   : > { %4976 = vrot.lane.b32.xlu0 %v12102_v21, %s8452_s29 }
 0x7f0   : > { %4990 = vrot.lane.b32.xlu1 %v12107_v60, %s8452_s29 }
 0x7f2   : > { %4992 = vrot.lane.b32.xlu0 %v12112_v18, %s8452_s29  ;;  %v12172_v51 = vpop.permute.xlu1 %4338 }
 0x7f4   : > { %v12176_v10 = vpop.permute.xlu0 %4340  ;;  %5076 = vrot.lane.b32.xlu1 %v12097_v50, %s8453_s15 }
 0x7f6   : > { %5078 = vrot.lane.b32.xlu0 %v12102_v21, %s8453_s15  ;;  %v12187_v16 = vpop.permute.xlu1 %4354 }
 0x7f8   : > { %v12194_v36 = vpop.permute.xlu0 %4356  ;;  %4342 = vrot.lane.b32.xlu1 %v12181_v41, %s8446_s11 }
 0x7fa   : > { %4344 = vrot.lane.b32.xlu0 %v12190_v4, %s8446_s11  ;;  %v12203_v58 = vpop.permute.xlu1 %4440 }
 0x7fc   : > { %v12208_v24 = vpop.permute.xlu0 %4442  ;;  %4358 = vrot.lane.b32.xlu1 %v12199_v9, %s8446_s11 }
 0x7fe   : > { %4360 = vrot.lane.b32.xlu0 %v12206_v62, %s8446_s11  ;;  %v12214_v52 = vpop.permute.xlu1 %4456 }
 0x800   : > { %v12216_v46 = vpop.permute.xlu0 %4458  ;;  %4444 = vrot.lane.b32.xlu1 %v12181_v41, %s8447_s12 }
 0x802   : > { %4446 = vrot.lane.b32.xlu0 %v12190_v4, %s8447_s12  ;;  %v12222_v29 = vpop.permute.xlu1 %4542 }
 0x804   : > { %v12224_v31 = vpop.permute.xlu0 %4544  ;;  %4460 = vrot.lane.b32.xlu1 %v12199_v9, %s8447_s12 }
 0x806   : > { %4462 = vrot.lane.b32.xlu0 %v12206_v62, %s8447_s12  ;;  %v12230_v17 = vpop.permute.xlu1 %4558 }
 0x808   : > { %v12232_v40 = vpop.permute.xlu0 %4560  ;;  %4546 = vrot.lane.b32.xlu1 %v12181_v41, %s8448_s13 }
 0x80a   : > { %4548 = vrot.lane.b32.xlu0 %v12190_v4, %s8448_s13  ;;  %v12238_v11 = vpop.permute.xlu1 %4644 }
 0x80c   : > { %v12240_v63 = vpop.permute.xlu0 %4646  ;;  %4562 = vrot.lane.b32.xlu1 %v12199_v9, %s8448_s13 }
 0x80e   : > { %4564 = vrot.lane.b32.xlu0 %v12206_v62, %s8448_s13  ;;  %v12246_v34 = vpop.permute.xlu1 %4660 }
 0x810   : > { %v12248_v35 = vpop.permute.xlu0 %4662  ;;  %4648 = vrot.lane.b32.xlu1 %v12181_v41, %s8449_s16 }
 0x812   : > { %4650 = vrot.lane.b32.xlu0 %v12190_v4, %s8449_s16  ;;  %v12254_v13 = vpop.permute.xlu1 %4762 }
 0x813   : > { %16920 = vst [vmem:[#allocation71_spill] sm:$0xff] %v12254_v13  ;;  %v8081_v13 = vld [vmem:[%s16299_s5 + $0x48] sm:$0xff] }
 0x814   : > { %v12256_v8 = vpop.permute.xlu0 %4764  ;;  %4664 = vrot.lane.b32.xlu1 %v12199_v9, %s8449_s16 }
 0x815   : > { %16921 = vst [vmem:[#allocation56_spill] sm:$0xff] %v12256_v8 }
 0x816   : > { %4666 = vrot.lane.b32.xlu0 %v12206_v62, %s8449_s16  ;;  %v12262_v39 = vpop.permute.xlu1 %4778 }
 0x817   : > { %16922 = vst [vmem:[#allocation72_spill] sm:$0xff] %v12262_v39 }
 0x818   : > { %v12264_v3 = vpop.permute.xlu0 %4780  ;;  %4766 = vrot.lane.b32.xlu1 %v12181_v41, %s8450_s19 }
 0x819   : > { %16923 = vst [vmem:[#allocation74_spill] sm:$0xff] %v12264_v3 }
 0x81a   : > { %4768 = vrot.lane.b32.xlu0 %v12190_v4, %s8450_s19  ;;  %v12270_v42 = vpop.permute.xlu1 %4864 }
 0x81b   : > { %16924 = vst [vmem:[#allocation73_spill] sm:$0xff] %v12270_v42 }
 0x81c   : > { %v12272_v33 = vpop.permute.xlu0 %4866  ;;  %4782 = vrot.lane.b32.xlu1 %v12199_v9, %s8450_s19 }
 0x81d   : > { %16925 = vst [vmem:[#allocation57_spill] sm:$0xff] %v12272_v33 }
 0x81e   : > { %4784 = vrot.lane.b32.xlu0 %v12206_v62, %s8450_s19  ;;  %v12278_v0 = vpop.permute.xlu1 %4880 }
 0x81f   : > { %16926 = vst [vmem:[#allocation59_spill] sm:$0xff] %v12278_v0 }
 0x820   : > { %v12280_v28 = vpop.permute.xlu0 %4882  ;;  %4868 = vrot.lane.b32.xlu1 %v12181_v41, %s8451_s24 }
 0x821   : > { %16927 = vst [vmem:[#allocation40_spill] sm:$0xff] %v12280_v28 }
 0x822   : > { %4870 = vrot.lane.b32.xlu0 %v12190_v4, %s8451_s24  ;;  %v12286_v23 = vpop.permute.xlu1 %4966 }
 0x823   : > { %16928 = vst [vmem:[#allocation58_spill] sm:$0xff] %v12286_v23 }
 0x824   : > { %v12288_v57 = vpop.permute.xlu0 %4968  ;;  %4884 = vrot.lane.b32.xlu1 %v12199_v9, %s8451_s24 }
 0x825   : > { %16929 = vst [vmem:[#allocation39_spill] sm:$0xff] %v12288_v57 }
 0x826   : > { %4886 = vrot.lane.b32.xlu0 %v12206_v62, %s8451_s24  ;;  %v12294_v61 = vpop.permute.xlu1 %4982 }
 0x827   : > { %16930 = vst [vmem:[#allocation42_spill] sm:$0xff] %v12294_v61 }
 0x828   : > { %v12296_v15 = vpop.permute.xlu0 %4984  ;;  %4970 = vrot.lane.b32.xlu1 %v12181_v41, %s8452_s29 }
 0x829   : > { %16931 = vst [vmem:[#allocation84_spill] sm:$0xff] %v12296_v15 }
 0x82a   : > { %4972 = vrot.lane.b32.xlu0 %v12190_v4, %s8452_s29  ;;  %v12304_v55 = vpop.permute.xlu1 %5068 }
 0x82b   : > { %16932 = vst [vmem:[#allocation85_spill] sm:$0xff] %v12304_v55 }
 0x82c   : > { %v12311_v37 = vpop.permute.xlu0 %5070  ;;  %4986 = vrot.lane.b32.xlu1 %v12199_v9, %s8452_s29 }
 0x82d   : > { %16933 = vst [vmem:[#allocation41_spill] sm:$0xff] %v12311_v37  ;;  %v16941_v37 = vld [vmem:[#allocation21_spill] sm:$0xff] }
 0x82e   : > { %4988 = vrot.lane.b32.xlu0 %v12206_v62, %s8452_s29  ;;  %v4347_v49 = vpop.permute.xlu1 %4346 }
 0x82f   : > { %v4378_v59 = vsel %vm393_vm0, %v12172_v51, %v4347_v49  ;;  %v4374_v55 = vsel %vm393_vm0, %v4347_v49, %v12187_v16 }
 0x830   : > { %v4349_v53 = vpop.permute.xlu0 %4348  ;;  %4350 = vrot.lane.b32.xlu1 %v12318_v56, %s8446_s11  ;;  %v4409_v20 = vmul.f32 %v12323_v54, %v4378_v59 }
 0x831   : > { %v4379_v25 = vsel %vm393_vm0, %v12176_v10, %v4349_v53  ;;  %v4375_v38 = vsel %vm393_vm0, %v4349_v53, %v12194_v36 }
 0x832   : > { %v4413_v12 = vmul.f32 %v12323_v54, %v4379_v25  ;;  %4352 = vrot.lane.b32.xlu0 %v12329_v30, %s8446_s11  ;;  %v4363_v6 = vpop.permute.xlu1 %4362  ;;  %v12364_v25 = vadd.f32 %v8197_v14, %v16941_v37  ;;  %v4414_v57 = vmul.f32 %v12355_v1, %v4375_v38  ;;  %v4410_v38 = vmul.f32 %v12355_v1, %v4374_v55 }
 0x833   : > { %v4370_v59 = vsel %vm393_vm0, %v12187_v16, %v4363_v6  ;;  %v4382_v53 = vsel %vm393_vm0, %v4363_v6, %v12172_v51 }
 0x834   : > { %16942 = vst [vmem:[#allocation61_spill] sm:$0xff] %v12364_v25  ;;  %v4365_v15 = vpop.permute.xlu0 %4364  ;;  %4366 = vrot.lane.b32.xlu1 %v12336_v32, %s8446_s11  ;;  %v4425_v48 = vpack.c.bf16 %v4413_v12, %v4409_v20  ;;  %v4408_v61 = vmul.f32 %v12342_v43, %v4382_v53  ;;  %v4411_v14 = vmul.f32 %v12352_v47, %v4370_v59 }
 0x835   : > { %v4371_v6 = vsel %vm393_vm0, %v12194_v36, %v4365_v15  ;;  %v4383_v51 = vsel %vm393_vm0, %v4365_v15, %v12176_v10  ;;  %v4426_v15 = vpack.c.bf16 %v4414_v57, %v4410_v38 }
 0x836   : > { %v4412_v49 = vmul.f32 %v12342_v43, %v4383_v51  ;;  %v4415_v16 = vmul.f32 %v12352_v47, %v4371_v6  ;;  %4368 = vrot.lane.b32.xlu0 %v12364_v25, %s8446_s11  ;;  %5298 = vmatprep.subr.bf16.mxu0 %v4425_v48  ;;  %v12384_v20 = vpop.permute.xlu1 %4448 }
 0x838   : > { %v4424_v12 = vpack.c.bf16 %v4412_v49, %v4408_v61  ;;  %v12387_v36 = vpop.permute.xlu0 %4450  ;;  %4452 = vrot.lane.b32.xlu1 %v12318_v56, %s8447_s12  ;;  %v4427_v10 = vpack.c.bf16 %v4415_v16, %v4411_v14 }
 0x83a   : > { %4454 = vrot.lane.b32.xlu0 %v12329_v30, %s8447_s12  ;;  %5299 = vmatpush1.bf16.msra.mxu0 %v4424_v12  ;;  %v12393_v59 = vpop.permute.xlu1 %4464 }
 0x83b   : > { %5404 = vmatprep.subr.bf16.mxu1 %v4427_v10 }
 0x83c   : > { %5405 = vmatpush1.bf16.msra.mxu1 %v4426_v15  ;;  %v12395_v53 = vpop.permute.xlu0 %4466  ;;  %4468 = vrot.lane.b32.xlu1 %v12336_v32, %s8447_s12 }
 0x83e   : > { %4470 = vrot.lane.b32.xlu0 %v12364_v25, %s8447_s12  ;;  %v12401_v55 = vpop.permute.xlu1 %4550 }
 0x840   : > { %v12403_v61 = vpop.permute.xlu0 %4552  ;;  %4554 = vrot.lane.b32.xlu1 %v12318_v56, %s8448_s13 }
 0x842   : > { %4556 = vrot.lane.b32.xlu0 %v12329_v30, %s8448_s13  ;;  %v12409_v57 = vpop.permute.xlu1 %4566 }
 0x844   : > { %v12411_v48 = vpop.permute.xlu0 %4568  ;;  %4570 = vrot.lane.b32.xlu1 %v12336_v32, %s8448_s13 }
 0x846   : > { %4572 = vrot.lane.b32.xlu0 %v12364_v25, %s8448_s13  ;;  %v12417_v6 = vpop.permute.xlu1 %4652 }
 0x848   : > { %v12419_v51 = vpop.permute.xlu0 %4654  ;;  %4656 = vrot.lane.b32.xlu1 %v12318_v56, %s8449_s16 }
 0x84a   : > { %4658 = vrot.lane.b32.xlu0 %v12329_v30, %s8449_s16  ;;  %v12425_v14 = vpop.permute.xlu1 %4668 }
 0x84c   : > { %v12427_v49 = vpop.permute.xlu0 %4670  ;;  %4672 = vrot.lane.b32.xlu1 %v12336_v32, %s8449_s16 }
 0x84d   : > { %16943 = vst [vmem:[#allocation28_spill] sm:$0xff] %v12427_v49 }
 0x84e   : > { %4674 = vrot.lane.b32.xlu0 %v12364_v25, %s8449_s16  ;;  %v12433_v16 = vpop.permute.xlu1 %4770 }
 0x84f   : > { %16944 = vst [vmem:[#allocation27_spill] sm:$0xff] %v12433_v16 }
 0x850   : > { %v12435_v38 = vpop.permute.xlu0 %4772  ;;  %5084 = vrot.lane.b32.xlu1 %v12019_v19, %s8453_s15 }
 0x851   : > { %16945 = vst [vmem:[#allocation30_spill] sm:$0xff] %v12435_v38  ;;  %v8080_v38 = vld [vmem:[%s16299_s5 + $0x40] sm:$0xff] }
 0x852   : > { %5086 = vrot.lane.b32.xlu0 %v12024_v5, %s8453_s15  ;;  %v12441_v12 = vpop.permute.xlu1 %4786  ;;  %v8089_v5 = vld [vmem:[%s16295_s1 + $0x1c] sm:$0xf] }
 0x853   : > { %16946 = vst [vmem:[#allocation29_spill] sm:$0xff] %v12441_v12 }
 0x854   : > { %v12443_v10 = vpop.permute.xlu0 %4788  ;;  %4774 = vrot.lane.b32.xlu1 %v12318_v56, %s8450_s19 }
 0x855   : > { %16947 = vst [vmem:[#allocation88_spill] sm:$0xff] %v12443_v10 }
 0x856   : > { %5094 = vrot.lane.b32.xlu0 %v12112_v18, %s8453_s15  ;;  %v12449_v15 = vpop.permute.xlu1 %4872 }
 0x857   : > { %16948 = vst [vmem:[#allocation89_spill] sm:$0xff] %v12449_v15 }
 0x858   : > { %v12451_v37 = vpop.permute.xlu0 %4874  ;;  %4790 = vrot.lane.b32.xlu1 %v12336_v32, %s8450_s19 }
 0x859   : > { %16949 = vst [vmem:[#allocation78_spill] sm:$0xff] %v12451_v37 }
 0x85a   : > { %4776 = vrot.lane.b32.xlu0 %v12329_v30, %s8450_s19  ;;  %v12457_v23 = vpop.permute.xlu1 %4888 }
 0x85b   : > { %16950 = vst [vmem:[#allocation24_spill] sm:$0xff] %v12457_v23 }
 0x85c   : > { %v12459_v42 = vpop.permute.xlu0 %4890  ;;  %4876 = vrot.lane.b32.xlu1 %v12318_v56, %s8451_s24 }
 0x85d   : > { %16951 = vst [vmem:[#allocation23_spill] sm:$0xff] %v12459_v42 }
 0x85e   : > { %4792 = vrot.lane.b32.xlu0 %v12364_v25, %s8450_s19  ;;  %v12465_v0 = vpop.permute.xlu1 %4974 }
 0x85f   : > { %16952 = vst [vmem:[#allocation62_spill] sm:$0xff] %v12465_v0 }
 0x860   : > { %v12467_v15 = vpop.permute.xlu0 %4976  ;;  %4892 = vrot.lane.b32.xlu1 %v12336_v32, %s8451_s24 }
 0x861   : > { %16953 = vst [vmem:[#allocation43_spill] sm:$0xff] %v12467_v15  ;;  %v8392_v15 = vld [vmem:[%s16298_s4 + $0x64] ss:$12 sps:$4 sm:$0xff]  }
 0x862   : > { %4878 = vrot.lane.b32.xlu0 %v12329_v30, %s8451_s24  ;;  %v12473_v28 = vpop.permute.xlu1 %4990  ;;  %5330 = vmatprep.mubr.bf16.mxu0 %v8392_v15 }
 0x863   : > { %16954 = vst [vmem:[#allocation76_spill] sm:$0xff] %v12473_v28  ;;  %5436 = vmatprep.mubr.bf16.mxu1 %v8392_v15 }
 0x864   : > { %v12475_v23 = vpop.permute.xlu0 %4992  ;;  %4978 = vrot.lane.b32.xlu1 %v12318_v56, %s8452_s29 }
 0x865   : > { %16955 = vst [vmem:[#allocation48_spill] sm:$0xff] %v12475_v23 }
 0x866   : > { %4894 = vrot.lane.b32.xlu0 %v12364_v25, %s8451_s24  ;;  %v12481_v42 = vpop.permute.xlu1 %5076 }
 0x867   : > { %16956 = vst [vmem:[#allocation50_spill] sm:$0xff] %v12481_v42 }
 0x868   : > { %v12486_v0 = vpop.permute.xlu0 %5078  ;;  %4994 = vrot.lane.b32.xlu1 %v12336_v32, %s8452_s29 }
 0x869   : > { %16957 = vst [vmem:[#allocation26_spill] sm:$0xff] %v12486_v0 }
 0x86a   : > { %4980 = vrot.lane.b32.xlu0 %v12329_v30, %s8452_s29  ;;  %v12492_v23 = vpop.permute.xlu1 %4342 }
 0x86c   : > { %v12494_v28 = vpop.permute.xlu0 %4344  ;;  %5092 = vrot.lane.b32.xlu1 %v12107_v60, %s8453_s15  ;;  %v4476_v60 = vsel %vm536_vm1, %v12384_v20, %v12214_v52 }
 0x86e   : > { %4996 = vrot.lane.b32.xlu0 %v12364_v25, %s8452_s29  ;;  %v12500_v42 = vpop.permute.xlu1 %4358 }
 0x870   : > { %v12502_v0 = vpop.permute.xlu0 %4360  ;;  %5072 = vrot.lane.b32.xlu1 %v12181_v41, %s8453_s15 }
 0x872   : > { %5074 = vrot.lane.b32.xlu0 %v12190_v4, %s8453_s15  ;;  %v12508_v15 = vpop.permute.xlu1 %4444 }
 0x874   : > { %v12510_v33 = vpop.permute.xlu0 %4446  ;;  %5080 = vrot.lane.b32.xlu1 %v12318_v56, %s8453_s15 }
 0x876   : > { %5090 = vrot.lane.b32.xlu0 %v12206_v62, %s8453_s15  ;;  %v12516_v37 = vpop.permute.xlu1 %4460 }
 0x877   : > { %16958 = vst [vmem:[#allocation25_spill] sm:$0xff] %v12516_v37 }
 0x878   : > { %v12518_v10 = vpop.permute.xlu0 %4462  ;;  %5088 = vrot.lane.b32.xlu1 %v12199_v9, %s8453_s15 }
 0x879   : > { %16959 = vst [vmem:[#allocation77_spill] sm:$0xff] %v12518_v10 }
 0x87a   : > { %5082 = vrot.lane.b32.xlu0 %v12329_v30, %s8453_s15  ;;  %v12524_v12 = vpop.permute.xlu1 %4546 }
 0x87b   : > { %16960 = vst [vmem:[#allocation51_spill] sm:$0xff] %v12524_v12  ;;  %v8083_v12 = vld [vmem:[%s16299_s5 + $0x58] sm:$0xff] }
 0x87c   : > { %v12526_v8 = vpop.permute.xlu0 %4548  ;;  %5096 = vrot.lane.b32.xlu1 %v12336_v32, %s8453_s15 }
 0x87d   : > { %16961 = vst [vmem:[#allocation52_spill] sm:$0xff] %v12526_v8  ;;  %v8082_v8 = vld [vmem:[%s16299_s5 + $0x50] sm:$0xff] }
 0x87e   : > { %5098 = vrot.lane.b32.xlu0 %v12364_v25, %s8453_s15  ;;  %v12535_v3 = vpop.permute.xlu1 %4562 }
 0x87f   : > { %16962 = vst [vmem:[#allocation45_spill] sm:$0xff] %v12535_v3 }
 0x880   : > { %v12540_v16 = vpop.permute.xlu0 %4564  ;;  %5244 = vperm.xlu1 %8361, %v8080_v38  }
 0x881   : > { %16963 = vst [vmem:[#allocation75_spill] sm:$0xff] %v12540_v16 }
 0x882   : > { %5249 = vperm.xlu0 %8360, %v8081_v13   ;;  %v12545_v39 = vpop.permute.xlu1 %4648 }
 0x883   : > { %16964 = vst [vmem:[#allocation91_spill] sm:$0xff] %v12545_v39  ;;  %v8084_v39 = vld [vmem:[%s16295_s1 + $0x4] sm:$0xf] }
 0x884   : > { %v12550_v49 = vpop.permute.xlu0 %4650  ;;  %5254 = vperm.xlu1 %8361, %v8082_v8   ;;  %v8085_v8 = vld [vmem:[%s16295_s1 + $0x8] sm:$0xf]  ;;  %v12603_v41 = vrot.slane %v8084_v39, %v16940_v7  ;;  %v12606_v4 = vrot.slane %v8084_v39, %v16865_v2 }
 0x885   : > { %16965 = vst [vmem:[#allocation31_spill] sm:$0xff] %v12550_v49 }
 0x886   : > { %5259 = vperm.xlu0 %8360, %v8083_v12   ;;  %v12552_v3 = vpop.permute.xlu1 %4664 }
 0x887   : > { %16966 = vst [vmem:[#allocation32_spill] sm:$0xff] %v12552_v3  ;;  %v8087_v3 = vld [vmem:[%s16295_s1 + $0x14] sm:$0xf] }
 0x888   : > { %v12554_v37 = vpop.permute.xlu0 %4666  ;;  %v12648_v56 = vrot.slane %v8087_v3, %v8706_v27  ;;  %v12651_v30 = vrot.slane %v8087_v3, %v16864_v45 }
 0x889   : > { %16967 = vst [vmem:[#allocation63_spill] sm:$0xff] %v12554_v37  ;;  %v12600_v37 = vrot.slane %v8084_v39, %v16864_v45 }
 0x88a   : > { %v12556_v38 = vpop.permute.xlu1 %4766  ;;  %16975 = vst [vmem:[#allocation64_spill] sm:$0xff] %v12651_v30  ;;  %v4480_v30 = vsel %vm536_vm1, %v12203_v58, %v12384_v20  ;;  %v12713_v20 = vrot.slane %v8089_v5, %v16865_v2 }
 0x88b   : > { %16968 = vst [vmem:[#allocation44_spill] sm:$0xff] %v12556_v38  ;;  %v8086_v38 = vld [vmem:[%s16295_s1 + $0xc] sm:$0xf] }
 0x88c   : > { %v12558_v16 = vpop.permute.xlu0 %4768  ;;  %v12621_v9 = vrot.slane %v8086_v38, %v8706_v27  ;;  %v12629_v32 = vrot.slane %v8086_v38, %v16864_v45  ;;  %v12632_v25 = vrot.slane %v8086_v38, %v16940_v7  ;;  %v12635_v19 = vrot.slane %v8086_v38, %v16865_v2  ;;  %16986 = vst [vmem:[#allocation49_spill] sm:$0xff] %v12713_v20 }
 0x88d   : > { %16969 = vst [vmem:[#allocation33_spill] sm:$0xff] %v12558_v16  ;;  %v12612_v16 = vrot.slane %v8085_v8, %v16864_v45  ;;  %v12654_v38 = vrot.slane %v8087_v3, %v16865_v2 }
 0x88e   : > { %v12560_v10 = vpop.permute.xlu1 %4782 }
 0x88f   : > { %16970 = vst [vmem:[#allocation34_spill] sm:$0xff] %v12560_v10  ;;  %v12618_v10 = vrot.slane %v8085_v8, %v16865_v2  ;;  %16976 = vst [vmem:[#allocation81_spill] sm:$0xff] %v12654_v38 }
 0x890   : > { %v12562_v13 = vpop.permute.xlu0 %4784 }
 0x891   : > { %16971 = vst [vmem:[#allocation46_spill] sm:$0xff] %v12562_v13  ;;  %v12615_v13 = vrot.slane %v8085_v8, %v16940_v7 }
 0x892   : > { %v12570_v12 = vpop.permute.xlu1 %4868 }
 0x893   : > { %16972 = vst [vmem:[#allocation92_spill] sm:$0xff] %v12570_v12  ;;  %v12586_v12 = vrot.slane %v8084_v39, %v8706_v27  ;;  %v8088_v39 = vld [vmem:[%s16295_s1 + $0x18] sm:$0xf] }
 0x894   : > { %v12591_v22 = vpop.permute.xlu0 %4870  ;;  %v12663_v18 = vrot.slane %v8088_v39, %v16940_v7  ;;  %v12666_v50 = vrot.slane %v8088_v39, %v8706_v27  ;;  %v12669_v21 = vrot.slane %v8088_v39, %v16864_v45  ;;  %v12681_v38 = vrot.slane %v8088_v39, %v16865_v2 }
 0x895   : > { %16973 = vst [vmem:[#allocation82_spill] sm:$0xff] %v12591_v22  ;;  %v12609_v22 = vrot.slane %v8085_v8, %v8706_v27  ;;  %v12638_v8 = vrot.slane %v8087_v3, %v16940_v7  ;;  %v12674_v3 = vld [vmem:[%s16295_s1 + $0x20] sm:$0xf]  ;;  %v12703_v39 = vrot.slane %v8089_v5, %v16864_v45 }
 0x896   : > { %v12626_v62 = vpop.permute.xlu1 %4884  ;;  %16978 = vst [vmem:[#allocation65_spill] sm:$0xff] %v12663_v18  ;;  %16979 = vst [vmem:[#allocation94_spill] sm:$0xff] %v12666_v50  ;;  %v12684_v18 = vrot.slane %v8089_v5, %v16940_v7  ;;  %v12687_v50 = vrot.slane %v8089_v5, %v8706_v27  ;;  %v4484_v5 = vsel %vm536_vm1, %v12393_v59, %v12203_v58 }
 0x897   : > { %16974 = vst [vmem:[#allocation80_spill] sm:$0xff] %v12626_v62  ;;  %v4477_v62 = vsel %vm536_vm1, %v12387_v36, %v12216_v46  ;;  %16980 = vst [vmem:[#allocation98_spill] sm:$0xff] %v12669_v21  ;;  %v4587_v58 = vsel %vm680_vm2, %v12411_v48, %v12224_v31 }
 0x898   : > { %v12656_v44 = vpop.permute.xlu0 %4886  ;;  %16981 = vst [vmem:[#allocation93_spill] sm:$0xff] %v12681_v38  ;;  %16982 = vst [vmem:[#allocation97_spill] sm:$0xff] %v12684_v18  ;;  %v12696_v49 = vmul.f32 %v12600_v37, %v4477_v62  ;;  %v12717_v62 = vrot.slane %v12674_v3, %v16940_v7 }
 0x899   : > { %16977 = vst [vmem:[#allocation79_spill] sm:$0xff] %v12656_v44  ;;  %v4481_v44 = vsel %vm536_vm1, %v12208_v24, %v12387_v36  ;;  %16983 = vst [vmem:[#allocation95_spill] sm:$0xff] %v12687_v50  ;;  %v4485_v36 = vsel %vm536_vm1, %v12395_v53, %v12208_v24  ;;  %v12706_v50 = vmul.f32 %v12600_v37, %v4476_v60 }
 0x89a   : > { %v12689_v21 = vpop.permute.xlu1 %4970  ;;  %16985 = vst [vmem:[#allocation66_spill] sm:$0xff] %v12703_v39  ;;  %16987 = vst [vmem:[#allocation47_spill] sm:$0xff] %v12717_v62  ;;  %v12722_v24 = vmul.f32 %v12586_v12, %v4481_v44  ;;  %v4472_v60 = vsel %vm536_vm1, %v12214_v52, %v12393_v59  ;;  %v12740_v44 = vmul.f32 %v12603_v41, %v4485_v36 }
 0x89b   : > { %16984 = vst [vmem:[#allocation90_spill] sm:$0xff] %v12689_v21  ;;  %v4473_v21 = vsel %vm536_vm1, %v12216_v46, %v12395_v53  ;;  %v4579_v46 = vsel %vm680_vm2, %v12403_v61, %v12232_v40  ;;  %v12737_v53 = vmul.f32 %v12586_v12, %v4480_v30  ;;  %v4583_v52 = vsel %vm680_vm2, %v12224_v31, %v12403_v61 }
 0x89c   : > { %v12719_v18 = vpop.permute.xlu0 %4972  ;;  %v12755_v30 = vmul.f32 %v12606_v4, %v4473_v21  ;;  %v4578_v36 = vsel %vm680_vm2, %v12401_v55, %v12230_v17  ;;  %v4582_v61 = vsel %vm680_vm2, %v12222_v29, %v12401_v55  ;;  %v12766_v31 = vmul.f32 %v12603_v41, %v4484_v5 }
 0x89d   : > { %16988 = vst [vmem:[#allocation96_spill] sm:$0xff] %v12719_v18  ;;  %v12769_v62 = vmul.f32 %v12606_v4, %v4472_v60  ;;  %v12772_v7 = vmul.f32 %v12612_v16, %v4579_v46  ;;  %v4586_v21 = vsel %vm680_vm2, %v12409_v57, %v12222_v29  ;;  %v4575_v55 = vsel %vm680_vm2, %v12232_v40, %v12411_v48 }
 0x89e   : > { %v12750_v59 = vpop.permute.xlu1 %4986  ;;  %v12788_v60 = vmul.f32 %v12615_v13, %v4587_v58  ;;  %v12795_v29 = vmul.f32 %v12609_v22, %v4582_v61  ;;  %v4574_v40 = vsel %vm680_vm2, %v12230_v17, %v12409_v57  ;;  %v12805_v58 = vmul.f32 %v12615_v13, %v4586_v21 }
 0x89f   : > { %16989 = vst [vmem:[#allocation99_spill] sm:$0xff] %v12750_v59  ;;  %16990 = vst [vmem:[#allocation100_spill] sm:$0xff] %v12772_v7  ;;  %v12781_v59 = vmul.f32 %v12609_v22, %v4583_v52  ;;  %v12798_v52 = vmul.f32 %v12612_v16, %v4578_v36  ;;  %v12814_v36 = vrot.slane %v12674_v3, %v8706_v27 }
 0x8a0   : > { %v12778_v18 = vpop.permute.xlu0 %4988  ;;  %v12819_v17 = vmul.f32 %v12618_v10, %v4575_v55  ;;  %v4680_v57 = vsel %vm824_vm3, %v12417_v6, %v12246_v34  ;;  %v4684_v21 = vsel %vm824_vm3, %v12238_v11, %v12417_v6  ;;  %v12830_v27 = vmul.f32 %v12618_v10, %v4574_v40 }
 0x8a1   : > { %16991 = vst [vmem:[#allocation101_spill] sm:$0xff] %v12778_v18  ;;  %16992 = vst [vmem:[#allocation102_spill] sm:$0xff] %v12798_v52  ;;  %v4681_v18 = vsel %vm824_vm3, %v12419_v51, %v12248_v35  ;;  %v12849_v39 = vmul.f32 %v12621_v9, %v4684_v21  ;;  %v12852_v38 = vmul.f32 %v12629_v32, %v4680_v57 }
 0x8a2   : > { %v4351_v48 = vpop.permute.xlu1 %4350  ;;  %16993 = vst [vmem:[#allocation103_spill] sm:$0xff] %v12814_v36  ;;  %v12870_v52 = vmul.f32 %v12629_v32, %v4681_v18 }
 0x8a3   : > { %v4380_v5 = vsel %vm393_vm0, %v12492_v23, %v4351_v48 }
 0x8a4   : > { %v4353_v61 = vpop.permute.xlu0 %4352  ;;  %v4417_v6 = vmul.f32 %v12323_v54, %v4380_v5 }
 0x8a5   : > { %v4381_v55 = vsel %vm393_vm0, %v12494_v28, %v4353_v61  ;;  %v4377_v40 = vsel %vm393_vm0, %v4353_v61, %v12502_v0  ;;  %v4376_v61 = vsel %vm393_vm0, %v4351_v48, %v12500_v42 }
 0x8a6   : > { %v4421_v46 = vmul.f32 %v12323_v54, %v4381_v55  ;;  %v4367_v20 = vpop.permute.xlu1 %4366  ;;  %v4685_v54 = vsel %vm824_vm3, %v12240_v63, %v12419_v51  ;;  %v4631_v55 = vpack.c.bf16 %v12819_v17, %v12830_v27  ;;  %v4422_v7 = vmul.f32 %v12355_v1, %v4377_v40 }
 0x8a7   : > { %v4372_v36 = vsel %vm393_vm0, %v12500_v42, %v4367_v20  ;;  %v4384_v5 = vsel %vm393_vm0, %v4367_v20, %v12492_v23  ;;  %v12889_v40 = vrot.slane %v12674_v3, %v16864_v45 }
 0x8a8   : > { %v4369_v21 = vpop.permute.xlu0 %4368  ;;  %v4429_v57 = vpack.c.bf16 %v4421_v46, %v4417_v6  ;;  %v4416_v42 = vmul.f32 %v12342_v43, %v4384_v5  ;;  %v4419_v20 = vmul.f32 %v12352_v47, %v4372_v36  ;;  %v4418_v6 = vmul.f32 %v12355_v1, %v4376_v61 }
 0x8a9   : > { %v4373_v23 = vsel %vm393_vm0, %v12502_v0, %v4369_v21  ;;  %v4385_v51 = vsel %vm393_vm0, %v4369_v21, %v12494_v28  ;;  %v12893_v28 = vrot.slane %v12674_v3, %v16865_v2  ;;  %v4688_v1 = vsel %vm824_vm3, %v12425_v14, %v12238_v11 }
 0x8aa   : > { %v4420_v46 = vmul.f32 %v12342_v43, %v4385_v51  ;;  %v4423_v48 = vmul.f32 %v12352_v47, %v4373_v23  ;;  %5300 = vmatprep.subr.bf16.mxu0 %v4429_v57  ;;  %v4453_v18 = vpop.permute.xlu1 %4452  ;;  %v12896_v43 = vmul.f32 %v12621_v9, %v4685_v54  ;;  %v4732_v61 = vpack.c.bf16 %v12870_v52, %v12852_v38  ;;  %v16994_v23 = vld [vmem:[#allocation77_spill] sm:$0xff]  ;;  %v17027_v52 = vld [vmem:[#allocation23_spill] sm:$0xff] }
 0x8ab   : > { %v4482_v0 = vsel %vm536_vm1, %v12508_v15, %v4453_v18  ;;  %v4676_v3 = vsel %vm824_vm3, %v12246_v34, %v12425_v14  ;;  %v4430_v21 = vpack.c.bf16 %v4422_v7, %v4418_v6  ;;  %v16995_v34 = vld [vmem:[#allocation25_spill] sm:$0xff] }
 0x8ac   : > { %v4428_v47 = vpack.c.bf16 %v4420_v46, %v4416_v42  ;;  %v4455_v36 = vpop.permute.xlu0 %4454  ;;  %v4431_v5 = vpack.c.bf16 %v4423_v48, %v4419_v20  ;;  %v4519_v57 = vmul.f32 %v12586_v12, %v4482_v0  ;;  %v12917_v20 = vmul.f32 %v12632_v25, %v4688_v1  ;;  %v16997_v48 = vld [vmem:[#allocation28_spill] sm:$0xff] }
 0x8ad   : > { %v4483_v54 = vsel %vm536_vm1, %v12510_v33, %v4455_v36  ;;  %v4479_v11 = vsel %vm536_vm1, %v4455_v36, %v16994_v23  ;;  %v16996_v46 = vpack.c.bf16 %v12722_v24, %v12737_v53  ;;  %v4689_v6 = vsel %vm824_vm3, %v16997_v48, %v12240_v63 }
 0x8ae   : > { %v4523_v51 = vmul.f32 %v12586_v12, %v4483_v54  ;;  %5301 = vmatpush1.bf16.msra.mxu0 %v4428_v47  ;;  %5406 = vmatprep.subr.bf16.mxu1 %v4431_v5  ;;  %v4469_v42 = vpop.permute.xlu1 %4468  ;;  %v12929_v12 = vmul.f32 %v12635_v19, %v4676_v3  ;;  %v4478_v0 = vsel %vm536_vm1, %v4453_v18, %v16995_v34 }
 0x8af   : > { %v4474_v7 = vsel %vm536_vm1, %v16995_v34, %v4469_v42  ;;  %v4486_v14 = vsel %vm536_vm1, %v4469_v42, %v12508_v15  ;;  %5302 = vmatprep.subr.bf16.mxu0 %v16996_v46  ;;  %5407 = vmatpush1.bf16.msra.mxu1 %v4430_v21  ;;  %v16998_v15 = vpack.c.bf16 %v12755_v30, %v12769_v62  ;;  %v17004_v34 = vld [vmem:[#allocation71_spill] sm:$0xff] }
 0x8b0   : > { %v4471_v1 = vpop.permute.xlu0 %4470  ;;  %v4531_v24 = vpack.c.bf16 %v4523_v51, %v4519_v57  ;;  %v4677_v53 = vsel %vm824_vm3, %v12248_v35, %v16997_v48  ;;  %v4524_v47 = vmul.f32 %v12600_v37, %v4479_v11  ;;  %v4518_v36 = vmul.f32 %v12603_v41, %v4486_v14  ;;  %v17000_v57 = vld [vmem:[#allocation51_spill] sm:$0xff]  ;;  %v17002_v51 = vld [vmem:[#allocation72_spill] sm:$0xff] }
 0x8b1   : > { %5408 = vmatprep.subr.bf16.mxu1 %v16998_v15  ;;  %v4475_v63 = vsel %vm536_vm1, %v16994_v23, %v4471_v1  ;;  %v4487_v18 = vsel %vm536_vm1, %v4471_v1, %v12510_v33  ;;  %v4521_v62 = vmul.f32 %v12606_v4, %v4474_v7  ;;  %v16999_v35 = vpack.c.bf16 %v12740_v44, %v12766_v31  ;;  %v17005_v7 = vld [vmem:[#allocation52_spill] sm:$0xff]  ;;  %v17006_v48 = vld [vmem:[#allocation75_spill] sm:$0xff]  ;;  %v17007_v1 = vld [vmem:[#allocation45_spill] sm:$0xff] }
 0x8b2   : > { %v4522_v30 = vmul.f32 %v12603_v41, %v4487_v18  ;;  %v4525_v5 = vmul.f32 %v12606_v4, %v4475_v63  ;;  %v4555_v3 = vpop.permute.xlu1 %4554  ;;  %v12960_v21 = vmul.f32 %v12632_v25, %v4689_v6  ;;  %v4520_v54 = vmul.f32 %v12600_v37, %v4478_v0  ;;  %v17003_v37 = vld [vmem:[#allocation27_spill] sm:$0xff]  ;;  %v17010_v63 = vld [vmem:[#allocation30_spill] sm:$0xff] }
 0x8b3   : > { %5303 = vmatpush1.bf16.msra.mxu0 %v16999_v35  ;;  %v4584_v33 = vsel %vm680_vm2, %v17000_v57, %v4555_v3  ;;  %v17001_v41 = vpack.c.bf16 %v12696_v49, %v12706_v50  ;;  %v12970_v4 = vmul.f32 %v12635_v19, %v4677_v53  ;;  %v4731_v11 = vpack.c.bf16 %v12896_v43, %v12849_v39 }
 0x8b4   : > { %5304 = vmatprep.subr.bf16.mxu0 %v4531_v24  ;;  %v4530_v44 = vpack.c.bf16 %v4522_v30, %v4518_v36  ;;  %v4557_v31 = vpop.permute.xlu0 %4556  ;;  %v4533_v23 = vpack.c.bf16 %v4525_v5, %v4521_v62  ;;  %v4798_v42 = vsel %vm992_vm4, %v17003_v37, %v17002_v51  ;;  %v4802_v50 = vsel %vm992_vm4, %v17004_v34, %v17003_v37 }
 0x8b5   : > { %5409 = vmatpush1.bf16.msra.mxu1 %v17001_v41  ;;  %v4532_v49 = vpack.c.bf16 %v4524_v47, %v4520_v54  ;;  %v4585_v14 = vsel %vm680_vm2, %v17005_v7, %v4557_v31  ;;  %v4621_v46 = vmul.f32 %v12609_v22, %v4584_v33  ;;  %v4581_v39 = vsel %vm680_vm2, %v4557_v31, %v17006_v48  ;;  %v17009_v47 = vld [vmem:[#allocation74_spill] sm:$0xff]  ;;  %v17013_v41 = vld [vmem:[#allocation91_spill] sm:$0xff]  ;;  %v17014_v31 = vld [vmem:[#allocation100_spill] sm:$0xff] }
 0x8b6   : > { %v4625_v43 = vmul.f32 %v12609_v22, %v4585_v14  ;;  %5410 = vmatprep.subr.bf16.mxu1 %v4533_v23  ;;  %v4571_v6 = vpop.permute.xlu1 %4570  ;;  %v4730_v0 = vpack.c.bf16 %v12960_v21, %v12917_v20  ;;  %v17008_v53 = vpack.c.bf16 %v12781_v59, %v12795_v29  ;;  %v13002_v22 = vmul.f32 %v12638_v8, %v4802_v50  ;;  %v17011_v29 = vld [vmem:[#allocation56_spill] sm:$0xff]  ;;  %v17015_v23 = vld [vmem:[#allocation102_spill] sm:$0xff]  ;;  %v17017_v50 = vld [vmem:[#allocation29_spill] sm:$0xff] }
 0x8b7   : > { %5305 = vmatpush1.bf16.msra.mxu0 %v4530_v44  ;;  %v4576_v15 = vsel %vm680_vm2, %v17007_v1, %v4571_v6  ;;  %v4588_v24 = vsel %vm680_vm2, %v4571_v6, %v17000_v57  ;;  %v4799_v20 = vsel %vm992_vm4, %v17010_v63, %v17009_v47  ;;  %v4580_v18 = vsel %vm680_vm2, %v4555_v3, %v17007_v1  ;;  %v17018_v14 = vld [vmem:[#allocation31_spill] sm:$0xff]  ;;  %v17020_v6 = vld [vmem:[#allocation32_spill] sm:$0xff] }
 0x8b8   : > { %5306 = vmatprep.subr.bf16.mxu0 %v17008_v53  ;;  %v4573_v36 = vpop.permute.xlu0 %4572  ;;  %v4633_v59 = vpack.c.bf16 %v4625_v43, %v4621_v46  ;;  %v4803_v62 = vsel %vm992_vm4, %v17011_v29, %v17010_v63  ;;  %v4626_v30 = vmul.f32 %v12612_v16, %v4581_v39  ;;  %v4620_v3 = vmul.f32 %v12615_v13, %v4588_v24  ;;  %v17019_v39 = vld [vmem:[#allocation63_spill] sm:$0xff]  ;;  %v17021_v24 = vld [vmem:[#allocation88_spill] sm:$0xff] }
 0x8b9   : > { %5411 = vmatpush1.bf16.msra.mxu1 %v4532_v49  ;;  %v4577_v5 = vsel %vm680_vm2, %v17006_v48, %v4573_v36  ;;  %v4589_v35 = vsel %vm680_vm2, %v4573_v36, %v17005_v7  ;;  %v4623_v27 = vmul.f32 %v12618_v10, %v4576_v15  ;;  %v17012_v21 = vpack.c.bf16 %v12788_v60, %v12805_v58 }
 0x8ba   : > { %5412 = vmatprep.subr.bf16.mxu1 %v4631_v55  ;;  %v4624_v17 = vmul.f32 %v12615_v13, %v4589_v35  ;;  %v4627_v55 = vmul.f32 %v12618_v10, %v4577_v5  ;;  %v4657_v54 = vpop.permute.xlu1 %4656  ;;  %v13033_v57 = vmul.f32 %v12648_v56, %v4798_v42  ;;  %v4622_v33 = vmul.f32 %v12612_v16, %v4580_v18  ;;  %v17022_v35 = vld [vmem:[#allocation64_spill] sm:$0xff] }
 0x8bb   : > { %5307 = vmatpush1.bf16.msra.mxu0 %v17012_v21  ;;  %v4686_v44 = vsel %vm824_vm3, %v17013_v41, %v4657_v54  ;;  %v17016_v13 = vpack.c.bf16 %v17014_v31, %v17015_v23  ;;  %v13043_v10 = vmul.f32 %v12638_v8, %v4803_v62  ;;  %v4733_v42 = vpack.c.bf16 %v12970_v4, %v12929_v12  ;;  %v17028_v23 = vld [vmem:[#allocation59_spill] sm:$0xff] }
 0x8bc   : > { %5308 = vmatprep.subr.bf16.mxu0 %v4633_v59  ;;  %v4632_v60 = vpack.c.bf16 %v4624_v17, %v4620_v3  ;;  %v4659_v58 = vpop.permute.xlu0 %4658  ;;  %v4635_v37 = vpack.c.bf16 %v4627_v55, %v4623_v27  ;;  %v13048_v16 = vmul.f32 %v12648_v56, %v4799_v20  ;;  %v4794_v49 = vsel %vm992_vm4, %v17002_v51, %v17017_v50  ;;  %v17023_v27 = vld [vmem:[#allocation81_spill] sm:$0xff] }
 0x8bd   : > { %5413 = vmatpush1.bf16.msra.mxu1 %v17016_v13  ;;  %v4634_v7 = vpack.c.bf16 %v4626_v30, %v4622_v33  ;;  %v4687_v46 = vsel %vm824_vm3, %v17018_v14, %v4659_v58  ;;  %v4723_v48 = vmul.f32 %v12621_v9, %v4686_v44  ;;  %v4683_v43 = vsel %vm824_vm3, %v4659_v58, %v17019_v39  ;;  %v17029_v13 = vld [vmem:[#allocation89_spill] sm:$0xff] }
 0x8be   : > { %v4727_v12 = vmul.f32 %v12621_v9, %v4687_v46  ;;  %5414 = vmatprep.subr.bf16.mxu1 %v4635_v37  ;;  %v4673_v4 = vpop.permute.xlu1 %4672  ;;  %v4806_v51 = vsel %vm992_vm4, %v17017_v50, %v17004_v34  ;;  %v4795_v53 = vsel %vm992_vm4, %v17009_v47, %v17021_v24  ;;  %v4682_v34 = vsel %vm824_vm3, %v4657_v54, %v17020_v6  ;;  %v17030_v58 = vld [vmem:[#allocation73_spill] sm:$0xff] }
 0x8bf   : > { %5309 = vmatpush1.bf16.msra.mxu0 %v4632_v60  ;;  %v4678_v1 = vsel %vm824_vm3, %v17020_v6, %v4673_v4  ;;  %v4690_v15 = vsel %vm824_vm3, %v4673_v4, %v17013_v41  ;;  %v4728_v18 = vmul.f32 %v12629_v32, %v4683_v43  ;;  %v13099_v3 = vmul.f32 %v17022_v35, %v4794_v49  ;;  %v17031_v49 = vld [vmem:[#allocation65_spill] sm:$0xff]  ;;  %v17034_v43 = vld [vmem:[#allocation35_spill] sm:$0xff]  ;;  %v17037_v6 = vld [vmem:[#allocation98_spill] sm:$0xff] }
 0x8c0   : > { %5310 = vmatprep.subr.bf16.mxu0 %v4731_v11  ;;  %v4675_v63 = vpop.permute.xlu0 %4674  ;;  %v4735_v20 = vpack.c.bf16 %v4727_v12, %v4723_v48  ;;  %v4807_v11 = vsel %vm992_vm4, %v17021_v24, %v17011_v29  ;;  %v4722_v59 = vmul.f32 %v12632_v25, %v4690_v15  ;;  %v4725_v62 = vmul.f32 %v12635_v19, %v4678_v1  ;;  %v17038_v24 = vld [vmem:[#allocation69_spill] sm:$0xff] }
 0x8c1   : > { %5415 = vmatpush1.bf16.msra.mxu1 %v4634_v7  ;;  %v4679_v36 = vsel %vm824_vm3, %v17019_v39, %v4675_v63  ;;  %v4691_v47 = vsel %vm824_vm3, %v4675_v63, %v17018_v14  ;;  %v13102_v17 = vmul.f32 %v17023_v27, %v4806_v51  ;;  %v4724_v55 = vmul.f32 %v12629_v32, %v4682_v34  ;;  %v17026_v32 = vld [vmem:[#allocation40_spill] sm:$0xff]  ;;  %v17064_v9 = vld [vmem:[#allocation33_spill] sm:$0xff] }
 0x8c2   : > { %5416 = vmatprep.subr.bf16.mxu1 %v4733_v42  ;;  %v4726_v30 = vmul.f32 %v12632_v25, %v4691_v47  ;;  %v4729_v5 = vmul.f32 %v12635_v19, %v4679_v36  ;;  %v13096_v29 = vpop.permute.xlu1 %5084  ;;  %v13109_v25 = vmul.f32 %v17022_v35, %v4795_v53  ;;  %v17024_v19 = vld [vmem:[#allocation78_spill] sm:$0xff]  ;;  %v4839_v44 = vmul.f32 %v17023_v27, %v4807_v11  ;;  %v17032_v14 = vld [vmem:[#allocation24_spill] sm:$0xff] }
 0x8c3   : > { %5311 = vmatpush1.bf16.msra.mxu0 %v4730_v0  ;;  %v17025_v0 = vld [vmem:[#allocation57_spill] sm:$0xff]  ;;  %v4901_v38 = vsel %vm1136_vm5, %v17024_v19, %v17026_v32  ;;  %v4736_v31 = vpack.c.bf16 %v4728_v18, %v4724_v55  ;;  %v4900_v60 = vsel %vm1136_vm5, %v17029_v13, %v17028_v23  ;;  %v4904_v37 = vsel %vm1136_vm5, %v17030_v58, %v17029_v13  ;;  %v17033_v39 = vld [vmem:[#allocation68_spill] sm:$0xff]  ;;  %v17039_v53 = vld [vmem:[#allocation70_spill] sm:$0xff] }
 0x8c4   : > { %5312 = vmatprep.subr.bf16.mxu0 %v4735_v20  ;;  %v4905_v21 = vsel %vm1136_vm5, %v17025_v0, %v17024_v19  ;;  %v4734_v54 = vpack.c.bf16 %v4726_v30, %v4722_v59  ;;  %v13115_v33 = vpop.permute.xlu0 %5086  ;;  %v4737_v41 = vpack.c.bf16 %v4729_v5, %v4725_v62  ;;  %v4849_v50 = vpack.c.bf16 %v13048_v16, %v13033_v57  ;;  %v17036_v16 = vld [vmem:[#allocation94_spill] sm:$0xff]  ;;  %v17043_v62 = vld [vmem:[#allocation93_spill] sm:$0xff]  ;;  %v17045_v55 = vld [vmem:[#allocation43_spill] sm:$0xff] }
 0x8c5   : > { %5417 = vmatpush1.bf16.msra.mxu1 %v4732_v61  ;;  %v4897_v61 = vsel %vm1136_vm5, %v17026_v32, %v17027_v52  ;;  %v13137_v7 = vmul.f32 %v17031_v49, %v4905_v21  ;;  %v4896_v46 = vsel %vm1136_vm5, %v17028_v23, %v17032_v14  ;;  %v4909_v48 = vsel %vm1136_vm5, %v17027_v52, %v17025_v0  ;;  %v17041_v11 = vld [vmem:[#allocation62_spill] sm:$0xff]  ;;  %v17047_v21 = vld [vmem:[#allocation67_spill] sm:$0xff]  ;;  %v17055_v13 = vld [vmem:[#allocation37_spill] sm:$0xff] }
 0x8c6   : > { %5418 = vmatprep.subr.bf16.mxu1 %v4737_v41  ;;  %v4775_v42 = vpop.permute.xlu1 %4774  ;;  %v17035_v12 = vpack.c.bf16 %v17033_v39, %v17034_v43  ;;  %v4850_v57 = vpack.c.bf16 %v13109_v25, %v13099_v3  ;;  %v13153_v4 = vmul.f32 %v17036_v16, %v4901_v38  ;;  %v4908_v51 = vsel %vm1136_vm5, %v17032_v14, %v17030_v58  ;;  %v17042_v18 = vld [vmem:[#allocation58_spill] sm:$0xff]  ;;  %v17046_v25 = vld [vmem:[#allocation39_spill] sm:$0xff] }
 0x8c7   : > { %5313 = vmatpush1.bf16.msra.mxu0 %v4734_v54  ;;  %v13160_v1 = vmul.f32 %v17037_v6, %v4897_v61  ;;  %v17040_v34 = vpack.c.bf16 %v17038_v24, %v17039_v53  ;;  %v13168_v63 = vmul.f32 %v17031_v49, %v4904_v37  ;;  %v13171_v20 = vmul.f32 %v17036_v16, %v4900_v60  ;;  %v17044_v5 = vld [vmem:[#allocation42_spill] sm:$0xff]  ;;  %v17048_v54 = vld [vmem:[#allocation53_spill] sm:$0xff]  ;;  %v17051_v52 = vld [vmem:[#allocation87_spill] sm:$0xff] }
 0x8c8   : > { %5314 = vmatprep.subr.bf16.mxu0 %v17035_v12  ;;  %v13162_v15 = vpop.permute.xlu0 %5094  ;;  %v5006_v36 = vsel %vm1280_vm7, %v17042_v18, %v17041_v11  ;;  %v4851_v47 = vpack.c.bf16 %v4839_v44, %v13102_v17  ;;  %v13179_v59 = vmul.f32 %v17037_v6, %v4896_v46  ;;  %v13182_v30 = vmul.f32 %v17043_v62, %v4909_v48  ;;  %v17050_v32 = vld [vmem:[#allocation34_spill] sm:$0xff]  ;;  %v17057_v37 = vld [vmem:[#allocation97_spill] sm:$0xff]  ;;  %v17058_v46 = vld [vmem:[#allocation84_spill] sm:$0xff] }
 0x8c9   : > { %5419 = vmatpush1.bf16.msra.mxu1 %v4736_v31  ;;  %v5002_v3 = vsel %vm1280_vm7, %v17041_v11, %v17044_v5  ;;  %v5007_v19 = vsel %vm1280_vm7, %v17046_v25, %v17045_v55  ;;  %v17049_v17 = vpack.c.bf16 %v17047_v21, %v17048_v54  ;;  %v13198_v44 = vmul.f32 %v17043_v62, %v4908_v51  ;;  %v17052_v61 = vld [vmem:[#allocation86_spill] sm:$0xff]  ;;  %v17059_v51 = vld [vmem:[#allocation61_spill] sm:$0xff] }
 0x8ca   : > { %5420 = vmatprep.subr.bf16.mxu1 %v17040_v34  ;;  %v4791_v0 = vpop.permute.xlu1 %4790  ;;  %v4800_v38 = vsel %vm992_vm4, %v4775_v42, %v17050_v32  ;;  %v17053_v31 = vpack.c.bf16 %v17051_v52, %v17052_v61  ;;  %v17054_v23 = vld [vmem:[#allocation54_spill] sm:$0xff]  ;;  %v13212_v14 = vmul.f32 %v17057_v37, %v5006_v36  ;;  %v5003_v48 = vsel %vm1280_vm7, %v17045_v55, %v17058_v46  ;;  %v17060_v34 = vld [vmem:[#allocation60_spill] sm:$0xff] }
 0x8cb   : > { %5315 = vmatpush1.bf16.msra.mxu0 %v17049_v17  ;;  %v17056_v60 = vpack.c.bf16 %v17054_v23, %v17055_v13  ;;  %v17061_v11 = vpack.c.bf16 %v17059_v51, %v17060_v34  ;;  %v4951_v17 = vpack.c.bf16 %v13153_v4, %v13171_v20  ;;  %v13227_v58 = vmul.f32 %v17057_v37, %v5007_v19  ;;  %v17063_v36 = vld [vmem:[#allocation46_spill] sm:$0xff]  ;;  %v17065_v52 = vld [vmem:[#allocation44_spill] sm:$0xff]  ;;  %v17066_v51 = vld [vmem:[#allocation55_spill] sm:$0xff] }
 0x8cc   : > { %5316 = vmatprep.subr.bf16.mxu0 %v17053_v31  ;;  %v4777_v12 = vpop.permute.xlu0 %4776  ;;  %v17062_v31 = vld [vmem:[#allocation95_spill] sm:$0xff]  ;;  %v4841_v4 = vmul.f32 %v12648_v56, %v4800_v38  ;;  %v17067_v19 = vld [vmem:[#allocation38_spill] sm:$0xff]  ;;  %v4953_v61 = vpack.c.bf16 %v13182_v30, %v13198_v44 }
 0x8cd   : > { %5421 = vmatpush1.bf16.msra.mxu1 %v17056_v60  ;;  %v13224_v60 = vmul.f32 %v17062_v31, %v5002_v3  ;;  %v4801_v41 = vsel %vm992_vm4, %v4777_v12, %v17063_v36  ;;  %v4805_v55 = vsel %vm992_vm4, %v17064_v9, %v4777_v12  ;;  %v17068_v34 = vpack.c.bf16 %v17066_v51, %v17067_v19  ;;  %v17122_v19 = vld [vmem:[#allocation3_spill] sm:$0xff] }
 0x8ce   : > { %5422 = vmatprep.subr.bf16.mxu1 %v17061_v11  ;;  %v4804_v11 = vsel %vm992_vm4, %v17065_v52, %v4775_v42  ;;  %v4845_v20 = vmul.f32 %v12648_v56, %v4801_v41  ;;  %v4877_v3 = vpop.permute.xlu1 %4876  ;;  %v13246_v24 = vmul.f32 %v17062_v31, %v5003_v48  ;;  %v4796_v12 = vsel %vm992_vm4, %v17050_v32, %v4791_v0  ;;  %v17069_v56 = vld [vmem:[#allocation83_spill] sm:$0xff]  ;;  %v17070_v41 = vld [vmem:[#allocation36_spill] sm:$0xff] }
 0x8cf   : > { %5317 = vmatpush1.bf16.msra.mxu0 %v17068_v34  ;;  %v4808_v42 = vsel %vm992_vm4, %v4791_v0, %v17065_v52  ;;  %v17071_v38 = vpack.c.bf16 %v17069_v56, %v17070_v41  ;;  %v17072_v34 = vld [vmem:[#allocation76_spill] sm:$0xff]  ;;  %v4844_v32 = vmul.f32 %v12638_v8, %v4805_v55  ;;  %v4840_v52 = vmul.f32 %v12638_v8, %v4804_v11  ;;  %v17074_v11 = vld [vmem:[#allocation66_spill] sm:$0xff] }
 0x8d0   : > { %5318 = vmatprep.subr.bf16.mxu0 %v4849_v50  ;;  %v4998_v30 = vsel %vm1280_vm7, %v17044_v5, %v17072_v34  ;;  %v5010_v44 = vsel %vm1280_vm7, %v17072_v34, %v17042_v18  ;;  %v4793_v48 = vpop.permute.xlu0 %4792  ;;  %v4853_v0 = vpack.c.bf16 %v4845_v20, %v4841_v4  ;;  %v4842_v18 = vmul.f32 %v17022_v35, %v4796_v12  ;;  %v17076_v12 = vld [vmem:[#allocation80_spill] sm:$0xff] }
 0x8d1   : > { %5423 = vmatpush1.bf16.msra.mxu1 %v17071_v38  ;;  %v4797_v38 = vsel %vm992_vm4, %v17063_v36, %v4793_v48  ;;  %v4809_v5 = vsel %vm992_vm4, %v4793_v48, %v17064_v9  ;;  %v4843_v55 = vmul.f32 %v17023_v27, %v4808_v42  ;;  %v17073_v8 = vpack.c.bf16 %v13043_v10, %v13002_v22  ;;  %v17075_v36 = vld [vmem:[#allocation48_spill] sm:$0xff]  ;;  %v17077_v48 = vld [vmem:[#allocation49_spill] sm:$0xff] }
 0x8d2   : > { %5424 = vmatprep.subr.bf16.mxu1 %v4851_v47  ;;  %v4846_v47 = vmul.f32 %v17022_v35, %v4797_v38  ;;  %v4847_v4 = vmul.f32 %v17023_v27, %v4809_v5  ;;  %v4893_v20 = vpop.permute.xlu1 %4892  ;;  %v13283_v34 = vmul.f32 %v17074_v11, %v4998_v30  ;;  %v4999_v9 = vsel %vm1280_vm7, %v17058_v46, %v17075_v36  ;;  %v17078_v5 = vld [vmem:[#allocation92_spill] sm:$0xff] }
 0x8d3   : > { %5319 = vmatpush1.bf16.msra.mxu0 %v17073_v8  ;;  %v4902_v42 = vsel %vm1136_vm5, %v4877_v3, %v17076_v12  ;;  %v5011_v22 = vsel %vm1280_vm7, %v17075_v36, %v17046_v25  ;;  %v4852_v10 = vpack.c.bf16 %v4844_v32, %v4840_v52  ;;  %v5039_v38 = vmul.f32 %v17077_v48, %v5010_v44  ;;  %v17079_v8 = vld [vmem:[#allocation79_spill] sm:$0xff] }
 0x8d4   : > { %5320 = vmatprep.subr.bf16.mxu0 %v4853_v0  ;;  %v4854_v35 = vpack.c.bf16 %v4846_v47, %v4842_v18  ;;  %v4879_v27 = vpop.permute.xlu0 %4878  ;;  %v4855_v30 = vpack.c.bf16 %v4847_v4, %v4843_v55  ;;  %v4906_v46 = vsel %vm1136_vm5, %v17078_v5, %v4877_v3  ;;  %v4943_v25 = vmul.f32 %v17036_v16, %v4902_v42  ;;  %v17081_v47 = vld [vmem:[#allocation50_spill] sm:$0xff]  ;;  %v17082_v4 = vld [vmem:[#allocation85_spill] sm:$0xff] }
 0x8d5   : > { %5425 = vmatpush1.bf16.msra.mxu1 %v4850_v57  ;;  %v4903_v0 = vsel %vm1136_vm5, %v4879_v27, %v17079_v8  ;;  %v17080_v57 = vld [vmem:[#allocation82_spill] sm:$0xff]  ;;  %v4898_v32 = vsel %vm1136_vm5, %v17076_v12, %v4893_v20  ;;  %v13312_v3 = vmul.f32 %v17074_v11, %v4999_v9  ;;  %v5043_v18 = vmul.f32 %v17077_v48, %v5011_v22 }
 0x8d6   : > { %v4907_v50 = vsel %vm1136_vm5, %v17080_v57, %v4879_v27  ;;  %v4947_v44 = vmul.f32 %v17036_v16, %v4903_v0  ;;  %5426 = vmatprep.subr.bf16.mxu1 %v4855_v30  ;;  %v4979_v52 = vpop.permute.xlu1 %4978  ;;  %v4910_v55 = vsel %vm1136_vm5, %v4893_v20, %v17078_v5  ;;  %v13322_v36 = vsel %vm1424_vm8, %v17082_v4, %v17081_v47  ;;  %v17085_v5 = vld [vmem:[#allocation26_spill] sm:$0xff] }
 0x8d7   : > { %5321 = vmatpush1.bf16.msra.mxu0 %v4852_v10  ;;  %v4946_v16 = vmul.f32 %v17031_v49, %v4907_v50  ;;  %v5053_v42 = vpack.c.bf16 %v13246_v24, %v13224_v60  ;;  %v4942_v22 = vmul.f32 %v17031_v49, %v4906_v46  ;;  %v4944_v20 = vmul.f32 %v17037_v6, %v4898_v32  ;;  %v17086_v46 = vld [vmem:[#allocation41_spill] sm:$0xff] }
 0x8d8   : > { %5322 = vmatprep.subr.bf16.mxu0 %v4951_v17  ;;  %v4895_v12 = vpop.permute.xlu0 %4894  ;;  %v4955_v9 = vpack.c.bf16 %v4947_v44, %v4943_v25  ;;  %v4945_v50 = vmul.f32 %v17043_v62, %v4910_v55  ;;  %v17084_v27 = vpack.c.bf16 %v13137_v7, %v13168_v63  ;;  %v5054_v30 = vpack.c.bf16 %v13312_v3, %v13283_v34  ;;  %v17088_v25 = vld [vmem:[#allocation90_spill] sm:$0xff]  ;;  %v17089_v3 = vld [vmem:[#allocation101_spill] sm:$0xff] }
 0x8d9   : > { %5427 = vmatpush1.bf16.msra.mxu1 %v4854_v35  ;;  %v4899_v17 = vsel %vm1136_vm5, %v17079_v8, %v4895_v12  ;;  %v4911_v10 = vsel %vm1136_vm5, %v4895_v12, %v17080_v57  ;;  %v17083_v35 = vld [vmem:[#allocation99_spill] sm:$0xff]  ;;  %v5109_v8 = vsel %vm1424_vm8, %v17086_v46, %v17085_v5  ;;  %v17087_v0 = vpack.c.bf16 %v13160_v1, %v13179_v59  ;;  %v17090_v59 = vld [vmem:[#allocation96_spill] sm:$0xff] }
 0x8da   : > { %5428 = vmatprep.subr.bf16.mxu1 %v4953_v61  ;;  %v5004_v61 = vsel %vm1280_vm7, %v4979_v52, %v17083_v35  ;;  %v4948_v24 = vmul.f32 %v17037_v6, %v4899_v17  ;;  %v4949_v49 = vmul.f32 %v17043_v62, %v4911_v10  ;;  %v4995_v60 = vpop.permute.xlu1 %4994  ;;  %v5055_v6 = vpack.c.bf16 %v5043_v18, %v5039_v38 }
 0x8db   : > { %5323 = vmatpush1.bf16.msra.mxu0 %v17084_v27  ;;  %v5105_v7 = vsel %vm1424_vm8, %v17085_v5, %v13115_v33  ;;  %v4954_v63 = vpack.c.bf16 %v4946_v16, %v4942_v22  ;;  %v5008_v32 = vsel %vm1280_vm7, %v17088_v25, %v4979_v52  ;;  %v5045_v44 = vmul.f32 %v17062_v31, %v5004_v61 }
 0x8dc   : > { %5324 = vmatprep.subr.bf16.mxu0 %v4955_v9  ;;  %v4956_v62 = vpack.c.bf16 %v4948_v24, %v4944_v20  ;;  %v4981_v57 = vpop.permute.xlu0 %4980  ;;  %v4957_v34 = vpack.c.bf16 %v4949_v49, %v4945_v50  ;;  %v5000_v18 = vsel %vm1280_vm7, %v17083_v35, %v4995_v60  ;;  %v5012_v55 = vsel %vm1280_vm7, %v4995_v60, %v17088_v25  ;;  %v17091_v9 = vld [vmem:[#allocation103_spill] sm:$0xff] }
 0x8dd   : > { %5429 = vmatpush1.bf16.msra.mxu1 %v17087_v0  ;;  %v5005_v1 = vsel %vm1280_vm7, %v4981_v57, %v17089_v3  ;;  %v5009_v38 = vsel %vm1280_vm7, %v17090_v59, %v4981_v57  ;;  %v5104_v12 = vsel %vm1424_vm8, %v17081_v47, %v13096_v29  ;;  %v5143_v22 = vmul.f32 %v17091_v9, %v5105_v7 }
 0x8de   : > { %v5049_v52 = vmul.f32 %v17062_v31, %v5005_v1  ;;  %5430 = vmatprep.subr.bf16.mxu1 %v4957_v34  ;;  %v5093_v16 = vpop.permute.xlu1 %5092  ;;  %v5113_v31 = vsel %vm1424_vm8, %v13162_v15, %v17086_v46  ;;  %v5044_v17 = vmul.f32 %v17057_v37, %v5008_v32  ;;  %v5048_v10 = vmul.f32 %v17057_v37, %v5009_v38  ;;  %v17093_v46 = vld [vmem:[#allocation47_spill] sm:$0xff]  ;;  %v8393_v34 = vld [vmem:[%s16298_s4 + $0x7c] ss:$12 sps:$4 sm:$0xff]  }
 0x8df   : > { %5325 = vmatpush1.bf16.msra.mxu0 %v4954_v63  ;;  %v5112_v20 = vsel %vm1424_vm8, %v5093_v16, %v17082_v4  ;;  %v5046_v35 = vmul.f32 %v17074_v11, %v5000_v18  ;;  %v5047_v61 = vmul.f32 %v17077_v48, %v5012_v55  ;;  %v5100_v24 = vsel %vm1424_vm8, %v13096_v29, %v5093_v16  ;;  %v8395_v55 = vld [vmem:[%s16298_s4 + $0x78] ss:$12 sps:$4 sm:$0xff]  }
 0x8e0   : > { %5326 = vmatprep.subr.bf16.mxu0 %v5053_v42  ;;  %v4997_v50 = vpop.permute.xlu0 %4996  ;;  %v5057_v47 = vpack.c.bf16 %v5049_v52, %v5045_v44  ;;  %v5141_v37 = vmul.f32 %v12893_v28, %v5112_v20  ;;  %v17092_v5 = vpack.c.bf16 %v13227_v58, %v13212_v14  ;;  %v5142_v0 = vmul.f32 %v17093_v46, %v5109_v8  ;;  %v8390_v8 = vld [vmem:[%s16298_s4 + $0x60] ss:$12 sps:$4 sm:$0xff]  }
 0x8e1   : > { %5431 = vmatpush1.bf16.msra.mxu1 %v4956_v62  ;;  %v5001_v4 = vsel %vm1280_vm7, %v17089_v3, %v4997_v50  ;;  %v5013_v42 = vsel %vm1280_vm7, %v4997_v50, %v17090_v59  ;;  %v5101_v29 = vsel %vm1424_vm8, %v13115_v33, %v13162_v15  ;;  %v5056_v7 = vpack.c.bf16 %v5048_v10, %v5044_v17 }
 0x8e2   : > { %5432 = vmatprep.subr.bf16.mxu1 %v5055_v6  ;;  %v5050_v49 = vmul.f32 %v17074_v11, %v5001_v4  ;;  %v5051_v60 = vmul.f32 %v17077_v48, %v5013_v42  ;;  %v5073_v27 = vpop.permute.xlu1 %5072  ;;  %v5139_v6 = vmul.f32 %v17091_v9, %v5104_v12  ;;  %v5145_v11 = vmul.f32 %v12893_v28, %v5113_v31 }
 0x8e3   : > { %5327 = vmatpush1.bf16.msra.mxu0 %v17092_v5  ;;  %v5140_v58 = vmul.f32 %v12889_v40, %v5100_v24  ;;  %v5138_v57 = vmul.f32 %v17093_v46, %v13322_v36 }
 0x8e4   : > { %5328 = vmatprep.subr.bf16.mxu0 %v5057_v47  ;;  %v5058_v48 = vpack.c.bf16 %v5050_v49, %v5046_v35  ;;  %v5075_v63 = vpop.permute.xlu0 %5074  ;;  %v5059_v62 = vpack.c.bf16 %v5051_v60, %v5047_v61  ;;  %v5155_v14 = vpack.c.bf16 %v5143_v22, %v5139_v6  ;;  %v5157_v15 = vpack.c.bf16 %v5145_v11, %v5141_v37 }
 0x8e5   : > { %5433 = vmatpush1.bf16.msra.mxu1 %v5054_v30  ;;  %v5144_v30 = vmul.f32 %v12889_v40, %v5101_v29  ;;  %v5154_v25 = vpack.c.bf16 %v5142_v0, %v5138_v57  ;;  %v17094_v37 = vmov 0  }
 0x8e6   : > { %5434 = vmatprep.subr.bf16.mxu1 %v5059_v62  ;;  %v5081_v33 = vpop.permute.xlu1 %5080 }
 0x8e7   : > { %5329 = vmatpush1.bf16.msra.mxu0 %v5056_v7  ;;  %v5156_v44 = vpack.c.bf16 %v5144_v30, %v5140_v58  ;;  %v5110_v36 = vsel %vm1424_vm8, %v5073_v27, %v5081_v33  ;;  %v5588_v30 = vld [vmem:[%s16295_s1] sm:$0xf] }
 0x8e8   : > { %5351 = vmatprep.subr.bf16.mxu0 %v5155_v14  ;;  %v5091_v32 = vpop.permute.xlu0 %5090  ;;  %v5146_v52 = vmul.f32 %v17093_v46, %v5110_v36  ;;  %v13765_v53 = vrot.slane %v5588_v30, %v17122_v19 }
 0x8e9   : > { %5435 = vmatpush1.bf16.msra.mxu1 %v5058_v48 }
 0x8ea   : > { %5457 = vmatprep.subr.bf16.mxu1 %v5157_v15  ;;  %5331 = vmatmul.mubr.bf16.vlgmr.msra.gmra.mrb[24].mxu0 %v8390_v8  ;;  %v5089_v3 = vpop.permute.xlu1 %5088 }
 0x8eb   : > { %5352 = vmatpush1.bf16.msra.mxu0 %v5154_v25  ;;  %v5106_v1 = vsel %vm1424_vm8, %v5081_v33, %v5089_v3  ;;  %5340 = vmatprep.mubr.bf16.mxu0 %v8393_v34 }
 0x8ec   : > { %5437 = vmatmul.mubr.bf16.vlgmr.msra.gmra.mrb[24].mxu1 %v8390_v8  ;;  %v5083_v59 = vpop.permute.xlu0 %5082  ;;  %v5147_v16 = vmul.f32 %v17091_v9, %v5106_v1 }
 0x8ed   : > { %5458 = vmatpush1.bf16.msra.mxu1 %v5156_v44  ;;  %5446 = vmatprep.mubr.bf16.mxu1 %v8393_v34  ;;  %v5107_v38 = vsel %vm1424_vm8, %v5083_v59, %v5091_v32  ;;  %v5111_v18 = vsel %vm1424_vm8, %v5075_v63, %v5083_v59 }
 0x8ee   : > { %v5150_v12 = vmul.f32 %v17093_v46, %v5111_v18  ;;  %v5151_v22 = vmul.f32 %v17091_v9, %v5107_v38  ;;  %v5097_v20 = vpop.permute.xlu1 %5096 }
 0x8ef   : > { %v5102_v31 = vsel %vm1424_vm8, %v5089_v3, %v5097_v20  ;;  %v5114_v17 = vsel %vm1424_vm8, %v5097_v20, %v5073_v27  ;;  %v8396_v27 = vld [vmem:[%s16298_s4 + $0x68] ss:$12 sps:$4 sm:$0xff]  }
 0x8f0   : > { %v5158_v10 = vpack.c.bf16 %v5150_v12, %v5146_v52  ;;  %v5099_v50 = vpop.permute.xlu0 %5098  ;;  %v5159_v47 = vpack.c.bf16 %v5151_v22, %v5147_v16  ;;  %v5148_v35 = vmul.f32 %v12889_v40, %v5102_v31  ;;  %v5149_v9 = vmul.f32 %v12893_v28, %v5114_v17 }
 0x8f1   : > { %v5103_v61 = vsel %vm1424_vm8, %v5091_v32, %v5099_v50  ;;  %v5115_v4 = vsel %vm1424_vm8, %v5099_v50, %v5075_v63 }
 0x8f2   : > { %5341 = vmatmul.mubr.bf16.gmra.mrb[28].mxu0 %v8395_v55  ;;  %v5152_v42 = vmul.f32 %v12889_v40, %v5103_v61  ;;  %v5153_v24 = vmul.f32 %v12893_v28, %v5115_v4  ;;  %5353 = vmatprep.subr.bf16.mxu0 %v5159_v47  ;;  %v8397_v40 = vld [vmem:[%s16298_s4 + $0x80] ss:$12 sps:$4 sm:$0xff]  }
 0x8f3   : > { %5354 = vmatpush1.bf16.msra.mxu0 %v5158_v10  ;;  %5383 = vmatprep.mubr.bf16.mxu0 %v17094_v37 }
 0x8f4   : > { %5447 = vmatmul.mubr.bf16.gmra.mrb[28].mxu1 %v8395_v55  ;;  %v5160_v49 = vpack.c.bf16 %v5152_v42, %v5148_v35  ;;  %v5161_v60 = vpack.c.bf16 %v5153_v24, %v5149_v9 }
 0x8f5   : > { %5489 = vmatprep.mubr.bf16.mxu1 %v17094_v37 }
 0x8f6   : > { %5459 = vmatprep.subr.bf16.mxu1 %v5161_v60 }
 0x8f7   : > { %5460 = vmatpush1.bf16.msra.mxu1 %v5160_v49 }
 0x8fa   : > { %8097 = vmatmul.mubr.msk.bf16.vlgmr.msra.gmra.mrb[24].mxu0 %vm2887_vm9, %v8396_v27 }
 0x8fb   : > { %5393 = vmatprep.mubr.bf16.mxu0 %v17094_v37 }
 0x8fc   : > { %8099 = vmatmul.mubr.msk.bf16.vlgmr.msra.gmra.mrb[24].mxu1 %vm2887_vm9, %v8396_v27 }
 0x8fd   : > { %5499 = vmatprep.mubr.bf16.mxu1 %v17094_v37  ;;  %v13795_v37 = vrot.slane %v5588_v30, %v16864_v45 }
 0x8ff   : > { %v5245_v28 = vpop.permute.xlu1 %5244 }
 0x901   : > { %v5250_v5 = vpop.permute.xlu0 %5249 }
 0x902   : > { %8098 = vmatmul.mubr.msk.bf16.gmra.mrb[28].mxu0 %vm2887_vm9, %v8397_v40 }
 0x903   : > { %v13607_v17 = vpop.permute.xlu1 %5254 }
 0x904   : > { %8100 = vmatmul.mubr.msk.bf16.gmra.mrb[28].mxu1 %vm2887_vm9, %v8397_v40 }
 0x905   : > { %v13611_v10 = vpop.permute.xlu0 %5259 }
 0x9cd   : > { %v5385_v46 = vpop.f32.mrb[24].mxu0 }
 0x9ce   : > { %v8198_v0 = vadd.f32 %v5385_v46, %v5245_v28  ;;  %v5387_v6 = vpop.f32.mrb[25].mxu0 }
 0x9cf   : > { %v5491_v29 = vpop.f32.mrb[24].mxu1  ;;  %v5389_v11 = vpop.f32.mrb[26].mxu0  ;;  %v8199_v18 = vadd.f32 %v5387_v6, %v5245_v28 }
 0x9d0   : > { %v5493_v7 = vpop.f32.mrb[25].mxu1  ;;  %v13463_v48 = vmax.f32 %v8198_v0, 0.0  ;;  %v8206_v63 = vadd.f32 %v5491_v29, %v5245_v28  ;;  %v8200_v62 = vadd.f32 %v5389_v11, %v5250_v5  ;;  %v5391_v58 = vpop.f32.mrb[27].mxu0 }
 0x9d1   : > { %v5495_v14 = vpop.f32.mrb[26].mxu1  ;;  %v8201_v55 = vadd.f32 %v5391_v58, %v5250_v5  ;;  %v13547_v52 = vmax.f32 %v8199_v18, 0.0  ;;  %v8207_v16 = vadd.f32 %v5493_v7, %v5245_v28 }
 0x9d2   : > { %17095 = vst [vmem:[#allocation77_spill] sm:$0xff] %v13463_v48  ;;  %v5497_v8 = vpop.f32.mrb[27].mxu1  ;;  %v13465_v57 = vmax.f32 %v8200_v62, 0.0  ;;  %v8208_v33 = vadd.f32 %v5495_v14, %v5250_v5  ;;  %5540 = vrot.lane.b32.xlu1 %v13463_v48, %s8446_s11  ;;  %v13469_v15 = vmax.f32 %v8206_v63, 0.0 }
 0x9d3   : > { %17099 = vst [vmem:[#allocation72_spill] sm:$0xff] %v13547_v52  ;;  %v13551_v12 = vmax.f32 %v8201_v55, 0.0  ;;  %v8209_v22 = vadd.f32 %v5497_v8, %v5250_v5  ;;  %v13555_v20 = vmax.f32 %v8207_v16, 0.0 }
 0x9d4   : > { %17096 = vst [vmem:[#allocation25_spill] sm:$0xff] %v13465_v57  ;;  %17097 = vst [vmem:[#allocation28_spill] sm:$0xff] %v13469_v15  ;;  %5542 = vrot.lane.b32.xlu0 %v13465_v57, %s8446_s11  ;;  %v13477_v25 = vmax.f32 %v8208_v33, 0.0 }
 0x9d5   : > { %v13475_v34 = vpop.f32.mrb[28].mxu0  ;;  %17100 = vst [vmem:[#allocation27_spill] sm:$0xff] %v13551_v12  ;;  %17101 = vst [vmem:[#allocation71_spill] sm:$0xff] %v13555_v20  ;;  %v13559_v31 = vmax.f32 %v8209_v22, 0.0 }
 0x9d6   : > { %17098 = vst [vmem:[#allocation51_spill] sm:$0xff] %v13477_v25  ;;  %v13479_v32 = vpop.f32.mrb[29].mxu0  ;;  %5556 = vrot.lane.b32.xlu1 %v13469_v15, %s8446_s11  ;;  %v8202_v50 = vadd.f32 %v13475_v34, %v13607_v17 }
 0x9d7   : > { %v13481_v44 = vpop.f32.mrb[28].mxu1  ;;  %v13485_v3 = vpop.f32.mrb[30].mxu0  ;;  %17102 = vst [vmem:[#allocation52_spill] sm:$0xff] %v13559_v31 }
 0x9d8   : > { %v13487_v36 = vpop.f32.mrb[29].mxu1  ;;  %v13489_v1 = vpop.f32.mrb[31].mxu0  ;;  %5558 = vrot.lane.b32.xlu0 %v13477_v25, %s8446_s11  ;;  %v8204_v35 = vadd.f32 %v13485_v3, %v13611_v10  ;;  %v13627_v4 = vmax.f32 %v8202_v50, 0.0  ;;  %v8210_v9 = vadd.f32 %v13481_v44, %v13607_v17 }
 0x9d9   : > { %v13491_v59 = vpop.f32.mrb[30].mxu1  ;;  %v8205_v56 = vadd.f32 %v13489_v1, %v13611_v10 }
 0x9da   : > { %v13495_v38 = vpop.f32.mrb[31].mxu1  ;;  %5642 = vrot.lane.b32.xlu1 %v13463_v48, %s8447_s12  ;;  %17103 = vst [vmem:[#allocation75_spill] sm:$0xff] %v13627_v4  ;;  %v13635_v24 = vmax.f32 %v8204_v35, 0.0  ;;  %v8212_v49 = vadd.f32 %v13491_v59, %v13611_v10  ;;  %v13643_v27 = vmax.f32 %v8210_v9, 0.0  ;;  %v8203_v9 = vadd.f32 %v13479_v32, %v13607_v17 }
 0x9db   : > { %v8211_v32 = vadd.f32 %v13487_v36, %v13607_v17  ;;  %v13770_v43 = vmax.f32 %v8205_v56, 0.0  ;;  %v8213_v23 = vadd.f32 %v13495_v38, %v13611_v10  ;;  %v13792_v10 = vrot.slane %v5588_v30, %v16865_v2 }
 0x9dc   : > { %5644 = vrot.lane.b32.xlu0 %v13465_v57, %s8447_s12  ;;  %17104 = vst [vmem:[#allocation45_spill] sm:$0xff] %v13635_v24  ;;  %17105 = vst [vmem:[#allocation74_spill] sm:$0xff] %v13643_v27  ;;  %v13649_v28 = vmax.f32 %v8212_v49, 0.0  ;;  %v13760_v51 = vmax.f32 %v8203_v9, 0.0  ;;  %v17125_v9 = vld [vmem:[#allocation5_spill] sm:$0xff] }
 0x9dd   : > { %17123 = vst [vmem:[#allocation59_spill] sm:$0xff] %v13770_v43  ;;  %v13776_v36 = vmax.f32 %v8211_v32, 0.0  ;;  %v13782_v21 = vrot.slane %v5588_v30, %v17125_v9 }
 0x9de   : > { %5658 = vrot.lane.b32.xlu1 %v13469_v15, %s8447_s12  ;;  %17106 = vst [vmem:[#allocation30_spill] sm:$0xff] %v13649_v28  ;;  %17121 = vst [vmem:[#allocation23_spill] sm:$0xff] %v13760_v51 }
 0x9df   : > { %17124 = vst [vmem:[#allocation89_spill] sm:$0xff] %v13776_v36 }
 0x9e0   : > { %5660 = vrot.lane.b32.xlu0 %v13477_v25, %s8447_s12 }
 0x9e2   : > { %5744 = vrot.lane.b32.xlu1 %v13463_v48, %s8448_s13 }
 0x9e4   : > { %5746 = vrot.lane.b32.xlu0 %v13465_v57, %s8448_s13 }
 0x9e6   : > { %5760 = vrot.lane.b32.xlu1 %v13469_v15, %s8448_s13 }
 0x9e8   : > { %5762 = vrot.lane.b32.xlu0 %v13477_v25, %s8448_s13 }
 0x9ea   : > { %5846 = vrot.lane.b32.xlu1 %v13463_v48, %s8449_s16 }
 0x9ec   : > { %5848 = vrot.lane.b32.xlu0 %v13465_v57, %s8449_s16 }
 0x9ee   : > { %5862 = vrot.lane.b32.xlu1 %v13469_v15, %s8449_s16 }
 0x9f0   : > { %5864 = vrot.lane.b32.xlu0 %v13477_v25, %s8449_s16 }
 0x9f2   : > { %5964 = vrot.lane.b32.xlu1 %v13463_v48, %s8450_s19 }
 0x9f4   : > { %5966 = vrot.lane.b32.xlu0 %v13465_v57, %s8450_s19 }
 0x9f6   : > { %5980 = vrot.lane.b32.xlu1 %v13469_v15, %s8450_s19 }
 0x9f8   : > { %5982 = vrot.lane.b32.xlu0 %v13477_v25, %s8450_s19 }
 0x9fa   : > { %6066 = vrot.lane.b32.xlu1 %v13463_v48, %s8451_s24 }
 0x9fc   : > { %6068 = vrot.lane.b32.xlu0 %v13465_v57, %s8451_s24 }
 0x9fe   : > { %6082 = vrot.lane.b32.xlu1 %v13469_v15, %s8451_s24 }
 0xa00   : > { %6084 = vrot.lane.b32.xlu0 %v13477_v25, %s8451_s24 }
 0xa02   : > { %6168 = vrot.lane.b32.xlu1 %v13463_v48, %s8452_s29 }
 0xa04   : > { %6170 = vrot.lane.b32.xlu0 %v13465_v57, %s8452_s29 }
 0xa06   : > { %6184 = vrot.lane.b32.xlu1 %v13469_v15, %s8452_s29 }
 0xa08   : > { %6186 = vrot.lane.b32.xlu0 %v13477_v25, %s8452_s29 }
 0xa0a   : > { %6270 = vrot.lane.b32.xlu1 %v13463_v48, %s8453_s15 }
 0xa0c   : > { %6272 = vrot.lane.b32.xlu0 %v13465_v57, %s8453_s15 }
 0xa0e   : > { %5548 = vrot.lane.b32.xlu1 %v13547_v52, %s8446_s11 }
 0xa10   : > { %5550 = vrot.lane.b32.xlu0 %v13551_v12, %s8446_s11 }
 0xa12   : > { %5564 = vrot.lane.b32.xlu1 %v13555_v20, %s8446_s11 }
 0xa14   : > { %5566 = vrot.lane.b32.xlu0 %v13559_v31, %s8446_s11 }
 0xa16   : > { %5650 = vrot.lane.b32.xlu1 %v13547_v52, %s8447_s12 }
 0xa18   : > { %5652 = vrot.lane.b32.xlu0 %v13551_v12, %s8447_s12 }
 0xa1a   : > { %5666 = vrot.lane.b32.xlu1 %v13555_v20, %s8447_s12 }
 0xa1c   : > { %5668 = vrot.lane.b32.xlu0 %v13559_v31, %s8447_s12 }
 0xa1e   : > { %5752 = vrot.lane.b32.xlu1 %v13547_v52, %s8448_s13 }
 0xa20   : > { %5754 = vrot.lane.b32.xlu0 %v13551_v12, %s8448_s13 }
 0xa22   : > { %5768 = vrot.lane.b32.xlu1 %v13555_v20, %s8448_s13 }
 0xa24   : > { %5770 = vrot.lane.b32.xlu0 %v13559_v31, %s8448_s13 }
 0xa26   : > { %5854 = vrot.lane.b32.xlu1 %v13547_v52, %s8449_s16 }
 0xa28   : > { %5856 = vrot.lane.b32.xlu0 %v13551_v12, %s8449_s16 }
 0xa2a   : > { %5870 = vrot.lane.b32.xlu1 %v13555_v20, %s8449_s16 }
 0xa2c   : > { %5872 = vrot.lane.b32.xlu0 %v13559_v31, %s8449_s16 }
 0xa2e   : > { %5972 = vrot.lane.b32.xlu1 %v13547_v52, %s8450_s19 }
 0xa30   : > { %5974 = vrot.lane.b32.xlu0 %v13551_v12, %s8450_s19 }
 0xa32   : > { %5988 = vrot.lane.b32.xlu1 %v13555_v20, %s8450_s19 }
 0xa34   : > { %5990 = vrot.lane.b32.xlu0 %v13559_v31, %s8450_s19 }
 0xa36   : > { %6074 = vrot.lane.b32.xlu1 %v13547_v52, %s8451_s24 }
 0xa38   : > { %6076 = vrot.lane.b32.xlu0 %v13551_v12, %s8451_s24 }
 0xa3a   : > { %6090 = vrot.lane.b32.xlu1 %v13555_v20, %s8451_s24 }
 0xa3c   : > { %6092 = vrot.lane.b32.xlu0 %v13559_v31, %s8451_s24 }
 0xa3e   : > { %6176 = vrot.lane.b32.xlu1 %v13547_v52, %s8452_s29 }
 0xa40   : > { %6178 = vrot.lane.b32.xlu0 %v13551_v12, %s8452_s29 }
 0xa42   : > { %6192 = vrot.lane.b32.xlu1 %v13555_v20, %s8452_s29 }
 0xa44   : > { %6194 = vrot.lane.b32.xlu0 %v13559_v31, %s8452_s29  ;;  %v13619_v47 = vpop.permute.xlu1 %5540 }
 0xa46   : > { %v13623_v61 = vpop.permute.xlu0 %5542  ;;  %6278 = vrot.lane.b32.xlu1 %v13547_v52, %s8453_s15 }
 0xa48   : > { %6280 = vrot.lane.b32.xlu0 %v13551_v12, %s8453_s15  ;;  %v13633_v42 = vpop.permute.xlu1 %5556 }
 0xa4a   : > { %v13639_v60 = vpop.permute.xlu0 %5558  ;;  %5544 = vrot.lane.b32.xlu1 %v13627_v4, %s8446_s11 }
 0xa4c   : > { %5546 = vrot.lane.b32.xlu0 %v13635_v24, %s8446_s11  ;;  %v13647_v40 = vpop.permute.xlu1 %5642 }
 0xa4e   : > { %v13651_v5 = vpop.permute.xlu0 %5644  ;;  %5560 = vrot.lane.b32.xlu1 %v13643_v27, %s8446_s11 }
 0xa50   : > { %5562 = vrot.lane.b32.xlu0 %v13649_v28, %s8446_s11  ;;  %v13657_v46 = vpop.permute.xlu1 %5658 }
 0xa52   : > { %v13659_v0 = vpop.permute.xlu0 %5660  ;;  %5646 = vrot.lane.b32.xlu1 %v13627_v4, %s8447_s12 }
 0xa54   : > { %5648 = vrot.lane.b32.xlu0 %v13635_v24, %s8447_s12  ;;  %v13665_v6 = vpop.permute.xlu1 %5744 }
 0xa56   : > { %v13667_v29 = vpop.permute.xlu0 %5746  ;;  %5662 = vrot.lane.b32.xlu1 %v13643_v27, %s8447_s12 }
 0xa58   : > { %5664 = vrot.lane.b32.xlu0 %v13649_v28, %s8447_s12  ;;  %v13673_v11 = vpop.permute.xlu1 %5760 }
 0xa5a   : > { %v13675_v7 = vpop.permute.xlu0 %5762  ;;  %5748 = vrot.lane.b32.xlu1 %v13627_v4, %s8448_s13 }
 0xa5c   : > { %5750 = vrot.lane.b32.xlu0 %v13635_v24, %s8448_s13  ;;  %v13681_v63 = vpop.permute.xlu1 %5846 }
 0xa5e   : > { %v13683_v62 = vpop.permute.xlu0 %5848  ;;  %5764 = vrot.lane.b32.xlu1 %v13643_v27, %s8448_s13 }
 0xa60   : > { %5766 = vrot.lane.b32.xlu0 %v13649_v28, %s8448_s13  ;;  %v13689_v58 = vpop.permute.xlu1 %5862 }
 0xa62   : > { %v13691_v14 = vpop.permute.xlu0 %5864  ;;  %5850 = vrot.lane.b32.xlu1 %v13627_v4, %s8449_s16 }
 0xa64   : > { %5852 = vrot.lane.b32.xlu0 %v13635_v24, %s8449_s16  ;;  %v13697_v8 = vpop.permute.xlu1 %5964 }
 0xa65   : > { %17107 = vst [vmem:[#allocation56_spill] sm:$0xff] %v13697_v8 }
 0xa66   : > { %v13699_v33 = vpop.permute.xlu0 %5966  ;;  %5866 = vrot.lane.b32.xlu1 %v13643_v27, %s8449_s16 }
 0xa67   : > { %17108 = vst [vmem:[#allocation91_spill] sm:$0xff] %v13699_v33 }
 0xa68   : > { %5868 = vrot.lane.b32.xlu0 %v13649_v28, %s8449_s16  ;;  %v13705_v34 = vpop.permute.xlu1 %5980 }
 0xa69   : > { %17109 = vst [vmem:[#allocation100_spill] sm:$0xff] %v13705_v34 }
 0xa6a   : > { %v13707_v44 = vpop.permute.xlu0 %5982  ;;  %5968 = vrot.lane.b32.xlu1 %v13627_v4, %s8450_s19 }
 0xa6b   : > { %17110 = vst [vmem:[#allocation102_spill] sm:$0xff] %v13707_v44 }
 0xa6c   : > { %5970 = vrot.lane.b32.xlu0 %v13635_v24, %s8450_s19  ;;  %v13713_v3 = vpop.permute.xlu1 %6066 }
 0xa6d   : > { %17111 = vst [vmem:[#allocation29_spill] sm:$0xff] %v13713_v3 }
 0xa6e   : > { %v13715_v59 = vpop.permute.xlu0 %6068  ;;  %5984 = vrot.lane.b32.xlu1 %v13643_v27, %s8450_s19 }
 0xa6f   : > { %17112 = vst [vmem:[#allocation31_spill] sm:$0xff] %v13715_v59 }
 0xa70   : > { %5986 = vrot.lane.b32.xlu0 %v13649_v28, %s8450_s19  ;;  %v13721_v18 = vpop.permute.xlu1 %6082 }
 0xa71   : > { %17113 = vst [vmem:[#allocation63_spill] sm:$0xff] %v13721_v18 }
 0xa72   : > { %v13723_v55 = vpop.permute.xlu0 %6084  ;;  %6070 = vrot.lane.b32.xlu1 %v13627_v4, %s8451_s24 }
 0xa73   : > { %17114 = vst [vmem:[#allocation32_spill] sm:$0xff] %v13723_v55 }
 0xa74   : > { %6072 = vrot.lane.b32.xlu0 %v13635_v24, %s8451_s24  ;;  %v13729_v16 = vpop.permute.xlu1 %6168 }
 0xa75   : > { %17115 = vst [vmem:[#allocation88_spill] sm:$0xff] %v13729_v16 }
 0xa76   : > { %v13731_v22 = vpop.permute.xlu0 %6170  ;;  %6086 = vrot.lane.b32.xlu1 %v13643_v27, %s8451_s24 }
 0xa77   : > { %17116 = vst [vmem:[#allocation64_spill] sm:$0xff] %v13731_v22 }
 0xa78   : > { %6088 = vrot.lane.b32.xlu0 %v13649_v28, %s8451_s24  ;;  %v13737_v50 = vpop.permute.xlu1 %6184 }
 0xa79   : > { %17117 = vst [vmem:[#allocation81_spill] sm:$0xff] %v13737_v50 }
 0xa7a   : > { %v13739_v35 = vpop.permute.xlu0 %6186  ;;  %6172 = vrot.lane.b32.xlu1 %v13627_v4, %s8452_s29 }
 0xa7b   : > { %17118 = vst [vmem:[#allocation78_spill] sm:$0xff] %v13739_v35 }
 0xa7c   : > { %6174 = vrot.lane.b32.xlu0 %v13635_v24, %s8452_s29  ;;  %v13747_v49 = vpop.permute.xlu1 %6270 }
 0xa7d   : > { %17119 = vst [vmem:[#allocation57_spill] sm:$0xff] %v13747_v49 }
 0xa7e   : > { %v13754_v41 = vpop.permute.xlu0 %6272  ;;  %6188 = vrot.lane.b32.xlu1 %v13643_v27, %s8452_s29 }
 0xa7f   : > { %17120 = vst [vmem:[#allocation40_spill] sm:$0xff] %v13754_v41  ;;  %v13803_v41 = vmax.f32 %v8213_v23, 0.0 }
 0xa80   : > { %6190 = vrot.lane.b32.xlu0 %v13649_v28, %s8452_s29  ;;  %v5549_v39 = vpop.permute.xlu1 %5548 }
 0xa81   : > { %v5580_v1 = vsel %vm393_vm0, %v13619_v47, %v5549_v39  ;;  %17126 = vst [vmem:[#allocation73_spill] sm:$0xff] %v13803_v41 }
 0xa82   : > { %v5551_v13 = vpop.permute.xlu0 %5550  ;;  %5552 = vrot.lane.b32.xlu1 %v13760_v51, %s8446_s11  ;;  %v5611_v54 = vmul.f32 %v13765_v53, %v5580_v1 }
 0xa83   : > { %v5581_v17 = vsel %vm393_vm0, %v13623_v61, %v5551_v13  ;;  %v5577_v56 = vsel %vm393_vm0, %v5551_v13, %v13639_v60 }
 0xa84   : > { %v5615_v38 = vmul.f32 %v13765_v53, %v5581_v17  ;;  %5554 = vrot.lane.b32.xlu0 %v13770_v43, %s8446_s11  ;;  %v5565_v32 = vpop.permute.xlu1 %5564  ;;  %v5576_v17 = vsel %vm393_vm0, %v5549_v39, %v13633_v42  ;;  %v5616_v35 = vmul.f32 %v13795_v37, %v5577_v56 }
 0xa85   : > { %v5572_v1 = vsel %vm393_vm0, %v13633_v42, %v5565_v32  ;;  %v5584_v13 = vsel %vm393_vm0, %v5565_v32, %v13619_v47  ;;  %v5612_v56 = vmul.f32 %v13795_v37, %v5576_v17 }
 0xa86   : > { %v5567_v49 = vpop.permute.xlu0 %5566  ;;  %5568 = vrot.lane.b32.xlu1 %v13776_v36, %s8446_s11  ;;  %v5627_v30 = vpack.c.bf16 %v5615_v38, %v5611_v54  ;;  %v5610_v48 = vmul.f32 %v13782_v21, %v5584_v13  ;;  %v5613_v47 = vmul.f32 %v13792_v10, %v5572_v1 }
 0xa87   : > { %v5573_v57 = vsel %vm393_vm0, %v13639_v60, %v5567_v49  ;;  %v5585_v23 = vsel %vm393_vm0, %v5567_v49, %v13623_v61  ;;  %v5628_v49 = vpack.c.bf16 %v5616_v35, %v5612_v56 }
 0xa88   : > { %v5614_v39 = vmul.f32 %v13782_v21, %v5585_v23  ;;  %v5617_v42 = vmul.f32 %v13792_v10, %v5573_v57  ;;  %5570 = vrot.lane.b32.xlu0 %v13803_v41, %s8446_s11  ;;  %6500 = vmatprep.subr.bf16.mxu0 %v5627_v30  ;;  %v13823_v54 = vpop.permute.xlu1 %5650 }
 0xa8a   : > { %v5626_v38 = vpack.c.bf16 %v5614_v39, %v5610_v48  ;;  %v13826_v60 = vpop.permute.xlu0 %5652  ;;  %5654 = vrot.lane.b32.xlu1 %v13760_v51, %s8447_s12  ;;  %v5629_v61 = vpack.c.bf16 %v5617_v42, %v5613_v47 }
 0xa8c   : > { %5656 = vrot.lane.b32.xlu0 %v13770_v43, %s8447_s12  ;;  %6501 = vmatpush1.bf16.msra.mxu0 %v5626_v38  ;;  %v13832_v57 = vpop.permute.xlu1 %5666 }
 0xa8d   : > { %6606 = vmatprep.subr.bf16.mxu1 %v5629_v61 }
 0xa8e   : > { %6607 = vmatpush1.bf16.msra.mxu1 %v5628_v49  ;;  %v13834_v32 = vpop.permute.xlu0 %5668  ;;  %5670 = vrot.lane.b32.xlu1 %v13776_v36, %s8447_s12 }
 0xa90   : > { %5672 = vrot.lane.b32.xlu0 %v13803_v41, %s8447_s12  ;;  %v13840_v48 = vpop.permute.xlu1 %5752 }
 0xa92   : > { %v13842_v1 = vpop.permute.xlu0 %5754  ;;  %5756 = vrot.lane.b32.xlu1 %v13760_v51, %s8448_s13 }
 0xa94   : > { %5758 = vrot.lane.b32.xlu0 %v13770_v43, %s8448_s13  ;;  %v13848_v35 = vpop.permute.xlu1 %5768 }
 0xa96   : > { %v13850_v13 = vpop.permute.xlu0 %5770  ;;  %5772 = vrot.lane.b32.xlu1 %v13776_v36, %s8448_s13 }
 0xa98   : > { %5774 = vrot.lane.b32.xlu0 %v13803_v41, %s8448_s13  ;;  %v13856_v17 = vpop.permute.xlu1 %5854 }
 0xa9a   : > { %v13858_v30 = vpop.permute.xlu0 %5856  ;;  %5858 = vrot.lane.b32.xlu1 %v13760_v51, %s8449_s16 }
 0xa9c   : > { %5860 = vrot.lane.b32.xlu0 %v13770_v43, %s8449_s16  ;;  %v13864_v23 = vpop.permute.xlu1 %5870 }
 0xa9e   : > { %v13866_v47 = vpop.permute.xlu0 %5872  ;;  %5874 = vrot.lane.b32.xlu1 %v13776_v36, %s8449_s16 }
 0xa9f   : > { %17127 = vst [vmem:[#allocation65_spill] sm:$0xff] %v13866_v47 }
 0xaa0   : > { %5876 = vrot.lane.b32.xlu0 %v13803_v41, %s8449_s16  ;;  %v13872_v39 = vpop.permute.xlu1 %5972 }
 0xaa1   : > { %17128 = vst [vmem:[#allocation24_spill] sm:$0xff] %v13872_v39  ;;  %v8112_v39 = vld [vmem:[%s16299_s5 + $0x78] sm:$0xff] }
 0xaa2   : > { %v13874_v42 = vpop.permute.xlu0 %5974  ;;  %6286 = vrot.lane.b32.xlu1 %v13469_v15, %s8453_s15 }
 0xaa3   : > { %17129 = vst [vmem:[#allocation94_spill] sm:$0xff] %v13874_v42  ;;  %v8110_v42 = vld [vmem:[%s16299_s5 + $0x68] sm:$0xff] }
 0xaa4   : > { %6288 = vrot.lane.b32.xlu0 %v13477_v25, %s8453_s15  ;;  %v13880_v56 = vpop.permute.xlu1 %5988  ;;  %v8118_v25 = vld [vmem:[%s16295_s1 + $0x1c] sm:$0xf] }
 0xaa5   : > { %17130 = vst [vmem:[#allocation98_spill] sm:$0xff] %v13880_v56  ;;  %v8109_v56 = vld [vmem:[%s16299_s5 + $0x60] sm:$0xff] }
 0xaa6   : > { %v13882_v38 = vpop.permute.xlu0 %5990  ;;  %5976 = vrot.lane.b32.xlu1 %v13760_v51, %s8450_s19 }
 0xaa7   : > { %17131 = vst [vmem:[#allocation62_spill] sm:$0xff] %v13882_v38 }
 0xaa8   : > { %6296 = vrot.lane.b32.xlu0 %v13559_v31, %s8453_s15  ;;  %v13888_v61 = vpop.permute.xlu1 %6074  ;;  %v5678_v31 = vsel %vm536_vm1, %v13823_v54, %v13657_v46 }
 0xaa9   : > { %17132 = vst [vmem:[#allocation58_spill] sm:$0xff] %v13888_v61 }
 0xaaa   : > { %v13890_v49 = vpop.permute.xlu0 %6076  ;;  %5992 = vrot.lane.b32.xlu1 %v13776_v36, %s8450_s19 }
 0xaab   : > { %17133 = vst [vmem:[#allocation93_spill] sm:$0xff] %v13890_v49 }
 0xaac   : > { %5978 = vrot.lane.b32.xlu0 %v13770_v43, %s8450_s19  ;;  %v13896_v22 = vpop.permute.xlu1 %6090 }
 0xaad   : > { %17134 = vst [vmem:[#allocation42_spill] sm:$0xff] %v13896_v22 }
 0xaae   : > { %v13898_v50 = vpop.permute.xlu0 %6092  ;;  %6078 = vrot.lane.b32.xlu1 %v13760_v51, %s8451_s24 }
 0xaaf   : > { %17135 = vst [vmem:[#allocation43_spill] sm:$0xff] %v13898_v50 }
 0xab0   : > { %5994 = vrot.lane.b32.xlu0 %v13803_v41, %s8450_s19  ;;  %v13904_v16 = vpop.permute.xlu1 %6176 }
 0xab1   : > { %17136 = vst [vmem:[#allocation39_spill] sm:$0xff] %v13904_v16 }
 0xab2   : > { %v13906_v3 = vpop.permute.xlu0 %6178  ;;  %6094 = vrot.lane.b32.xlu1 %v13776_v36, %s8451_s24 }
 0xab3   : > { %17137 = vst [vmem:[#allocation34_spill] sm:$0xff] %v13906_v3  ;;  %v8400_v3 = vld [vmem:[%s16298_s4 + $0x94] ss:$12 sps:$4 sm:$0xff]  }
 0xab4   : > { %6080 = vrot.lane.b32.xlu0 %v13770_v43, %s8451_s24  ;;  %v13912_v61 = vpop.permute.xlu1 %6192  ;;  %6532 = vmatprep.mubr.bf16.mxu0 %v8400_v3 }
 0xab5   : > { %17138 = vst [vmem:[#allocation97_spill] sm:$0xff] %v13912_v61  ;;  %6638 = vmatprep.mubr.bf16.mxu1 %v8400_v3 }
 0xab6   : > { %v13914_v22 = vpop.permute.xlu0 %6194  ;;  %6180 = vrot.lane.b32.xlu1 %v13760_v51, %s8452_s29 }
 0xab7   : > { %17139 = vst [vmem:[#allocation84_spill] sm:$0xff] %v13914_v22 }
 0xab8   : > { %6096 = vrot.lane.b32.xlu0 %v13803_v41, %s8451_s24  ;;  %v13920_v18 = vpop.permute.xlu1 %6278 }
 0xab9   : > { %17140 = vst [vmem:[#allocation95_spill] sm:$0xff] %v13920_v18 }
 0xaba   : > { %v13925_v16 = vpop.permute.xlu0 %6280  ;;  %6196 = vrot.lane.b32.xlu1 %v13776_v36, %s8452_s29 }
 0xabb   : > { %17141 = vst [vmem:[#allocation46_spill] sm:$0xff] %v13925_v16 }
 0xabc   : > { %6182 = vrot.lane.b32.xlu0 %v13770_v43, %s8452_s29  ;;  %v13931_v22 = vpop.permute.xlu1 %5544 }
 0xabe   : > { %v13933_v61 = vpop.permute.xlu0 %5546  ;;  %6294 = vrot.lane.b32.xlu1 %v13555_v20, %s8453_s15 }
 0xac0   : > { %6198 = vrot.lane.b32.xlu0 %v13803_v41, %s8452_s29  ;;  %v13939_v18 = vpop.permute.xlu1 %5560 }
 0xac2   : > { %v13941_v16 = vpop.permute.xlu0 %5562  ;;  %6274 = vrot.lane.b32.xlu1 %v13627_v4, %s8453_s15 }
 0xac4   : > { %6276 = vrot.lane.b32.xlu0 %v13635_v24, %s8453_s15  ;;  %v13947_v3 = vpop.permute.xlu1 %5646 }
 0xac6   : > { %v13949_v50 = vpop.permute.xlu0 %5648  ;;  %6282 = vrot.lane.b32.xlu1 %v13760_v51, %s8453_s15 }
 0xac8   : > { %6292 = vrot.lane.b32.xlu0 %v13649_v28, %s8453_s15  ;;  %v13955_v55 = vpop.permute.xlu1 %5662 }
 0xaca   : > { %v13957_v59 = vpop.permute.xlu0 %5664  ;;  %6290 = vrot.lane.b32.xlu1 %v13643_v27, %s8453_s15 }
 0xacc   : > { %6284 = vrot.lane.b32.xlu0 %v13770_v43, %s8453_s15  ;;  %v13963_v49 = vpop.permute.xlu1 %5748 }
 0xacd   : > { %17142 = vst [vmem:[#allocation33_spill] sm:$0xff] %v13963_v49 }
 0xace   : > { %v13965_v38 = vpop.permute.xlu0 %5750  ;;  %6298 = vrot.lane.b32.xlu1 %v13776_v36, %s8453_s15 }
 0xacf   : > { %17143 = vst [vmem:[#allocation44_spill] sm:$0xff] %v13965_v38  ;;  %v8111_v38 = vld [vmem:[%s16299_s5 + $0x70] sm:$0xff] }
 0xad0   : > { %6300 = vrot.lane.b32.xlu0 %v13803_v41, %s8453_s15  ;;  %v13974_v33 = vpop.permute.xlu1 %5764 }
 0xad1   : > { %17144 = vst [vmem:[#allocation76_spill] sm:$0xff] %v13974_v33 }
 0xad2   : > { %v13979_v44 = vpop.permute.xlu0 %5766  ;;  %6446 = vperm.xlu1 %8361, %v8109_v56  }
 0xad3   : > { %17145 = vst [vmem:[#allocation66_spill] sm:$0xff] %v13979_v44 }
 0xad4   : > { %6451 = vperm.xlu0 %8360, %v8110_v42   ;;  %v13984_v8 = vpop.permute.xlu1 %5850 }
 0xad5   : > { %17146 = vst [vmem:[#allocation48_spill] sm:$0xff] %v13984_v8  ;;  %v8113_v8 = vld [vmem:[%s16295_s1 + $0x4] sm:$0xf] }
 0xad6   : > { %v13989_v34 = vpop.permute.xlu0 %5852  ;;  %6456 = vperm.xlu1 %8361, %v8111_v38   ;;  %v14040_v4 = vrot.slane %v8113_v8, %v17125_v9  ;;  %v14043_v24 = vrot.slane %v8113_v8, %v16865_v2 }
 0xad7   : > { %17147 = vst [vmem:[#allocation80_spill] sm:$0xff] %v13989_v34 }
 0xad8   : > { %6461 = vperm.xlu0 %8360, %v8112_v39   ;;  %v13991_v33 = vpop.permute.xlu1 %5866  ;;  %v8114_v39 = vld [vmem:[%s16295_s1 + $0x8] sm:$0xf] }
 0xad9   : > { %17148 = vst [vmem:[#allocation49_spill] sm:$0xff] %v13991_v33  ;;  %v14037_v33 = vrot.slane %v8113_v8, %v16864_v45 }
 0xada   : > { %v13993_v49 = vpop.permute.xlu0 %5868 }
 0xadb   : > { %17149 = vst [vmem:[#allocation92_spill] sm:$0xff] %v13993_v49  ;;  %v14023_v49 = vrot.slane %v8113_v8, %v17122_v19  ;;  %v8117_v8 = vld [vmem:[%s16295_s1 + $0x18] sm:$0xf] }
 0xadc   : > { %v13995_v56 = vpop.permute.xlu1 %5968  ;;  %v14100_v52 = vrot.slane %v8117_v8, %v17125_v9  ;;  %v14103_v12 = vrot.slane %v8117_v8, %v17122_v19 }
 0xadd   : > { %17150 = vst [vmem:[#allocation79_spill] sm:$0xff] %v13995_v56  ;;  %v8115_v56 = vld [vmem:[%s16295_s1 + $0xc] sm:$0xf] }
 0xade   : > { %v13997_v44 = vpop.permute.xlu0 %5970  ;;  %v14058_v27 = vrot.slane %v8115_v56, %v17122_v19  ;;  %v14066_v36 = vrot.slane %v8115_v56, %v16864_v45  ;;  %v14069_v41 = vrot.slane %v8115_v56, %v17125_v9  ;;  %v14072_v15 = vrot.slane %v8115_v56, %v16865_v2  ;;  %17162 = vst [vmem:[#allocation104_spill] sm:$0xff] %v14100_v52 }
 0xadf   : > { %17151 = vst [vmem:[#allocation82_spill] sm:$0xff] %v13997_v44  ;;  %v14049_v44 = vrot.slane %v8114_v39, %v16864_v45  ;;  %17163 = vst [vmem:[#allocation105_spill] sm:$0xff] %v14103_v12  ;;  %v14121_v52 = vrot.slane %v8118_v25, %v17125_v9  ;;  %v14124_v12 = vrot.slane %v8118_v25, %v17122_v19 }
 0xae0   : > { %v13999_v47 = vpop.permute.xlu1 %5984 }
 0xae1   : > { %17152 = vst [vmem:[#allocation50_spill] sm:$0xff] %v13999_v47  ;;  %v14055_v47 = vrot.slane %v8114_v39, %v16865_v2  ;;  %17166 = vst [vmem:[#allocation108_spill] sm:$0xff] %v14121_v52 }
 0xae2   : > { %v14001_v42 = vpop.permute.xlu0 %5986  ;;  %17167 = vst [vmem:[#allocation109_spill] sm:$0xff] %v14124_v12  ;;  %v14143_v12 = vmul.f32 %v14037_v33, %v5678_v31  ;;  %v5674_v31 = vsel %vm536_vm1, %v13657_v46, %v13832_v57  ;;  %v5785_v46 = vsel %vm680_vm2, %v13667_v29, %v13842_v1 }
 0xae3   : > { %17153 = vst [vmem:[#allocation85_spill] sm:$0xff] %v14001_v42  ;;  %v14052_v42 = vrot.slane %v8114_v39, %v17125_v9 }
 0xae4   : > { %v14009_v38 = vpop.permute.xlu1 %6070 }
 0xae5   : > { %17154 = vst [vmem:[#allocation99_spill] sm:$0xff] %v14009_v38  ;;  %v8116_v38 = vld [vmem:[%s16295_s1 + $0x14] sm:$0xf] }
 0xae6   : > { %v14028_v34 = vpop.permute.xlu0 %6072  ;;  %v14085_v51 = vrot.slane %v8116_v38, %v17122_v19  ;;  %v14088_v43 = vrot.slane %v8116_v38, %v16864_v45  ;;  %v14091_v56 = vrot.slane %v8116_v38, %v16865_v2 }
 0xae7   : > { %17155 = vst [vmem:[#allocation26_spill] sm:$0xff] %v14028_v34  ;;  %v14046_v34 = vrot.slane %v8114_v39, %v17122_v19  ;;  %v14075_v39 = vrot.slane %v8116_v38, %v17125_v9  ;;  %v14111_v38 = vld [vmem:[%s16295_s1 + $0x20] sm:$0xf] }
 0xae8   : > { %v14063_v28 = vpop.permute.xlu1 %6086  ;;  %17158 = vst [vmem:[#allocation101_spill] sm:$0xff] %v14085_v51  ;;  %17159 = vst [vmem:[#allocation96_spill] sm:$0xff] %v14088_v43  ;;  %v14106_v51 = vrot.slane %v8117_v8, %v16864_v45  ;;  %v5682_v43 = vsel %vm536_vm1, %v13647_v40, %v13823_v54  ;;  %v14150_v54 = vrot.slane %v8118_v25, %v16865_v2 }
 0xae9   : > { %17156 = vst [vmem:[#allocation41_spill] sm:$0xff] %v14063_v28  ;;  %17157 = vst [vmem:[#allocation90_spill] sm:$0xff] %v14075_v39  ;;  %v5679_v28 = vsel %vm536_vm1, %v13826_v60, %v13659_v0 }
 0xaea   : > { %17160 = vst [vmem:[#allocation103_spill] sm:$0xff] %v14091_v56  ;;  %v14093_v20 = vpop.permute.xlu0 %6088  ;;  %17164 = vst [vmem:[#allocation106_spill] sm:$0xff] %v14106_v51  ;;  %v14118_v56 = vrot.slane %v8117_v8, %v16865_v2  ;;  %v14133_v39 = vmul.f32 %v14037_v33, %v5679_v28  ;;  %v14140_v8 = vrot.slane %v8118_v25, %v16864_v45 }
 0xaeb   : > { %17161 = vst [vmem:[#allocation47_spill] sm:$0xff] %v14093_v20  ;;  %v5683_v20 = vsel %vm536_vm1, %v13651_v5, %v13826_v60  ;;  %v5687_v60 = vsel %vm536_vm1, %v13834_v32, %v13651_v5  ;;  %17170 = vst [vmem:[#allocation112_spill] sm:$0xff] %v14150_v54  ;;  %v14154_v28 = vrot.slane %v14111_v38, %v17125_v9 }
 0xaec   : > { %17165 = vst [vmem:[#allocation107_spill] sm:$0xff] %v14118_v56  ;;  %v14126_v51 = vpop.permute.xlu1 %6172  ;;  %17169 = vst [vmem:[#allocation111_spill] sm:$0xff] %v14140_v8  ;;  %v14159_v5 = vmul.f32 %v14023_v49, %v5683_v20  ;;  %v5686_v25 = vsel %vm536_vm1, %v13832_v57, %v13647_v40  ;;  %v14177_v20 = vmul.f32 %v14040_v4, %v5687_v60 }
 0xaed   : > { %17168 = vst [vmem:[#allocation110_spill] sm:$0xff] %v14126_v51  ;;  %v5675_v51 = vsel %vm536_vm1, %v13659_v0, %v13834_v32  ;;  %17171 = vst [vmem:[#allocation113_spill] sm:$0xff] %v14154_v28  ;;  %v5781_v0 = vsel %vm680_vm2, %v13842_v1, %v13675_v7  ;;  %v14174_v32 = vmul.f32 %v14023_v49, %v5682_v43 }
 0xaee   : > { %v14156_v52 = vpop.permute.xlu0 %6174  ;;  %v5789_v40 = vsel %vm680_vm2, %v13850_v13, %v13667_v29  ;;  %v14192_v43 = vmul.f32 %v14043_v24, %v5675_v51  ;;  %v5780_v60 = vsel %vm680_vm2, %v13840_v48, %v13673_v11  ;;  %v5784_v1 = vsel %vm680_vm2, %v13665_v6, %v13840_v48 }
 0xaef   : > { %17172 = vst [vmem:[#allocation114_spill] sm:$0xff] %v14156_v52  ;;  %v14203_v29 = vmul.f32 %v14040_v4, %v5686_v25  ;;  %v14206_v28 = vmul.f32 %v14043_v24, %v5674_v31  ;;  %v14209_v9 = vmul.f32 %v14049_v44, %v5781_v0  ;;  %v5788_v51 = vsel %vm680_vm2, %v13848_v35, %v13665_v6 }
 0xaf0   : > { %v14187_v57 = vpop.permute.xlu1 %6188  ;;  %v5777_v48 = vsel %vm680_vm2, %v13675_v7, %v13850_v13  ;;  %v14225_v31 = vmul.f32 %v14052_v42, %v5789_v40  ;;  %v14232_v6 = vmul.f32 %v14046_v34, %v5784_v1  ;;  %v5776_v7 = vsel %vm680_vm2, %v13673_v11, %v13848_v35 }
 0xaf1   : > { %17173 = vst [vmem:[#allocation115_spill] sm:$0xff] %v14187_v57  ;;  %17174 = vst [vmem:[#allocation116_spill] sm:$0xff] %v14209_v9  ;;  %v14218_v57 = vmul.f32 %v14046_v34, %v5785_v46  ;;  %v14235_v46 = vmul.f32 %v14049_v44, %v5780_v60  ;;  %v14242_v40 = vmul.f32 %v14052_v42, %v5788_v51 }
 0xaf2   : > { %v14215_v52 = vpop.permute.xlu0 %6190  ;;  %v14251_v60 = vrot.slane %v14111_v38, %v17122_v19  ;;  %v14256_v11 = vmul.f32 %v14055_v47, %v5777_v48  ;;  %v5882_v35 = vsel %vm824_vm3, %v13856_v17, %v13689_v58  ;;  %v5886_v51 = vsel %vm824_vm3, %v13681_v63, %v13856_v17 }
 0xaf3   : > { %17175 = vst [vmem:[#allocation117_spill] sm:$0xff] %v14215_v52  ;;  %17176 = vst [vmem:[#allocation118_spill] sm:$0xff] %v14235_v46  ;;  %v14267_v19 = vmul.f32 %v14055_v47, %v5776_v7  ;;  %v5883_v52 = vsel %vm824_vm3, %v13858_v30, %v13691_v14  ;;  %v14286_v8 = vmul.f32 %v14058_v27, %v5886_v51 }
 0xaf4   : > { %v5553_v13 = vpop.permute.xlu1 %5552  ;;  %17177 = vst [vmem:[#allocation119_spill] sm:$0xff] %v14251_v60  ;;  %v14289_v56 = vmul.f32 %v14066_v36, %v5882_v35  ;;  %v14307_v46 = vmul.f32 %v14066_v36, %v5883_v52 }
 0xaf5   : > { %v5582_v25 = vsel %vm393_vm0, %v13931_v22, %v5553_v13 }
 0xaf6   : > { %v5555_v1 = vpop.permute.xlu0 %5554  ;;  %v5619_v17 = vmul.f32 %v13765_v53, %v5582_v25 }
 0xaf7   : > { %v5583_v48 = vsel %vm393_vm0, %v13933_v61, %v5555_v1  ;;  %v5579_v7 = vsel %vm393_vm0, %v5555_v1, %v13941_v16  ;;  %v5578_v1 = vsel %vm393_vm0, %v5553_v13, %v13939_v18 }
 0xaf8   : > { %v5623_v0 = vmul.f32 %v13765_v53, %v5583_v48  ;;  %v5569_v54 = vpop.permute.xlu1 %5568  ;;  %v5887_v53 = vsel %vm824_vm3, %v13683_v62, %v13858_v30  ;;  %v5833_v48 = vpack.c.bf16 %v14256_v11, %v14267_v19  ;;  %v5624_v9 = vmul.f32 %v13795_v37, %v5579_v7 }
 0xaf9   : > { %v5574_v60 = vsel %vm393_vm0, %v13939_v18, %v5569_v54  ;;  %v5586_v25 = vsel %vm393_vm0, %v5569_v54, %v13931_v22  ;;  %v14326_v7 = vrot.slane %v14111_v38, %v16864_v45 }
 0xafa   : > { %v5571_v51 = vpop.permute.xlu0 %5570  ;;  %v5631_v35 = vpack.c.bf16 %v5623_v0, %v5619_v17  ;;  %v5618_v18 = vmul.f32 %v13782_v21, %v5586_v25  ;;  %v5621_v54 = vmul.f32 %v13792_v10, %v5574_v60  ;;  %v5620_v17 = vmul.f32 %v13795_v37, %v5578_v1 }
 0xafb   : > { %v5575_v22 = vsel %vm393_vm0, %v13941_v16, %v5571_v51  ;;  %v5587_v30 = vsel %vm393_vm0, %v5571_v51, %v13933_v61  ;;  %v14330_v61 = vrot.slane %v14111_v38, %v16865_v2  ;;  %v5890_v37 = vsel %vm824_vm3, %v13864_v23, %v13681_v63 }
 0xafc   : > { %v5622_v0 = vmul.f32 %v13782_v21, %v5587_v30  ;;  %v5625_v13 = vmul.f32 %v13792_v10, %v5575_v22  ;;  %6502 = vmatprep.subr.bf16.mxu0 %v5631_v35  ;;  %v5655_v52 = vpop.permute.xlu1 %5654  ;;  %v14333_v21 = vmul.f32 %v14058_v27, %v5887_v53  ;;  %v5934_v1 = vpack.c.bf16 %v14307_v46, %v14289_v56  ;;  %v17211_v46 = vld [vmem:[#allocation43_spill] sm:$0xff] }
 0xafd   : > { %v5684_v16 = vsel %vm536_vm1, %v13947_v3, %v5655_v52  ;;  %v5878_v38 = vsel %vm824_vm3, %v13689_v58, %v13864_v23  ;;  %v5632_v51 = vpack.c.bf16 %v5624_v9, %v5620_v17  ;;  %v17178_v23 = vpack.c.bf16 %v14159_v5, %v14174_v32 }
 0xafe   : > { %v5630_v10 = vpack.c.bf16 %v5622_v0, %v5618_v18  ;;  %v5657_v60 = vpop.permute.xlu0 %5656  ;;  %v5633_v25 = vpack.c.bf16 %v5625_v13, %v5621_v54  ;;  %v5721_v35 = vmul.f32 %v14023_v49, %v5684_v16  ;;  %v14354_v18 = vmul.f32 %v14069_v41, %v5890_v37  ;;  %v17179_v54 = vld [vmem:[#allocation65_spill] sm:$0xff] }
 0xaff   : > { %v5685_v53 = vsel %vm536_vm1, %v13949_v50, %v5657_v60  ;;  %v5681_v63 = vsel %vm536_vm1, %v5657_v60, %v13957_v59  ;;  %v5891_v0 = vsel %vm824_vm3, %v17179_v54, %v13683_v62  ;;  %v5680_v13 = vsel %vm536_vm1, %v5655_v52, %v13955_v55 }
 0xb00   : > { %v5725_v22 = vmul.f32 %v14023_v49, %v5685_v53  ;;  %6503 = vmatpush1.bf16.msra.mxu0 %v5630_v10  ;;  %6608 = vmatprep.subr.bf16.mxu1 %v5633_v25  ;;  %v5671_v30 = vpop.permute.xlu1 %5670  ;;  %v14366_v49 = vmul.f32 %v14072_v15, %v5878_v38  ;;  %v5879_v32 = vsel %vm824_vm3, %v13691_v14, %v17179_v54  ;;  %v17182_v25 = vld [vmem:[#allocation33_spill] sm:$0xff]  ;;  %v17184_v53 = vld [vmem:[#allocation100_spill] sm:$0xff] }
 0xb01   : > { %v5676_v58 = vsel %vm536_vm1, %v13955_v55, %v5671_v30  ;;  %v5688_v9 = vsel %vm536_vm1, %v5671_v30, %v13947_v3  ;;  %6504 = vmatprep.subr.bf16.mxu0 %v17178_v23  ;;  %6609 = vmatpush1.bf16.msra.mxu1 %v5632_v51  ;;  %v17180_v3 = vpack.c.bf16 %v14192_v43, %v14206_v28 }
 0xb02   : > { %v5673_v17 = vpop.permute.xlu0 %5672  ;;  %v5733_v5 = vpack.c.bf16 %v5725_v22, %v5721_v35  ;;  %v5726_v16 = vmul.f32 %v14037_v33, %v5681_v63  ;;  %v5720_v52 = vmul.f32 %v14040_v4, %v5688_v9  ;;  %v5723_v28 = vmul.f32 %v14043_v24, %v5676_v58  ;;  %v17186_v63 = vld [vmem:[#allocation56_spill] sm:$0xff]  ;;  %v17188_v9 = vld [vmem:[#allocation66_spill] sm:$0xff] }
 0xb03   : > { %6610 = vmatprep.subr.bf16.mxu1 %v17180_v3  ;;  %v5677_v62 = vsel %vm536_vm1, %v13957_v59, %v5673_v17  ;;  %v5689_v55 = vsel %vm536_vm1, %v5673_v17, %v13949_v50  ;;  %v17181_v14 = vpack.c.bf16 %v14177_v20, %v14203_v29  ;;  %v14397_v60 = vmul.f32 %v14069_v41, %v5891_v0  ;;  %v17187_v22 = vld [vmem:[#allocation44_spill] sm:$0xff] }
 0xb04   : > { %v5724_v43 = vmul.f32 %v14040_v4, %v5689_v55  ;;  %v5727_v37 = vmul.f32 %v14043_v24, %v5677_v62  ;;  %v5757_v10 = vpop.permute.xlu1 %5756  ;;  %v5722_v59 = vmul.f32 %v14037_v33, %v5680_v13  ;;  %v17183_v4 = vpack.c.bf16 %v14133_v39, %v14143_v12  ;;  %v17185_v33 = vld [vmem:[#allocation24_spill] sm:$0xff] }
 0xb05   : > { %6505 = vmatpush1.bf16.msra.mxu0 %v17181_v14  ;;  %v5786_v50 = vsel %vm680_vm2, %v17182_v25, %v5757_v10  ;;  %v14407_v24 = vmul.f32 %v14072_v15, %v5879_v32  ;;  %v5933_v51 = vpack.c.bf16 %v14333_v21, %v14286_v8  ;;  %v6000_v35 = vsel %vm992_vm4, %v17185_v33, %v17184_v53  ;;  %v17189_v0 = vld [vmem:[#allocation76_spill] sm:$0xff]  ;;  %v17192_v32 = vld [vmem:[#allocation102_spill] sm:$0xff] }
 0xb06   : > { %6506 = vmatprep.subr.bf16.mxu0 %v5733_v5  ;;  %6611 = vmatpush1.bf16.msra.mxu1 %v17183_v4  ;;  %v5732_v20 = vpack.c.bf16 %v5724_v43, %v5720_v52  ;;  %v5759_v29 = vpop.permute.xlu0 %5758  ;;  %v5735_v38 = vpack.c.bf16 %v5727_v37, %v5723_v28  ;;  %v6004_v12 = vsel %vm992_vm4, %v17186_v63, %v17185_v33  ;;  %v17197_v4 = vld [vmem:[#allocation48_spill] sm:$0xff] }
 0xb07   : > { %v5734_v39 = vpack.c.bf16 %v5726_v16, %v5722_v59  ;;  %v5787_v30 = vsel %vm680_vm2, %v17187_v22, %v5759_v29  ;;  %v5823_v58 = vmul.f32 %v14046_v34, %v5786_v50  ;;  %v5783_v8 = vsel %vm680_vm2, %v5759_v29, %v17188_v9  ;;  %v17193_v16 = vld [vmem:[#allocation94_spill] sm:$0xff]  ;;  %v17196_v59 = vld [vmem:[#allocation101_spill] sm:$0xff]  ;;  %v17198_v29 = vld [vmem:[#allocation116_spill] sm:$0xff] }
 0xb08   : > { %v5827_v21 = vmul.f32 %v14046_v34, %v5787_v30  ;;  %6612 = vmatprep.subr.bf16.mxu1 %v5735_v38  ;;  %v5773_v23 = vpop.permute.xlu1 %5772  ;;  %v5932_v54 = vpack.c.bf16 %v14397_v60, %v14354_v18  ;;  %v17190_v3 = vpack.c.bf16 %v14218_v57, %v14232_v6  ;;  %v17191_v34 = vld [vmem:[#allocation90_spill] sm:$0xff]  ;;  %v6001_v18 = vsel %vm992_vm4, %v17193_v16, %v17192_v32  ;;  %v17194_v6 = vld [vmem:[#allocation91_spill] sm:$0xff]  ;;  %v17202_v30 = vld [vmem:[#allocation80_spill] sm:$0xff] }
 0xb09   : > { %6507 = vmatpush1.bf16.msra.mxu0 %v5732_v20  ;;  %v5778_v13 = vsel %vm680_vm2, %v17189_v0, %v5773_v23  ;;  %v5790_v17 = vsel %vm680_vm2, %v5773_v23, %v17182_v25  ;;  %v14439_v5 = vmul.f32 %v17191_v34, %v6004_v12  ;;  %v5782_v62 = vsel %vm680_vm2, %v5757_v10, %v17189_v0  ;;  %v17199_v38 = vld [vmem:[#allocation118_spill] sm:$0xff]  ;;  %v17204_v23 = vld [vmem:[#allocation49_spill] sm:$0xff] }
 0xb0a   : > { %6508 = vmatprep.subr.bf16.mxu0 %v17190_v3  ;;  %6613 = vmatpush1.bf16.msra.mxu1 %v5734_v39  ;;  %v5775_v55 = vpop.permute.xlu0 %5774  ;;  %v5835_v57 = vpack.c.bf16 %v5827_v21, %v5823_v58  ;;  %v6005_v52 = vsel %vm992_vm4, %v17194_v6, %v17193_v16  ;;  %v5828_v28 = vmul.f32 %v14049_v44, %v5783_v8  ;;  %v17201_v12 = vld [vmem:[#allocation98_spill] sm:$0xff]  ;;  %v17203_v8 = vld [vmem:[#allocation92_spill] sm:$0xff] }
 0xb0b   : > { %6614 = vmatprep.subr.bf16.mxu1 %v5833_v48  ;;  %v5779_v43 = vsel %vm680_vm2, %v17188_v9, %v5775_v55  ;;  %v5791_v37 = vsel %vm680_vm2, %v5775_v55, %v17187_v22  ;;  %v5822_v14 = vmul.f32 %v14052_v42, %v5790_v17  ;;  %v5825_v19 = vmul.f32 %v14055_v47, %v5778_v13  ;;  %v17205_v17 = vld [vmem:[#allocation62_spill] sm:$0xff] }
 0xb0c   : > { %v5826_v11 = vmul.f32 %v14052_v42, %v5791_v37  ;;  %v5829_v48 = vmul.f32 %v14055_v47, %v5779_v43  ;;  %v17195_v10 = vpack.c.bf16 %v14225_v31, %v14242_v40  ;;  %v5859_v60 = vpop.permute.xlu1 %5858  ;;  %v14470_v25 = vmul.f32 %v17196_v59, %v6000_v35  ;;  %v17206_v37 = vld [vmem:[#allocation96_spill] sm:$0xff] }
 0xb0d   : > { %v5824_v50 = vmul.f32 %v14049_v44, %v5782_v62  ;;  %v5888_v20 = vsel %vm824_vm3, %v17197_v4, %v5859_v60  ;;  %v17200_v42 = vpack.c.bf16 %v17198_v29, %v17199_v38  ;;  %v14480_v47 = vmul.f32 %v17191_v34, %v6005_v52  ;;  %v17212_v38 = vld [vmem:[#allocation63_spill] sm:$0xff] }
 0xb0e   : > { %6509 = vmatpush1.bf16.msra.mxu0 %v17195_v10  ;;  %v5834_v31 = vpack.c.bf16 %v5826_v11, %v5822_v14  ;;  %v5861_v40 = vpop.permute.xlu0 %5860  ;;  %v5837_v33 = vpack.c.bf16 %v5829_v48, %v5825_v19  ;;  %v5935_v35 = vpack.c.bf16 %v14407_v24, %v14366_v49  ;;  %v14485_v44 = vmul.f32 %v17196_v59, %v6001_v18  ;;  %v17207_v19 = vld [vmem:[#allocation103_spill] sm:$0xff] }
 0xb0f   : > { %6510 = vmatprep.subr.bf16.mxu0 %v5835_v57  ;;  %6615 = vmatpush1.bf16.msra.mxu1 %v17200_v42  ;;  %v5996_v39 = vsel %vm992_vm4, %v17184_v53, %v17201_v12  ;;  %v5836_v22 = vpack.c.bf16 %v5828_v28, %v5824_v50  ;;  %v5889_v58 = vsel %vm824_vm3, %v17202_v30, %v5861_v40  ;;  %v17213_v42 = vld [vmem:[#allocation58_spill] sm:$0xff] }
 0xb10   : > { %v5925_v9 = vmul.f32 %v14058_v27, %v5888_v20  ;;  %v5885_v21 = vsel %vm824_vm3, %v5861_v40, %v17203_v8  ;;  %v5929_v49 = vmul.f32 %v14058_v27, %v5889_v58  ;;  %6616 = vmatprep.subr.bf16.mxu1 %v5837_v33  ;;  %v5875_v24 = vpop.permute.xlu1 %5874  ;;  %v6008_v53 = vsel %vm992_vm4, %v17201_v12, %v17186_v63  ;;  %v17214_v40 = vld [vmem:[#allocation29_spill] sm:$0xff] }
 0xb11   : > { %v5880_v0 = vsel %vm824_vm3, %v17204_v23, %v5875_v24  ;;  %v5892_v13 = vsel %vm824_vm3, %v5875_v24, %v17197_v4  ;;  %v6050_v27 = vpack.c.bf16 %v14480_v47, %v14439_v5  ;;  %v5997_v3 = vsel %vm992_vm4, %v17192_v32, %v17205_v17 }
 0xb12   : > { %6511 = vmatpush1.bf16.msra.mxu0 %v5834_v31  ;;  %v5884_v63 = vsel %vm824_vm3, %v5859_v60, %v17204_v23  ;;  %v5877_v16 = vpop.permute.xlu0 %5876  ;;  %v5937_v18 = vpack.c.bf16 %v5929_v49, %v5925_v9  ;;  %v5930_v62 = vmul.f32 %v14066_v36, %v5885_v21  ;;  %v5924_v57 = vmul.f32 %v14069_v41, %v5892_v13  ;;  %v17218_v21 = vld [vmem:[#allocation72_spill] sm:$0xff]  ;;  %v17221_v23 = vld [vmem:[#allocation106_spill] sm:$0xff] }
 0xb13   : > { %6512 = vmatprep.subr.bf16.mxu0 %v5933_v51  ;;  %6617 = vmatpush1.bf16.msra.mxu1 %v5836_v22  ;;  %v6009_v51 = vsel %vm992_vm4, %v17205_v17, %v17194_v6  ;;  %v5881_v55 = vsel %vm824_vm3, %v17203_v8, %v5877_v16  ;;  %v5893_v32 = vsel %vm824_vm3, %v5877_v16, %v17202_v30  ;;  %v17216_v30 = vld [vmem:[#allocation42_spill] sm:$0xff]  ;;  %v17217_v8 = vld [vmem:[#allocation27_spill] sm:$0xff]  ;;  %v17222_v17 = vld [vmem:[#allocation52_spill] sm:$0xff] }
 0xb14   : > { %6618 = vmatprep.subr.bf16.mxu1 %v5935_v35  ;;  %v5927_v52 = vmul.f32 %v14072_v15, %v5880_v0  ;;  %v5928_v28 = vmul.f32 %v14069_v41, %v5893_v32  ;;  %v5931_v43 = vmul.f32 %v14072_v15, %v5881_v55  ;;  %v14533_v6 = vpop.permute.xlu1 %6286  ;;  %v14536_v14 = vmul.f32 %v17206_v37, %v5996_v39  ;;  %v17208_v15 = vld [vmem:[#allocation93_spill] sm:$0xff]  ;;  %v17215_v39 = vld [vmem:[#allocation104_spill] sm:$0xff] }
 0xb15   : > { %v14539_v11 = vmul.f32 %v17207_v19, %v6008_v53  ;;  %v5926_v48 = vmul.f32 %v14066_v36, %v5884_v63  ;;  %v14546_v41 = vmul.f32 %v17206_v37, %v5997_v3  ;;  %v6041_v20 = vmul.f32 %v17207_v19, %v6009_v51  ;;  %v17210_v36 = vld [vmem:[#allocation32_spill] sm:$0xff]  ;;  %v17223_v3 = vld [vmem:[#allocation71_spill] sm:$0xff] }
 0xb16   : > { %6513 = vmatpush1.bf16.msra.mxu0 %v5932_v54  ;;  %v17209_v54 = vld [vmem:[#allocation31_spill] sm:$0xff]  ;;  %v5936_v60 = vpack.c.bf16 %v5928_v28, %v5924_v57  ;;  %v14552_v50 = vpop.permute.xlu0 %6288  ;;  %v5939_v4 = vpack.c.bf16 %v5931_v43, %v5927_v52  ;;  %v6103_v56 = vsel %vm1136_vm5, %v17208_v15, %v17210_v36  ;;  %v6102_v31 = vsel %vm1136_vm5, %v17213_v42, %v17212_v38  ;;  %v17228_v43 = vld [vmem:[#allocation81_spill] sm:$0xff] }
 0xb17   : > { %6514 = vmatprep.subr.bf16.mxu0 %v5937_v18  ;;  %6619 = vmatpush1.bf16.msra.mxu1 %v5934_v1  ;;  %v6107_v10 = vsel %vm1136_vm5, %v17209_v54, %v17208_v15  ;;  %v6099_v1 = vsel %vm1136_vm5, %v17210_v36, %v17211_v46  ;;  %v5938_v29 = vpack.c.bf16 %v5930_v62, %v5926_v48  ;;  %v17225_v51 = vld [vmem:[#allocation39_spill] sm:$0xff]  ;;  %v17226_v62 = vld [vmem:[#allocation88_spill] sm:$0xff]  ;;  %v17229_v48 = vld [vmem:[#allocation34_spill] sm:$0xff] }
 0xb18   : > { %v6106_v33 = vsel %vm1136_vm5, %v17214_v40, %v17213_v42  ;;  %6620 = vmatprep.subr.bf16.mxu1 %v5939_v4  ;;  %v5977_v35 = vpop.permute.xlu1 %5976  ;;  %v6051_v12 = vpack.c.bf16 %v14485_v44, %v14470_v25  ;;  %v14574_v22 = vmul.f32 %v17215_v39, %v6107_v10  ;;  %v6098_v58 = vsel %vm1136_vm5, %v17212_v38, %v17216_v30  ;;  %v17220_v44 = vld [vmem:[#allocation105_spill] sm:$0xff]  ;;  %v17227_v52 = vld [vmem:[#allocation107_spill] sm:$0xff]  ;;  %v17234_v36 = vld [vmem:[#allocation50_spill] sm:$0xff] }
 0xb19   : > { %v6111_v9 = vsel %vm1136_vm5, %v17211_v46, %v17209_v54  ;;  %v17219_v49 = vpack.c.bf16 %v17217_v8, %v17218_v21  ;;  %v6052_v25 = vpack.c.bf16 %v14546_v41, %v14536_v14  ;;  %v14590_v24 = vmul.f32 %v17220_v44, %v6103_v56  ;;  %v17230_v41 = vld [vmem:[#allocation64_spill] sm:$0xff]  ;;  %v17231_v10 = vld [vmem:[#allocation25_spill] sm:$0xff]  ;;  %v17235_v46 = vld [vmem:[#allocation59_spill] sm:$0xff] }
 0xb1a   : > { %6515 = vmatpush1.bf16.msra.mxu0 %v5936_v60  ;;  %v6110_v53 = vsel %vm1136_vm5, %v17216_v30, %v17214_v40  ;;  %v14597_v0 = vmul.f32 %v17221_v23, %v6099_v1  ;;  %v14599_v13 = vpop.permute.xlu0 %6296  ;;  %v17224_v63 = vpack.c.bf16 %v17222_v17, %v17223_v3  ;;  %v14605_v16 = vmul.f32 %v17215_v39, %v6106_v33  ;;  %v17232_v60 = vld [vmem:[#allocation77_spill] sm:$0xff]  ;;  %v17236_v1 = vld [vmem:[#allocation23_spill] sm:$0xff]  ;;  %v17239_v42 = vld [vmem:[#allocation28_spill] sm:$0xff] }
 0xb1b   : > { %6516 = vmatprep.subr.bf16.mxu0 %v17219_v49  ;;  %6621 = vmatpush1.bf16.msra.mxu1 %v5938_v29  ;;  %v14608_v18 = vmul.f32 %v17220_v44, %v6102_v31  ;;  %v6208_v55 = vsel %vm1280_vm7, %v17226_v62, %v17225_v51  ;;  %v6053_v32 = vpack.c.bf16 %v6041_v20, %v14539_v11  ;;  %v17238_v38 = vld [vmem:[#allocation51_spill] sm:$0xff]  ;;  %v17241_v33 = vld [vmem:[#allocation108_spill] sm:$0xff]  ;;  %v17243_v21 = vld [vmem:[#allocation73_spill] sm:$0xff] }
 0xb1c   : > { %6622 = vmatprep.subr.bf16.mxu1 %v17224_v63  ;;  %v14616_v57 = vmul.f32 %v17221_v23, %v6098_v58  ;;  %v14619_v28 = vmul.f32 %v17227_v52, %v6111_v9  ;;  %v6204_v14 = vsel %vm1280_vm7, %v17225_v51, %v17228_v43  ;;  %v6209_v15 = vsel %vm1280_vm7, %v17230_v41, %v17229_v48  ;;  %v5993_v54 = vpop.permute.xlu1 %5992  ;;  %v17242_v58 = vld [vmem:[#allocation78_spill] sm:$0xff]  ;;  %v17244_v49 = vld [vmem:[#allocation89_spill] sm:$0xff] }
 0xb1d   : > { %v17233_v11 = vpack.c.bf16 %v17231_v10, %v17232_v60  ;;  %v6152_v4 = vpack.c.bf16 %v14574_v22, %v14605_v16  ;;  %v14635_v20 = vmul.f32 %v17227_v52, %v6110_v53  ;;  %v6002_v56 = vsel %vm992_vm4, %v5977_v35, %v17234_v36  ;;  %v17246_v3 = vld [vmem:[#allocation109_spill] sm:$0xff]  ;;  %v17248_v60 = vld [vmem:[#allocation82_spill] sm:$0xff] }
 0xb1e   : > { %v17237_v29 = vpack.c.bf16 %v17235_v46, %v17236_v1  ;;  %v17240_v31 = vpack.c.bf16 %v17238_v38, %v17239_v42  ;;  %v6154_v40 = vpack.c.bf16 %v14597_v0, %v14616_v57  ;;  %v14649_v30 = vmul.f32 %v17241_v33, %v6208_v55  ;;  %v5979_v8 = vpop.permute.xlu0 %5978  ;;  %v17247_v55 = vld [vmem:[#allocation85_spill] sm:$0xff]  ;;  %v17271_v57 = vld [vmem:[#allocation114_spill] sm:$0xff] }
 0xb1f   : > { %6517 = vmatpush1.bf16.msra.mxu0 %v17233_v11  ;;  %v6205_v9 = vsel %vm1280_vm7, %v17229_v48, %v17242_v58  ;;  %v17245_v53 = vpack.c.bf16 %v17243_v21, %v17244_v49  ;;  %v6153_v17 = vpack.c.bf16 %v14590_v24, %v14608_v18  ;;  %v14661_v63 = vmul.f32 %v17246_v3, %v6204_v14  ;;  %v17249_v11 = vld [vmem:[#allocation79_spill] sm:$0xff]  ;;  %v17250_v1 = vld [vmem:[#allocation45_spill] sm:$0xff] }
 0xb20   : > { %6518 = vmatprep.subr.bf16.mxu0 %v17237_v29  ;;  %6623 = vmatpush1.bf16.msra.mxu1 %v17240_v31  ;;  %v14664_v51 = vmul.f32 %v17241_v33, %v6209_v15  ;;  %v6003_v10 = vsel %vm992_vm4, %v5979_v8, %v17247_v55  ;;  %v6007_v48 = vsel %vm992_vm4, %v17248_v60, %v5979_v8  ;;  %v6079_v14 = vpop.permute.xlu1 %6078  ;;  %v17251_v15 = vld [vmem:[#allocation75_spill] sm:$0xff]  ;;  %v17256_v21 = vld [vmem:[#allocation97_spill] sm:$0xff] }
 0xb21   : > { %6624 = vmatprep.subr.bf16.mxu1 %v17245_v53  ;;  %v6006_v46 = vsel %vm992_vm4, %v17249_v11, %v5977_v35  ;;  %v6043_v24 = vmul.f32 %v17196_v59, %v6002_v56  ;;  %v6047_v18 = vmul.f32 %v17196_v59, %v6003_v10  ;;  %v17252_v29 = vpack.c.bf16 %v17250_v1, %v17251_v15  ;;  %v17253_v59 = vld [vmem:[#allocation30_spill] sm:$0xff]  ;;  %v17260_v1 = vld [vmem:[#allocation112_spill] sm:$0xff] }
 0xb22   : > { %v6155_v38 = vpack.c.bf16 %v14619_v28, %v14635_v20  ;;  %v14683_v42 = vmul.f32 %v17246_v3, %v6205_v9  ;;  %v5998_v31 = vsel %vm992_vm4, %v17234_v36, %v5993_v54  ;;  %v6010_v35 = vsel %vm992_vm4, %v5993_v54, %v17249_v11  ;;  %v17254_v56 = vld [vmem:[#allocation74_spill] sm:$0xff]  ;;  %v5995_v9 = vpop.permute.xlu0 %5994 }
 0xb23   : > { %6519 = vmatpush1.bf16.msra.mxu0 %v17252_v29  ;;  %v17255_v8 = vpack.c.bf16 %v17253_v59, %v17254_v56  ;;  %v6200_v28 = vsel %vm1280_vm7, %v17228_v43, %v17256_v21  ;;  %v6212_v20 = vsel %vm1280_vm7, %v17256_v21, %v17226_v62  ;;  %v6046_v36 = vmul.f32 %v17191_v34, %v6007_v48  ;;  %v17261_v29 = vld [vmem:[#allocation99_spill] sm:$0xff] }
 0xb24   : > { %6520 = vmatprep.subr.bf16.mxu0 %v6051_v12  ;;  %v6055_v54 = vpack.c.bf16 %v6047_v18, %v6043_v24  ;;  %v6254_v12 = vpack.c.bf16 %v14664_v51, %v14649_v30  ;;  %v6042_v49 = vmul.f32 %v17191_v34, %v6006_v46  ;;  %v5999_v53 = vsel %vm992_vm4, %v17247_v55, %v5995_v9  ;;  %v6095_v11 = vpop.permute.xlu1 %6094  ;;  %v17257_v34 = vld [vmem:[#allocation111_spill] sm:$0xff]  ;;  %v17258_v55 = vld [vmem:[#allocation84_spill] sm:$0xff]  ;;  %v17259_v24 = vld [vmem:[#allocation41_spill] sm:$0xff] }
 0xb25   : > { %6625 = vmatpush1.bf16.msra.mxu1 %v17255_v8  ;;  %v6011_v43 = vsel %vm992_vm4, %v5995_v9, %v17248_v60  ;;  %v6044_v62 = vmul.f32 %v17206_v37, %v5998_v31  ;;  %v6045_v10 = vmul.f32 %v17207_v19, %v6010_v35  ;;  %v14720_v46 = vmul.f32 %v17257_v34, %v6200_v28  ;;  %v17262_v31 = vld [vmem:[#allocation47_spill] sm:$0xff]  ;;  %v17265_v9 = vld [vmem:[#allocation57_spill] sm:$0xff] }
 0xb26   : > { %6626 = vmatprep.subr.bf16.mxu1 %v6053_v32  ;;  %v6048_v32 = vmul.f32 %v17206_v37, %v5999_v53  ;;  %v6049_v48 = vmul.f32 %v17207_v19, %v6011_v43  ;;  %v6201_v60 = vsel %vm1280_vm7, %v17242_v58, %v17258_v55  ;;  %v6104_v18 = vsel %vm1136_vm5, %v6079_v14, %v17259_v24  ;;  %v6081_v37 = vpop.permute.xlu0 %6080 }
 0xb27   : > { %6521 = vmatpush1.bf16.msra.mxu0 %v6050_v27  ;;  %v6213_v5 = vsel %vm1280_vm7, %v17258_v55, %v17230_v41  ;;  %v6054_v47 = vpack.c.bf16 %v6046_v36, %v6042_v49  ;;  %v6241_v15 = vmul.f32 %v17260_v1, %v6212_v20  ;;  %v6108_v58 = vsel %vm1136_vm5, %v17261_v29, %v6079_v14  ;;  %v17264_v36 = vld [vmem:[#allocation95_spill] sm:$0xff] }
 0xb28   : > { %6522 = vmatprep.subr.bf16.mxu0 %v6055_v54  ;;  %v6056_v27 = vpack.c.bf16 %v6048_v32, %v6044_v62  ;;  %v6057_v19 = vpack.c.bf16 %v6049_v48, %v6045_v10  ;;  %v6105_v35 = vsel %vm1136_vm5, %v6081_v37, %v17262_v31  ;;  %v6145_v41 = vmul.f32 %v17220_v44, %v6104_v18  ;;  %v6181_v21 = vpop.permute.xlu1 %6180 }
 0xb29   : > { %6627 = vmatpush1.bf16.msra.mxu1 %v6052_v25  ;;  %v17263_v25 = vld [vmem:[#allocation26_spill] sm:$0xff]  ;;  %v6100_v56 = vsel %vm1136_vm5, %v17259_v24, %v6095_v11  ;;  %v6149_v8 = vmul.f32 %v17220_v44, %v6105_v35  ;;  %v14749_v14 = vmul.f32 %v17257_v34, %v6201_v60  ;;  %v6245_v28 = vmul.f32 %v17260_v1, %v6213_v5  ;;  %v17268_v24 = vld [vmem:[#allocation40_spill] sm:$0xff]  ;;  %v17272_v35 = vld [vmem:[#allocation119_spill] sm:$0xff] }
 0xb2a   : > { %v6109_v59 = vsel %vm1136_vm5, %v17263_v25, %v6081_v37  ;;  %6628 = vmatprep.subr.bf16.mxu1 %v6057_v19  ;;  %v6112_v20 = vsel %vm1136_vm5, %v6095_v11, %v17261_v29  ;;  %v14759_v54 = vsel %vm1424_vm8, %v17265_v9, %v17264_v36  ;;  %v6097_v49 = vpop.permute.xlu0 %6096  ;;  %v6255_v43 = vpack.c.bf16 %v14683_v42, %v14661_v63  ;;  %v17266_v11 = vld [vmem:[#allocation115_spill] sm:$0xff]  ;;  %v17267_v60 = vld [vmem:[#allocation46_spill] sm:$0xff]  ;;  %v17270_v37 = vld [vmem:[#allocation117_spill] sm:$0xff] }
 0xb2b   : > { %6523 = vmatpush1.bf16.msra.mxu0 %v6054_v47  ;;  %v6148_v44 = vmul.f32 %v17215_v39, %v6109_v59  ;;  %v6157_v53 = vpack.c.bf16 %v6149_v8, %v6145_v41  ;;  %v6144_v62 = vmul.f32 %v17215_v39, %v6108_v58  ;;  %v6146_v10 = vmul.f32 %v17221_v23, %v6100_v56  ;;  %v17269_v5 = vld [vmem:[#allocation110_spill] sm:$0xff] }
 0xb2c   : > { %6524 = vmatprep.subr.bf16.mxu0 %v6153_v17  ;;  %v6101_v17 = vsel %vm1136_vm5, %v17262_v31, %v6097_v49  ;;  %v6113_v32 = vsel %vm1136_vm5, %v6097_v49, %v17263_v25  ;;  %v6147_v48 = vmul.f32 %v17227_v52, %v6112_v20  ;;  %v6197_v42 = vpop.permute.xlu1 %6196  ;;  %v6256_v55 = vpack.c.bf16 %v14749_v14, %v14720_v46 }
 0xb2d   : > { %6629 = vmatpush1.bf16.msra.mxu1 %v6056_v27  ;;  %v6150_v63 = vmul.f32 %v17221_v23, %v6101_v17  ;;  %v6151_v39 = vmul.f32 %v17227_v52, %v6113_v32  ;;  %v6311_v18 = vsel %vm1424_vm8, %v17268_v24, %v17267_v60  ;;  %v6257_v23 = vpack.c.bf16 %v6245_v28, %v6241_v15 }
 0xb2e   : > { %6630 = vmatprep.subr.bf16.mxu1 %v6155_v38  ;;  %v6206_v38 = vsel %vm1280_vm7, %v6181_v21, %v17266_v11  ;;  %v6307_v22 = vsel %vm1424_vm8, %v17267_v60, %v14552_v50  ;;  %v6156_v16 = vpack.c.bf16 %v6148_v44, %v6144_v62  ;;  %v6210_v47 = vsel %vm1280_vm7, %v17269_v5, %v6181_v21 }
 0xb2f   : > { %6525 = vmatpush1.bf16.msra.mxu0 %v6152_v4  ;;  %v6158_v52 = vpack.c.bf16 %v6150_v63, %v6146_v10  ;;  %v6183_v4 = vpop.permute.xlu0 %6182  ;;  %v6159_v46 = vpack.c.bf16 %v6151_v39, %v6147_v48  ;;  %v6247_v27 = vmul.f32 %v17246_v3, %v6206_v38  ;;  %v6202_v19 = vsel %vm1280_vm7, %v17266_v11, %v6197_v42  ;;  %v8401_v63 = vld [vmem:[%s16298_s4 + $0xac] ss:$12 sps:$4 sm:$0xff]  }
 0xb30   : > { %6526 = vmatprep.subr.bf16.mxu0 %v6157_v53  ;;  %v6207_v0 = vsel %vm1280_vm7, %v6183_v4, %v17270_v37  ;;  %v6214_v15 = vsel %vm1280_vm7, %v6197_v42, %v17269_v5  ;;  %v6295_v58 = vpop.permute.xlu1 %6294  ;;  %v6306_v31 = vsel %vm1424_vm8, %v17264_v36, %v14533_v6  ;;  %v6345_v25 = vmul.f32 %v17272_v35, %v6307_v22 }
 0xb31   : > { %6631 = vmatpush1.bf16.msra.mxu1 %v6154_v40  ;;  %v6211_v40 = vsel %vm1280_vm7, %v17271_v57, %v6183_v4  ;;  %v6251_v29 = vmul.f32 %v17246_v3, %v6207_v0  ;;  %v6314_v59 = vsel %vm1424_vm8, %v6295_v58, %v17265_v9  ;;  %v6315_v3 = vsel %vm1424_vm8, %v14599_v13, %v17268_v24 }
 0xb32   : > { %6632 = vmatprep.subr.bf16.mxu1 %v6159_v46  ;;  %v6246_v41 = vmul.f32 %v17241_v33, %v6210_v47  ;;  %v6250_v56 = vmul.f32 %v17241_v33, %v6211_v40  ;;  %v6248_v14 = vmul.f32 %v17257_v34, %v6202_v19  ;;  %v6249_v28 = vmul.f32 %v17260_v1, %v6214_v15 }
 0xb33   : > { %6527 = vmatpush1.bf16.msra.mxu0 %v6156_v16  ;;  %v6199_v8 = vpop.permute.xlu0 %6198  ;;  %v6259_v21 = vpack.c.bf16 %v6251_v29, %v6247_v27  ;;  %v6302_v9 = vsel %vm1424_vm8, %v14533_v6, %v6295_v58  ;;  %v6343_v33 = vmul.f32 %v14330_v61, %v6314_v59  ;;  %v6341_v10 = vmul.f32 %v17272_v35, %v6306_v31  ;;  %v8403_v16 = vld [vmem:[%s16298_s4 + $0xa8] ss:$12 sps:$4 sm:$0xff]  }
 0xb34   : > { %6528 = vmatprep.subr.bf16.mxu0 %v6255_v43  ;;  %v6203_v20 = vsel %vm1280_vm7, %v17270_v37, %v6199_v8  ;;  %v6215_v36 = vsel %vm1280_vm7, %v6199_v8, %v17271_v57  ;;  %v6275_v53 = vpop.permute.xlu1 %6274  ;;  %v17273_v43 = vld [vmem:[#allocation113_spill] sm:$0xff]  ;;  %v6303_v6 = vsel %vm1424_vm8, %v14552_v50, %v14599_v13  ;;  %v6258_v17 = vpack.c.bf16 %v6250_v56, %v6246_v41  ;;  %v8404_v41 = vld [vmem:[%s16298_s4 + $0x98] ss:$12 sps:$4 sm:$0xff]  }
 0xb35   : > { %6633 = vmatpush1.bf16.msra.mxu1 %v6158_v52  ;;  %v6252_v44 = vmul.f32 %v17257_v34, %v6203_v20  ;;  %v6253_v49 = vmul.f32 %v17260_v1, %v6215_v36  ;;  %v6344_v62 = vmul.f32 %v17273_v43, %v6311_v18  ;;  %v6347_v34 = vmul.f32 %v14330_v61, %v6315_v3 }
 0xb36   : > { %6634 = vmatprep.subr.bf16.mxu1 %v6257_v23  ;;  %v6342_v30 = vmul.f32 %v14326_v7, %v6302_v9  ;;  %v6357_v51 = vpack.c.bf16 %v6345_v25, %v6341_v10  ;;  %v6340_v11 = vmul.f32 %v17273_v43, %v14759_v54  ;;  %v6346_v38 = vmul.f32 %v14326_v7, %v6303_v6  ;;  %v17275_v9 = vld [vmem:[#allocation53_spill] sm:$0xff]  ;;  %v17277_v10 = vld [vmem:[#allocation67_spill] sm:$0xff] }
 0xb37   : > { %6529 = vmatpush1.bf16.msra.mxu0 %v6254_v12  ;;  %v6260_v1 = vpack.c.bf16 %v6252_v44, %v6248_v14  ;;  %v6277_v32 = vpop.permute.xlu0 %6276  ;;  %v6261_v48 = vpack.c.bf16 %v6253_v49, %v6249_v28  ;;  %v8398_v12 = vld [vmem:[%s16298_s4 + $0x90] ss:$12 sps:$4 sm:$0xff]   ;;  %v6359_v13 = vpack.c.bf16 %v6347_v34, %v6343_v33  ;;  %v17274_v25 = vmov 0  }
 0xb38   : > { %6530 = vmatprep.subr.bf16.mxu0 %v6259_v21  ;;  %v6283_v50 = vpop.permute.xlu1 %6282  ;;  %v6356_v39 = vpack.c.bf16 %v6344_v62, %v6340_v11 }
 0xb39   : > { %6635 = vmatpush1.bf16.msra.mxu1 %v6256_v55  ;;  %v6358_v55 = vpack.c.bf16 %v6346_v38, %v6342_v30  ;;  %v6312_v54 = vsel %vm1424_vm8, %v6275_v53, %v6283_v50  ;;  %v17281_v30 = vld [vmem:[#allocation54_spill] sm:$0xff] }
 0xb3a   : > { %6636 = vmatprep.subr.bf16.mxu1 %v6261_v48  ;;  %v6348_v52 = vmul.f32 %v17273_v43, %v6312_v54 }
 0xb3b   : > { %6531 = vmatpush1.bf16.msra.mxu0 %v6258_v17  ;;  %v6293_v42 = vpop.permute.xlu0 %6292  ;;  %v17279_v17 = vld [vmem:[#allocation37_spill] sm:$0xff] }
 0xb3c   : > { %6553 = vmatprep.subr.bf16.mxu0 %v6357_v51  ;;  %v6291_v60 = vpop.permute.xlu1 %6290 }
 0xb3d   : > { %6637 = vmatpush1.bf16.msra.mxu1 %v6260_v1  ;;  %v6308_v24 = vsel %vm1424_vm8, %v6283_v50, %v6291_v60 }
 0xb3e   : > { %6659 = vmatprep.subr.bf16.mxu1 %v6359_v13  ;;  %6533 = vmatmul.mubr.bf16.vlgmr.msra.gmra.mrb[32].mxu0 %v8398_v12  ;;  %v6349_v4 = vmul.f32 %v17272_v35, %v6308_v24 }
 0xb3f   : > { %6554 = vmatpush1.bf16.msra.mxu0 %v6356_v39  ;;  %6542 = vmatprep.mubr.bf16.mxu0 %v8401_v63  ;;  %v6285_v18 = vpop.permute.xlu0 %6284 }
 0xb40   : > { %6639 = vmatmul.mubr.bf16.vlgmr.msra.gmra.mrb[32].mxu1 %v8398_v12  ;;  %v6309_v23 = vsel %vm1424_vm8, %v6285_v18, %v6293_v42  ;;  %v6313_v22 = vsel %vm1424_vm8, %v6277_v32, %v6285_v18  ;;  %v6299_v47 = vpop.permute.xlu1 %6298  ;;  %v17284_v18 = vld [vmem:[#allocation68_spill] sm:$0xff] }
 0xb41   : > { %6660 = vmatpush1.bf16.msra.mxu1 %v6358_v55  ;;  %6648 = vmatprep.mubr.bf16.mxu1 %v8401_v63  ;;  %v6352_v46 = vmul.f32 %v17273_v43, %v6313_v22  ;;  %v6353_v5 = vmul.f32 %v17272_v35, %v6309_v23  ;;  %v6304_v27 = vsel %vm1424_vm8, %v6291_v60, %v6299_v47  ;;  %v17282_v60 = vld [vmem:[#allocation35_spill] sm:$0xff] }
 0xb42   : > { %v6316_v37 = vsel %vm1424_vm8, %v6299_v47, %v6275_v53  ;;  %v6350_v19 = vmul.f32 %v14326_v7, %v6304_v27 }
 0xb43   : > { %v6360_v0 = vpack.c.bf16 %v6352_v46, %v6348_v52  ;;  %v6301_v57 = vpop.permute.xlu0 %6300  ;;  %v6361_v40 = vpack.c.bf16 %v6353_v5, %v6349_v4  ;;  %v6351_v58 = vmul.f32 %v14330_v61, %v6316_v37  ;;  %v17287_v4 = vld [vmem:[#allocation69_spill] sm:$0xff] }
 0xb44   : > { %v6305_v15 = vsel %vm1424_vm8, %v6293_v42, %v6301_v57  ;;  %v6317_v29 = vsel %vm1424_vm8, %v6301_v57, %v6277_v32  ;;  %v17302_v32 = vld [vmem:[#allocation5_spill] sm:$0xff] }
 0xb45   : > { %v6354_v31 = vmul.f32 %v14326_v7, %v6305_v15  ;;  %v6355_v35 = vmul.f32 %v14330_v61, %v6317_v29  ;;  %6555 = vmatprep.subr.bf16.mxu0 %v6361_v40  ;;  %v8405_v7 = vld [vmem:[%s16298_s4 + $0xb0] ss:$12 sps:$4 sm:$0xff]  }
 0xb46   : > { %6543 = vmatmul.mubr.bf16.gmra.mrb[36].mxu0 %v8403_v16  ;;  %v17288_v40 = vld [vmem:[#allocation38_spill] sm:$0xff] }
 0xb47   : > { %6556 = vmatpush1.bf16.msra.mxu0 %v6360_v0  ;;  %6585 = vmatprep.mubr.bf16.mxu0 %v17274_v25  ;;  %v6362_v59 = vpack.c.bf16 %v6354_v31, %v6350_v19  ;;  %v6363_v3 = vpack.c.bf16 %v6355_v35, %v6351_v58  ;;  %v17289_v58 = vld [vmem:[#allocation55_spill] sm:$0xff] }
 0xb48   : > { %6649 = vmatmul.mubr.bf16.gmra.mrb[36].mxu1 %v8403_v16  ;;  %v17286_v16 = vld [vmem:[#allocation70_spill] sm:$0xff] }
 0xb49   : > { %6691 = vmatprep.mubr.bf16.mxu1 %v17274_v25  ;;  %6661 = vmatprep.subr.bf16.mxu1 %v6363_v3  ;;  %v17291_v3 = vld [vmem:[#allocation36_spill] sm:$0xff] }
 0xb4a   : > { %6662 = vmatpush1.bf16.msra.mxu1 %v6362_v59 }
 0xb4e   : > { %8126 = vmatmul.mubr.msk.bf16.vlgmr.msra.gmra.mrb[32].mxu0 %vm2887_vm9, %v8404_v41 }
 0xb4f   : > { %6595 = vmatprep.mubr.bf16.mxu0 %v17274_v25 }
 0xb50   : > { %8128 = vmatmul.mubr.msk.bf16.vlgmr.msra.gmra.mrb[32].mxu1 %vm2887_vm9, %v8404_v41 }
 0xb51   : > { %6701 = vmatprep.mubr.bf16.mxu1 %v17274_v25  ;;  %v6447_v61 = vpop.permute.xlu1 %6446 }
 0xb53   : > { %v6452_v56 = vpop.permute.xlu0 %6451 }
 0xb55   : > { %v15052_v5 = vpop.permute.xlu1 %6456 }
 0xb56   : > { %8127 = vmatmul.mubr.msk.bf16.gmra.mrb[36].mxu0 %vm2887_vm9, %v8405_v7 }
 0xb57   : > { %v15056_v47 = vpop.permute.xlu0 %6461 }
 0xb58   : > { %8129 = vmatmul.mubr.msk.bf16.gmra.mrb[36].mxu1 %vm2887_vm9, %v8405_v7 }
 0xc21   : > { %v6587_v8 = vpop.f32.mrb[32].mxu0 }
 0xc22   : > { %v8214_v21 = vadd.f32 %v6587_v8, %v6447_v61  ;;  %v6589_v14 = vpop.f32.mrb[33].mxu0 }
 0xc23   : > { %v6693_v28 = vpop.f32.mrb[32].mxu1  ;;  %v6591_v20 = vpop.f32.mrb[34].mxu0  ;;  %v8215_v42 = vadd.f32 %v6589_v14, %v6447_v61 }
 0xc24   : > { %v6695_v36 = vpop.f32.mrb[33].mxu1  ;;  %v14901_v33 = vadd.f32 %v8214_v21, %v17275_v9  ;;  %v8222_v44 = vadd.f32 %v6693_v28, %v6447_v61  ;;  %v8216_v49 = vadd.f32 %v6591_v20, %v6452_v56  ;;  %v6593_v53 = vpop.f32.mrb[35].mxu0 }
 0xc25   : > { %v6697_v43 = vpop.f32.mrb[34].mxu1  ;;  %v8217_v55 = vadd.f32 %v6593_v53, %v6452_v56  ;;  %v14989_v54 = vadd.f32 %v8215_v42, %v17282_v60  ;;  %v8223_v24 = vadd.f32 %v6695_v36, %v6447_v61  ;;  %v17293_v61 = vld [vmem:[#allocation83_spill] sm:$0xff] }
 0xc26   : > { %17276 = vst [vmem:[#allocation65_spill] sm:$0xff] %v14901_v33  ;;  %v6699_v62 = vpop.f32.mrb[35].mxu1  ;;  %v14904_v6 = vadd.f32 %v8216_v49, %v17277_v10  ;;  %v8224_v34 = vadd.f32 %v6697_v43, %v6452_v56  ;;  %6740 = vrot.lane.b32.xlu1 %v14901_v33, %s8446_s11  ;;  %v14909_v1 = vadd.f32 %v8222_v44, %v17279_v17 }
 0xc27   : > { %17283 = vst [vmem:[#allocation24_spill] sm:$0xff] %v14989_v54  ;;  %v14994_v23 = vadd.f32 %v8217_v55, %v17284_v18  ;;  %v8225_v22 = vadd.f32 %v6699_v62, %v6452_v56  ;;  %v14999_v52 = vadd.f32 %v8223_v24, %v17286_v16 }
 0xc28   : > { %17278 = vst [vmem:[#allocation33_spill] sm:$0xff] %v14904_v6  ;;  %17280 = vst [vmem:[#allocation100_spill] sm:$0xff] %v14909_v1  ;;  %6742 = vrot.lane.b32.xlu0 %v14904_v6, %s8446_s11  ;;  %v14918_v51 = vadd.f32 %v8224_v34, %v17281_v30 }
 0xc29   : > { %v14915_v48 = vpop.f32.mrb[36].mxu0  ;;  %17285 = vst [vmem:[#allocation56_spill] sm:$0xff] %v14994_v23  ;;  %v15004_v46 = vadd.f32 %v8225_v22, %v17287_v4  ;;  %v6788_v22 = vld [vmem:[%s16295_s1] sm:$0xf] }
 0xc2a   : > { %v14920_v12 = vpop.f32.mrb[37].mxu0  ;;  %6756 = vrot.lane.b32.xlu1 %v14909_v1, %s8446_s11  ;;  %v8218_v27 = vadd.f32 %v14915_v48, %v15052_v5  ;;  %v15234_v25 = vrot.slane %v6788_v22, %v17302_v32 }
 0xc2b   : > { %v14922_v11 = vpop.f32.mrb[36].mxu1  ;;  %v14926_v50 = vpop.f32.mrb[38].mxu0  ;;  %v8219_v24 = vadd.f32 %v14920_v12, %v15052_v5 }
 0xc2c   : > { %v14928_v13 = vpop.f32.mrb[37].mxu1  ;;  %v14930_v38 = vpop.f32.mrb[39].mxu0  ;;  %6758 = vrot.lane.b32.xlu0 %v14918_v51, %s8446_s11  ;;  %v8220_v0 = vadd.f32 %v14926_v50, %v15056_v47  ;;  %v15073_v19 = vadd.f32 %v8218_v27, %v17288_v40  ;;  %v8226_v15 = vadd.f32 %v14922_v11, %v15052_v5  ;;  %v17297_v27 = vld [vmem:[#allocation86_spill] sm:$0xff]  ;;  %v17298_v40 = vld [vmem:[#allocation3_spill] sm:$0xff] }
 0xc2d   : > { %v14932_v63 = vpop.f32.mrb[38].mxu1  ;;  %v8221_v16 = vadd.f32 %v14930_v38, %v15056_v47  ;;  %v8227_v12 = vadd.f32 %v14928_v13, %v15052_v5 }
 0xc2e   : > { %v14936_v39 = vpop.f32.mrb[39].mxu1  ;;  %6842 = vrot.lane.b32.xlu1 %v14901_v33, %s8447_s12  ;;  %v15082_v31 = vadd.f32 %v8220_v0, %v17289_v58  ;;  %v8228_v35 = vadd.f32 %v14932_v63, %v15056_v47  ;;  %v15091_v41 = vadd.f32 %v8226_v15, %v17291_v3  ;;  %v15210_v0 = vadd.f32 %v8219_v24, %v17297_v27 }
 0xc2f   : > { %v15215_v15 = vrot.slane %v6788_v22, %v17298_v40  ;;  %v8229_v13 = vadd.f32 %v14936_v39, %v15056_v47 }
 0xc30   : > { %6844 = vrot.lane.b32.xlu0 %v14904_v6, %s8447_s12  ;;  %17290 = vst [vmem:[#allocation44_spill] sm:$0xff] %v15082_v31  ;;  %17292 = vst [vmem:[#allocation66_spill] sm:$0xff] %v15091_v41  ;;  %v15098_v56 = vadd.f32 %v8228_v35, %v17293_v61  ;;  %v17300_v35 = vld [vmem:[#allocation87_spill] sm:$0xff]  ;;  %v17301_v61 = vld [vmem:[#allocation60_spill] sm:$0xff] }
 0xc31   : > { %17299 = vst [vmem:[#allocation94_spill] sm:$0xff] %v15215_v15  ;;  %v15221_v3 = vadd.f32 %v8221_v16, %v17300_v35  ;;  %v15228_v24 = vadd.f32 %v8227_v12, %v17301_v61  ;;  %v8130_v16 = vld [vmem:[%s16295_s1 + $0x4] sm:$0xf]  ;;  %v15247_v35 = vrot.slane %v6788_v22, %v16865_v2 }
 0xc32   : > { %6858 = vrot.lane.b32.xlu1 %v14909_v1, %s8447_s12  ;;  %17294 = vst [vmem:[#allocation76_spill] sm:$0xff] %v15098_v56 }
 0xc34   : > { %6860 = vrot.lane.b32.xlu0 %v14918_v51, %s8447_s12 }
 0xc36   : > { %6944 = vrot.lane.b32.xlu1 %v14901_v33, %s8448_s13 }
 0xc38   : > { %6946 = vrot.lane.b32.xlu0 %v14904_v6, %s8448_s13 }
 0xc3a   : > { %6960 = vrot.lane.b32.xlu1 %v14909_v1, %s8448_s13 }
 0xc3c   : > { %6962 = vrot.lane.b32.xlu0 %v14918_v51, %s8448_s13 }
 0xc3e   : > { %7046 = vrot.lane.b32.xlu1 %v14901_v33, %s8449_s16 }
 0xc40   : > { %7048 = vrot.lane.b32.xlu0 %v14904_v6, %s8449_s16 }
 0xc42   : > { %7062 = vrot.lane.b32.xlu1 %v14909_v1, %s8449_s16 }
 0xc44   : > { %7064 = vrot.lane.b32.xlu0 %v14918_v51, %s8449_s16 }
 0xc46   : > { %7164 = vrot.lane.b32.xlu1 %v14901_v33, %s8450_s19 }
 0xc48   : > { %7166 = vrot.lane.b32.xlu0 %v14904_v6, %s8450_s19 }
 0xc4a   : > { %7180 = vrot.lane.b32.xlu1 %v14909_v1, %s8450_s19 }
 0xc4c   : > { %7182 = vrot.lane.b32.xlu0 %v14918_v51, %s8450_s19 }
 0xc4e   : > { %7266 = vrot.lane.b32.xlu1 %v14901_v33, %s8451_s24 }
 0xc50   : > { %7268 = vrot.lane.b32.xlu0 %v14904_v6, %s8451_s24 }
 0xc52   : > { %7282 = vrot.lane.b32.xlu1 %v14909_v1, %s8451_s24 }
 0xc54   : > { %7284 = vrot.lane.b32.xlu0 %v14918_v51, %s8451_s24 }
 0xc56   : > { %7368 = vrot.lane.b32.xlu1 %v14901_v33, %s8452_s29 }
 0xc58   : > { %7370 = vrot.lane.b32.xlu0 %v14904_v6, %s8452_s29 }
 0xc5a   : > { %7384 = vrot.lane.b32.xlu1 %v14909_v1, %s8452_s29 }
 0xc5c   : > { %7386 = vrot.lane.b32.xlu0 %v14918_v51, %s8452_s29 }
 0xc5e   : > { %7470 = vrot.lane.b32.xlu1 %v14901_v33, %s8453_s15 }
 0xc60   : > { %7472 = vrot.lane.b32.xlu0 %v14904_v6, %s8453_s15 }
 0xc62   : > { %6748 = vrot.lane.b32.xlu1 %v14989_v54, %s8446_s11 }
 0xc64   : > { %6750 = vrot.lane.b32.xlu0 %v14994_v23, %s8446_s11 }
 0xc66   : > { %6764 = vrot.lane.b32.xlu1 %v14999_v52, %s8446_s11 }
 0xc68   : > { %6766 = vrot.lane.b32.xlu0 %v15004_v46, %s8446_s11 }
 0xc6a   : > { %6850 = vrot.lane.b32.xlu1 %v14989_v54, %s8447_s12 }
 0xc6c   : > { %6852 = vrot.lane.b32.xlu0 %v14994_v23, %s8447_s12 }
 0xc6e   : > { %6866 = vrot.lane.b32.xlu1 %v14999_v52, %s8447_s12 }
 0xc70   : > { %6868 = vrot.lane.b32.xlu0 %v15004_v46, %s8447_s12 }
 0xc72   : > { %6952 = vrot.lane.b32.xlu1 %v14989_v54, %s8448_s13 }
 0xc74   : > { %6954 = vrot.lane.b32.xlu0 %v14994_v23, %s8448_s13 }
 0xc76   : > { %6968 = vrot.lane.b32.xlu1 %v14999_v52, %s8448_s13 }
 0xc78   : > { %6970 = vrot.lane.b32.xlu0 %v15004_v46, %s8448_s13 }
 0xc7a   : > { %7054 = vrot.lane.b32.xlu1 %v14989_v54, %s8449_s16 }
 0xc7c   : > { %7056 = vrot.lane.b32.xlu0 %v14994_v23, %s8449_s16 }
 0xc7e   : > { %7070 = vrot.lane.b32.xlu1 %v14999_v52, %s8449_s16 }
 0xc80   : > { %7072 = vrot.lane.b32.xlu0 %v15004_v46, %s8449_s16 }
 0xc82   : > { %7172 = vrot.lane.b32.xlu1 %v14989_v54, %s8450_s19 }
 0xc84   : > { %7174 = vrot.lane.b32.xlu0 %v14994_v23, %s8450_s19 }
 0xc86   : > { %7188 = vrot.lane.b32.xlu1 %v14999_v52, %s8450_s19 }
 0xc88   : > { %7190 = vrot.lane.b32.xlu0 %v15004_v46, %s8450_s19 }
 0xc8a   : > { %7274 = vrot.lane.b32.xlu1 %v14989_v54, %s8451_s24 }
 0xc8c   : > { %7276 = vrot.lane.b32.xlu0 %v14994_v23, %s8451_s24 }
 0xc8e   : > { %7290 = vrot.lane.b32.xlu1 %v14999_v52, %s8451_s24 }
 0xc90   : > { %7292 = vrot.lane.b32.xlu0 %v15004_v46, %s8451_s24 }
 0xc92   : > { %7376 = vrot.lane.b32.xlu1 %v14989_v54, %s8452_s29 }
 0xc94   : > { %7378 = vrot.lane.b32.xlu0 %v14994_v23, %s8452_s29 }
 0xc96   : > { %7392 = vrot.lane.b32.xlu1 %v14999_v52, %s8452_s29 }
 0xc98   : > { %7394 = vrot.lane.b32.xlu0 %v15004_v46, %s8452_s29  ;;  %v15064_v37 = vpop.permute.xlu1 %6740 }
 0xc9a   : > { %v15068_v57 = vpop.permute.xlu0 %6742  ;;  %7478 = vrot.lane.b32.xlu1 %v14989_v54, %s8453_s15 }
 0xc9c   : > { %7480 = vrot.lane.b32.xlu0 %v14994_v23, %s8453_s15  ;;  %v15079_v29 = vpop.permute.xlu1 %6756  ;;  %v15267_v23 = vrot.slane %v8130_v16, %v16864_v45 }
 0xc9e   : > { %v15086_v59 = vpop.permute.xlu0 %6758  ;;  %6744 = vrot.lane.b32.xlu1 %v15073_v19, %s8446_s11 }
 0xca0   : > { %6746 = vrot.lane.b32.xlu0 %v15082_v31, %s8446_s11  ;;  %v15095_v7 = vpop.permute.xlu1 %6842 }
 0xca2   : > { %v15100_v8 = vpop.permute.xlu0 %6844  ;;  %6760 = vrot.lane.b32.xlu1 %v15091_v41, %s8446_s11 }
 0xca4   : > { %6762 = vrot.lane.b32.xlu0 %v15098_v56, %s8446_s11  ;;  %v15106_v21 = vpop.permute.xlu1 %6858 }
 0xca6   : > { %v15108_v14 = vpop.permute.xlu0 %6860  ;;  %6846 = vrot.lane.b32.xlu1 %v15073_v19, %s8447_s12 }
 0xca8   : > { %6848 = vrot.lane.b32.xlu0 %v15082_v31, %s8447_s12  ;;  %v15114_v28 = vpop.permute.xlu1 %6944 }
 0xcaa   : > { %v15116_v20 = vpop.permute.xlu0 %6946  ;;  %6862 = vrot.lane.b32.xlu1 %v15091_v41, %s8447_s12 }
 0xcac   : > { %6864 = vrot.lane.b32.xlu0 %v15098_v56, %s8447_s12  ;;  %v15122_v36 = vpop.permute.xlu1 %6960 }
 0xcae   : > { %v15124_v9 = vpop.permute.xlu0 %6962  ;;  %6948 = vrot.lane.b32.xlu1 %v15073_v19, %s8448_s13 }
 0xcb0   : > { %6950 = vrot.lane.b32.xlu0 %v15082_v31, %s8448_s13  ;;  %v15130_v44 = vpop.permute.xlu1 %7046 }
 0xcb2   : > { %v15132_v49 = vpop.permute.xlu0 %7048  ;;  %6964 = vrot.lane.b32.xlu1 %v15091_v41, %s8448_s13 }
 0xcb4   : > { %6966 = vrot.lane.b32.xlu0 %v15098_v56, %s8448_s13  ;;  %v15138_v53 = vpop.permute.xlu1 %7062 }
 0xcb6   : > { %v15140_v43 = vpop.permute.xlu0 %7064  ;;  %7050 = vrot.lane.b32.xlu1 %v15073_v19, %s8449_s16 }
 0xcb8   : > { %7052 = vrot.lane.b32.xlu0 %v15082_v31, %s8449_s16  ;;  %v15146_v62 = vpop.permute.xlu1 %7164 }
 0xcba   : > { %v15148_v10 = vpop.permute.xlu0 %7166  ;;  %7066 = vrot.lane.b32.xlu1 %v15091_v41, %s8449_s16 }
 0xcbc   : > { %7068 = vrot.lane.b32.xlu0 %v15098_v56, %s8449_s16  ;;  %v15154_v34 = vpop.permute.xlu1 %7180 }
 0xcbe   : > { %v15156_v17 = vpop.permute.xlu0 %7182  ;;  %7168 = vrot.lane.b32.xlu1 %v15073_v19, %s8450_s19 }
 0xcc0   : > { %7170 = vrot.lane.b32.xlu0 %v15082_v31, %s8450_s19  ;;  %v15162_v48 = vpop.permute.xlu1 %7266 }
 0xcc2   : > { %v15164_v30 = vpop.permute.xlu0 %7268  ;;  %7184 = vrot.lane.b32.xlu1 %v15091_v41, %s8450_s19 }
 0xcc4   : > { %7186 = vrot.lane.b32.xlu0 %v15098_v56, %s8450_s19  ;;  %v15170_v11 = vpop.permute.xlu1 %7282 }
 0xcc6   : > { %v15172_v50 = vpop.permute.xlu0 %7284  ;;  %7270 = vrot.lane.b32.xlu1 %v15073_v19, %s8451_s24 }
 0xcc8   : > { %7272 = vrot.lane.b32.xlu0 %v15082_v31, %s8451_s24  ;;  %v15178_v63 = vpop.permute.xlu1 %7368 }
 0xcca   : > { %v15180_v42 = vpop.permute.xlu0 %7370  ;;  %7286 = vrot.lane.b32.xlu1 %v15091_v41, %s8451_s24 }
 0xccc   : > { %7288 = vrot.lane.b32.xlu0 %v15098_v56, %s8451_s24  ;;  %v15186_v55 = vpop.permute.xlu1 %7384 }
 0xcce   : > { %v15188_v60 = vpop.permute.xlu0 %7386  ;;  %7372 = vrot.lane.b32.xlu1 %v15073_v19, %s8452_s29 }
 0xcd0   : > { %7374 = vrot.lane.b32.xlu0 %v15082_v31, %s8452_s29  ;;  %v15196_v18 = vpop.permute.xlu1 %7470 }
 0xcd1   : > { %17295 = vst [vmem:[#allocation90_spill] sm:$0xff] %v15196_v18  ;;  %v17303_v18 = vld [vmem:[#allocation61_spill] sm:$0xff] }
 0xcd2   : > { %v15203_v4 = vpop.permute.xlu0 %7472  ;;  %7388 = vrot.lane.b32.xlu1 %v15091_v41, %s8452_s29 }
 0xcd3   : > { %17296 = vst [vmem:[#allocation102_spill] sm:$0xff] %v15203_v4  ;;  %v15250_v4 = vrot.slane %v6788_v22, %v16864_v45 }
 0xcd4   : > { %7390 = vrot.lane.b32.xlu0 %v15098_v56, %s8452_s29  ;;  %v6749_v58 = vpop.permute.xlu1 %6748 }
 0xcd5   : > { %v6780_v38 = vsel %vm393_vm0, %v15064_v37, %v6749_v58  ;;  %v6776_v33 = vsel %vm393_vm0, %v6749_v58, %v15079_v29 }
 0xcd6   : > { %v6751_v5 = vpop.permute.xlu0 %6750  ;;  %6752 = vrot.lane.b32.xlu1 %v15210_v0, %s8446_s11  ;;  %v6811_v39 = vmul.f32 %v15215_v15, %v6780_v38 }
 0xcd7   : > { %v6781_v27 = vsel %vm393_vm0, %v15068_v57, %v6751_v5  ;;  %v6777_v47 = vsel %vm393_vm0, %v6751_v5, %v15086_v59 }
 0xcd8   : > { %v6815_v12 = vmul.f32 %v15215_v15, %v6781_v27  ;;  %6754 = vrot.lane.b32.xlu0 %v15221_v3, %s8446_s11  ;;  %v6765_v61 = vpop.permute.xlu1 %6764  ;;  %v15259_v27 = vadd.f32 %v8229_v13, %v17303_v18  ;;  %v6816_v54 = vmul.f32 %v15250_v4, %v6777_v47  ;;  %v6812_v47 = vmul.f32 %v15250_v4, %v6776_v33 }
 0xcd9   : > { %v6772_v38 = vsel %vm393_vm0, %v15079_v29, %v6765_v61  ;;  %v6784_v5 = vsel %vm393_vm0, %v6765_v61, %v15064_v37 }
 0xcda   : > { %v6767_v6 = vpop.permute.xlu0 %6766  ;;  %6768 = vrot.lane.b32.xlu1 %v15228_v24, %s8446_s11  ;;  %v6827_v22 = vpack.c.bf16 %v6815_v12, %v6811_v39  ;;  %v6810_v15 = vmul.f32 %v15234_v25, %v6784_v5  ;;  %v6813_v18 = vmul.f32 %v15247_v35, %v6772_v38  ;;  %v15284_v12 = vrot.slane %v8130_v16, %v17298_v40 }
 0xcdb   : > { %v6773_v37 = vsel %vm393_vm0, %v15086_v59, %v6767_v6  ;;  %v6785_v29 = vsel %vm393_vm0, %v6767_v6, %v15068_v57  ;;  %v15295_v5 = vrot.slane %v8130_v16, %v17302_v32  ;;  %v6828_v33 = vpack.c.bf16 %v6816_v54, %v6812_v47 }
 0xcdc   : > { %v6814_v58 = vmul.f32 %v15234_v25, %v6785_v29  ;;  %v6817_v13 = vmul.f32 %v15247_v35, %v6773_v37  ;;  %6770 = vrot.lane.b32.xlu0 %v15259_v27, %s8446_s11  ;;  %7700 = vmatprep.subr.bf16.mxu0 %v6827_v22  ;;  %v6851_v39 = vpop.permute.xlu1 %6850  ;;  %v15304_v37 = vrot.slane %v8130_v16, %v16865_v2  ;;  %v8131_v29 = vld [vmem:[%s16295_s1 + $0x8] sm:$0xf] }
 0xcdd   : > { %v6878_v6 = vsel %vm536_vm1, %v6851_v39, %v15106_v21  ;;  %v6882_v59 = vsel %vm536_vm1, %v15095_v7, %v6851_v39 }
 0xcde   : > { %v6826_v57 = vpack.c.bf16 %v6814_v58, %v6810_v15  ;;  %v6853_v61 = vpop.permute.xlu0 %6852  ;;  %6854 = vrot.lane.b32.xlu1 %v15210_v0, %s8447_s12  ;;  %v6829_v38 = vpack.c.bf16 %v6817_v13, %v6813_v18  ;;  %v15310_v18 = vmul.f32 %v15267_v23, %v6878_v6  ;;  %v15321_v16 = vmul.f32 %v15284_v12, %v6882_v59 }
 0xcdf   : > { %v6879_v22 = vsel %vm536_vm1, %v6853_v61, %v15108_v14  ;;  %v6883_v15 = vsel %vm536_vm1, %v15100_v8, %v6853_v61 }
 0xce0   : > { %17304 = vst [vmem:[#allocation91_spill] sm:$0xff] %v15310_v18  ;;  %v15313_v54 = vmul.f32 %v15284_v12, %v6883_v15  ;;  %v15316_v58 = vmul.f32 %v15267_v23, %v6879_v22  ;;  %6856 = vrot.lane.b32.xlu0 %v15221_v3, %s8447_s12  ;;  %7701 = vmatpush1.bf16.msra.mxu0 %v6826_v57  ;;  %v6867_v13 = vpop.permute.xlu1 %6866 }
 0xce1   : > { %7806 = vmatprep.subr.bf16.mxu1 %v6829_v38  ;;  %v6874_v39 = vsel %vm536_vm1, %v15106_v21, %v6867_v13  ;;  %v6886_v47 = vsel %vm536_vm1, %v6867_v13, %v15095_v7  ;;  %v15334_v57 = vrot.slane %v8131_v29, %v17298_v40  ;;  %v15343_v7 = vrot.slane %v8131_v29, %v16864_v45 }
 0xce2   : > { %17305 = vst [vmem:[#allocation101_spill] sm:$0xff] %v15316_v58  ;;  %7807 = vmatpush1.bf16.msra.mxu1 %v6828_v33  ;;  %v6869_v61 = vpop.permute.xlu0 %6868  ;;  %6870 = vrot.lane.b32.xlu1 %v15228_v24, %s8447_s12  ;;  %v15348_v33 = vmul.f32 %v15295_v5, %v6886_v47  ;;  %v15351_v22 = vmul.f32 %v15304_v37, %v6874_v39 }
 0xce3   : > { %17306 = vst [vmem:[#allocation48_spill] sm:$0xff] %v15334_v57  ;;  %v6875_v59 = vsel %vm536_vm1, %v15108_v14, %v6869_v61  ;;  %v6887_v21 = vsel %vm536_vm1, %v6869_v61, %v15100_v8  ;;  %17307 = vst [vmem:[#allocation116_spill] sm:$0xff] %v15343_v7  ;;  %v15383_v39 = vrot.slane %v8131_v29, %v16865_v2 }
 0xce4   : > { %v15354_v15 = vmul.f32 %v15295_v5, %v6887_v21  ;;  %v15357_v14 = vmul.f32 %v15304_v37, %v6875_v59  ;;  %6872 = vrot.lane.b32.xlu0 %v15259_v27, %s8447_s12  ;;  %v6953_v8 = vpop.permute.xlu1 %6952 }
 0xce5   : > { %v6980_v13 = vsel %vm680_vm2, %v6953_v8, %v15122_v36  ;;  %v6984_v47 = vsel %vm680_vm2, %v15114_v28, %v6953_v8  ;;  %v15380_v8 = vrot.slane %v8131_v29, %v17302_v32  ;;  %17309 = vst [vmem:[#allocation98_spill] sm:$0xff] %v15383_v39  ;;  %v8132_v29 = vld [vmem:[%s16295_s1 + $0xc] sm:$0xf] }
 0xce6   : > { %v6955_v61 = vpop.permute.xlu0 %6954  ;;  %6956 = vrot.lane.b32.xlu1 %v15210_v0, %s8448_s13  ;;  %v15386_v38 = vmul.f32 %v15334_v57, %v6984_v47  ;;  %v15389_v18 = vmul.f32 %v15343_v7, %v6980_v13 }
 0xce7   : > { %v6981_v21 = vsel %vm680_vm2, %v6955_v61, %v15124_v9  ;;  %v6985_v6 = vsel %vm680_vm2, %v15116_v20, %v6955_v61  ;;  %17308 = vst [vmem:[#allocation118_spill] sm:$0xff] %v15380_v8 }
 0xce8   : > { %17310 = vst [vmem:[#allocation80_spill] sm:$0xff] %v15389_v18  ;;  %v15392_v59 = vmul.f32 %v15334_v57, %v6985_v6  ;;  %v15395_v58 = vmul.f32 %v15343_v7, %v6981_v21  ;;  %6958 = vrot.lane.b32.xlu0 %v15221_v3, %s8448_s13  ;;  %v6969_v61 = vpop.permute.xlu1 %6968 }
 0xce9   : > { %v6976_v47 = vsel %vm680_vm2, %v15122_v36, %v6969_v61  ;;  %v6988_v6 = vsel %vm680_vm2, %v6969_v61, %v15114_v28  ;;  %v15421_v28 = vrot.slane %v8132_v29, %v17298_v40  ;;  %v15424_v61 = vrot.slane %v8132_v29, %v16864_v45 }
 0xcea   : > { %17311 = vst [vmem:[#allocation92_spill] sm:$0xff] %v15395_v58  ;;  %v6971_v21 = vpop.permute.xlu0 %6970  ;;  %6972 = vrot.lane.b32.xlu1 %v15228_v24, %s8448_s13  ;;  %v15427_v13 = vmul.f32 %v15380_v8, %v6988_v6  ;;  %v15430_v18 = vmul.f32 %v15383_v39, %v6976_v47  ;;  %v15462_v47 = vrot.slane %v8132_v29, %v16865_v2 }
 0xceb   : > { %v6977_v57 = vsel %vm680_vm2, %v15124_v9, %v6971_v21  ;;  %v6989_v36 = vsel %vm680_vm2, %v6971_v21, %v15116_v20  ;;  %17312 = vst [vmem:[#allocation49_spill] sm:$0xff] %v15421_v28  ;;  %17313 = vst [vmem:[#allocation62_spill] sm:$0xff] %v15424_v61 }
 0xcec   : > { %17314 = vst [vmem:[#allocation96_spill] sm:$0xff] %v15427_v13  ;;  %v15433_v7 = vmul.f32 %v15380_v8, %v6989_v36  ;;  %v15436_v9 = vmul.f32 %v15383_v39, %v6977_v57  ;;  %6974 = vrot.lane.b32.xlu0 %v15259_v27, %s8448_s13  ;;  %v7055_v20 = vpop.permute.xlu1 %7054  ;;  %17316 = vst [vmem:[#allocation93_spill] sm:$0xff] %v15462_v47 }
 0xced   : > { %v7082_v21 = vsel %vm824_vm3, %v7055_v20, %v15138_v53  ;;  %v7086_v6 = vsel %vm824_vm3, %v15130_v44, %v7055_v20  ;;  %v15459_v20 = vrot.slane %v8132_v29, %v17302_v32  ;;  %v8133_v29 = vld [vmem:[%s16295_s1 + $0x14] sm:$0xf] }
 0xcee   : > { %17315 = vst [vmem:[#allocation103_spill] sm:$0xff] %v15433_v7  ;;  %v7057_v36 = vpop.permute.xlu0 %7056  ;;  %7058 = vrot.lane.b32.xlu1 %v15210_v0, %s8449_s16  ;;  %v15465_v13 = vmul.f32 %v15421_v28, %v7086_v6  ;;  %v15468_v7 = vmul.f32 %v15424_v61, %v7082_v21 }
 0xcef   : > { %v7083_v58 = vsel %vm824_vm3, %v7057_v36, %v15140_v43  ;;  %v7087_v39 = vsel %vm824_vm3, %v15132_v49, %v7057_v36 }
 0xcf0   : > { %17317 = vst [vmem:[#allocation31_spill] sm:$0xff] %v15468_v7  ;;  %v15471_v57 = vmul.f32 %v15421_v28, %v7087_v39  ;;  %v15474_v8 = vmul.f32 %v15424_v61, %v7083_v58  ;;  %7060 = vrot.lane.b32.xlu0 %v15221_v3, %s8449_s16  ;;  %v7071_v36 = vpop.permute.xlu1 %7070 }
 0xcf1   : > { %v7078_v6 = vsel %vm824_vm3, %v15138_v53, %v7071_v36  ;;  %v7090_v39 = vsel %vm824_vm3, %v7071_v36, %v15130_v44  ;;  %v15500_v44 = vrot.slane %v8133_v29, %v17302_v32  ;;  %v15503_v36 = vrot.slane %v8133_v29, %v17298_v40 }
 0xcf2   : > { %17318 = vst [vmem:[#allocation32_spill] sm:$0xff] %v15474_v8  ;;  %v7073_v21 = vpop.permute.xlu0 %7072  ;;  %7074 = vrot.lane.b32.xlu1 %v15228_v24, %s8449_s16  ;;  %v15506_v58 = vmul.f32 %v15459_v20, %v7090_v39  ;;  %v15509_v7 = vmul.f32 %v15462_v47, %v7078_v6  ;;  %v15541_v6 = vrot.slane %v8133_v29, %v16865_v2 }
 0xcf3   : > { %v7079_v28 = vsel %vm824_vm3, %v15140_v43, %v7073_v21  ;;  %v7091_v53 = vsel %vm824_vm3, %v7073_v21, %v15132_v49  ;;  %17319 = vst [vmem:[#allocation43_spill] sm:$0xff] %v15500_v44  ;;  %17320 = vst [vmem:[#allocation63_spill] sm:$0xff] %v15503_v36 }
 0xcf4   : > { %17321 = vst [vmem:[#allocation58_spill] sm:$0xff] %v15506_v58  ;;  %v15512_v61 = vmul.f32 %v15459_v20, %v7091_v53  ;;  %v15515_v43 = vmul.f32 %v15462_v47, %v7079_v28  ;;  %7076 = vrot.lane.b32.xlu0 %v15259_v27, %s8449_s16  ;;  %v7173_v49 = vpop.permute.xlu1 %7172  ;;  %17324 = vst [vmem:[#allocation42_spill] sm:$0xff] %v15541_v6 }
 0xcf5   : > { %v7200_v21 = vsel %vm992_vm4, %v7173_v49, %v15154_v34  ;;  %v7204_v39 = vsel %vm992_vm4, %v15146_v62, %v7173_v49  ;;  %v15538_v49 = vrot.slane %v8133_v29, %v16864_v45  ;;  %v8134_v29 = vld [vmem:[%s16295_s1 + $0x18] sm:$0xf] }
 0xcf6   : > { %17322 = vst [vmem:[#allocation29_spill] sm:$0xff] %v15512_v61  ;;  %v7175_v53 = vpop.permute.xlu0 %7174  ;;  %7486 = vrot.lane.b32.xlu1 %v14909_v1, %s8453_s15  ;;  %v15544_v58 = vmul.f32 %v15500_v44, %v7204_v39  ;;  %v15547_v1 = vmul.f32 %v15503_v36, %v7200_v21 }
 0xcf7   : > { %v7201_v8 = vsel %vm992_vm4, %v7175_v53, %v15156_v17  ;;  %v7205_v47 = vsel %vm992_vm4, %v15148_v10, %v7175_v53  ;;  %17323 = vst [vmem:[#allocation104_spill] sm:$0xff] %v15538_v49 }
 0xcf8   : > { %17325 = vst [vmem:[#allocation27_spill] sm:$0xff] %v15544_v58  ;;  %17326 = vst [vmem:[#allocation72_spill] sm:$0xff] %v15547_v1  ;;  %v15550_v28 = vmul.f32 %v15500_v44, %v7205_v47  ;;  %v15553_v61 = vmul.f32 %v15503_v36, %v7201_v8  ;;  %7488 = vrot.lane.b32.xlu0 %v14918_v51, %s8453_s15  ;;  %v7189_v53 = vpop.permute.xlu1 %7188 }
 0xcf9   : > { %v7196_v39 = vsel %vm992_vm4, %v15154_v34, %v7189_v53  ;;  %v7208_v47 = vsel %vm992_vm4, %v7189_v53, %v15146_v62  ;;  %v15579_v62 = vrot.slane %v8134_v29, %v17302_v32  ;;  %v15582_v53 = vrot.slane %v8134_v29, %v17298_v40 }
 0xcfa   : > { %17327 = vst [vmem:[#allocation105_spill] sm:$0xff] %v15550_v28  ;;  %17328 = vst [vmem:[#allocation106_spill] sm:$0xff] %v15553_v61  ;;  %v7191_v21 = vpop.permute.xlu0 %7190  ;;  %7176 = vrot.lane.b32.xlu1 %v15210_v0, %s8450_s19  ;;  %v15585_v8 = vmul.f32 %v15538_v49, %v7196_v39  ;;  %v15588_v58 = vmul.f32 %v15541_v6, %v7208_v47  ;;  %v15620_v47 = vrot.slane %v8134_v29, %v16865_v2 }
 0xcfb   : > { %v7197_v36 = vsel %vm992_vm4, %v15156_v17, %v7191_v21  ;;  %v7209_v34 = vsel %vm992_vm4, %v7191_v21, %v15148_v10  ;;  %17329 = vst [vmem:[#allocation52_spill] sm:$0xff] %v15579_v62  ;;  %17330 = vst [vmem:[#allocation71_spill] sm:$0xff] %v15582_v53 }
 0xcfc   : > { %17331 = vst [vmem:[#allocation39_spill] sm:$0xff] %v15585_v8  ;;  %17332 = vst [vmem:[#allocation88_spill] sm:$0xff] %v15588_v58  ;;  %v15591_v44 = vmul.f32 %v15538_v49, %v7197_v36  ;;  %v15594_v17 = vmul.f32 %v15541_v6, %v7209_v34  ;;  %7496 = vrot.lane.b32.xlu0 %v15004_v46, %s8453_s15  ;;  %v7275_v10 = vpop.permute.xlu1 %7274 }
 0xcfd   : > { %v7302_v21 = vsel %vm1136_vm5, %v7275_v10, %v15170_v11  ;;  %v7306_v39 = vsel %vm1136_vm5, %v15162_v48, %v7275_v10  ;;  %v15617_v10 = vrot.slane %v8134_v29, %v16864_v45  ;;  %17336 = vst [vmem:[#allocation64_spill] sm:$0xff] %v15620_v47  ;;  %v8135_v29 = vld [vmem:[%s16295_s1 + $0x1c] sm:$0xf] }
 0xcfe   : > { %17333 = vst [vmem:[#allocation107_spill] sm:$0xff] %v15591_v44  ;;  %17334 = vst [vmem:[#allocation81_spill] sm:$0xff] %v15594_v17  ;;  %v7277_v36 = vpop.permute.xlu0 %7276  ;;  %7192 = vrot.lane.b32.xlu1 %v15228_v24, %s8450_s19  ;;  %v15623_v8 = vmul.f32 %v15579_v62, %v7306_v39  ;;  %v15626_v44 = vmul.f32 %v15582_v53, %v7302_v21 }
 0xcff   : > { %v7303_v28 = vsel %vm1136_vm5, %v7277_v36, %v15172_v50  ;;  %v7307_v6 = vsel %vm1136_vm5, %v15164_v30, %v7277_v36  ;;  %17335 = vst [vmem:[#allocation34_spill] sm:$0xff] %v15617_v10 }
 0xd00   : > { %17337 = vst [vmem:[#allocation25_spill] sm:$0xff] %v15623_v8  ;;  %17338 = vst [vmem:[#allocation77_spill] sm:$0xff] %v15626_v44  ;;  %v15629_v34 = vmul.f32 %v15579_v62, %v7307_v6  ;;  %v15632_v49 = vmul.f32 %v15582_v53, %v7303_v28  ;;  %7178 = vrot.lane.b32.xlu0 %v15221_v3, %s8450_s19  ;;  %v7291_v36 = vpop.permute.xlu1 %7290 }
 0xd01   : > { %v7298_v39 = vsel %vm1136_vm5, %v15170_v11, %v7291_v36  ;;  %v7310_v6 = vsel %vm1136_vm5, %v7291_v36, %v15162_v48  ;;  %v15658_v48 = vrot.slane %v8135_v29, %v17302_v32  ;;  %v15661_v36 = vrot.slane %v8135_v29, %v17298_v40 }
 0xd02   : > { %17339 = vst [vmem:[#allocation50_spill] sm:$0xff] %v15629_v34  ;;  %17340 = vst [vmem:[#allocation59_spill] sm:$0xff] %v15632_v49  ;;  %v7293_v21 = vpop.permute.xlu0 %7292  ;;  %7278 = vrot.lane.b32.xlu1 %v15210_v0, %s8451_s24  ;;  %v15664_v28 = vmul.f32 %v15617_v10, %v7298_v39  ;;  %v15667_v8 = vmul.f32 %v15620_v47, %v7310_v6  ;;  %v15699_v6 = vrot.slane %v8135_v29, %v16865_v2  ;;  %v6739_v2 = vld [vmem:[%s16301_s7 + $0x18] sm:$0xff] }
 0xd03   : > { %v7299_v53 = vsel %vm1136_vm5, %v15172_v50, %v7293_v21  ;;  %v7311_v11 = vsel %vm1136_vm5, %v7293_v21, %v15164_v30  ;;  %17341 = vst [vmem:[#allocation23_spill] sm:$0xff] %v15658_v48  ;;  %17342 = vst [vmem:[#allocation51_spill] sm:$0xff] %v15661_v36 }
 0xd04   : > { %17343 = vst [vmem:[#allocation28_spill] sm:$0xff] %v15664_v28  ;;  %17344 = vst [vmem:[#allocation108_spill] sm:$0xff] %v15667_v8  ;;  %v15670_v62 = vmul.f32 %v15617_v10, %v7299_v53  ;;  %v15673_v50 = vmul.f32 %v15620_v47, %v7311_v11  ;;  %7194 = vrot.lane.b32.xlu0 %v15259_v27, %s8450_s19  ;;  %v7377_v30 = vpop.permute.xlu1 %7376 }
 0xd05   : > { %v7404_v21 = vsel %vm1280_vm7, %v7377_v30, %v15186_v55  ;;  %v7408_v39 = vsel %vm1280_vm7, %v15178_v63, %v7377_v30  ;;  %v15696_v30 = vrot.slane %v8135_v29, %v16864_v45  ;;  %17348 = vst [vmem:[#allocation109_spill] sm:$0xff] %v15699_v6 }
 0xd06   : > { %17345 = vst [vmem:[#allocation78_spill] sm:$0xff] %v15670_v62  ;;  %17346 = vst [vmem:[#allocation73_spill] sm:$0xff] %v15673_v50  ;;  %v7379_v53 = vpop.permute.xlu0 %7378  ;;  %7294 = vrot.lane.b32.xlu1 %v15228_v24, %s8451_s24  ;;  %v15702_v28 = vmul.f32 %v15658_v48, %v7408_v39  ;;  %v15705_v62 = vmul.f32 %v15661_v36, %v7404_v21 }
 0xd07   : > { %v7405_v34 = vsel %vm1280_vm7, %v7379_v53, %v15188_v60  ;;  %v7409_v47 = vsel %vm1280_vm7, %v15180_v42, %v7379_v53  ;;  %17347 = vst [vmem:[#allocation89_spill] sm:$0xff] %v15696_v30 }
 0xd08   : > { %17349 = vst [vmem:[#allocation85_spill] sm:$0xff] %v15702_v28  ;;  %17350 = vst [vmem:[#allocation82_spill] sm:$0xff] %v15705_v62  ;;  %v15708_v11 = vmul.f32 %v15658_v48, %v7409_v47  ;;  %v15711_v10 = vmul.f32 %v15661_v36, %v7405_v34  ;;  %7280 = vrot.lane.b32.xlu0 %v15221_v3, %s8451_s24  ;;  %v7393_v53 = vpop.permute.xlu1 %7392 }
 0xd09   : > { %v7400_v29 = vsel %vm1280_vm7, %v15186_v55, %v7393_v53  ;;  %v7412_v39 = vsel %vm1280_vm7, %v7393_v53, %v15178_v63 }
 0xd0a   : > { %17351 = vst [vmem:[#allocation79_spill] sm:$0xff] %v15708_v11  ;;  %17352 = vst [vmem:[#allocation45_spill] sm:$0xff] %v15711_v10  ;;  %v7395_v47 = vpop.permute.xlu0 %7394  ;;  %7380 = vrot.lane.b32.xlu1 %v15210_v0, %s8452_s29  ;;  %v15734_v63 = vmul.f32 %v15696_v30, %v7400_v29  ;;  %v15737_v53 = vmul.f32 %v15699_v6, %v7412_v39  ;;  %v6738_v10 = vld [vmem:[%s16301_s7 + $0x10] sm:$0xff] }
 0xd0b   : > { %v7401_v48 = vsel %vm1280_vm7, %v15188_v60, %v7395_v47  ;;  %v7413_v55 = vsel %vm1280_vm7, %v7395_v47, %v15180_v42  ;;  %v8408_v42 = vld [vmem:[%s16300_s6 + $0x4] ss:$12 sps:$4 sm:$0xff]  }
 0xd0c   : > { %17353 = vst [vmem:[#allocation75_spill] sm:$0xff] %v15734_v63  ;;  %17354 = vst [vmem:[#allocation30_spill] sm:$0xff] %v15737_v53  ;;  %v15740_v21 = vmul.f32 %v15696_v30, %v7401_v48  ;;  %v15743_v28 = vmul.f32 %v15699_v6, %v7413_v55  ;;  %7296 = vrot.lane.b32.xlu0 %v15259_v27, %s8451_s24  ;;  %v15747_v60 = vpop.permute.xlu1 %7478  ;;  %7732 = vmatprep.mubr.bf16.mxu0 %v8408_v42  ;;  %v6736_v30 = vld [vmem:[%s16301_s7] sm:$0xff]  ;;  %s8149_s24 = sshll.u32 %s17494_s28, 7 }
 0xd0d   : > { %17357 = vst [vmem:[#allocation111_spill] sm:$0xff] %v15747_v60  ;;  %7838 = vmatprep.mubr.bf16.mxu1 %v8408_v42  ;;  %s16257_s20 = scalar_lea.vmem %s16302_s8, %s8149_s24 }
 0xd0e   : > { %17355 = vst [vmem:[#allocation74_spill] sm:$0xff] %v15740_v21  ;;  %17356 = vst [vmem:[#allocation97_spill] sm:$0xff] %v15743_v28  ;;  %v15754_v39 = vpop.permute.xlu0 %7480  ;;  %7396 = vrot.lane.b32.xlu1 %v15228_v24, %s8452_s29  ;;  %v6737_v28 = vld [vmem:[%s16301_s7 + $0x8] sm:$0xff] }
 0xd0f   : > { %17358 = vst [vmem:[#allocation84_spill] sm:$0xff] %v15754_v39 }
 0xd10   : > { %7382 = vrot.lane.b32.xlu0 %v15221_v3, %s8452_s29  ;;  %v6745_v47 = vpop.permute.xlu1 %6744 }
 0xd12   : > { %v6747_v55 = vpop.permute.xlu0 %6746  ;;  %7494 = vrot.lane.b32.xlu1 %v14999_v52, %s8453_s15 }
 0xd14   : > { %7398 = vrot.lane.b32.xlu0 %v15259_v27, %s8452_s29  ;;  %v6761_v29 = vpop.permute.xlu1 %6760 }
 0xd16   : > { %v6763_v34 = vpop.permute.xlu0 %6762  ;;  %7474 = vrot.lane.b32.xlu1 %v15073_v19, %s8453_s15 }
 0xd18   : > { %7476 = vrot.lane.b32.xlu0 %v15082_v31, %s8453_s15  ;;  %v15770_v42 = vpop.permute.xlu1 %6846 }
 0xd1a   : > { %v15772_v48 = vpop.permute.xlu0 %6848  ;;  %7482 = vrot.lane.b32.xlu1 %v15210_v0, %s8453_s15 }
 0xd1c   : > { %7492 = vrot.lane.b32.xlu0 %v15098_v56, %s8453_s15  ;;  %v15778_v63 = vpop.permute.xlu1 %6862 }
 0xd1e   : > { %v15780_v21 = vpop.permute.xlu0 %6864  ;;  %7490 = vrot.lane.b32.xlu1 %v15091_v41, %s8453_s15 }
 0xd20   : > { %7484 = vrot.lane.b32.xlu0 %v15221_v3, %s8453_s15  ;;  %v15786_v11 = vpop.permute.xlu1 %6948 }
 0xd22   : > { %v15788_v6 = vpop.permute.xlu0 %6950  ;;  %7498 = vrot.lane.b32.xlu1 %v15228_v24, %s8453_s15 }
 0xd24   : > { %7500 = vrot.lane.b32.xlu0 %v15259_v27, %s8453_s15  ;;  %v15797_v53 = vpop.permute.xlu1 %6964 }
 0xd26   : > { %v15802_v62 = vpop.permute.xlu0 %6966  ;;  %7646 = vperm.xlu1 %8361, %v6736_v30  }
 0xd28   : > { %7651 = vperm.xlu0 %8360, %v6737_v28   ;;  %v15807_v36 = vpop.permute.xlu1 %7050 }
 0xd2a   : > { %v15812_v39 = vpop.permute.xlu0 %7052  ;;  %7656 = vperm.xlu1 %8361, %v6738_v10  }
 0xd2c   : > { %7661 = vperm.xlu0 %8360, %v6739_v2   ;;  %v15814_v60 = vpop.permute.xlu1 %7066 }
 0xd2e   : > { %v15816_v8 = vpop.permute.xlu0 %7068 }
 0xd30   : > { %v15818_v30 = vpop.permute.xlu1 %7168 }
 0xd31   : > { %17359 = vst [vmem:[#allocation41_spill] sm:$0xff] %v15818_v30 }
 0xd32   : > { %v15820_v50 = vpop.permute.xlu0 %7170 }
 0xd33   : > { %17360 = vst [vmem:[#allocation112_spill] sm:$0xff] %v15820_v50 }
 0xd34   : > { %v15822_v45 = vpop.permute.xlu1 %7184 }
 0xd36   : > { %v15824_v28 = vpop.permute.xlu0 %7186 }
 0xd37   : > { %17361 = vst [vmem:[#allocation99_spill] sm:$0xff] %v15824_v28 }
 0xd38   : > { %v15826_v40 = vpop.permute.xlu1 %7270 }
 0xd39   : > { %17362 = vst [vmem:[#allocation47_spill] sm:$0xff] %v15826_v40  ;;  %v17370_v40 = vld [vmem:[#allocation94_spill] sm:$0xff] }
 0xd3a   : > { %v15828_v44 = vpop.permute.xlu0 %7272 }
 0xd3b   : > { %17363 = vst [vmem:[#allocation26_spill] sm:$0xff] %v15828_v44 }
 0xd3c   : > { %v15830_v49 = vpop.permute.xlu1 %7286 }
 0xd3d   : > { %17364 = vst [vmem:[#allocation95_spill] sm:$0xff] %v15830_v49 }
 0xd3e   : > { %v15832_v10 = vpop.permute.xlu0 %7288 }
 0xd3f   : > { %17365 = vst [vmem:[#allocation57_spill] sm:$0xff] %v15832_v10 }
 0xd40   : > { %v15834_v2 = vpop.permute.xlu1 %7372 }
 0xd41   : > { %17366 = vst [vmem:[#allocation115_spill] sm:$0xff] %v15834_v2 }
 0xd42   : > { %v15836_v32 = vpop.permute.xlu0 %7374 }
 0xd43   : > { %17367 = vst [vmem:[#allocation46_spill] sm:$0xff] %v15836_v32 }
 0xd44   : > { %v15838_v58 = vpop.permute.xlu1 %7388 }
 0xd45   : > { %17368 = vst [vmem:[#allocation40_spill] sm:$0xff] %v15838_v58 }
 0xd46   : > { %v15840_v17 = vpop.permute.xlu0 %7390 }
 0xd47   : > { %17369 = vst [vmem:[#allocation110_spill] sm:$0xff] %v15840_v17 }
 0xd48   : > { %v6753_v1 = vpop.permute.xlu1 %6752 }
 0xd49   : > { %v6782_v61 = vsel %vm393_vm0, %v6745_v47, %v6753_v1  ;;  %v6778_v56 = vsel %vm393_vm0, %v6753_v1, %v6761_v29 }
 0xd4a   : > { %v6755_v30 = vpop.permute.xlu0 %6754  ;;  %v6819_v49 = vmul.f32 %v17370_v40, %v6782_v61 }
 0xd4b   : > { %v6783_v44 = vsel %vm393_vm0, %v6747_v55, %v6755_v30  ;;  %v6779_v10 = vsel %vm393_vm0, %v6755_v30, %v6763_v34 }
 0xd4c   : > { %v6823_v2 = vmul.f32 %v17370_v40, %v6783_v44  ;;  %v6769_v32 = vpop.permute.xlu1 %6768  ;;  %v6824_v28 = vmul.f32 %v15250_v4, %v6779_v10 }
 0xd4d   : > { %v6774_v58 = vsel %vm393_vm0, %v6761_v29, %v6769_v32  ;;  %v6786_v17 = vsel %vm393_vm0, %v6769_v32, %v6745_v47 }
 0xd4e   : > { %v6771_v41 = vpop.permute.xlu0 %6770  ;;  %v6831_v50 = vpack.c.bf16 %v6823_v2, %v6819_v49  ;;  %v6818_v44 = vmul.f32 %v15234_v25, %v6786_v17  ;;  %v6821_v30 = vmul.f32 %v15247_v35, %v6774_v58  ;;  %v6820_v49 = vmul.f32 %v15250_v4, %v6778_v56 }
 0xd4f   : > { %v6775_v61 = vsel %vm393_vm0, %v6763_v34, %v6771_v41  ;;  %v6787_v40 = vsel %vm393_vm0, %v6771_v41, %v6747_v55 }
 0xd50   : > { %v6822_v31 = vmul.f32 %v15234_v25, %v6787_v40  ;;  %v6825_v32 = vmul.f32 %v15247_v35, %v6775_v61  ;;  %7702 = vmatprep.subr.bf16.mxu0 %v6831_v50  ;;  %v6855_v1 = vpop.permute.xlu1 %6854  ;;  %v6832_v41 = vpack.c.bf16 %v6824_v28, %v6820_v49  ;;  %v17371_v50 = vpack.c.bf16 %v15313_v54, %v15321_v16 }
 0xd51   : > { %v6884_v29 = vsel %vm536_vm1, %v15770_v42, %v6855_v1  ;;  %v17372_v28 = vpack.c.bf16 %v15357_v14, %v15351_v22  ;;  %v17373_v14 = vpack.c.bf16 %v15354_v15, %v15348_v33  ;;  %v17377_v15 = vld [vmem:[#allocation48_spill] sm:$0xff] }
 0xd52   : > { %v6830_v34 = vpack.c.bf16 %v6822_v31, %v6818_v44  ;;  %v6857_v47 = vpop.permute.xlu0 %6856  ;;  %v6833_v10 = vpack.c.bf16 %v6825_v32, %v6821_v30  ;;  %v6921_v25 = vmul.f32 %v15284_v12, %v6884_v29  ;;  %v17375_v32 = vld [vmem:[#allocation91_spill] sm:$0xff] }
 0xd53   : > { %v6885_v58 = vsel %vm536_vm1, %v15772_v48, %v6857_v47  ;;  %v6881_v35 = vsel %vm536_vm1, %v6857_v47, %v15780_v21 }
 0xd54   : > { %v6925_v56 = vmul.f32 %v15284_v12, %v6885_v58  ;;  %7703 = vmatpush1.bf16.msra.mxu0 %v6830_v34  ;;  %7808 = vmatprep.subr.bf16.mxu1 %v6833_v10  ;;  %v6871_v4 = vpop.permute.xlu1 %6870  ;;  %v6880_v12 = vsel %vm536_vm1, %v6855_v1, %v15778_v63  ;;  %v6926_v61 = vmul.f32 %v15267_v23, %v6881_v35 }
 0xd55   : > { %v6876_v31 = vsel %vm536_vm1, %v15778_v63, %v6871_v4  ;;  %v6888_v17 = vsel %vm536_vm1, %v6871_v4, %v15770_v42  ;;  %7704 = vmatprep.subr.bf16.mxu0 %v17371_v50  ;;  %7809 = vmatpush1.bf16.msra.mxu1 %v6832_v41  ;;  %v6922_v30 = vmul.f32 %v15267_v23, %v6880_v12 }
 0xd56   : > { %v6873_v55 = vpop.permute.xlu0 %6872  ;;  %7810 = vmatprep.subr.bf16.mxu1 %v17372_v28  ;;  %v6933_v2 = vpack.c.bf16 %v6925_v56, %v6921_v25  ;;  %v6920_v16 = vmul.f32 %v15295_v5, %v6888_v17  ;;  %v6923_v63 = vmul.f32 %v15304_v37, %v6876_v31  ;;  %v17378_v25 = vpack.c.bf16 %v15392_v59, %v15386_v38  ;;  %v17380_v17 = vld [vmem:[#allocation116_spill] sm:$0xff]  ;;  %v17381_v59 = vld [vmem:[#allocation118_spill] sm:$0xff] }
 0xd57   : > { %v6877_v42 = vsel %vm536_vm1, %v15780_v21, %v6873_v55  ;;  %v6889_v54 = vsel %vm536_vm1, %v6873_v55, %v15772_v48  ;;  %v17374_v48 = vld [vmem:[#allocation101_spill] sm:$0xff]  ;;  %v17379_v4 = vpack.c.bf16 %v15436_v9, %v15430_v18  ;;  %v17382_v55 = vld [vmem:[#allocation98_spill] sm:$0xff]  ;;  %v17383_v9 = vld [vmem:[#allocation103_spill] sm:$0xff] }
 0xd58   : > { %v6924_v40 = vmul.f32 %v15295_v5, %v6889_v54  ;;  %v6927_v22 = vmul.f32 %v15304_v37, %v6877_v42  ;;  %7705 = vmatpush1.bf16.msra.mxu0 %v17373_v14  ;;  %v6957_v44 = vpop.permute.xlu1 %6956  ;;  %v17376_v1 = vpack.c.bf16 %v17374_v48, %v17375_v32  ;;  %v6934_v37 = vpack.c.bf16 %v6926_v61, %v6922_v30 }
 0xd59   : > { %v6986_v21 = vsel %vm680_vm2, %v15786_v11, %v6957_v44  ;;  %7706 = vmatprep.subr.bf16.mxu0 %v6933_v2  ;;  %v6982_v35 = vsel %vm680_vm2, %v6957_v44, %v15797_v53  ;;  %v17384_v2 = vld [vmem:[#allocation96_spill] sm:$0xff] }
 0xd5a   : > { %7811 = vmatpush1.bf16.msra.mxu1 %v17376_v1  ;;  %v6932_v49 = vpack.c.bf16 %v6924_v40, %v6920_v16  ;;  %v6959_v5 = vpop.permute.xlu0 %6958  ;;  %v6935_v29 = vpack.c.bf16 %v6927_v22, %v6923_v63  ;;  %v7023_v34 = vmul.f32 %v17377_v15, %v6986_v21  ;;  %v17385_v61 = vpack.c.bf16 %v17383_v9, %v17384_v2  ;;  %v17387_v16 = vld [vmem:[#allocation80_spill] sm:$0xff]  ;;  %v17389_v21 = vld [vmem:[#allocation49_spill] sm:$0xff] }
 0xd5b   : > { %v6987_v33 = vsel %vm680_vm2, %v15788_v6, %v6959_v5  ;;  %v6983_v23 = vsel %vm680_vm2, %v6959_v5, %v15802_v62  ;;  %v7024_v54 = vmul.f32 %v17380_v17, %v6982_v35  ;;  %v17402_v9 = vld [vmem:[#allocation100_spill] sm:$0xff] }
 0xd5c   : > { %v7027_v47 = vmul.f32 %v17377_v15, %v6987_v33  ;;  %7707 = vmatpush1.bf16.msra.mxu0 %v6932_v49  ;;  %7812 = vmatprep.subr.bf16.mxu1 %v6935_v29  ;;  %v6973_v10 = vpop.permute.xlu1 %6972  ;;  %v7028_v50 = vmul.f32 %v17380_v17, %v6983_v23  ;;  %v7150_v2 = vpack.c.bf16 %v14918_v51, %v17402_v9  ;;  %v17407_v51 = vld [vmem:[#allocation99_spill] sm:$0xff] }
 0xd5d   : > { %v6978_v41 = vsel %vm680_vm2, %v15797_v53, %v6973_v10  ;;  %v6990_v58 = vsel %vm680_vm2, %v6973_v10, %v15786_v11  ;;  %7708 = vmatprep.subr.bf16.mxu0 %v17378_v25  ;;  %v17395_v25 = vld [vmem:[#allocation58_spill] sm:$0xff] }
 0xd5e   : > { %7813 = vmatpush1.bf16.msra.mxu1 %v6934_v37  ;;  %v6975_v56 = vpop.permute.xlu0 %6974  ;;  %v7035_v31 = vpack.c.bf16 %v7027_v47, %v7023_v34  ;;  %v7022_v12 = vmul.f32 %v17381_v59, %v6990_v58  ;;  %v7025_v53 = vmul.f32 %v17382_v55, %v6978_v41  ;;  %v7036_v44 = vpack.c.bf16 %v7028_v50, %v7024_v54  ;;  %v17392_v47 = vld [vmem:[#allocation62_spill] sm:$0xff]  ;;  %v17393_v41 = vld [vmem:[#allocation93_spill] sm:$0xff] }
 0xd5f   : > { %7814 = vmatprep.subr.bf16.mxu1 %v17379_v4  ;;  %v6979_v11 = vsel %vm680_vm2, %v15802_v62, %v6975_v56  ;;  %v6991_v38 = vsel %vm680_vm2, %v6975_v56, %v15788_v6  ;;  %v17386_v6 = vld [vmem:[#allocation92_spill] sm:$0xff]  ;;  %v17390_v37 = vpack.c.bf16 %v15471_v57, %v15465_v13  ;;  %v17391_v34 = vpack.c.bf16 %v15515_v43, %v15509_v7  ;;  %v17394_v43 = vld [vmem:[#allocation29_spill] sm:$0xff] }
 0xd60   : > { %v7026_v28 = vmul.f32 %v17381_v59, %v6991_v38  ;;  %v7029_v18 = vmul.f32 %v17382_v55, %v6979_v11  ;;  %7709 = vmatpush1.bf16.msra.mxu0 %v17385_v61  ;;  %v7059_v42 = vpop.permute.xlu1 %7058  ;;  %v17388_v63 = vpack.c.bf16 %v17386_v6, %v17387_v16  ;;  %v17396_v35 = vpack.c.bf16 %v17394_v43, %v17395_v25  ;;  %v17397_v4 = vld [vmem:[#allocation32_spill] sm:$0xff]  ;;  %v17404_v54 = vld [vmem:[#allocation65_spill] sm:$0xff] }
 0xd61   : > { %v7088_v62 = vsel %vm824_vm3, %v15807_v36, %v7059_v42  ;;  %7710 = vmatprep.subr.bf16.mxu0 %v7035_v31  ;;  %v7084_v33 = vsel %vm824_vm3, %v7059_v42, %v15814_v60  ;;  %v17398_v31 = vld [vmem:[#allocation31_spill] sm:$0xff]  ;;  %v17400_v38 = vld [vmem:[#allocation24_spill] sm:$0xff]  ;;  %v17403_v42 = vld [vmem:[#allocation33_spill] sm:$0xff]  ;;  %v7155_v6 = vpack.c.bf16 %v15259_v27, %v15228_v24 }
 0xd62   : > { %7815 = vmatpush1.bf16.msra.mxu1 %v17388_v63  ;;  %v7034_v40 = vpack.c.bf16 %v7026_v28, %v7022_v12  ;;  %v7061_v22 = vpop.permute.xlu0 %7060  ;;  %v7037_v14 = vpack.c.bf16 %v7029_v18, %v7025_v53  ;;  %v7125_v48 = vmul.f32 %v17389_v21, %v7088_v62  ;;  %v17401_v59 = vld [vmem:[#allocation56_spill] sm:$0xff]  ;;  %v7151_v53 = vpack.c.bf16 %v15004_v46, %v14999_v52  ;;  %v17409_v24 = vld [vmem:[#allocation66_spill] sm:$0xff] }
 0xd63   : > { %v7089_v30 = vsel %vm824_vm3, %v15812_v39, %v7061_v22  ;;  %v7085_v32 = vsel %vm824_vm3, %v7061_v22, %v15816_v8  ;;  %v7149_v12 = vpack.c.bf16 %v17401_v59, %v17400_v38  ;;  %v7153_v18 = vpack.c.bf16 %v15221_v3, %v15210_v0  ;;  %v17406_v0 = vld [vmem:[#allocation44_spill] sm:$0xff]  ;;  %v8136_v38 = vld [vmem:[%s16295_s1 + $0x20] sm:$0xf] }
 0xd64   : > { %v7129_v1 = vmul.f32 %v17389_v21, %v7089_v30  ;;  %7711 = vmatpush1.bf16.msra.mxu0 %v7034_v40  ;;  %7816 = vmatprep.subr.bf16.mxu1 %v7037_v14  ;;  %v7075_v49 = vpop.permute.xlu1 %7074  ;;  %v7130_v10 = vmul.f32 %v17392_v47, %v7085_v32  ;;  %v17405_v62 = vpack.c.bf16 %v17403_v42, %v17404_v54  ;;  %v17408_v63 = vld [vmem:[#allocation112_spill] sm:$0xff]  ;;  %v17411_v14 = vld [vmem:[#allocation41_spill] sm:$0xff]  ;;  %v17412_v30 = vld [vmem:[#allocation63_spill] sm:$0xff] }
 0xd65   : > { %v7080_v5 = vsel %vm824_vm3, %v15814_v60, %v7075_v49  ;;  %v7092_v29 = vsel %vm824_vm3, %v7075_v49, %v15807_v36  ;;  %7712 = vmatprep.subr.bf16.mxu0 %v17390_v37  ;;  %v7152_v3 = vpack.c.bf16 %v17406_v0, %v15073_v19  ;;  %v17410_v27 = vld [vmem:[#allocation76_spill] sm:$0xff]  ;;  %v17413_v49 = vld [vmem:[#allocation106_spill] sm:$0xff]  ;;  %v17416_v37 = vld [vmem:[#allocation43_spill] sm:$0xff] }
 0xd66   : > { %7817 = vmatpush1.bf16.msra.mxu1 %v7036_v44  ;;  %v7077_v15 = vpop.permute.xlu0 %7076  ;;  %v7137_v23 = vpack.c.bf16 %v7129_v1, %v7125_v48  ;;  %v7124_v57 = vmul.f32 %v15459_v20, %v7092_v29  ;;  %v7127_v60 = vmul.f32 %v17393_v41, %v7080_v5  ;;  %v7154_v22 = vpack.c.bf16 %v17410_v27, %v17409_v24  ;;  %v17414_v5 = vld [vmem:[#allocation72_spill] sm:$0xff]  ;;  %v17431_v42 = vld [vmem:[#allocation26_spill] sm:$0xff]  ;;  %v17437_v27 = vld [vmem:[#allocation3_spill] sm:$0xff] }
 0xd67   : > { %7818 = vmatprep.subr.bf16.mxu1 %v17391_v34  ;;  %v7081_v36 = vsel %vm824_vm3, %v15816_v8, %v7077_v15  ;;  %v7093_v13 = vsel %vm824_vm3, %v7077_v15, %v15812_v39  ;;  %v7126_v8 = vmul.f32 %v17392_v47, %v7084_v33  ;;  %v17399_v39 = vpack.c.bf16 %v17397_v4, %v17398_v31  ;;  %v17417_v34 = vld [vmem:[#allocation81_spill] sm:$0xff]  ;;  %v17425_v31 = vld [vmem:[#allocation95_spill] sm:$0xff] }
 0xd68   : > { %v7128_v58 = vmul.f32 %v15459_v20, %v7093_v13  ;;  %v7131_v7 = vmul.f32 %v17393_v41, %v7081_v36  ;;  %7713 = vmatpush1.bf16.msra.mxu0 %v17396_v35  ;;  %v15994_v56 = vpop.permute.xlu1 %7486  ;;  %v17415_v29 = vpack.c.bf16 %v17413_v49, %v17414_v5  ;;  %v17422_v35 = vld [vmem:[#allocation105_spill] sm:$0xff] }
 0xd69   : > { %7714 = vmatprep.subr.bf16.mxu0 %v7137_v23  ;;  %v7138_v20 = vpack.c.bf16 %v7130_v10, %v7126_v8  ;;  %v17418_v23 = vld [vmem:[#allocation88_spill] sm:$0xff]  ;;  %v17423_v8 = vld [vmem:[#allocation27_spill] sm:$0xff] }
 0xd6a   : > { %7819 = vmatpush1.bf16.msra.mxu1 %v17399_v39  ;;  %v7136_v17 = vpack.c.bf16 %v7128_v58, %v7124_v57  ;;  %v16000_v50 = vpop.permute.xlu0 %7488  ;;  %v7139_v11 = vpack.c.bf16 %v7131_v7, %v7127_v60  ;;  %v17419_v47 = vpack.c.bf16 %v17417_v34, %v17418_v23  ;;  %v17420_v57 = vld [vmem:[#allocation104_spill] sm:$0xff]  ;;  %v17421_v60 = vld [vmem:[#allocation42_spill] sm:$0xff]  ;;  %v17424_v4 = vpack.c.bf16 %v17422_v35, %v17423_v8 }
 0xd6b   : > { %v17444_v34 = vld [vmem:[#allocation64_spill] sm:$0xff]  ;;  %v17452_v35 = vld [vmem:[#allocation102_spill] sm:$0xff] }
 0xd6c   : > { %7715 = vmatpush1.bf16.msra.mxu0 %v7136_v17  ;;  %7820 = vmatprep.subr.bf16.mxu1 %v7139_v11  ;;  %v7177_v55 = vpop.permute.xlu1 %7176  ;;  %v17426_v17 = vld [vmem:[#allocation107_spill] sm:$0xff] }
 0xd6d   : > { %7716 = vmatprep.subr.bf16.mxu0 %v7149_v12  ;;  %v7202_v52 = vsel %vm992_vm4, %v7177_v55, %v15822_v45  ;;  %v7206_v44 = vsel %vm992_vm4, %v17411_v14, %v7177_v55  ;;  %v17427_v11 = vld [vmem:[#allocation39_spill] sm:$0xff] }
 0xd6e   : > { %7821 = vmatpush1.bf16.msra.mxu1 %v7138_v20  ;;  %v16006_v28 = vpop.permute.xlu0 %7496  ;;  %v7243_v21 = vmul.f32 %v17412_v30, %v7202_v52  ;;  %v7242_v36 = vmul.f32 %v17416_v37, %v7206_v44  ;;  %v17428_v20 = vpack.c.bf16 %v17426_v17, %v17427_v11  ;;  %v17455_v17 = vld [vmem:[#allocation28_spill] sm:$0xff] }
 0xd6f   : > { %7822 = vmatprep.subr.bf16.mxu1 %v7151_v53 }
 0xd70   : > { %v7193_v61 = vpop.permute.xlu1 %7192  ;;  %7717 = vmatpush1.bf16.msra.mxu0 %v17405_v62  ;;  %v17432_v62 = vld [vmem:[#allocation71_spill] sm:$0xff] }
 0xd71   : > { %7718 = vmatprep.subr.bf16.mxu0 %v7153_v18  ;;  %v7198_v32 = vsel %vm992_vm4, %v15822_v45, %v7193_v61  ;;  %v7210_v1 = vsel %vm992_vm4, %v7193_v61, %v17411_v14  ;;  %v17429_v18 = vld [vmem:[#allocation47_spill] sm:$0xff]  ;;  %v17438_v14 = vld [vmem:[#allocation4_spill] sm:$0xff] }
 0xd72   : > { %7823 = vmatpush1.bf16.msra.mxu1 %v7150_v2  ;;  %v7179_v46 = vpop.permute.xlu0 %7178  ;;  %v7244_v41 = vmul.f32 %v17420_v57, %v7198_v32  ;;  %v7245_v58 = vmul.f32 %v17421_v60, %v7210_v1  ;;  %v17430_v2 = vld [vmem:[#allocation57_spill] sm:$0xff]  ;;  %v16098_v44 = vrot.slane %v8136_v38, %v17438_v14  ;;  %v17441_v32 = vld [vmem:[#allocation108_spill] sm:$0xff]  ;;  %v7515_v14 = vsel %vm1424_vm8, %v16006_v28, %v17452_v35 }
 0xd73   : > { %7824 = vmatprep.subr.bf16.mxu1 %v7155_v6  ;;  %v7203_v16 = vsel %vm992_vm4, %v7179_v46, %v17407_v51  ;;  %v7207_v40 = vsel %vm992_vm4, %v17408_v63, %v7179_v46 }
 0xd74   : > { %v7247_v48 = vmul.f32 %v17412_v30, %v7203_v16  ;;  %v7279_v19 = vpop.permute.xlu1 %7278  ;;  %7719 = vmatpush1.bf16.msra.mxu0 %v7152_v3  ;;  %v7246_v33 = vmul.f32 %v17416_v37, %v7207_v40  ;;  %v17433_v3 = vld [vmem:[#allocation5_spill] sm:$0xff]  ;;  %v17439_v30 = vld [vmem:[#allocation52_spill] sm:$0xff] }
 0xd75   : > { %7720 = vmatprep.subr.bf16.mxu0 %v17415_v29  ;;  %v7304_v39 = vsel %vm1136_vm5, %v7279_v19, %v17425_v31  ;;  %v7308_v9 = vsel %vm1136_vm5, %v17429_v18, %v7279_v19  ;;  %v17435_v40 = vld [vmem:[#allocation77_spill] sm:$0xff]  ;;  %v17443_v29 = vld [vmem:[#allocation34_spill] sm:$0xff] }
 0xd76   : > { %7825 = vmatpush1.bf16.msra.mxu1 %v7154_v22  ;;  %v7195_v15 = vpop.permute.xlu0 %7194  ;;  %v7255_v10 = vpack.c.bf16 %v7247_v48, %v7243_v21  ;;  %v7254_v59 = vpack.c.bf16 %v7246_v33, %v7242_v36  ;;  %v7345_v6 = vmul.f32 %v17432_v62, %v7304_v39  ;;  %v16095_v22 = vrot.slane %v8136_v38, %v17437_v27  ;;  %v17440_v19 = vld [vmem:[#allocation73_spill] sm:$0xff]  ;;  %v17454_v39 = vld [vmem:[#allocation78_spill] sm:$0xff] }
 0xd77   : > { %7826 = vmatprep.subr.bf16.mxu1 %v17419_v47  ;;  %v7199_v45 = vsel %vm992_vm4, %v17407_v51, %v7195_v15  ;;  %v7211_v13 = vsel %vm992_vm4, %v7195_v15, %v17408_v63  ;;  %v16086_v51 = vrot.slane %v8136_v38, %v17433_v3  ;;  %v17434_v63 = vld [vmem:[#allocation59_spill] sm:$0xff]  ;;  %v17442_v1 = vpack.c.bf16 %v17440_v19, %v17441_v32  ;;  %v17445_v47 = vld [vmem:[#allocation40_spill] sm:$0xff]  ;;  %v17465_v32 = vld [vmem:[#allocation97_spill] sm:$0xff] }
 0xd78   : > { %v7248_v7 = vmul.f32 %v17420_v57, %v7199_v45  ;;  %v7249_v43 = vmul.f32 %v17421_v60, %v7211_v13  ;;  %v7295_v25 = vpop.permute.xlu1 %7294  ;;  %7721 = vmatpush1.bf16.msra.mxu0 %v17424_v4  ;;  %v17436_v24 = vpack.c.bf16 %v17434_v63, %v17435_v40  ;;  %v7344_v5 = vmul.f32 %v17439_v30, %v7308_v9  ;;  %v17446_v57 = vld [vmem:[#allocation50_spill] sm:$0xff]  ;;  %v17461_v40 = vld [vmem:[#allocation45_spill] sm:$0xff] }
 0xd79   : > { %7722 = vmatprep.subr.bf16.mxu0 %v7255_v10  ;;  %v7300_v52 = vsel %vm1136_vm5, %v17425_v31, %v7295_v25  ;;  %v7312_v16 = vsel %vm1136_vm5, %v7295_v25, %v17429_v18  ;;  %v17451_v25 = vld [vmem:[#allocation84_spill] sm:$0xff]  ;;  %v17453_v4 = vld [vmem:[#allocation6_spill] sm:$0xff]  ;;  %v17456_v11 = vpack.c.bf16 %v17454_v39, %v17455_v17  ;;  %v17457_v18 = vld [vmem:[#allocation115_spill] sm:$0xff] }
 0xd7a   : > { %7827 = vmatpush1.bf16.msra.mxu1 %v17428_v20  ;;  %v7256_v12 = vpack.c.bf16 %v7248_v7, %v7244_v41  ;;  %v7281_v55 = vpop.permute.xlu0 %7280  ;;  %v7257_v53 = vpack.c.bf16 %v7249_v43, %v7245_v58  ;;  %v7346_v37 = vmul.f32 %v17443_v29, %v7300_v52  ;;  %v7347_v23 = vmul.f32 %v17444_v34, %v7312_v16  ;;  %v17447_v41 = vld [vmem:[#allocation25_spill] sm:$0xff]  ;;  %v17449_v58 = vld [vmem:[#allocation111_spill] sm:$0xff]  ;;  %v17450_v7 = vld [vmem:[#allocation90_spill] sm:$0xff] }
 0xd7b   : > { %v7305_v61 = vsel %vm1136_vm5, %v7281_v55, %v17430_v2  ;;  %v7309_v54 = vsel %vm1136_vm5, %v17431_v42, %v7281_v55  ;;  %v17448_v60 = vpack.c.bf16 %v17446_v57, %v17447_v41  ;;  %v7510_v43 = vsel %vm1424_vm8, %v17450_v7, %v17449_v58  ;;  %v17470_v57 = vld [vmem:[#allocation79_spill] sm:$0xff]  ;;  %v17471_v41 = vld [vmem:[#allocation85_spill] sm:$0xff] }
 0xd7c   : > { %v7349_v46 = vmul.f32 %v17432_v62, %v7305_v61  ;;  %7828 = vmatprep.subr.bf16.mxu1 %v7257_v53  ;;  %v7381_v0 = vpop.permute.xlu1 %7380  ;;  %7723 = vmatpush1.bf16.msra.mxu0 %v7254_v59  ;;  %v7348_v21 = vmul.f32 %v17439_v30, %v7309_v54  ;;  %v7511_v8 = vsel %vm1424_vm8, %v17452_v35, %v17451_v25  ;;  %v17459_v61 = vld [vmem:[#allocation110_spill] sm:$0xff]  ;;  %v17464_v30 = vld [vmem:[#allocation23_spill] sm:$0xff] }
 0xd7d   : > { %7724 = vmatprep.subr.bf16.mxu0 %v17436_v24  ;;  %v7406_v10 = vsel %vm1280_vm7, %v7381_v0, %v17445_v47  ;;  %v16130_v31 = vrot.slane %v8136_v38, %v17453_v4  ;;  %v7507_v20 = vsel %vm1424_vm8, %v17451_v25, %v16000_v50  ;;  %v7410_v9 = vsel %vm1280_vm7, %v17457_v18, %v7381_v0  ;;  %v17458_v38 = vld [vmem:[#allocation51_spill] sm:$0xff]  ;;  %v17460_v54 = vld [vmem:[#allocation46_spill] sm:$0xff] }
 0xd7e   : > { %7829 = vmatpush1.bf16.msra.mxu1 %v7256_v12  ;;  %v7297_v48 = vpop.permute.xlu0 %7296  ;;  %v7357_v49 = vpack.c.bf16 %v7349_v46, %v7345_v6  ;;  %v7356_v59 = vpack.c.bf16 %v7348_v21, %v7344_v5  ;;  %v7506_v3 = vsel %vm1424_vm8, %v17449_v58, %v15994_v56  ;;  %v7545_v16 = vmul.f32 %v16095_v22, %v7507_v20  ;;  %v17462_v24 = vld [vmem:[#allocation82_spill] sm:$0xff]  ;;  %v17474_v35 = vld [vmem:[#allocation75_spill] sm:$0xff] }
 0xd7f   : > { %7830 = vmatprep.subr.bf16.mxu1 %v17442_v1  ;;  %v7301_v33 = vsel %vm1136_vm5, %v17430_v2, %v7297_v48  ;;  %v7313_v15 = vsel %vm1136_vm5, %v7297_v48, %v17431_v42  ;;  %v7447_v2 = vmul.f32 %v17458_v38, %v7406_v10  ;;  %v17463_v27 = vpack.c.bf16 %v17461_v40, %v17462_v24  ;;  %v17466_v1 = vld [vmem:[#allocation30_spill] sm:$0xff] }
 0xd80   : > { %v7350_v36 = vmul.f32 %v17443_v29, %v7301_v33  ;;  %v7351_v45 = vmul.f32 %v17444_v34, %v7313_v15  ;;  %v7397_v13 = vpop.permute.xlu1 %7396  ;;  %7725 = vmatpush1.bf16.msra.mxu0 %v17448_v60  ;;  %v7446_v21 = vmul.f32 %v17464_v30, %v7410_v9  ;;  %v17468_v29 = vld [vmem:[#allocation89_spill] sm:$0xff]  ;;  %v17472_v60 = vpack.c.bf16 %v17470_v57, %v17471_v41  ;;  %v17473_v25 = vld [vmem:[#allocation74_spill] sm:$0xff] }
 0xd81   : > { %7726 = vmatprep.subr.bf16.mxu0 %v7357_v49  ;;  %v7402_v6 = vsel %vm1280_vm7, %v17445_v47, %v7397_v13  ;;  %v7414_v52 = vsel %vm1280_vm7, %v7397_v13, %v17457_v18  ;;  %v17467_v49 = vpack.c.bf16 %v17465_v32, %v17466_v1  ;;  %v17469_v33 = vld [vmem:[#allocation109_spill] sm:$0xff]  ;;  %v7544_v58 = vmul.f32 %v16086_v51, %v7511_v8  ;;  %v8409_v9 = vld [vmem:[%s16300_s6 + $0x1c] ss:$12 sps:$4 sm:$0xff]  }
 0xd82   : > { %7831 = vmatpush1.bf16.msra.mxu1 %v17456_v11  ;;  %v7358_v12 = vpack.c.bf16 %v7350_v36, %v7346_v37  ;;  %v7383_v55 = vpop.permute.xlu0 %7382  ;;  %v7359_v53 = vpack.c.bf16 %v7351_v45, %v7347_v23  ;;  %v7448_v37 = vmul.f32 %v17468_v29, %v7402_v6  ;;  %v7449_v15 = vmul.f32 %v17469_v33, %v7414_v52 }
 0xd83   : > { %v7407_v42 = vsel %vm1280_vm7, %v7383_v55, %v17459_v61  ;;  %v7411_v62 = vsel %vm1280_vm7, %v17460_v54, %v7383_v55  ;;  %v17475_v4 = vpack.c.bf16 %v17473_v25, %v17474_v35  ;;  %v7547_v39 = vmul.f32 %v16130_v31, %v7515_v14  ;;  %v8406_v55 = vld [vmem:[%s16300_s6] ss:$12 sps:$4 sm:$0xff]   ;;  %v17479_v35 = vld [vmem:[#allocation9_spill] sm:$0xff] }
 0xd84   : > { %v7451_v46 = vmul.f32 %v17458_v38, %v7407_v42  ;;  %7832 = vmatprep.subr.bf16.mxu1 %v7359_v53  ;;  %v7495_v0 = vpop.permute.xlu1 %7494  ;;  %7727 = vmatpush1.bf16.msra.mxu0 %v7356_v59  ;;  %v7450_v48 = vmul.f32 %v17464_v30, %v7411_v62 }
 0xd85   : > { %v7514_v63 = vsel %vm1424_vm8, %v7495_v0, %v17450_v7  ;;  %7728 = vmatprep.subr.bf16.mxu0 %v17463_v27  ;;  %v7502_v47 = vsel %vm1424_vm8, %v15994_v56, %v7495_v0  ;;  %v7541_v7 = vmul.f32 %v16095_v22, %v7506_v3  ;;  %v7503_v56 = vsel %vm1424_vm8, %v16000_v50, %v16006_v28 }
 0xd86   : > { %7833 = vmatpush1.bf16.msra.mxu1 %v7358_v12  ;;  %v7399_v19 = vpop.permute.xlu0 %7398  ;;  %v7459_v5 = vpack.c.bf16 %v7451_v46, %v7447_v2  ;;  %v7543_v10 = vmul.f32 %v16130_v31, %v7514_v63  ;;  %v7458_v17 = vpack.c.bf16 %v7450_v48, %v7446_v21  ;;  %v7542_v8 = vmul.f32 %v16098_v44, %v7502_v47  ;;  %v8411_v46 = vld [vmem:[%s16300_s6 + $0x18] ss:$12 sps:$4 sm:$0xff]  }
 0xd87   : > { %7834 = vmatprep.subr.bf16.mxu1 %v17467_v49  ;;  %v7403_v34 = vsel %vm1280_vm7, %v17459_v61, %v7399_v19  ;;  %v7415_v23 = vsel %vm1280_vm7, %v7399_v19, %v17460_v54  ;;  %v7557_v12 = vpack.c.bf16 %v7545_v16, %v7541_v7  ;;  %v7540_v50 = vmul.f32 %v16086_v51, %v7510_v43 }
 0xd88   : > { %v7452_v36 = vmul.f32 %v17468_v29, %v7403_v34  ;;  %v7453_v45 = vmul.f32 %v17469_v33, %v7415_v23  ;;  %v7475_v13 = vpop.permute.xlu1 %7474  ;;  %7729 = vmatpush1.bf16.msra.mxu0 %v17472_v60  ;;  %v7559_v53 = vpack.c.bf16 %v7547_v39, %v7543_v10  ;;  %v7546_v18 = vmul.f32 %v16098_v44, %v7503_v56  ;;  %v17478_v56 = vld [vmem:[#allocation11_spill] sm:$0xff] }
 0xd89   : > { %7730 = vmatprep.subr.bf16.mxu0 %v7459_v5  ;;  %v7556_v38 = vpack.c.bf16 %v7544_v58, %v7540_v50  ;;  %v17476_v49 = vmov 0   ;;  %v17482_v50 = vld [vmem:[#allocation12_spill] sm:$0xff] }
 0xd8a   : > { %7835 = vmatpush1.bf16.msra.mxu1 %v17475_v4  ;;  %v7460_v11 = vpack.c.bf16 %v7452_v36, %v7448_v37  ;;  %v7477_v20 = vpop.permute.xlu0 %7476  ;;  %v7461_v59 = vpack.c.bf16 %v7453_v45, %v7449_v15  ;;  %v7558_v61 = vpack.c.bf16 %v7546_v18, %v7542_v8  ;;  %v17481_v8 = vld [vmem:[#allocation13_spill] sm:$0xff] }
 0xd8c   : > { %7836 = vmatprep.subr.bf16.mxu1 %v7461_v59  ;;  %v7483_v28 = vpop.permute.xlu1 %7482  ;;  %7731 = vmatpush1.bf16.msra.mxu0 %v7458_v17 }
 0xd8d   : > { %7753 = vmatprep.subr.bf16.mxu0 %v7557_v12  ;;  %v7512_v43 = vsel %vm1424_vm8, %v7475_v13, %v7483_v28 }
 0xd8e   : > { %7837 = vmatpush1.bf16.msra.mxu1 %v7460_v11  ;;  %v7493_v2 = vpop.permute.xlu0 %7492  ;;  %v7548_v0 = vmul.f32 %v16086_v51, %v7512_v43 }
 0xd8f   : > { %7859 = vmatprep.subr.bf16.mxu1 %v7559_v53  ;;  %7733 = vmatmul.mubr.bf16.vlgmr.msra.gmra.mrb[40].mxu0 %v8406_v55  ;;  %v17483_v53 = vld [vmem:[#allocation10_spill] sm:$0xff] }
 0xd90   : > { %v7491_v42 = vpop.permute.xlu1 %7490  ;;  %7754 = vmatpush1.bf16.msra.mxu0 %v7556_v38  ;;  %7742 = vmatprep.mubr.bf16.mxu0 %v8409_v9  ;;  %v17484_v38 = vld [vmem:[#allocation14_spill] sm:$0xff] }
 0xd91   : > { %7839 = vmatmul.mubr.bf16.vlgmr.msra.gmra.mrb[40].mxu1 %v8406_v55  ;;  %v7508_v54 = vsel %vm1424_vm8, %v7483_v28, %v7491_v42 }
 0xd92   : > { %7860 = vmatpush1.bf16.msra.mxu1 %v7558_v61  ;;  %v7485_v62 = vpop.permute.xlu0 %7484  ;;  %7848 = vmatprep.mubr.bf16.mxu1 %v8409_v9  ;;  %v7549_v3 = vmul.f32 %v16095_v22, %v7508_v54 }
 0xd93   : > { %v7509_v6 = vsel %vm1424_vm8, %v7485_v62, %v7493_v2  ;;  %v7513_v52 = vsel %vm1424_vm8, %v7477_v20, %v7485_v62 }
 0xd94   : > { %v7552_v16 = vmul.f32 %v16086_v51, %v7513_v52  ;;  %v7553_v63 = vmul.f32 %v16095_v22, %v7509_v6  ;;  %v7499_v40 = vpop.permute.xlu1 %7498 }
 0xd95   : > { %v7504_v24 = vsel %vm1424_vm8, %v7491_v42, %v7499_v40  ;;  %v7516_v27 = vsel %vm1424_vm8, %v7499_v40, %v7475_v13  ;;  %v17477_v13 = vld [vmem:[#allocation7_spill] sm:$0xff] }
 0xd96   : > { %v7560_v14 = vpack.c.bf16 %v7552_v16, %v7548_v0  ;;  %v7501_v30 = vpop.permute.xlu0 %7500  ;;  %v7561_v21 = vpack.c.bf16 %v7553_v63, %v7549_v3  ;;  %v7550_v48 = vmul.f32 %v16098_v44, %v7504_v24  ;;  %v7551_v22 = vmul.f32 %v16130_v31, %v7516_v27  ;;  %v17485_v3 = vld [vmem:[#allocation16_spill] sm:$0xff] }
 0xd97   : > { %v7505_v19 = vsel %vm1424_vm8, %v7493_v2, %v7501_v30  ;;  %v7517_v51 = vsel %vm1424_vm8, %v7501_v30, %v7477_v20  ;;  %7743 = vmatmul.mubr.bf16.gmra.mrb[44].mxu0 %v8411_v46  ;;  %v17480_v20 = vld [vmem:[#allocation8_spill] sm:$0xff] }
 0xd98   : > { %v7554_v32 = vmul.f32 %v16098_v44, %v7505_v19  ;;  %v7555_v1 = vmul.f32 %v16130_v31, %v7517_v51  ;;  %7755 = vmatprep.subr.bf16.mxu0 %v7561_v21  ;;  %7785 = vmatprep.mubr.bf16.mxu0 %v17476_v49  ;;  %v8413_v44 = vld [vmem:[%s16300_s6 + $0x20] ss:$12 sps:$4 sm:$0xff]   ;;  %v17487_v21 = vld [vmem:[#allocation18_spill] sm:$0xff] }
 0xd99   : > { %7849 = vmatmul.mubr.bf16.gmra.mrb[44].mxu1 %v8411_v46  ;;  %7756 = vmatpush1.bf16.msra.mxu0 %v7560_v14  ;;  %v17486_v14 = vld [vmem:[#allocation20_spill] sm:$0xff] }
 0xd9a   : > { %v7562_v5 = vpack.c.bf16 %v7554_v32, %v7550_v48  ;;  %v7563_v29 = vpack.c.bf16 %v7555_v1, %v7551_v22  ;;  %7891 = vmatprep.mubr.bf16.mxu1 %v17476_v49  ;;  %v17488_v32 = vld [vmem:[#allocation15_spill] sm:$0xff] }
 0xd9c   : > { %7861 = vmatprep.subr.bf16.mxu1 %v7563_v29 }
 0xd9d   : > { %7862 = vmatpush1.bf16.msra.mxu1 %v7562_v5 }
 0xd9f   : > { %8143 = vmatmul.mubr.msk.bf16.vlgmr.msra.gmra.mrb[40].mxu0 %vm2887_vm9, %v8412_v26 }
 0xda0   : > { %7795 = vmatprep.mubr.bf16.mxu0 %v17476_v49 }
 0xda1   : > { %8145 = vmatmul.mubr.msk.bf16.vlgmr.msra.gmra.mrb[40].mxu1 %vm2887_vm9, %v8412_v26  ;;  %v17490_v26 = vld [vmem:[#allocation19_spill] sm:$0xff] }
 0xda2   : > { %7901 = vmatprep.mubr.bf16.mxu1 %v17476_v49  ;;  %v17489_v49 = vld [vmem:[#allocation22_spill] sm:$0xff] }
 0xda5   : > { %v7647_v31 = vpop.permute.xlu1 %7646 }
 0xda7   : > { %8144 = vmatmul.mubr.msk.bf16.gmra.mrb[44].mxu0 %vm2887_vm9, %v8413_v44  ;;  %v7652_v37 = vpop.permute.xlu0 %7651 }
 0xda9   : > { %8146 = vmatmul.mubr.msk.bf16.gmra.mrb[44].mxu1 %vm2887_vm9, %v8413_v44  ;;  %v7657_v9 = vpop.permute.xlu1 %7656 }
 0xdab   : > { %v7662_v61 = vpop.permute.xlu0 %7661 }
 0xe72   : > { %v7787_v33 = vpop.f32.mrb[40].mxu0 }
 0xe73   : > { %v8230_v15 = vadd.f32 %v7787_v33, %v7647_v31  ;;  %v7789_v34 = vpop.f32.mrb[41].mxu0  ;;  %v17492_v33 = vld [vmem:[#allocation21_spill] sm:$0xff] }
 0xe74   : > { %v7893_v23 = vpop.f32.mrb[40].mxu1  ;;  %v8231_v47 = vadd.f32 %v7789_v34, %v7647_v31  ;;  %v7791_v36 = vpop.f32.mrb[42].mxu0 }
 0xe75   : > { %v8238_v10 = vadd.f32 %v7893_v23, %v7647_v31  ;;  %v7895_v45 = vpop.f32.mrb[41].mxu1  ;;  %v7912_v57 = vadd.f32 %v8230_v15, %v17477_v13  ;;  %v8232_v41 = vadd.f32 %v7791_v36, %v7652_v37  ;;  %v7793_v58 = vpop.f32.mrb[43].mxu0 }
 0xe76   : > { %v8239_v60 = vadd.f32 %v7895_v45, %v7647_v31  ;;  %v7897_v7 = vpop.f32.mrb[42].mxu1  ;;  %v7913_v25 = vadd.f32 %v8231_v47, %v17478_v56  ;;  %v8233_v39 = vadd.f32 %v7793_v58, %v7652_v37  ;;  %v17491_v31 = vld [vmem:[#allocation17_spill] sm:$0xff] }
 0xe77   : > { %v7914_v4 = vadd.f32 %v8238_v10, %v17479_v35  ;;  %v8240_v17 = vadd.f32 %v7897_v7, %v7652_v37  ;;  %v7899_v11 = vpop.f32.mrb[43].mxu1  ;;  %7928 = vst [vmem:[%s16257_s20] sm:$0xff] %v7912_v57  ;;  %v7916_v59 = vadd.f32 %v8232_v41, %v17480_v20 }
 0xe78   : > { %v7915_v12 = vadd.f32 %v8239_v60, %v17481_v8  ;;  %v8241_v55 = vadd.f32 %v7899_v11, %v7652_v37  ;;  %7929 = vst [vmem:[%s16257_s20 + $0x8] sm:$0xff] %v7913_v25  ;;  %v7917_v28 = vadd.f32 %v8233_v39, %v17482_v50 }
 0xe79   : > { %7930 = vst [vmem:[%s16257_s20 + $0x10] sm:$0xff] %v7914_v4  ;;  %v7918_v18 = vadd.f32 %v8240_v17, %v17483_v53  ;;  %7932 = vst [vmem:[%s16257_s20 + $0x20] sm:$0xff] %v7916_v59 }
 0xe7a   : > { %7931 = vst [vmem:[%s16257_s20 + $0x18] sm:$0xff] %v7915_v12  ;;  %v7919_v2 = vadd.f32 %v8241_v55, %v17484_v38  ;;  %7933 = vst [vmem:[%s16257_s20 + $0x28] sm:$0xff] %v7917_v28  ;;  %v7797_v42 = vpop.f32.mrb[44].mxu0 }
 0xe7b   : > { %7934 = vst [vmem:[%s16257_s20 + $0x30] sm:$0xff] %v7918_v18  ;;  %v8234_v43 = vadd.f32 %v7797_v42, %v7657_v9  ;;  %v7799_v54 = vpop.f32.mrb[45].mxu0 }
 0xe7c   : > { %7935 = vst [vmem:[%s16257_s20 + $0x38] sm:$0xff] %v7919_v2  ;;  %v7903_v62 = vpop.f32.mrb[44].mxu1  ;;  %v8235_v6 = vadd.f32 %v7799_v54, %v7657_v9  ;;  %v7801_v46 = vpop.f32.mrb[46].mxu0 }
 0xe7d   : > { %v8242_v52 = vadd.f32 %v7903_v62, %v7657_v9  ;;  %v7905_v0 = vpop.f32.mrb[45].mxu1  ;;  %v7920_v16 = vadd.f32 %v8234_v43, %v17485_v3  ;;  %v8236_v63 = vadd.f32 %v7801_v46, %v7662_v61  ;;  %v7803_v24 = vpop.f32.mrb[47].mxu0 }
 0xe7e   : > { %v8243_v40 = vadd.f32 %v7905_v0, %v7657_v9  ;;  %v7907_v27 = vpop.f32.mrb[46].mxu1  ;;  %v7921_v30 = vadd.f32 %v8235_v6, %v17486_v14  ;;  %v8237_v19 = vadd.f32 %v7803_v24, %v7662_v61 }
 0xe7f   : > { %v7922_v48 = vadd.f32 %v8242_v52, %v17487_v21  ;;  %v8244_v51 = vadd.f32 %v7907_v27, %v7662_v61  ;;  %v7909_v22 = vpop.f32.mrb[47].mxu1  ;;  %7936 = vst [vmem:[%s16257_s20 + $0x40] sm:$0xff] %v7920_v16  ;;  %v7924_v1 = vadd.f32 %v8236_v63, %v17488_v32 }
 0xe80   : > { %v7923_v5 = vadd.f32 %v8243_v40, %v17489_v49  ;;  %v8245_v29 = vadd.f32 %v7909_v22, %v7662_v61  ;;  %7937 = vst [vmem:[%s16257_s20 + $0x48] sm:$0xff] %v7921_v30  ;;  %v7925_v44 = vadd.f32 %v8237_v19, %v17490_v26 }
 0xe81   : > { %7938 = vst [vmem:[%s16257_s20 + $0x50] sm:$0xff] %v7922_v48  ;;  %v7926_v37 = vadd.f32 %v8244_v51, %v17491_v31  ;;  %7940 = vst [vmem:[%s16257_s20 + $0x60] sm:$0xff] %v7924_v1 }
 0xe82   : > { %7939 = vst [vmem:[%s16257_s20 + $0x58] sm:$0xff] %v7923_v5  ;;  %v7927_v15 = vadd.f32 %v8245_v29, %v17492_v33  ;;  %7941 = vst [vmem:[%s16257_s20 + $0x68] sm:$0xff] %v7925_v44 }
 0xe83   : > { %7942 = vst [vmem:[%s16257_s20 + $0x70] sm:$0xff] %v7926_v37 }
 0xe84   : > { %7943 = vst [vmem:[%s16257_s20 + $0x78] sm:$0xff] %v7927_v15 }
 0xe85 PF: > { %s18_s27 = sadd.s32 1, %s8444_s27  }
 0xe86   : > { %p15_p4 = scmp.ge.s32.totalorder %s18_s27, 4  }
 0xe88   :  { %17 = sbr.rel (!%p15_p4) target bundleno = 1 (0x1), region = 95 }

</bundles_post_ra>
